<compile_context>
chip_gen: v7x
topology: tpu7x:2x2x1
jax: 0.10.0
libtpu: 0.0.40
codegen_flags: <defaults>
</compile_context>

<pallas_src>
import functools

import jax
import jax.numpy as jnp
import numpy as np
from jax.experimental import pallas as pl
from jax.experimental.pallas import tpu as pltpu

EPS = 1e-5
_VMEM_LIMIT = 32 * 1024 * 1024   # safe on v5e/v6e/v7x


# --------------------------- conv stage kernel -------------------------------

def _stage_kernel(src_ref, scale_ref, shift_ref, alpha_ref, w_ref, b_ref,
                  mask_ref, out_ref, ssum_ref, ssq_ref, *, W):
    """(BN affine + PReLU) -> 3x3 conv (+bias) -> per-image channel stats.

    Stage 1 passes scale=1, shift=0, alpha=1 so the pre-activation is the
    identity; stage 2 passes the folded BN1 affine and the real PReLU alpha.
    src_ref block is (1, H*W, C); conv taps are handled with pltpu.roll along
    the flattened pixel axis plus precomputed validity masks (zero padding).
    """
    _, L, C = src_ref.shape            # L = H*W
    alpha = alpha_ref[0]               # SMEM scalar

    # Pre-activation in f32 (identity for stage 1).
    a = src_ref[0].astype(jnp.float32) * scale_ref[...] + shift_ref[...]
    a = jnp.where(a >= 0.0, a, a * alpha)                       # PReLU

    # 3x3 conv = 9 tap matmuls; shift via roll, zero-pad via {0,1} masks.
    acc = jnp.zeros((L, C), jnp.float32)
    for dy in range(3):
        for dx in range(3):
            k = dy * 3 + dx
            off = (dy - 1) * W + (dx - 1)
            if off == 0:
                sh = a
            else:
                sh = pltpu.roll(a, shift=(-off) % L, axis=0)
            if k != 4:                          # center tap is always valid
                sh = sh * mask_ref[k]           # (L, C) * (L, 1)
            acc = acc + jnp.dot(sh.astype(jnp.bfloat16), w_ref[k],
                                preferred_element_type=jnp.float32)
    t = acc + b_ref[...]                                        # (L, C) f32

    out_ref[0] = t.astype(out_ref.dtype)                        # bf16 store
    ssum_ref[0] = jnp.sum(t, axis=0, keepdims=True)             # (1, C)
    ssq_ref[0] = jnp.sum(t * t, axis=0, keepdims=True)          # (1, C)


def _conv_stage(src, scale, shift, alpha, w9, bias, masks, *, W):
    """Run one conv stage over a per-image grid.

    src: (N, H*W, C).  Returns (conv_out bf16 (N,H*W,C),
    per-image sum (N,1,C) f32, per-image sum_sq (N,1,C) f32)."""
    N, L, C = src.shape
    call = pl.pallas_call(
        functools.partial(_stage_kernel, W=W),
        grid=(N,),
        in_specs=[
            pl.BlockSpec((1, L, C), lambda n: (n, 0, 0)),          # image
            pl.BlockSpec((1, C), lambda n: (0, 0)),                # bn scale
            pl.BlockSpec((1, C), lambda n: (0, 0)),                # bn shift
            pl.BlockSpec(memory_space=pltpu.MemorySpace.SMEM),     # prelu alpha
            pl.BlockSpec((9, C, C), lambda n: (0, 0, 0)),          # tap weights
            pl.BlockSpec((1, C), lambda n: (0, 0)),                # conv bias
            pl.BlockSpec((9, L, 1), lambda n: (0, 0, 0)),          # tap masks
        ],
        out_specs=(
            pl.BlockSpec((1, L, C), lambda n: (n, 0, 0)),          # conv output
            pl.BlockSpec((1, 1, C), lambda n: (n, 0, 0)),          # sum
            pl.BlockSpec((1, 1, C), lambda n: (n, 0, 0)),          # sum of sq
        ),
        out_shape=(
            jax.ShapeDtypeStruct((N, L, C), jnp.bfloat16),
            jax.ShapeDtypeStruct((N, 1, C), jnp.float32),
            jax.ShapeDtypeStruct((N, 1, C), jnp.float32),
        ),
        compiler_params=pltpu.CompilerParams(
            dimension_semantics=("parallel",),
            vmem_limit_bytes=_VMEM_LIMIT),
    )
    return call(src, scale, shift, alpha, w9, bias, masks)


# ---------------------- BN2 apply + residual kernel ---------------------------

def _bn_residual_kernel(t_ref, x_ref, scale_ref, shift_ref, o_ref):
    o_ref[...] = (t_ref[...].astype(jnp.float32) * scale_ref[...]
                  + shift_ref[...] + x_ref[...])


def _row_tile(rows, lanes):
    """Largest multiple-of-8 divisor of `rows` that keeps tiles VMEM-friendly."""
    cap = max(8, min(1024, (8 * 1024 * 1024) // (20 * lanes)))
    for t in range(min(rows, cap), 0, -1):
        if rows % t == 0 and t % 8 == 0:
            return t
    return rows


def _bn_apply_residual(t, x, scale_c, shift_c, *, W, C):
    """out = bn2(t) + x, as a lane-dense (N*H, W*C) row-tiled kernel."""
    N, L, _ = t.shape
    H = L // W
    rows, lanes = N * H, W * C
    tf = t.reshape(rows, lanes)
    xf = x.reshape(rows, lanes)
    scale_l = jnp.tile(scale_c.reshape(1, 1, C), (1, W, 1)).reshape(1, lanes)
    shift_l = jnp.tile(shift_c.reshape(1, 1, C), (1, W, 1)).reshape(1, lanes)
    tr = _row_tile(rows, lanes)
    out = pl.pallas_call(
        _bn_residual_kernel,
        grid=(rows // tr,),
        in_specs=[
            pl.BlockSpec((tr, lanes), lambda i: (i, 0)),
            pl.BlockSpec((tr, lanes), lambda i: (i, 0)),
            pl.BlockSpec((1, lanes), lambda i: (0, 0)),
            pl.BlockSpec((1, lanes), lambda i: (0, 0)),
        ],
        out_specs=pl.BlockSpec((tr, lanes), lambda i: (i, 0)),
        out_shape=jax.ShapeDtypeStruct((rows, lanes), jnp.float32),
        compiler_params=pltpu.CompilerParams(
            dimension_semantics=("parallel",),
            vmem_limit_bytes=_VMEM_LIMIT),
    )(tf, xf, scale_l, shift_l)
    return out.reshape(N, L, C)


# ------------------------------- glue / wrapper -------------------------------

def _make_tap_masks(H, W):
    """(9, H*W, 1) f32 validity masks for the 3x3 taps (zero padding)."""
    y, x = np.mgrid[0:H, 0:W]
    m = np.zeros((9, H * W, 1), np.float32)
    for dy in range(3):
        for dx in range(3):
            yy, xx = y + dy - 1, x + dx - 1
            valid = (yy >= 0) & (yy < H) & (xx >= 0) & (xx < W)
            m[dy * 3 + dx, :, 0] = valid.reshape(-1).astype(np.float32)
    return jnp.asarray(m)


def _bn_affine(ssum, ssq, gamma, beta, cnt):
    """Fold batch stats into per-channel (scale, shift): bn(x)=x*scale+shift."""
    s = jnp.sum(ssum, axis=(0, 1))            # (C,)
    sq = jnp.sum(ssq, axis=(0, 1))            # (C,)
    mean = s / cnt
    var = sq / cnt - mean * mean              # biased variance (training BN)
    scale = gamma * jax.lax.rsqrt(var + EPS)
    shift = beta - mean * scale
    return scale.reshape(1, -1), shift.reshape(1, -1)


def residual_block(x_nchw, p):
    """Pallas implementation of ResidualBlock.forward. Input/output NCHW f32."""
    x = jnp.transpose(x_nchw, (0, 2, 3, 1)).astype(jnp.float32)   # NHWC
    N, H, W, C = x.shape
    L = H * W
    cnt = float(N * L)

    xf = x.reshape(N, L, C)
    masks = _make_tap_masks(H, W)
    one = jnp.ones((1, C), jnp.float32)
    zero = jnp.zeros((1, C), jnp.float32)
    alpha_id = jnp.ones((1,), jnp.float32)     # identity PReLU for stage 1

    # Stage 1: conv1 (+ per-image stats of its output).
    t1, s1, q1 = _conv_stage(xf, one, zero, alpha_id, p["w1_k"], p["b1"],
                             masks, W=W)
    scale1, shift1 = _bn_affine(s1, q1, p["g1_v"], p["be1_v"], cnt)

    # Stage 2: bn1 + PReLU fused into the conv2 stage (+ stats of conv2 out).
    t2, s2, q2 = _conv_stage(t1, scale1, shift1, p["alpha"], p["w2_k"], p["b2"],
                             masks, W=W)
    scale2, shift2 = _bn_affine(s2, q2, p["g2_v"], p["be2_v"], cnt)

    # Stage 3: bn2 + residual add (lane-dense elementwise kernel).
    out = _bn_apply_residual(t2, xf, scale2, shift2, W=W, C=C)
    return jnp.transpose(out.reshape(N, H, W, C), (0, 3, 1, 2))   # back to NCHW


# ------------------------------ parameter setup -------------------------------

def make_params(key, channels):
    C = channels
    ks = jax.random.split(key, 8)
    scale = 1.0 / np.sqrt(C * 9)
    w1_pt = jax.random.normal(ks[0], (C, C, 3, 3), jnp.float32) * scale  # OIHW
    w2_pt = jax.random.normal(ks[1], (C, C, 3, 3), jnp.float32) * scale
    b1 = jax.random.normal(ks[2], (C,), jnp.float32) * 0.1
    b2 = jax.random.normal(ks[3], (C,), jnp.float32) * 0.1
    g1 = 1.0 + 0.1 * jax.random.normal(ks[4], (C,), jnp.float32)
    g2 = 1.0 + 0.1 * jax.random.normal(ks[5], (C,), jnp.float32)
    be1 = 0.1 * jax.random.normal(ks[6], (C,), jnp.float32)
    be2 = 0.1 * jax.random.normal(ks[7], (C,), jnp.float32)

    def to_taps(w_pt):
        # OIHW -> (tap k = dy*3+dx, cin, cout); bf16 for the MXU.
        wt = jnp.transpose(w_pt, (2, 3, 1, 0))        # (dy, dx, cin, cout)
        return wt.reshape(9, C, C).astype(jnp.bfloat16)

    return {
        "w1_pt": w1_pt, "w2_pt": w2_pt,
        "w1_k": to_taps(w1_pt), "w2_k": to_taps(w2_pt),
        "b1": b1.reshape(1, C), "b2": b2.reshape(1, C),
        "b1_v": b1, "b2_v": b2,
        "g1_v": g1, "g2_v": g2, "be1_v": be1, "be2_v": be2,
        "alpha": jnp.full((1,), 0.25, jnp.float32),   # PReLU default init
    }


# --------------------------- pure-JAX reference (NCHW) ------------------------

def ref_forward(x, p):
    dn = ("NCHW", "OIHW", "NCHW")

    def conv(t, w, b):
        y = jax.lax.conv_general_dilated(t, w, (1, 1), ((1, 1), (1, 1)),
                                         dimension_numbers=dn)
        return y + b.reshape(1, -1, 1, 1)

    def bn(t, g, be):
        mean = jnp.mean(t, axis=(0, 2, 3), keepdims=True)
        var = jnp.mean((t - mean) ** 2, axis=(0, 2, 3), keepdims=True)
        return ((t - mean) * jax.lax.rsqrt(var + EPS)
                * g.reshape(1, -1, 1, 1) + be.reshape(1, -1, 1, 1))

    t = conv(x, p["w1_pt"], p["b1_v"])
    t = bn(t, p["g1_v"], p["be1_v"])
    t = jnp.where(t >= 0, t, 0.25 * t)
    t = conv(t, p["w2_pt"], p["b2_v"])
    t = bn(t, p["g2_v"], p["be2_v"])
    return t + x


if __name__ == "__main__":
    key = jax.random.PRNGKey(0)
    k_x, k_p = jax.random.split(key)

    N, C, H, W = 2, 8, 16, 16          # small shapes; C=8 stands in for 64
    x = jax.random.normal(k_x, (N, C, H, W), jnp.float32)
    params = make_params(k_p, C)

    out = jax.block_until_ready(jax.jit(residual_block)(x, params))
    ref = jax.block_until_ready(ref_forward(x, params))

    assert out.shape == (N, C, H, W)
    # bf16 MXU operands + bf16 intermediate activations -> loosened tolerance.
    np.testing.assert_allclose(np.asarray(out), np.asarray(ref),
                               rtol=5e-2, atol=5e-2)
    print("KERNEL_OK")
</pallas_src>

<mosaic_0001>
module attributes {stable_mosaic.version = 11 : i64} {
  func.func @_stage_kernel(%arg0: i32, %arg1: memref<1x256x8xf32, #tpu.memory_space<vmem>>, %arg2: memref<1x8xf32, #tpu.memory_space<vmem>>, %arg3: memref<1x8xf32, #tpu.memory_space<vmem>>, %arg4: memref<1xf32, #tpu.memory_space<smem>>, %arg5: memref<9x8x8xbf16, #tpu.memory_space<vmem>>, %arg6: memref<1x8xf32, #tpu.memory_space<vmem>>, %arg7: memref<9x256x1xf32, #tpu.memory_space<vmem>>, %arg8: memref<1x256x8xbf16, #tpu.memory_space<vmem>>, %arg9: memref<1x1x8xf32, #tpu.memory_space<vmem>>, %arg10: memref<1x1x8xf32, #tpu.memory_space<vmem>>) attributes {dimension_semantics = [#tpu.dimension_semantics<parallel>], iteration_bounds = array<i64: 2>, scalar_prefetch = 0 : i64, scratch_operands = 0 : i64, tpu.core_type = #tpu.core_type<tc>, window_params = [{transform_indices = @transform_0, window_bounds = array<i64: 1, 256, 8>}, {pipeline_mode = #tpu.pipeline_mode<synchronous>, transform_indices = @transform_1, window_bounds = array<i64: 1, 8>}, {pipeline_mode = #tpu.pipeline_mode<synchronous>, transform_indices = @transform_2, window_bounds = array<i64: 1, 8>}, {transform_indices = @transform_3, window_bounds = array<i64: 1>}, {pipeline_mode = #tpu.pipeline_mode<synchronous>, transform_indices = @transform_4, window_bounds = array<i64: 9, 8, 8>}, {pipeline_mode = #tpu.pipeline_mode<synchronous>, transform_indices = @transform_5, window_bounds = array<i64: 1, 8>}, {pipeline_mode = #tpu.pipeline_mode<synchronous>, transform_indices = @transform_6, window_bounds = array<i64: 9, 256, 1>}, {transform_indices = @transform_7, window_bounds = array<i64: 1, 256, 8>}, {transform_indices = @transform_8, window_bounds = array<i64: 1, 1, 8>}, {transform_indices = @transform_9, window_bounds = array<i64: 1, 1, 8>}]} {
    %c0 = arith.constant 0 : index
    %0 = memref.load %arg4[%c0] : memref<1xf32, #tpu.memory_space<smem>>
    %c0_0 = arith.constant 0 : index
    %c0_1 = arith.constant 0 : index
    %c0_2 = arith.constant 0 : index
    %1 = vector.load %arg1[%c0_0, %c0_1, %c0_2] : memref<1x256x8xf32, #tpu.memory_space<vmem>>, vector<1x256x8xf32>
    %2 = vector.shape_cast %1 : vector<1x256x8xf32> to vector<256x8xf32>
    %c0_3 = arith.constant 0 : index
    %c0_4 = arith.constant 0 : index
    %3 = vector.load %arg2[%c0_3, %c0_4] : memref<1x8xf32, #tpu.memory_space<vmem>>, vector<1x8xf32>
    %4 = vector.broadcast %3 : vector<1x8xf32> to vector<256x8xf32>
    %5 = arith.mulf %2, %4 : vector<256x8xf32>
    %c0_5 = arith.constant 0 : index
    %c0_6 = arith.constant 0 : index
    %6 = vector.load %arg3[%c0_5, %c0_6] : memref<1x8xf32, #tpu.memory_space<vmem>>, vector<1x8xf32>
    %7 = vector.broadcast %6 : vector<1x8xf32> to vector<256x8xf32>
    %8 = arith.addf %5, %7 : vector<256x8xf32>
    %cst = arith.constant 0.000000e+00 : f32
    %9 = vector.broadcast %cst : f32 to vector<256x8xf32>
    %10 = arith.cmpf oge, %8, %9 : vector<256x8xf32>
    %11 = vector.broadcast %0 : f32 to vector<256x8xf32>
    %12 = arith.mulf %8, %11 : vector<256x8xf32>
    %13 = arith.select %10, %8, %12 : vector<256x8xi1>, vector<256x8xf32>
    %cst_7 = arith.constant 0.000000e+00 : f32
    %14 = vector.broadcast %cst_7 : f32 to vector<256x8xf32>
    %c17_i32 = arith.constant 17 : i32
    %15 = tpu.dynamic_rotate %13 by %c17_i32 dim 0 : vector<256x8xf32>, i32 -> vector<256x8xf32>
    %c0_8 = arith.constant 0 : index
    %c0_9 = arith.constant 0 : index
    %c0_10 = arith.constant 0 : index
    %16 = vector.load %arg7[%c0_8, %c0_9, %c0_10] : memref<9x256x1xf32, #tpu.memory_space<vmem>>, vector<1x256x1xf32>
    %17 = vector.shape_cast %16 : vector<1x256x1xf32> to vector<256x1xf32>
    %18 = vector.broadcast %17 : vector<256x1xf32> to vector<256x8xf32>
    %19 = arith.mulf %15, %18 : vector<256x8xf32>
    %20 = arith.truncf %19 : vector<256x8xf32> to vector<256x8xbf16>
    %c0_11 = arith.constant 0 : index
    %c0_12 = arith.constant 0 : index
    %c0_13 = arith.constant 0 : index
    %21 = vector.load %arg5[%c0_11, %c0_12, %c0_13] : memref<9x8x8xbf16, #tpu.memory_space<vmem>>, vector<1x8x8xbf16>
    %22 = vector.shape_cast %21 : vector<1x8x8xbf16> to vector<8x8xbf16>
    %cst_14 = arith.constant dense<0.000000e+00> : vector<256x8xf32>
    %23 = tpu.matmul %20, %22, %cst_14 {dimension_numbers = #tpu.dot_dimension_numbers<[1], [0], [0], [1], [0, 0, 1, 1], [], []>} : vector<256x8xbf16>, vector<8x8xbf16>, vector<256x8xf32> -> vector<256x8xf32>
    %24 = arith.addf %14, %23 : vector<256x8xf32>
    %c16_i32 = arith.constant 16 : i32
    %25 = tpu.dynamic_rotate %13 by %c16_i32 dim 0 : vector<256x8xf32>, i32 -> vector<256x8xf32>
    %c1 = arith.constant 1 : index
    %c0_15 = arith.constant 0 : index
    %c0_16 = arith.constant 0 : index
    %26 = vector.load %arg7[%c1, %c0_15, %c0_16] : memref<9x256x1xf32, #tpu.memory_space<vmem>>, vector<1x256x1xf32>
    %27 = vector.shape_cast %26 : vector<1x256x1xf32> to vector<256x1xf32>
    %28 = vector.broadcast %27 : vector<256x1xf32> to vector<256x8xf32>
    %29 = arith.mulf %25, %28 : vector<256x8xf32>
    %30 = arith.truncf %29 : vector<256x8xf32> to vector<256x8xbf16>
    %c1_17 = arith.constant 1 : index
    %c0_18 = arith.constant 0 : index
    %c0_19 = arith.constant 0 : index
    %31 = vector.load %arg5[%c1_17, %c0_18, %c0_19] : memref<9x8x8xbf16, #tpu.memory_space<vmem>>, vector<1x8x8xbf16>
    %32 = vector.shape_cast %31 : vector<1x8x8xbf16> to vector<8x8xbf16>
    %cst_20 = arith.constant dense<0.000000e+00> : vector<256x8xf32>
    %33 = tpu.matmul %30, %32, %cst_20 {dimension_numbers = #tpu.dot_dimension_numbers<[1], [0], [0], [1], [0, 0, 1, 1], [], []>} : vector<256x8xbf16>, vector<8x8xbf16>, vector<256x8xf32> -> vector<256x8xf32>
    %34 = arith.addf %24, %33 : vector<256x8xf32>
    %c15_i32 = arith.constant 15 : i32
    %35 = tpu.dynamic_rotate %13 by %c15_i32 dim 0 : vector<256x8xf32>, i32 -> vector<256x8xf32>
    %c2 = arith.constant 2 : index
    %c0_21 = arith.constant 0 : index
    %c0_22 = arith.constant 0 : index
    %36 = vector.load %arg7[%c2, %c0_21, %c0_22] : memref<9x256x1xf32, #tpu.memory_space<vmem>>, vector<1x256x1xf32>
    %37 = vector.shape_cast %36 : vector<1x256x1xf32> to vector<256x1xf32>
    %38 = vector.broadcast %37 : vector<256x1xf32> to vector<256x8xf32>
    %39 = arith.mulf %35, %38 : vector<256x8xf32>
    %40 = arith.truncf %39 : vector<256x8xf32> to vector<256x8xbf16>
    %c2_23 = arith.constant 2 : index
    %c0_24 = arith.constant 0 : index
    %c0_25 = arith.constant 0 : index
    %41 = vector.load %arg5[%c2_23, %c0_24, %c0_25] : memref<9x8x8xbf16, #tpu.memory_space<vmem>>, vector<1x8x8xbf16>
    %42 = vector.shape_cast %41 : vector<1x8x8xbf16> to vector<8x8xbf16>
    %cst_26 = arith.constant dense<0.000000e+00> : vector<256x8xf32>
    %43 = tpu.matmul %40, %42, %cst_26 {dimension_numbers = #tpu.dot_dimension_numbers<[1], [0], [0], [1], [0, 0, 1, 1], [], []>} : vector<256x8xbf16>, vector<8x8xbf16>, vector<256x8xf32> -> vector<256x8xf32>
    %44 = arith.addf %34, %43 : vector<256x8xf32>
    %c1_i32 = arith.constant 1 : i32
    %45 = tpu.dynamic_rotate %13 by %c1_i32 dim 0 : vector<256x8xf32>, i32 -> vector<256x8xf32>
    %c3 = arith.constant 3 : index
    %c0_27 = arith.constant 0 : index
    %c0_28 = arith.constant 0 : index
    %46 = vector.load %arg7[%c3, %c0_27, %c0_28] : memref<9x256x1xf32, #tpu.memory_space<vmem>>, vector<1x256x1xf32>
    %47 = vector.shape_cast %46 : vector<1x256x1xf32> to vector<256x1xf32>
    %48 = vector.broadcast %47 : vector<256x1xf32> to vector<256x8xf32>
    %49 = arith.mulf %45, %48 : vector<256x8xf32>
    %50 = arith.truncf %49 : vector<256x8xf32> to vector<256x8xbf16>
    %c3_29 = arith.constant 3 : index
    %c0_30 = arith.constant 0 : index
    %c0_31 = arith.constant 0 : index
    %51 = vector.load %arg5[%c3_29, %c0_30, %c0_31] : memref<9x8x8xbf16, #tpu.memory_space<vmem>>, vector<1x8x8xbf16>
    %52 = vector.shape_cast %51 : vector<1x8x8xbf16> to vector<8x8xbf16>
    %cst_32 = arith.constant dense<0.000000e+00> : vector<256x8xf32>
    %53 = tpu.matmul %50, %52, %cst_32 {dimension_numbers = #tpu.dot_dimension_numbers<[1], [0], [0], [1], [0, 0, 1, 1], [], []>} : vector<256x8xbf16>, vector<8x8xbf16>, vector<256x8xf32> -> vector<256x8xf32>
    %54 = arith.addf %44, %53 : vector<256x8xf32>
    %55 = arith.truncf %13 : vector<256x8xf32> to vector<256x8xbf16>
    %c4 = arith.constant 4 : index
    %c0_33 = arith.constant 0 : index
    %c0_34 = arith.constant 0 : index
    %56 = vector.load %arg5[%c4, %c0_33, %c0_34] : memref<9x8x8xbf16, #tpu.memory_space<vmem>>, vector<1x8x8xbf16>
    %57 = vector.shape_cast %56 : vector<1x8x8xbf16> to vector<8x8xbf16>
    %cst_35 = arith.constant dense<0.000000e+00> : vector<256x8xf32>
    %58 = tpu.matmul %55, %57, %cst_35 {dimension_numbers = #tpu.dot_dimension_numbers<[1], [0], [0], [1], [0, 0, 1, 1], [], []>} : vector<256x8xbf16>, vector<8x8xbf16>, vector<256x8xf32> -> vector<256x8xf32>
    %59 = arith.addf %54, %58 : vector<256x8xf32>
    %c255_i32 = arith.constant 255 : i32
    %60 = tpu.dynamic_rotate %13 by %c255_i32 dim 0 : vector<256x8xf32>, i32 -> vector<256x8xf32>
    %c5 = arith.constant 5 : index
    %c0_36 = arith.constant 0 : index
    %c0_37 = arith.constant 0 : index
    %61 = vector.load %arg7[%c5, %c0_36, %c0_37] : memref<9x256x1xf32, #tpu.memory_space<vmem>>, vector<1x256x1xf32>
    %62 = vector.shape_cast %61 : vector<1x256x1xf32> to vector<256x1xf32>
    %63 = vector.broadcast %62 : vector<256x1xf32> to vector<256x8xf32>
    %64 = arith.mulf %60, %63 : vector<256x8xf32>
    %65 = arith.truncf %64 : vector<256x8xf32> to vector<256x8xbf16>
    %c5_38 = arith.constant 5 : index
    %c0_39 = arith.constant 0 : index
    %c0_40 = arith.constant 0 : index
    %66 = vector.load %arg5[%c5_38, %c0_39, %c0_40] : memref<9x8x8xbf16, #tpu.memory_space<vmem>>, vector<1x8x8xbf16>
    %67 = vector.shape_cast %66 : vector<1x8x8xbf16> to vector<8x8xbf16>
    %cst_41 = arith.constant dense<0.000000e+00> : vector<256x8xf32>
    %68 = tpu.matmul %65, %67, %cst_41 {dimension_numbers = #tpu.dot_dimension_numbers<[1], [0], [0], [1], [0, 0, 1, 1], [], []>} : vector<256x8xbf16>, vector<8x8xbf16>, vector<256x8xf32> -> vector<256x8xf32>
    %69 = arith.addf %59, %68 : vector<256x8xf32>
    %c241_i32 = arith.constant 241 : i32
    %70 = tpu.dynamic_rotate %13 by %c241_i32 dim 0 : vector<256x8xf32>, i32 -> vector<256x8xf32>
    %c6 = arith.constant 6 : index
    %c0_42 = arith.constant 0 : index
    %c0_43 = arith.constant 0 : index
    %71 = vector.load %arg7[%c6, %c0_42, %c0_43] : memref<9x256x1xf32, #tpu.memory_space<vmem>>, vector<1x256x1xf32>
    %72 = vector.shape_cast %71 : vector<1x256x1xf32> to vector<256x1xf32>
    %73 = vector.broadcast %72 : vector<256x1xf32> to vector<256x8xf32>
    %74 = arith.mulf %70, %73 : vector<256x8xf32>
    %75 = arith.truncf %74 : vector<256x8xf32> to vector<256x8xbf16>
    %c6_44 = arith.constant 6 : index
    %c0_45 = arith.constant 0 : index
    %c0_46 = arith.constant 0 : index
    %76 = vector.load %arg5[%c6_44, %c0_45, %c0_46] : memref<9x8x8xbf16, #tpu.memory_space<vmem>>, vector<1x8x8xbf16>
    %77 = vector.shape_cast %76 : vector<1x8x8xbf16> to vector<8x8xbf16>
    %cst_47 = arith.constant dense<0.000000e+00> : vector<256x8xf32>
    %78 = tpu.matmul %75, %77, %cst_47 {dimension_numbers = #tpu.dot_dimension_numbers<[1], [0], [0], [1], [0, 0, 1, 1], [], []>} : vector<256x8xbf16>, vector<8x8xbf16>, vector<256x8xf32> -> vector<256x8xf32>
    %79 = arith.addf %69, %78 : vector<256x8xf32>
    %c240_i32 = arith.constant 240 : i32
    %80 = tpu.dynamic_rotate %13 by %c240_i32 dim 0 : vector<256x8xf32>, i32 -> vector<256x8xf32>
    %c7 = arith.constant 7 : index
    %c0_48 = arith.constant 0 : index
    %c0_49 = arith.constant 0 : index
    %81 = vector.load %arg7[%c7, %c0_48, %c0_49] : memref<9x256x1xf32, #tpu.memory_space<vmem>>, vector<1x256x1xf32>
    %82 = vector.shape_cast %81 : vector<1x256x1xf32> to vector<256x1xf32>
    %83 = vector.broadcast %82 : vector<256x1xf32> to vector<256x8xf32>
    %84 = arith.mulf %80, %83 : vector<256x8xf32>
    %85 = arith.truncf %84 : vector<256x8xf32> to vector<256x8xbf16>
    %c7_50 = arith.constant 7 : index
    %c0_51 = arith.constant 0 : index
    %c0_52 = arith.constant 0 : index
    %86 = vector.load %arg5[%c7_50, %c0_51, %c0_52] : memref<9x8x8xbf16, #tpu.memory_space<vmem>>, vector<1x8x8xbf16>
    %87 = vector.shape_cast %86 : vector<1x8x8xbf16> to vector<8x8xbf16>
    %cst_53 = arith.constant dense<0.000000e+00> : vector<256x8xf32>
    %88 = tpu.matmul %85, %87, %cst_53 {dimension_numbers = #tpu.dot_dimension_numbers<[1], [0], [0], [1], [0, 0, 1, 1], [], []>} : vector<256x8xbf16>, vector<8x8xbf16>, vector<256x8xf32> -> vector<256x8xf32>
    %89 = arith.addf %79, %88 : vector<256x8xf32>
    %c239_i32 = arith.constant 239 : i32
    %90 = tpu.dynamic_rotate %13 by %c239_i32 dim 0 : vector<256x8xf32>, i32 -> vector<256x8xf32>
    %c8 = arith.constant 8 : index
    %c0_54 = arith.constant 0 : index
    %c0_55 = arith.constant 0 : index
    %91 = vector.load %arg7[%c8, %c0_54, %c0_55] : memref<9x256x1xf32, #tpu.memory_space<vmem>>, vector<1x256x1xf32>
    %92 = vector.shape_cast %91 : vector<1x256x1xf32> to vector<256x1xf32>
    %93 = vector.broadcast %92 : vector<256x1xf32> to vector<256x8xf32>
    %94 = arith.mulf %90, %93 : vector<256x8xf32>
    %95 = arith.truncf %94 : vector<256x8xf32> to vector<256x8xbf16>
    %c8_56 = arith.constant 8 : index
    %c0_57 = arith.constant 0 : index
    %c0_58 = arith.constant 0 : index
    %96 = vector.load %arg5[%c8_56, %c0_57, %c0_58] : memref<9x8x8xbf16, #tpu.memory_space<vmem>>, vector<1x8x8xbf16>
    %97 = vector.shape_cast %96 : vector<1x8x8xbf16> to vector<8x8xbf16>
    %cst_59 = arith.constant dense<0.000000e+00> : vector<256x8xf32>
    %98 = tpu.matmul %95, %97, %cst_59 {dimension_numbers = #tpu.dot_dimension_numbers<[1], [0], [0], [1], [0, 0, 1, 1], [], []>} : vector<256x8xbf16>, vector<8x8xbf16>, vector<256x8xf32> -> vector<256x8xf32>
    %99 = arith.addf %89, %98 : vector<256x8xf32>
    %c0_60 = arith.constant 0 : index
    %c0_61 = arith.constant 0 : index
    %100 = vector.load %arg6[%c0_60, %c0_61] : memref<1x8xf32, #tpu.memory_space<vmem>>, vector<1x8xf32>
    %101 = vector.broadcast %100 : vector<1x8xf32> to vector<256x8xf32>
    %102 = arith.addf %99, %101 : vector<256x8xf32>
    %103 = arith.truncf %102 : vector<256x8xf32> to vector<256x8xbf16>
    %c0_62 = arith.constant 0 : index
    %c0_63 = arith.constant 0 : index
    %c0_64 = arith.constant 0 : index
    %104 = vector.load %arg8[%c0_62, %c0_63, %c0_64] : memref<1x256x8xbf16, #tpu.memory_space<vmem>>, vector<1x256x8xbf16>
    %105 = vector.shape_cast %104 : vector<1x256x8xbf16> to vector<256x8xbf16>
    %106 = vector.shape_cast %103 : vector<256x8xbf16> to vector<1x256x8xbf16>
    tpu.vector_store %arg8[%c0_62, %c0_63, %c0_64], %106 {strides = array<i32>} : memref<1x256x8xbf16, #tpu.memory_space<vmem>>, vector<1x256x8xbf16>,
    %cst_65 = arith.constant dense<0.000000e+00> : vector<8xf32>
    %107 = vector.multi_reduction <add>, %102, %cst_65 [0] : vector<256x8xf32> to vector<8xf32>
    %108 = vector.shape_cast %107 : vector<8xf32> to vector<1x8xf32>
    %c0_66 = arith.constant 0 : index
    %c0_67 = arith.constant 0 : index
    %c0_68 = arith.constant 0 : index
    %109 = vector.load %arg9[%c0_66, %c0_67, %c0_68] : memref<1x1x8xf32, #tpu.memory_space<vmem>>, vector<1x1x8xf32>
    %110 = vector.shape_cast %109 : vector<1x1x8xf32> to vector<1x8xf32>
    %111 = vector.shape_cast %108 : vector<1x8xf32> to vector<1x1x8xf32>
    tpu.vector_store %arg9[%c0_66, %c0_67, %c0_68], %111 {strides = array<i32>} : memref<1x1x8xf32, #tpu.memory_space<vmem>>, vector<1x1x8xf32>,
    %112 = arith.mulf %102, %102 : vector<256x8xf32>
    %cst_69 = arith.constant dense<0.000000e+00> : vector<8xf32>
    %113 = vector.multi_reduction <add>, %112, %cst_69 [0] : vector<256x8xf32> to vector<8xf32>
    %114 = vector.shape_cast %113 : vector<8xf32> to vector<1x8xf32>
    %c0_70 = arith.constant 0 : index
    %c0_71 = arith.constant 0 : index
    %c0_72 = arith.constant 0 : index
    %115 = vector.load %arg10[%c0_70, %c0_71, %c0_72] : memref<1x1x8xf32, #tpu.memory_space<vmem>>, vector<1x1x8xf32>
    %116 = vector.shape_cast %115 : vector<1x1x8xf32> to vector<1x8xf32>
    %117 = vector.shape_cast %114 : vector<1x8xf32> to vector<1x1x8xf32>
    tpu.vector_store %arg10[%c0_70, %c0_71, %c0_72], %117 {strides = array<i32>} : memref<1x1x8xf32, #tpu.memory_space<vmem>>, vector<1x1x8xf32>,
    return
  }
  func.func @transform_0(%arg0: i32) -> (i32, i32, i32) {
    %c0_i32 = arith.constant 0 : i32
    %c0_i32_0 = arith.constant 0 : i32
    %c0_i32_1 = arith.constant 0 : i32
    return %arg0, %c0_i32, %c0_i32_0 : i32, i32, i32
  }
  func.func @transform_1(%arg0: i32) -> (i32, i32) {
    %c0_i32 = arith.constant 0 : i32
    %c0_i32_0 = arith.constant 0 : i32
    %c0_i32_1 = arith.constant 0 : i32
    return %c0_i32, %c0_i32_0 : i32, i32
  }
  func.func @transform_2(%arg0: i32) -> (i32, i32) {
    %c0_i32 = arith.constant 0 : i32
    %c0_i32_0 = arith.constant 0 : i32
    %c0_i32_1 = arith.constant 0 : i32
    return %c0_i32, %c0_i32_0 : i32, i32
  }
  func.func @transform_3(%arg0: i32) -> i32 {
    %c0_i32 = arith.constant 0 : i32
    %c0_i32_0 = arith.constant 0 : i32
    return %c0_i32 : i32
  }
  func.func @transform_4(%arg0: i32) -> (i32, i32, i32) {
    %c0_i32 = arith.constant 0 : i32
    %c0_i32_0 = arith.constant 0 : i32
    %c0_i32_1 = arith.constant 0 : i32
    %c0_i32_2 = arith.constant 0 : i32
    return %c0_i32, %c0_i32_0, %c0_i32_1 : i32, i32, i32
  }
  func.func @transform_5(%arg0: i32) -> (i32, i32) {
    %c0_i32 = arith.constant 0 : i32
    %c0_i32_0 = arith.constant 0 : i32
    %c0_i32_1 = arith.constant 0 : i32
    return %c0_i32, %c0_i32_0 : i32, i32
  }
  func.func @transform_6(%arg0: i32) -> (i32, i32, i32) {
    %c0_i32 = arith.constant 0 : i32
    %c0_i32_0 = arith.constant 0 : i32
    %c0_i32_1 = arith.constant 0 : i32
    %c0_i32_2 = arith.constant 0 : i32
    return %c0_i32, %c0_i32_0, %c0_i32_1 : i32, i32, i32
  }
  func.func @transform_7(%arg0: i32) -> (i32, i32, i32) {
    %c0_i32 = arith.constant 0 : i32
    %c0_i32_0 = arith.constant 0 : i32
    %c0_i32_1 = arith.constant 0 : i32
    return %arg0, %c0_i32, %c0_i32_0 : i32, i32, i32
  }
  func.func @transform_8(%arg0: i32) -> (i32, i32, i32) {
    %c0_i32 = arith.constant 0 : i32
    %c0_i32_0 = arith.constant 0 : i32
    %c0_i32_1 = arith.constant 0 : i32
    return %arg0, %c0_i32, %c0_i32_0 : i32, i32, i32
  }
  func.func @transform_9(%arg0: i32) -> (i32, i32, i32) {
    %c0_i32 = arith.constant 0 : i32
    %c0_i32_0 = arith.constant 0 : i32
    %c0_i32_1 = arith.constant 0 : i32
    return %arg0, %c0_i32, %c0_i32_0 : i32, i32, i32
  }
}

module attributes {stable_mosaic.version = 11 : i64} {
  func.func @_stage_kernel(%arg0: i32, %arg1: memref<1x256x8xbf16, #tpu.memory_space<vmem>>, %arg2: memref<1x8xf32, #tpu.memory_space<vmem>>, %arg3: memref<1x8xf32, #tpu.memory_space<vmem>>, %arg4: memref<1xf32, #tpu.memory_space<smem>>, %arg5: memref<9x8x8xbf16, #tpu.memory_space<vmem>>, %arg6: memref<1x8xf32, #tpu.memory_space<vmem>>, %arg7: memref<9x256x1xf32, #tpu.memory_space<vmem>>, %arg8: memref<1x256x8xbf16, #tpu.memory_space<vmem>>, %arg9: memref<1x1x8xf32, #tpu.memory_space<vmem>>, %arg10: memref<1x1x8xf32, #tpu.memory_space<vmem>>) attributes {dimension_semantics = [#tpu.dimension_semantics<parallel>], iteration_bounds = array<i64: 2>, scalar_prefetch = 0 : i64, scratch_operands = 0 : i64, tpu.core_type = #tpu.core_type<tc>, window_params = [{transform_indices = @transform_0, window_bounds = array<i64: 1, 256, 8>}, {pipeline_mode = #tpu.pipeline_mode<synchronous>, transform_indices = @transform_1, window_bounds = array<i64: 1, 8>}, {pipeline_mode = #tpu.pipeline_mode<synchronous>, transform_indices = @transform_2, window_bounds = array<i64: 1, 8>}, {transform_indices = @transform_3, window_bounds = array<i64: 1>}, {pipeline_mode = #tpu.pipeline_mode<synchronous>, transform_indices = @transform_4, window_bounds = array<i64: 9, 8, 8>}, {pipeline_mode = #tpu.pipeline_mode<synchronous>, transform_indices = @transform_5, window_bounds = array<i64: 1, 8>}, {pipeline_mode = #tpu.pipeline_mode<synchronous>, transform_indices = @transform_6, window_bounds = array<i64: 9, 256, 1>}, {transform_indices = @transform_7, window_bounds = array<i64: 1, 256, 8>}, {transform_indices = @transform_8, window_bounds = array<i64: 1, 1, 8>}, {transform_indices = @transform_9, window_bounds = array<i64: 1, 1, 8>}]} {
    %c0 = arith.constant 0 : index
    %0 = memref.load %arg4[%c0] : memref<1xf32, #tpu.memory_space<smem>>
    %c0_0 = arith.constant 0 : index
    %c0_1 = arith.constant 0 : index
    %c0_2 = arith.constant 0 : index
    %1 = vector.load %arg1[%c0_0, %c0_1, %c0_2] : memref<1x256x8xbf16, #tpu.memory_space<vmem>>, vector<1x256x8xbf16>
    %2 = vector.shape_cast %1 : vector<1x256x8xbf16> to vector<256x8xbf16>
    %3 = arith.extf %2 : vector<256x8xbf16> to vector<256x8xf32>
    %c0_3 = arith.constant 0 : index
    %c0_4 = arith.constant 0 : index
    %4 = vector.load %arg2[%c0_3, %c0_4] : memref<1x8xf32, #tpu.memory_space<vmem>>, vector<1x8xf32>
    %5 = vector.broadcast %4 : vector<1x8xf32> to vector<256x8xf32>
    %6 = arith.mulf %3, %5 : vector<256x8xf32>
    %c0_5 = arith.constant 0 : index
    %c0_6 = arith.constant 0 : index
    %7 = vector.load %arg3[%c0_5, %c0_6] : memref<1x8xf32, #tpu.memory_space<vmem>>, vector<1x8xf32>
    %8 = vector.broadcast %7 : vector<1x8xf32> to vector<256x8xf32>
    %9 = arith.addf %6, %8 : vector<256x8xf32>
    %cst = arith.constant 0.000000e+00 : f32
    %10 = vector.broadcast %cst : f32 to vector<256x8xf32>
    %11 = arith.cmpf oge, %9, %10 : vector<256x8xf32>
    %12 = vector.broadcast %0 : f32 to vector<256x8xf32>
    %13 = arith.mulf %9, %12 : vector<256x8xf32>
    %14 = arith.select %11, %9, %13 : vector<256x8xi1>, vector<256x8xf32>
    %cst_7 = arith.constant 0.000000e+00 : f32
    %15 = vector.broadcast %cst_7 : f32 to vector<256x8xf32>
    %c17_i32 = arith.constant 17 : i32
    %16 = tpu.dynamic_rotate %14 by %c17_i32 dim 0 : vector<256x8xf32>, i32 -> vector<256x8xf32>
    %c0_8 = arith.constant 0 : index
    %c0_9 = arith.constant 0 : index
    %c0_10 = arith.constant 0 : index
    %17 = vector.load %arg7[%c0_8, %c0_9, %c0_10] : memref<9x256x1xf32, #tpu.memory_space<vmem>>, vector<1x256x1xf32>
    %18 = vector.shape_cast %17 : vector<1x256x1xf32> to vector<256x1xf32>
    %19 = vector.broadcast %18 : vector<256x1xf32> to vector<256x8xf32>
    %20 = arith.mulf %16, %19 : vector<256x8xf32>
    %21 = arith.truncf %20 : vector<256x8xf32> to vector<256x8xbf16>
    %c0_11 = arith.constant 0 : index
    %c0_12 = arith.constant 0 : index
    %c0_13 = arith.constant 0 : index
    %22 = vector.load %arg5[%c0_11, %c0_12, %c0_13] : memref<9x8x8xbf16, #tpu.memory_space<vmem>>, vector<1x8x8xbf16>
    %23 = vector.shape_cast %22 : vector<1x8x8xbf16> to vector<8x8xbf16>
    %cst_14 = arith.constant dense<0.000000e+00> : vector<256x8xf32>
    %24 = tpu.matmul %21, %23, %cst_14 {dimension_numbers = #tpu.dot_dimension_numbers<[1], [0], [0], [1], [0, 0, 1, 1], [], []>} : vector<256x8xbf16>, vector<8x8xbf16>, vector<256x8xf32> -> vector<256x8xf32>
    %25 = arith.addf %15, %24 : vector<256x8xf32>
    %c16_i32 = arith.constant 16 : i32
    %26 = tpu.dynamic_rotate %14 by %c16_i32 dim 0 : vector<256x8xf32>, i32 -> vector<256x8xf32>
    %c1 = arith.constant 1 : index
    %c0_15 = arith.constant 0 : index
    %c0_16 = arith.constant 0 : index
    %27 = vector.load %arg7[%c1, %c0_15, %c0_16] : memref<9x256x1xf32, #tpu.memory_space<vmem>>, vector<1x256x1xf32>
    %28 = vector.shape_cast %27 : vector<1x256x1xf32> to vector<256x1xf32>
    %29 = vector.broadcast %28 : vector<256x1xf32> to vector<256x8xf32>
    %30 = arith.mulf %26, %29 : vector<256x8xf32>
    %31 = arith.truncf %30 : vector<256x8xf32> to vector<256x8xbf16>
    %c1_17 = arith.constant 1 : index
    %c0_18 = arith.constant 0 : index
    %c0_19 = arith.constant 0 : index
    %32 = vector.load %arg5[%c1_17, %c0_18, %c0_19] : memref<9x8x8xbf16, #tpu.memory_space<vmem>>, vector<1x8x8xbf16>
    %33 = vector.shape_cast %32 : vector<1x8x8xbf16> to vector<8x8xbf16>
    %cst_20 = arith.constant dense<0.000000e+00> : vector<256x8xf32>
    %34 = tpu.matmul %31, %33, %cst_20 {dimension_numbers = #tpu.dot_dimension_numbers<[1], [0], [0], [1], [0, 0, 1, 1], [], []>} : vector<256x8xbf16>, vector<8x8xbf16>, vector<256x8xf32> -> vector<256x8xf32>
    %35 = arith.addf %25, %34 : vector<256x8xf32>
    %c15_i32 = arith.constant 15 : i32
    %36 = tpu.dynamic_rotate %14 by %c15_i32 dim 0 : vector<256x8xf32>, i32 -> vector<256x8xf32>
    %c2 = arith.constant 2 : index
    %c0_21 = arith.constant 0 : index
    %c0_22 = arith.constant 0 : index
    %37 = vector.load %arg7[%c2, %c0_21, %c0_22] : memref<9x256x1xf32, #tpu.memory_space<vmem>>, vector<1x256x1xf32>
    %38 = vector.shape_cast %37 : vector<1x256x1xf32> to vector<256x1xf32>
    %39 = vector.broadcast %38 : vector<256x1xf32> to vector<256x8xf32>
    %40 = arith.mulf %36, %39 : vector<256x8xf32>
    %41 = arith.truncf %40 : vector<256x8xf32> to vector<256x8xbf16>
    %c2_23 = arith.constant 2 : index
    %c0_24 = arith.constant 0 : index
    %c0_25 = arith.constant 0 : index
    %42 = vector.load %arg5[%c2_23, %c0_24, %c0_25] : memref<9x8x8xbf16, #tpu.memory_space<vmem>>, vector<1x8x8xbf16>
    %43 = vector.shape_cast %42 : vector<1x8x8xbf16> to vector<8x8xbf16>
    %cst_26 = arith.constant dense<0.000000e+00> : vector<256x8xf32>
    %44 = tpu.matmul %41, %43, %cst_26 {dimension_numbers = #tpu.dot_dimension_numbers<[1], [0], [0], [1], [0, 0, 1, 1], [], []>} : vector<256x8xbf16>, vector<8x8xbf16>, vector<256x8xf32> -> vector<256x8xf32>
    %45 = arith.addf %35, %44 : vector<256x8xf32>
    %c1_i32 = arith.constant 1 : i32
    %46 = tpu.dynamic_rotate %14 by %c1_i32 dim 0 : vector<256x8xf32>, i32 -> vector<256x8xf32>
    %c3 = arith.constant 3 : index
    %c0_27 = arith.constant 0 : index
    %c0_28 = arith.constant 0 : index
    %47 = vector.load %arg7[%c3, %c0_27, %c0_28] : memref<9x256x1xf32, #tpu.memory_space<vmem>>, vector<1x256x1xf32>
    %48 = vector.shape_cast %47 : vector<1x256x1xf32> to vector<256x1xf32>
    %49 = vector.broadcast %48 : vector<256x1xf32> to vector<256x8xf32>
    %50 = arith.mulf %46, %49 : vector<256x8xf32>
    %51 = arith.truncf %50 : vector<256x8xf32> to vector<256x8xbf16>
    %c3_29 = arith.constant 3 : index
    %c0_30 = arith.constant 0 : index
    %c0_31 = arith.constant 0 : index
    %52 = vector.load %arg5[%c3_29, %c0_30, %c0_31] : memref<9x8x8xbf16, #tpu.memory_space<vmem>>, vector<1x8x8xbf16>
    %53 = vector.shape_cast %52 : vector<1x8x8xbf16> to vector<8x8xbf16>
    %cst_32 = arith.constant dense<0.000000e+00> : vector<256x8xf32>
    %54 = tpu.matmul %51, %53, %cst_32 {dimension_numbers = #tpu.dot_dimension_numbers<[1], [0], [0], [1], [0, 0, 1, 1], [], []>} : vector<256x8xbf16>, vector<8x8xbf16>, vector<256x8xf32> -> vector<256x8xf32>
    %55 = arith.addf %45, %54 : vector<256x8xf32>
    %56 = arith.truncf %14 : vector<256x8xf32> to vector<256x8xbf16>
    %c4 = arith.constant 4 : index
    %c0_33 = arith.constant 0 : index
    %c0_34 = arith.constant 0 : index
    %57 = vector.load %arg5[%c4, %c0_33, %c0_34] : memref<9x8x8xbf16, #tpu.memory_space<vmem>>, vector<1x8x8xbf16>
    %58 = vector.shape_cast %57 : vector<1x8x8xbf16> to vector<8x8xbf16>
    %cst_35 = arith.constant dense<0.000000e+00> : vector<256x8xf32>
    %59 = tpu.matmul %56, %58, %cst_35 {dimension_numbers = #tpu.dot_dimension_numbers<[1], [0], [0], [1], [0, 0, 1, 1], [], []>} : vector<256x8xbf16>, vector<8x8xbf16>, vector<256x8xf32> -> vector<256x8xf32>
    %60 = arith.addf %55, %59 : vector<256x8xf32>
    %c255_i32 = arith.constant 255 : i32
    %61 = tpu.dynamic_rotate %14 by %c255_i32 dim 0 : vector<256x8xf32>, i32 -> vector<256x8xf32>
    %c5 = arith.constant 5 : index
    %c0_36 = arith.constant 0 : index
    %c0_37 = arith.constant 0 : index
    %62 = vector.load %arg7[%c5, %c0_36, %c0_37] : memref<9x256x1xf32, #tpu.memory_space<vmem>>, vector<1x256x1xf32>
    %63 = vector.shape_cast %62 : vector<1x256x1xf32> to vector<256x1xf32>
    %64 = vector.broadcast %63 : vector<256x1xf32> to vector<256x8xf32>
    %65 = arith.mulf %61, %64 : vector<256x8xf32>
    %66 = arith.truncf %65 : vector<256x8xf32> to vector<256x8xbf16>
    %c5_38 = arith.constant 5 : index
    %c0_39 = arith.constant 0 : index
    %c0_40 = arith.constant 0 : index
    %67 = vector.load %arg5[%c5_38, %c0_39, %c0_40] : memref<9x8x8xbf16, #tpu.memory_space<vmem>>, vector<1x8x8xbf16>
    %68 = vector.shape_cast %67 : vector<1x8x8xbf16> to vector<8x8xbf16>
    %cst_41 = arith.constant dense<0.000000e+00> : vector<256x8xf32>
    %69 = tpu.matmul %66, %68, %cst_41 {dimension_numbers = #tpu.dot_dimension_numbers<[1], [0], [0], [1], [0, 0, 1, 1], [], []>} : vector<256x8xbf16>, vector<8x8xbf16>, vector<256x8xf32> -> vector<256x8xf32>
    %70 = arith.addf %60, %69 : vector<256x8xf32>
    %c241_i32 = arith.constant 241 : i32
    %71 = tpu.dynamic_rotate %14 by %c241_i32 dim 0 : vector<256x8xf32>, i32 -> vector<256x8xf32>
    %c6 = arith.constant 6 : index
    %c0_42 = arith.constant 0 : index
    %c0_43 = arith.constant 0 : index
    %72 = vector.load %arg7[%c6, %c0_42, %c0_43] : memref<9x256x1xf32, #tpu.memory_space<vmem>>, vector<1x256x1xf32>
    %73 = vector.shape_cast %72 : vector<1x256x1xf32> to vector<256x1xf32>
    %74 = vector.broadcast %73 : vector<256x1xf32> to vector<256x8xf32>
    %75 = arith.mulf %71, %74 : vector<256x8xf32>
    %76 = arith.truncf %75 : vector<256x8xf32> to vector<256x8xbf16>
    %c6_44 = arith.constant 6 : index
    %c0_45 = arith.constant 0 : index
    %c0_46 = arith.constant 0 : index
    %77 = vector.load %arg5[%c6_44, %c0_45, %c0_46] : memref<9x8x8xbf16, #tpu.memory_space<vmem>>, vector<1x8x8xbf16>
    %78 = vector.shape_cast %77 : vector<1x8x8xbf16> to vector<8x8xbf16>
    %cst_47 = arith.constant dense<0.000000e+00> : vector<256x8xf32>
    %79 = tpu.matmul %76, %78, %cst_47 {dimension_numbers = #tpu.dot_dimension_numbers<[1], [0], [0], [1], [0, 0, 1, 1], [], []>} : vector<256x8xbf16>, vector<8x8xbf16>, vector<256x8xf32> -> vector<256x8xf32>
    %80 = arith.addf %70, %79 : vector<256x8xf32>
    %c240_i32 = arith.constant 240 : i32
    %81 = tpu.dynamic_rotate %14 by %c240_i32 dim 0 : vector<256x8xf32>, i32 -> vector<256x8xf32>
    %c7 = arith.constant 7 : index
    %c0_48 = arith.constant 0 : index
    %c0_49 = arith.constant 0 : index
    %82 = vector.load %arg7[%c7, %c0_48, %c0_49] : memref<9x256x1xf32, #tpu.memory_space<vmem>>, vector<1x256x1xf32>
    %83 = vector.shape_cast %82 : vector<1x256x1xf32> to vector<256x1xf32>
    %84 = vector.broadcast %83 : vector<256x1xf32> to vector<256x8xf32>
    %85 = arith.mulf %81, %84 : vector<256x8xf32>
    %86 = arith.truncf %85 : vector<256x8xf32> to vector<256x8xbf16>
    %c7_50 = arith.constant 7 : index
    %c0_51 = arith.constant 0 : index
    %c0_52 = arith.constant 0 : index
    %87 = vector.load %arg5[%c7_50, %c0_51, %c0_52] : memref<9x8x8xbf16, #tpu.memory_space<vmem>>, vector<1x8x8xbf16>
    %88 = vector.shape_cast %87 : vector<1x8x8xbf16> to vector<8x8xbf16>
    %cst_53 = arith.constant dense<0.000000e+00> : vector<256x8xf32>
    %89 = tpu.matmul %86, %88, %cst_53 {dimension_numbers = #tpu.dot_dimension_numbers<[1], [0], [0], [1], [0, 0, 1, 1], [], []>} : vector<256x8xbf16>, vector<8x8xbf16>, vector<256x8xf32> -> vector<256x8xf32>
    %90 = arith.addf %80, %89 : vector<256x8xf32>
    %c239_i32 = arith.constant 239 : i32
    %91 = tpu.dynamic_rotate %14 by %c239_i32 dim 0 : vector<256x8xf32>, i32 -> vector<256x8xf32>
    %c8 = arith.constant 8 : index
    %c0_54 = arith.constant 0 : index
    %c0_55 = arith.constant 0 : index
    %92 = vector.load %arg7[%c8, %c0_54, %c0_55] : memref<9x256x1xf32, #tpu.memory_space<vmem>>, vector<1x256x1xf32>
    %93 = vector.shape_cast %92 : vector<1x256x1xf32> to vector<256x1xf32>
    %94 = vector.broadcast %93 : vector<256x1xf32> to vector<256x8xf32>
    %95 = arith.mulf %91, %94 : vector<256x8xf32>
    %96 = arith.truncf %95 : vector<256x8xf32> to vector<256x8xbf16>
    %c8_56 = arith.constant 8 : index
    %c0_57 = arith.constant 0 : index
    %c0_58 = arith.constant 0 : index
    %97 = vector.load %arg5[%c8_56, %c0_57, %c0_58] : memref<9x8x8xbf16, #tpu.memory_space<vmem>>, vector<1x8x8xbf16>
    %98 = vector.shape_cast %97 : vector<1x8x8xbf16> to vector<8x8xbf16>
    %cst_59 = arith.constant dense<0.000000e+00> : vector<256x8xf32>
    %99 = tpu.matmul %96, %98, %cst_59 {dimension_numbers = #tpu.dot_dimension_numbers<[1], [0], [0], [1], [0, 0, 1, 1], [], []>} : vector<256x8xbf16>, vector<8x8xbf16>, vector<256x8xf32> -> vector<256x8xf32>
    %100 = arith.addf %90, %99 : vector<256x8xf32>
    %c0_60 = arith.constant 0 : index
    %c0_61 = arith.constant 0 : index
    %101 = vector.load %arg6[%c0_60, %c0_61] : memref<1x8xf32, #tpu.memory_space<vmem>>, vector<1x8xf32>
    %102 = vector.broadcast %101 : vector<1x8xf32> to vector<256x8xf32>
    %103 = arith.addf %100, %102 : vector<256x8xf32>
    %104 = arith.truncf %103 : vector<256x8xf32> to vector<256x8xbf16>
    %c0_62 = arith.constant 0 : index
    %c0_63 = arith.constant 0 : index
    %c0_64 = arith.constant 0 : index
    %105 = vector.load %arg8[%c0_62, %c0_63, %c0_64] : memref<1x256x8xbf16, #tpu.memory_space<vmem>>, vector<1x256x8xbf16>
    %106 = vector.shape_cast %105 : vector<1x256x8xbf16> to vector<256x8xbf16>
    %107 = vector.shape_cast %104 : vector<256x8xbf16> to vector<1x256x8xbf16>
    tpu.vector_store %arg8[%c0_62, %c0_63, %c0_64], %107 {strides = array<i32>} : memref<1x256x8xbf16, #tpu.memory_space<vmem>>, vector<1x256x8xbf16>,
    %cst_65 = arith.constant dense<0.000000e+00> : vector<8xf32>
    %108 = vector.multi_reduction <add>, %103, %cst_65 [0] : vector<256x8xf32> to vector<8xf32>
    %109 = vector.shape_cast %108 : vector<8xf32> to vector<1x8xf32>
    %c0_66 = arith.constant 0 : index
    %c0_67 = arith.constant 0 : index
    %c0_68 = arith.constant 0 : index
    %110 = vector.load %arg9[%c0_66, %c0_67, %c0_68] : memref<1x1x8xf32, #tpu.memory_space<vmem>>, vector<1x1x8xf32>
    %111 = vector.shape_cast %110 : vector<1x1x8xf32> to vector<1x8xf32>
    %112 = vector.shape_cast %109 : vector<1x8xf32> to vector<1x1x8xf32>
    tpu.vector_store %arg9[%c0_66, %c0_67, %c0_68], %112 {strides = array<i32>} : memref<1x1x8xf32, #tpu.memory_space<vmem>>, vector<1x1x8xf32>,
    %113 = arith.mulf %103, %103 : vector<256x8xf32>
    %cst_69 = arith.constant dense<0.000000e+00> : vector<8xf32>
    %114 = vector.multi_reduction <add>, %113, %cst_69 [0] : vector<256x8xf32> to vector<8xf32>
    %115 = vector.shape_cast %114 : vector<8xf32> to vector<1x8xf32>
    %c0_70 = arith.constant 0 : index
    %c0_71 = arith.constant 0 : index
    %c0_72 = arith.constant 0 : index
    %116 = vector.load %arg10[%c0_70, %c0_71, %c0_72] : memref<1x1x8xf32, #tpu.memory_space<vmem>>, vector<1x1x8xf32>
    %117 = vector.shape_cast %116 : vector<1x1x8xf32> to vector<1x8xf32>
    %118 = vector.shape_cast %115 : vector<1x8xf32> to vector<1x1x8xf32>
    tpu.vector_store %arg10[%c0_70, %c0_71, %c0_72], %118 {strides = array<i32>} : memref<1x1x8xf32, #tpu.memory_space<vmem>>, vector<1x1x8xf32>,
    return
  }
  func.func @transform_0(%arg0: i32) -> (i32, i32, i32) {
    %c0_i32 = arith.constant 0 : i32
    %c0_i32_0 = arith.constant 0 : i32
    %c0_i32_1 = arith.constant 0 : i32
    return %arg0, %c0_i32, %c0_i32_0 : i32, i32, i32
  }
  func.func @transform_1(%arg0: i32) -> (i32, i32) {
    %c0_i32 = arith.constant 0 : i32
    %c0_i32_0 = arith.constant 0 : i32
    %c0_i32_1 = arith.constant 0 : i32
    return %c0_i32, %c0_i32_0 : i32, i32
  }
  func.func @transform_2(%arg0: i32) -> (i32, i32) {
    %c0_i32 = arith.constant 0 : i32
    %c0_i32_0 = arith.constant 0 : i32
    %c0_i32_1 = arith.constant 0 : i32
    return %c0_i32, %c0_i32_0 : i32, i32
  }
  func.func @transform_3(%arg0: i32) -> i32 {
    %c0_i32 = arith.constant 0 : i32
    %c0_i32_0 = arith.constant 0 : i32
    return %c0_i32 : i32
  }
  func.func @transform_4(%arg0: i32) -> (i32, i32, i32) {
    %c0_i32 = arith.constant 0 : i32
    %c0_i32_0 = arith.constant 0 : i32
    %c0_i32_1 = arith.constant 0 : i32
    %c0_i32_2 = arith.constant 0 : i32
    return %c0_i32, %c0_i32_0, %c0_i32_1 : i32, i32, i32
  }
  func.func @transform_5(%arg0: i32) -> (i32, i32) {
    %c0_i32 = arith.constant 0 : i32
    %c0_i32_0 = arith.constant 0 : i32
    %c0_i32_1 = arith.constant 0 : i32
    return %c0_i32, %c0_i32_0 : i32, i32
  }
  func.func @transform_6(%arg0: i32) -> (i32, i32, i32) {
    %c0_i32 = arith.constant 0 : i32
    %c0_i32_0 = arith.constant 0 : i32
    %c0_i32_1 = arith.constant 0 : i32
    %c0_i32_2 = arith.constant 0 : i32
    return %c0_i32, %c0_i32_0, %c0_i32_1 : i32, i32, i32
  }
  func.func @transform_7(%arg0: i32) -> (i32, i32, i32) {
    %c0_i32 = arith.constant 0 : i32
    %c0_i32_0 = arith.constant 0 : i32
    %c0_i32_1 = arith.constant 0 : i32
    return %arg0, %c0_i32, %c0_i32_0 : i32, i32, i32
  }
  func.func @transform_8(%arg0: i32) -> (i32, i32, i32) {
    %c0_i32 = arith.constant 0 : i32
    %c0_i32_0 = arith.constant 0 : i32
    %c0_i32_1 = arith.constant 0 : i32
    return %arg0, %c0_i32, %c0_i32_0 : i32, i32, i32
  }
  func.func @transform_9(%arg0: i32) -> (i32, i32, i32) {
    %c0_i32 = arith.constant 0 : i32
    %c0_i32_0 = arith.constant 0 : i32
    %c0_i32_1 = arith.constant 0 : i32
    return %arg0, %c0_i32, %c0_i32_0 : i32, i32, i32
  }
}

module attributes {stable_mosaic.version = 11 : i64} {
  func.func @_bn_residual_kernel(%arg0: i32, %arg1: memref<32x128xbf16, #tpu.memory_space<vmem>>, %arg2: memref<32x128xf32, #tpu.memory_space<vmem>>, %arg3: memref<1x128xf32, #tpu.memory_space<vmem>>, %arg4: memref<1x128xf32, #tpu.memory_space<vmem>>, %arg5: memref<32x128xf32, #tpu.memory_space<vmem>>) attributes {dimension_semantics = [#tpu.dimension_semantics<parallel>], iteration_bounds = array<i64: 1>, scalar_prefetch = 0 : i64, scratch_operands = 0 : i64, tpu.core_type = #tpu.core_type<tc>, window_params = [{transform_indices = @transform_0, window_bounds = array<i64: 32, 128>}, {transform_indices = @transform_1, window_bounds = array<i64: 32, 128>}, {pipeline_mode = #tpu.pipeline_mode<synchronous>, transform_indices = @transform_2, window_bounds = array<i64: 1, 128>}, {pipeline_mode = #tpu.pipeline_mode<synchronous>, transform_indices = @transform_3, window_bounds = array<i64: 1, 128>}, {transform_indices = @transform_4, window_bounds = array<i64: 32, 128>}]} {
    %c0 = arith.constant 0 : index
    %c0_0 = arith.constant 0 : index
    %0 = vector.load %arg1[%c0, %c0_0] : memref<32x128xbf16, #tpu.memory_space<vmem>>, vector<32x128xbf16>
    %1 = arith.extf %0 : vector<32x128xbf16> to vector<32x128xf32>
    %c0_1 = arith.constant 0 : index
    %c0_2 = arith.constant 0 : index
    %2 = vector.load %arg3[%c0_1, %c0_2] : memref<1x128xf32, #tpu.memory_space<vmem>>, vector<1x128xf32>
    %3 = vector.broadcast %2 : vector<1x128xf32> to vector<32x128xf32>
    %4 = arith.mulf %1, %3 : vector<32x128xf32>
    %c0_3 = arith.constant 0 : index
    %c0_4 = arith.constant 0 : index
    %5 = vector.load %arg4[%c0_3, %c0_4] : memref<1x128xf32, #tpu.memory_space<vmem>>, vector<1x128xf32>
    %6 = vector.broadcast %5 : vector<1x128xf32> to vector<32x128xf32>
    %7 = arith.addf %4, %6 : vector<32x128xf32>
    %c0_5 = arith.constant 0 : index
    %c0_6 = arith.constant 0 : index
    %8 = vector.load %arg2[%c0_5, %c0_6] : memref<32x128xf32, #tpu.memory_space<vmem>>, vector<32x128xf32>
    %9 = arith.addf %7, %8 : vector<32x128xf32>
    %c0_7 = arith.constant 0 : index
    %c0_8 = arith.constant 0 : index
    %10 = vector.load %arg5[%c0_7, %c0_8] : memref<32x128xf32, #tpu.memory_space<vmem>>, vector<32x128xf32>
    tpu.vector_store %arg5[%c0_7, %c0_8], %9 {strides = array<i32>} : memref<32x128xf32, #tpu.memory_space<vmem>>, vector<32x128xf32>,
    return
  }
  func.func @transform_0(%arg0: i32) -> (i32, i32) {
    %c0_i32 = arith.constant 0 : i32
    %c0_i32_0 = arith.constant 0 : i32
    return %arg0, %c0_i32 : i32, i32
  }
  func.func @transform_1(%arg0: i32) -> (i32, i32) {
    %c0_i32 = arith.constant 0 : i32
    %c0_i32_0 = arith.constant 0 : i32
    return %arg0, %c0_i32 : i32, i32
  }
  func.func @transform_2(%arg0: i32) -> (i32, i32) {
    %c0_i32 = arith.constant 0 : i32
    %c0_i32_0 = arith.constant 0 : i32
    %c0_i32_1 = arith.constant 0 : i32
    return %c0_i32, %c0_i32_0 : i32, i32
  }
  func.func @transform_3(%arg0: i32) -> (i32, i32) {
    %c0_i32 = arith.constant 0 : i32
    %c0_i32_0 = arith.constant 0 : i32
    %c0_i32_1 = arith.constant 0 : i32
    return %c0_i32, %c0_i32_0 : i32, i32
  }
  func.func @transform_4(%arg0: i32) -> (i32, i32) {
    %c0_i32 = arith.constant 0 : i32
    %c0_i32_0 = arith.constant 0 : i32
    return %arg0, %c0_i32 : i32, i32
  }
}

</mosaic_0001>

<bundles_post_ra>
// kernel: residual_block.5
= control target key start
LH: loop header
LB: loop body
LE: loop exit
PB: predicated region body
PF: predicated region fallthrough
CT: control target
= control target key end

     0   :  { %s135_s0 = inlined_call_operand.vmem [shape: bf16[32,128], index: 0, kind: input, shape index: {}]   ;;  %s136_s2 = inlined_call_operand.vmem [shape: f32[1,128], index: 2, kind: input, shape index: {}]   ;;  %s137_s3 = inlined_call_operand.vmem [shape: f32[1,128], index: 3, kind: input, shape index: {}]   ;;  %s138_s1 = inlined_call_operand.vmem [shape: f32[32,128], index: 1, kind: input, shape index: {}]   ;;  %s139_s4 = inlined_call_operand.vmem [shape: f32[32,128], index: 4, kind: output, shape index: {}]  }
   0x1   :  { %v66_v0 = vld [vmem:[%s135_s0] sm:$0xff]   ;;  %v73_v4 = vld [vmem:[%s135_s0 + $0x8] sm:$0xff]   ;;  %v49_v16 = vld [vmem:[%s138_s1 + $0x10] sm:$0xff] }
   0x2   :  { %v63_v1 = vld [vmem:[%s136_s2] ss:$0 sm:$0xff]  ;;  %v67_v2 = vunpack.c.l.bf16 %v66_v0  ;;  %v68_v3 = vunpack.c.h.bf16 %v66_v0  ;;  %v71_v6 = vunpack.c.l.bf16 %v73_v4  ;;  %v72_v7 = vunpack.c.h.bf16 %v73_v4  ;;  %v48_v11 = vld [vmem:[%s138_s1 + $0x8] sm:$0xff]  ;;  %v50_v17 = vld [vmem:[%s138_s1 + $0x18] sm:$0xff] }
   0x3   :  { %v64_v5 = vld [vmem:[%s137_s3] ss:$0 sm:$0xff] }
   0x4   :  { %v32_v8 = vmul.f32 %v67_v2, %v63_v1  ;;  %v33_v9 = vmul.f32 %v68_v3, %v63_v1  ;;  %v47_v10 = vld [vmem:[%s138_s1] sm:$0xff]  ;;  %v34_v12 = vmul.f32 %v71_v6, %v63_v1  ;;  %v35_v13 = vmul.f32 %v72_v7, %v63_v1 }
   0x6   :  { %v43_v14 = vadd.f32 %v64_v5, %v32_v8  ;;  %v44_v15 = vadd.f32 %v64_v5, %v33_v9  ;;  %v45_v18 = vadd.f32 %v64_v5, %v34_v12  ;;  %v46_v19 = vadd.f32 %v64_v5, %v35_v13 }
   0x8   :  { %v51_v20 = vadd.f32 %v47_v10, %v43_v14  ;;  %v52_v21 = vadd.f32 %v48_v11, %v44_v15  ;;  %v53_v22 = vadd.f32 %v49_v16, %v45_v18  ;;  %v54_v23 = vadd.f32 %v50_v17, %v46_v19 }
   0xa   :  { %55 = vst [vmem:[%s139_s4] sm:$0xff] %v51_v20  ;;  %56 = vst [vmem:[%s139_s4 + $0x8] sm:$0xff] %v52_v21 }
   0xb   :  { %57 = vst [vmem:[%s139_s4 + $0x10] sm:$0xff] %v53_v22  ;;  %58 = vst [vmem:[%s139_s4 + $0x18] sm:$0xff] %v54_v23 }

// kernel: residual_block.3
= control target key start
LH: loop header
LB: loop body
LE: loop exit
PB: predicated region body
PF: predicated region fallthrough
CT: control target
= control target key end

     0   :  { %s8088_s0 = inlined_call_operand.vmem [shape: f32[2,256,8], index: 0, kind: input, shape index: {}]   ;;  %s8089_s1 = inlined_call_operand.vmem [shape: f32[1,8], index: 1, kind: input, shape index: {}]   ;;  %s8090_s2 = inlined_call_operand.vmem [shape: f32[1,8], index: 2, kind: input, shape index: {}]   ;;  %s8091_s3 = inlined_call_operand.<no memory space> [shape: f32[1], index: 3, kind: input, shape index: {}]   ;;  %s8092_s4 = inlined_call_operand.vmem [shape: bf16[9,8,8], index: 4, kind: input, shape index: {}]   ;;  %s8093_s5 = inlined_call_operand.hbm [shape: f32[1,8], index: 5, kind: input, shape index: {}]   ;;  %s8094_s6 = inlined_call_operand.hbm [shape: f32[9,256,1], index: 6, kind: input, shape index: {}]   ;;  %s8095_s7 = inlined_call_operand.vmem [shape: bf16[2,256,8], index: 7, kind: output, shape index: {0}]   ;;  %s8096_s8 = inlined_call_operand.vmem [shape: f32[2,1,8], index: 8, kind: output, shape index: {1}]   ;;  %s8097_s9 = inlined_call_operand.vmem [shape: f32[2,1,8], index: 9, kind: output, shape index: {2}]  }
   0x1   :  { %15 = sst [smem:[#allocation2]] %s8091_s3 }
   0x2   :  { %16 = vsyncpa [#allocation4], 0 }
   0x3   :  { %17 = vsyncpa [#allocation6], 0  ;;  %s6442_s11 = smov 0  }
   0x4 LB: > { %s6448_s12 = sadd.s32 4294967295, %s6382_s11   ;;  %p5316_p0 = scmp.ge.s32.totalorder %s6382_s11, 1  ;;  %s6382_s11 = sphi %s6442_s11, %s23_s11  }
   0x5   : > { %p258_p1 = scmp.lt.s32.totalorder %s6382_s11, 3  ;;  %p8098_p2 = scmp.eq.s32.totalorder %s6448_s12, 0 }
   0x6   : > { %s6384_s3 = smov [#allocation3]   ;;  %s6385_s15 = smov [#allocation5]  }
   0x7   : > { %s283_s13 = sshll.u32 %s6384_s3, 4  ;;  %p6453_p3 = pnand %p5316_p0, %p258_p1  ;;  %s284_s13 = int_to_ptr.vmem [resolvable:$true] %s283_s13 }
   0x8   : > { %s293_s16 = sshll.u32 %s6385_s15, 4  ;;  %s6312_s20 = scalar_lea.hbm %s8093_s5, 16  ;;  %s6465_s16 = int_to_ptr.vmem [resolvable:$true] %s293_s16 }
   0x9   : > { %s8237_s14 = scalar_select %p6453_p3, 1, 0 }
   0xa   : > { %p6285_p4 = pneg %p6453_p3  ;;  %p6313_p6 = scmp.ne.s32.totalorder %s8093_s5, %s6312_s20 }
   0xb   : > { %p6319_p10 = scmp.lt.u32.totalorder %s6312_s20, %s8093_s5 }
   0xc   : > { %p6461_p5 = pnand %p8098_p2, %p6285_p4 }
   0xe   : > { %p6314_p7 = pneg %p6461_p5 }
  0x10   : > { %p6315_p8 = pnand %p6314_p7, %p6313_p6 }
  0x12   : > { %p6316_p9 = pneg %p6315_p8 }
  0x14   : > { %p6321_p11 = pnand %p6319_p10, %p6316_p9 }
  0x16   : > { %6324 = shalt.err (!%p6321_p11)
}
  0x17   : > { %s6325_s25 = scalar_lea.vmem %s284_s13, 16  ;;  %s6332_s26 = scalar_lea.vmem %s284_s13, 32 }
  0x18   : > { %p6326_p12 = scmp.ne.s32.totalorder %s284_s13, %s6325_s25  ;;  %p6333_p1 = scmp.lt.s32.totalorder %s284_s13, %s284_s13 }
  0x19   : > { %p6334_p4 = scmp.lt.s32.totalorder %s6332_s26, %s6325_s25 }
  0x1a   : > { %p6328_p13 = pnand %p6326_p12, %p6314_p7 }
  0x1b   : > { %p6335_p2 = por %p6334_p4, %p6333_p1 }
  0x1c   : > { %p6329_p0 = pneg %p6328_p13 }
  0x1e   : > { %p6336_p3 = pnand %p6335_p2, %p6329_p0 }
  0x20   : > { %6339 = shalt.err (!%p6336_p3)
}
  0x21   : > { %6288 = dma.hbm_to_vmem [thread:$0]  (!%p6461_p5), %s8093_s5, 16, %s284_s13, [#allocation4]  }
  0x22   : > { %s6340_s10 = scalar_lea.hbm %s8094_s6, 36864 }
  0x23   : > { %p6341_p6 = scmp.ne.s32.totalorder %s8094_s6, %s6340_s10  ;;  %p6347_p3 = scmp.lt.u32.totalorder %s6340_s10, %s8094_s6 }
  0x25   : > { %p6343_p8 = pnand %p6341_p6, %p6314_p7 }
  0x27   : > { %p6344_p2 = pneg %p6343_p8 }
  0x29   : > { %p6349_p9 = pnand %p6347_p3, %p6344_p2 }
  0x2b   : > { %6352 = shalt.err (!%p6349_p9)
}
  0x2c   : > { %s6353_s13 = scalar_lea.vmem %s6465_s16, 36864  ;;  %p6361_p13 = scmp.lt.s32.totalorder %s6465_s16, %s6465_s16 }
  0x2d   : > { %p6354_p10 = scmp.ne.s32.totalorder %s6465_s16, %s6353_s13  ;;  %p6362_p0 = scmp.lt.s32.totalorder %s6353_s13, %s6353_s13 }
  0x2f   : > { %p6356_p11 = pnand %p6354_p10, %p6314_p7  ;;  %p6363_p1 = por %p6362_p0, %p6361_p13 }
  0x31   : > { %p6357_p12 = pneg %p6356_p11 }
  0x33   : > { %p6364_p4 = pnand %p6363_p1, %p6357_p12 }
  0x35   : > { %6367 = shalt.err (!%p6364_p4)
}
  0x36   : > { %s6386_s20 = smov 128   ;;  %s6387_s21 = smov 8  }
  0x37   : > { %6291 = dma.hbm_to_vmem [thread:$0]  (!%p6461_p5), %s8094_s6, 36864, %s6465_s16, [#allocation6], %s6386_s20, %s6386_s20, %s6387_s21  }
  0x38   : > { %p8239_p6 = scmp.ne.s32.totalorder %s8237_s14, 0 }
  0x3a   : > { %317 = sbr.rel (%p8239_p6) target bundleno = 957 (0x3bd), region = 48 }
  0x41   : > { %p8240_p7 = scmp.eq.s32.totalorder %s6448_s12, 0 }
  0x43   : > { %6373 = dma.done.wait (%p8240_p7), [#allocation4], 16   ;;  %p8241_p8 = pmov %p8240_p7 }
  0x44   : > { %p8242_p2 = pmov %p8240_p7 }
  0x45   : > { %6375 = vsyncadd (%p8241_p8), [#allocation4], 4294967280 }
  0x46   : > { %6377 = dma.done.wait (%p8242_p2), [#allocation6], 36864   ;;  %p8243_p3 = pmov %p8242_p2 }
  0x47   : > { %v6388_v0 = vmov 0   ;;  %v657_v1 = vld [vmem:[#allocation5 + $0x10] sm:$0xff]  ;;  %v655_v2 = vld [vmem:[#allocation5] sm:$0xff]  ;;  %v658_v3 = vld [vmem:[#allocation5 + $0x18] sm:$0xff]  ;;  %vm1188_vm0 = vcmask 1043456   ;;  %p363_p5 = scmp.lt.s32.totalorder %s6448_s12, 1 }
  0x48   : > { %6379 = vsyncadd (%p8243_p3), [#allocation6], 4294930432  ;;  %6310 = vset.pattern.permute.xlu1 %v6388_v0  ;;  %6309 = vset.pattern.permute.xlu0 %v6388_v0  ;;  %v656_v4 = vld [vmem:[#allocation5 + $0x8] sm:$0xff]  ;;  %v659_v6 = vld [vmem:[#allocation5 + $0x20] sm:$0xff]  ;;  %s380_s29 = sld [smem:[#allocation2]]  ;;  %vm1139_vm8 = vcmask 64512  }
  0x49   : > { %699 = vperm.xlu1 %6310, %v657_v1   ;;  %689 = vperm.xlu0 %6309, %v655_v2   ;;  %v660_v5 = vld [vmem:[#allocation5 + $0x28] sm:$0xff]  ;;  %v662_v7 = vld [vmem:[#allocation5 + $0x38] sm:$0xff]  ;;  %v661_v8 = vld [vmem:[#allocation5 + $0x30] sm:$0xff]  ;;  %s8497_s12 = smov (!%p363_p5, %s6448_s12), 1 }
  0x4a   : > { %v664_v9 = vld [vmem:[#allocation5 + $0x48] sm:$0xff]  ;;  %v663_v10 = vld [vmem:[#allocation5 + $0x40] sm:$0xff]  ;;  %v666_v11 = vld [vmem:[#allocation5 + $0x58] sm:$0xff]  ;;  %s5516_s25 = sshll.u32 %s8497_s12, 8  ;;  %s5517_s30 = sshll.u32 %s8497_s12, 7 }
  0x4b   : > { %v665_v12 = vld [vmem:[#allocation5 + $0x50] sm:$0xff]  ;;  %v668_v13 = vld [vmem:[#allocation5 + $0x68] sm:$0xff]  ;;  %v667_v14 = vld [vmem:[#allocation5 + $0x60] sm:$0xff]  ;;  %s6584_s28 = scalar_lea.vmem %s8088_s0, %s5516_s25  ;;  %s7903_s15 = scalar_lea.vmem %s8095_s7, %s5517_s30 }
  0x4c   : > { %v670_v15 = vld [vmem:[#allocation5 + $0x78] sm:$0xff]  ;;  %v669_v16 = vld [vmem:[#allocation5 + $0x70] sm:$0xff]  ;;  %v672_v17 = vld [vmem:[#allocation5 + $0x88] sm:$0xff]  ;;  %s375_s13 = scalar_lea.vmem %s8096_s8, %s8497_s12  ;;  %s378_s22 = scalar_lea.vmem %s8097_s9, %s8497_s12 }
  0x4d   : > { %704 = vperm.xlu1 %6310, %v658_v3   ;;  %694 = vperm.xlu0 %6309, %v656_v4   ;;  %v671_v18 = vld [vmem:[#allocation5 + $0x80] sm:$0xff]  ;;  %v674_v19 = vld [vmem:[#allocation5 + $0x98] sm:$0xff]  ;;  %v673_v20 = vld [vmem:[#allocation5 + $0x90] sm:$0xff] }
  0x4e   : > { %v676_v21 = vld [vmem:[#allocation5 + $0xa8] sm:$0xff]  ;;  %v675_v22 = vld [vmem:[#allocation5 + $0xa0] sm:$0xff]  ;;  %v678_v23 = vld [vmem:[#allocation5 + $0xb8] sm:$0xff] }
  0x4f   : > { %v677_v24 = vld [vmem:[#allocation5 + $0xb0] sm:$0xff]  ;;  %v680_v25 = vld [vmem:[#allocation5 + $0xc8] sm:$0xff]  ;;  %v679_v26 = vld [vmem:[#allocation5 + $0xc0] sm:$0xff] }
  0x50   : > { %v682_v27 = vld [vmem:[#allocation5 + $0xd8] sm:$0xff]  ;;  %v681_v28 = vld [vmem:[#allocation5 + $0xd0] sm:$0xff]  ;;  %v684_v29 = vld [vmem:[#allocation5 + $0xe8] sm:$0xff] }
  0x51   : > { %714 = vperm.xlu1 %6310, %v660_v5   ;;  %709 = vperm.xlu0 %6309, %v659_v6   ;;  %v683_v30 = vld [vmem:[#allocation5 + $0xe0] sm:$0xff]  ;;  %v686_v31 = vld [vmem:[#allocation5 + $0xf8] sm:$0xff]  ;;  %v685_v32 = vld [vmem:[#allocation5 + $0xf0] sm:$0xff] }
  0x52   : > { %v898_v33 = vld [vmem:[#allocation5 + $0x108] sm:$0xff]  ;;  %v897_v34 = vld [vmem:[#allocation5 + $0x100] sm:$0xff]  ;;  %v900_v35 = vld [vmem:[#allocation5 + $0x118] sm:$0xff] }
  0x53   : > { %v899_v36 = vld [vmem:[#allocation5 + $0x110] sm:$0xff]  ;;  %v5329_v37 = vld [vmem:[%s8092_s4 + $0x4] sm:$0xf]  ;;  %v902_v38 = vld [vmem:[#allocation5 + $0x128] sm:$0xff] }
  0x54   : > { %v901_v39 = vld [vmem:[#allocation5 + $0x120] sm:$0xff]  ;;  %6267 = vmatprep.subr.msk.bf16.mxu1 %vm1188_vm0, %v5329_v37  ;;  %v904_v40 = vld [vmem:[#allocation5 + $0x138] sm:$0xff]  ;;  %v903_v41 = vld [vmem:[#allocation5 + $0x130] sm:$0xff]  ;;  %v1190_v42 = vsel %vm1188_vm0, %v5329_v37, 0 }
  0x55   : > { %724 = vperm.xlu1 %6310, %v662_v7   ;;  %719 = vperm.xlu0 %6309, %v661_v8   ;;  %v906_v43 = vld [vmem:[#allocation5 + $0x148] sm:$0xff]  ;;  %v905_v44 = vld [vmem:[#allocation5 + $0x140] sm:$0xff]  ;;  %v908_v45 = vld [vmem:[#allocation5 + $0x158] sm:$0xff] }
  0x56   : > { %5704 = vmatpush3.bf16.msra.mxu1 %v1190_v42  ;;  %v907_v46 = vld [vmem:[#allocation5 + $0x150] sm:$0xff]  ;;  %v910_v47 = vld [vmem:[#allocation5 + $0x168] sm:$0xff]  ;;  %v909_v48 = vld [vmem:[#allocation5 + $0x160] sm:$0xff] }
  0x57   : > { %v912_v49 = vld [vmem:[#allocation5 + $0x178] sm:$0xff]  ;;  %v911_v50 = vld [vmem:[#allocation5 + $0x170] sm:$0xff]  ;;  %v914_v51 = vld [vmem:[#allocation5 + $0x188] sm:$0xff] }
  0x58   : > { %v913_v52 = vld [vmem:[#allocation5 + $0x180] sm:$0xff]  ;;  %v916_v53 = vld [vmem:[#allocation5 + $0x198] sm:$0xff]  ;;  %v915_v54 = vld [vmem:[#allocation5 + $0x190] sm:$0xff] }
  0x59   : > { %734 = vperm.xlu1 %6310, %v664_v9   ;;  %729 = vperm.xlu0 %6309, %v663_v10   ;;  %v918_v55 = vld [vmem:[#allocation5 + $0x1a8] sm:$0xff]  ;;  %v917_v56 = vld [vmem:[#allocation5 + $0x1a0] sm:$0xff]  ;;  %v920_v57 = vld [vmem:[#allocation5 + $0x1b8] sm:$0xff] }
  0x5a   : > { %v919_v58 = vld [vmem:[#allocation5 + $0x1b0] sm:$0xff]  ;;  %v922_v59 = vld [vmem:[#allocation5 + $0x1c8] sm:$0xff]  ;;  %v921_v60 = vld [vmem:[#allocation5 + $0x1c0] sm:$0xff] }
  0x5b   : > { %v924_v61 = vld [vmem:[#allocation5 + $0x1d8] sm:$0xff]  ;;  %v923_v62 = vld [vmem:[#allocation5 + $0x1d0] sm:$0xff]  ;;  %v926_v63 = vld [vmem:[#allocation5 + $0x1e8] sm:$0xff] }
  0x5c   : > { %v925_v0 = vld [vmem:[#allocation5 + $0x1e0] sm:$0xff]  ;;  %v928_v1 = vld [vmem:[#allocation5 + $0x1f8] sm:$0xff]  ;;  %v927_v2 = vld [vmem:[#allocation5 + $0x1f0] sm:$0xff] }
  0x5d   : > { %744 = vperm.xlu1 %6310, %v666_v11   ;;  %739 = vperm.xlu0 %6309, %v665_v12   ;;  %v1632_v3 = vld [vmem:[#allocation5 + $0x208] sm:$0xff]  ;;  %v1631_v4 = vld [vmem:[#allocation5 + $0x200] sm:$0xff]  ;;  %v1634_v7 = vld [vmem:[#allocation5 + $0x218] sm:$0xff] }
  0x5e   : > { %v1633_v8 = vld [vmem:[#allocation5 + $0x210] sm:$0xff]  ;;  %v6540_v11 = vld [vmem:[%s8092_s4] sm:$0xf]  ;;  %v1636_v12 = vld [vmem:[#allocation5 + $0x228] sm:$0xff] }
  0x5f   : > { %6268 = vmatprep.subr.msk.bf16.mxu1 %vm1188_vm0, %v6540_v11  ;;  %v1647_v37 = vld [vmem:[#allocation5 + $0x280] sm:$0xff] }
  0x61   : > { %754 = vperm.xlu1 %6310, %v668_v13   ;;  %749 = vperm.xlu0 %6309, %v667_v14   ;;  %v1635_v13 = vld [vmem:[#allocation5 + $0x220] sm:$0xff] }
  0x65   : > { %764 = vperm.xlu1 %6310, %v670_v15   ;;  %759 = vperm.xlu0 %6309, %v669_v16   ;;  %v1638_v16 = vld [vmem:[#allocation5 + $0x238] sm:$0xff] }
  0x69   : > { %774 = vperm.xlu1 %6310, %v672_v17   ;;  %769 = vperm.xlu0 %6309, %v671_v18   ;;  %v1637_v17 = vld [vmem:[#allocation5 + $0x230] sm:$0xff] }
  0x6d   : > { %784 = vperm.xlu1 %6310, %v674_v19   ;;  %779 = vperm.xlu0 %6309, %v673_v20   ;;  %v1640_v20 = vld [vmem:[#allocation5 + $0x248] sm:$0xff] }
  0x71   : > { %794 = vperm.xlu1 %6310, %v676_v21   ;;  %789 = vperm.xlu0 %6309, %v675_v22   ;;  %v1639_v21 = vld [vmem:[#allocation5 + $0x240] sm:$0xff] }
  0x75   : > { %804 = vperm.xlu1 %6310, %v678_v23   ;;  %799 = vperm.xlu0 %6309, %v677_v24   ;;  %v1642_v24 = vld [vmem:[#allocation5 + $0x258] sm:$0xff] }
  0x79   : > { %814 = vperm.xlu1 %6310, %v680_v25   ;;  %809 = vperm.xlu0 %6309, %v679_v26   ;;  %v1641_v25 = vld [vmem:[#allocation5 + $0x250] sm:$0xff] }
  0x7d   : > { %824 = vperm.xlu1 %6310, %v682_v27   ;;  %819 = vperm.xlu0 %6309, %v681_v28   ;;  %v1644_v28 = vld [vmem:[#allocation5 + $0x268] sm:$0xff] }
  0x81   : > { %834 = vperm.xlu1 %6310, %v684_v29   ;;  %829 = vperm.xlu0 %6309, %v683_v30   ;;  %v1643_v29 = vld [vmem:[#allocation5 + $0x260] sm:$0xff] }
  0x85   : > { %844 = vperm.xlu1 %6310, %v686_v31   ;;  %839 = vperm.xlu0 %6309, %v685_v32   ;;  %v1646_v32 = vld [vmem:[#allocation5 + $0x278] sm:$0xff] }
  0x89   : > { %936 = vperm.xlu1 %6310, %v898_v33   ;;  %931 = vperm.xlu0 %6309, %v897_v34   ;;  %v1645_v33 = vld [vmem:[#allocation5 + $0x270] sm:$0xff] }
  0x8d   : > { %946 = vperm.xlu1 %6310, %v900_v35   ;;  %941 = vperm.xlu0 %6309, %v899_v36   ;;  %v1648_v36 = vld [vmem:[#allocation5 + $0x288] sm:$0xff] }
  0x91   : > { %956 = vperm.xlu1 %6310, %v902_v38   ;;  %951 = vperm.xlu0 %6309, %v901_v39  }
  0x95   : > { %966 = vperm.xlu1 %6310, %v904_v40   ;;  %961 = vperm.xlu0 %6309, %v903_v41   ;;  %v1650_v40 = vld [vmem:[#allocation5 + $0x298] sm:$0xff]  ;;  %v1649_v41 = vld [vmem:[#allocation5 + $0x290] sm:$0xff] }
  0x99   : > { %976 = vperm.xlu1 %6310, %v906_v43   ;;  %971 = vperm.xlu0 %6309, %v905_v44   ;;  %v1652_v44 = vld [vmem:[#allocation5 + $0x2a8] sm:$0xff] }
  0x9d   : > { %986 = vperm.xlu1 %6310, %v908_v45   ;;  %981 = vperm.xlu0 %6309, %v907_v46   ;;  %v1651_v45 = vld [vmem:[#allocation5 + $0x2a0] sm:$0xff] }
  0xa1   : > { %996 = vperm.xlu1 %6310, %v910_v47   ;;  %991 = vperm.xlu0 %6309, %v909_v48   ;;  %v1654_v48 = vld [vmem:[#allocation5 + $0x2b8] sm:$0xff] }
  0xa5   : > { %1006 = vperm.xlu1 %6310, %v912_v49   ;;  %1001 = vperm.xlu0 %6309, %v911_v50   ;;  %v1653_v49 = vld [vmem:[#allocation5 + $0x2b0] sm:$0xff]  ;;  %v6593_v50 = vld [vmem:[%s8089_s1] ss:$0 sm:$0xff] }
  0xa9   : > { %1016 = vperm.xlu1 %6310, %v914_v51   ;;  %1011 = vperm.xlu0 %6309, %v913_v52   ;;  %v410_v51 = vld [vmem:[%s6584_s28 + $0xe8] sm:$0xff]  ;;  %v411_v52 = vld [vmem:[%s6584_s28 + $0xf0] sm:$0xff] }
  0xad   : > { %1026 = vperm.xlu1 %6310, %v916_v53   ;;  %1021 = vperm.xlu0 %6309, %v915_v54  }
  0xb1   : > { %1036 = vperm.xlu1 %6310, %v918_v55   ;;  %1031 = vperm.xlu0 %6309, %v917_v56   ;;  %v449_v55 = vmul.f32 %v6593_v50, %v410_v51  ;;  %v450_v56 = vmul.f32 %v6593_v50, %v411_v52  ;;  %v1661_v51 = vld [vmem:[#allocation5 + $0x2f0] sm:$0xff]  ;;  %v385_v52 = vld [vmem:[%s6584_s28 + $0x20] sm:$0xff] }
  0xb5   : > { %1046 = vperm.xlu1 %6310, %v920_v57   ;;  %1041 = vperm.xlu0 %6309, %v919_v58   ;;  %v1656_v57 = vld [vmem:[#allocation5 + $0x2c8] sm:$0xff]  ;;  %v1655_v58 = vld [vmem:[#allocation5 + $0x2c0] sm:$0xff] }
  0xb9   : > { %1056 = vperm.xlu1 %6310, %v922_v59   ;;  %1051 = vperm.xlu0 %6309, %v921_v60   ;;  %v6606_v59 = vld [vmem:[%s8090_s2] ss:$0 sm:$0xff] }
  0xbd   : > { %1066 = vperm.xlu1 %6310, %v924_v61   ;;  %1061 = vperm.xlu0 %6309, %v923_v62   ;;  %v412_v62 = vld [vmem:[%s6584_s28 + $0xf8] sm:$0xff] }
  0xc1   : > { %1076 = vperm.xlu1 %6310, %v926_v63   ;;  %1071 = vperm.xlu0 %6309, %v925_v0   ;;  %v488_v63 = vadd.f32 %v6606_v59, %v449_v55  ;;  %v489_v0 = vadd.f32 %v6606_v59, %v450_v56 }
  0xc3   : > { %vm520_vm1 = vcmp.ge.f32.partialorder %v488_v63, 0.0  ;;  %vm521_vm2 = vcmp.ge.f32.partialorder %v489_v0, 0.0 }
  0xc5   : > { %1086 = vperm.xlu1 %6310, %v928_v1   ;;  %1081 = vperm.xlu0 %6309, %v927_v2   ;;  %v1658_v1 = vld [vmem:[#allocation5 + $0x2d8] sm:$0xff]  ;;  %v1657_v2 = vld [vmem:[#allocation5 + $0x2d0] sm:$0xff] }
  0xc8   : > { %v6529_v5 = vpop.permute.xlu1 %699  ;;  %v6531_v6 = vpop.permute.xlu0 %689 }
  0xc9   : > { %1670 = vperm.xlu1 %6310, %v1632_v3   ;;  %1665 = vperm.xlu0 %6309, %v1631_v4   ;;  %v381_v3 = vld [vmem:[%s6584_s28] sm:$0xff]  ;;  %v6616_v4 = vstv %s380_s29 }
  0xcc   : > { %v6533_v9 = vpop.permute.xlu1 %704  ;;  %v6535_v10 = vpop.permute.xlu0 %694 }
  0xcd   : > { %1680 = vperm.xlu1 %6310, %v1634_v7   ;;  %1675 = vperm.xlu0 %6309, %v1633_v8   ;;  %v451_v7 = vmul.f32 %v6593_v50, %v412_v62 }
  0xd0   : > { %v6544_v14 = vpop.permute.xlu1 %714  ;;  %v6546_v15 = vpop.permute.xlu0 %709 }
  0xd1   : > { %1690 = vperm.xlu1 %6310, %v1636_v12   ;;  %1685 = vperm.xlu0 %6309, %v1635_v13   ;;  %v620_v13 = vlaneseq }
  0xd4   : > { %v6548_v18 = vpop.permute.xlu1 %724  ;;  %v6550_v19 = vpop.permute.xlu0 %719 }
  0xd5   : > { %1700 = vperm.xlu1 %6310, %v1638_v16   ;;  %1695 = vperm.xlu0 %6309, %v1637_v17   ;;  %v382_v16 = vld [vmem:[%s6584_s28 + $0x8] sm:$0xff]  ;;  %v420_v17 = vmul.f32 %v6593_v50, %v381_v3 }
  0xd8   : > { %v6552_v22 = vpop.permute.xlu1 %734  ;;  %v6554_v23 = vpop.permute.xlu0 %729 }
  0xd9   : > { %1710 = vperm.xlu1 %6310, %v1640_v20   ;;  %1705 = vperm.xlu0 %6309, %v1639_v21   ;;  %v553_v20 = vmul.f32 %v6616_v4, %v488_v63  ;;  %v554_v21 = vmul.f32 %v6616_v4, %v489_v0 }
  0xdc   : > { %v6556_v26 = vpop.permute.xlu1 %744  ;;  %v6558_v27 = vpop.permute.xlu0 %739 }
  0xdd   : > { %1720 = vperm.xlu1 %6310, %v1642_v24   ;;  %1715 = vperm.xlu0 %6309, %v1641_v25   ;;  %v1660_v24 = vld [vmem:[#allocation5 + $0x2e8] sm:$0xff]  ;;  %v1659_v25 = vld [vmem:[#allocation5 + $0x2e0] sm:$0xff] }
  0xe0   : > { %v6560_v30 = vpop.permute.xlu1 %754  ;;  %v6562_v31 = vpop.permute.xlu0 %749 }
  0xe1   : > { %8244 = vst [vmem:[#allocation9_spill] sm:$0xff] %v6562_v31  ;;  %1730 = vperm.xlu1 %6310, %v1644_v28   ;;  %1725 = vperm.xlu0 %6309, %v1643_v29   ;;  %v383_v28 = vld [vmem:[%s6584_s28 + $0x10] sm:$0xff]  ;;  %v490_v29 = vadd.f32 %v6606_v59, %v451_v7  ;;  %v2138_v31 = vld [vmem:[#allocation5 + $0x3a0] sm:$0xff] }
  0xe3   : > { %vm522_vm4 = vcmp.ge.f32.partialorder %v490_v29, 0.0 }
  0xe4   : > { %v6564_v34 = vpop.permute.xlu1 %764  ;;  %v6566_v35 = vpop.permute.xlu0 %759 }
  0xe5   : > { %8245 = vst [vmem:[#allocation10_spill] sm:$0xff] %v6564_v34  ;;  %8246 = vst [vmem:[#allocation11_spill] sm:$0xff] %v6566_v35  ;;  %1740 = vperm.xlu1 %6310, %v1646_v32   ;;  %1735 = vperm.xlu0 %6309, %v1645_v33   ;;  %v421_v32 = vmul.f32 %v6593_v50, %v382_v16  ;;  %v2119_v16 = vld [vmem:[#allocation5 + $0x308] sm:$0xff]  ;;  %v2867_v34 = vld [vmem:[#allocation5 + $0x500] sm:$0xff] }
  0xe8   : > { %v6569_v38 = vpop.permute.xlu1 %774  ;;  %v6571_v39 = vpop.permute.xlu0 %769 }
  0xe9   : > { %8247 = vst [vmem:[#allocation12_spill] sm:$0xff] %v6569_v38  ;;  %8248 = vst [vmem:[#allocation13_spill] sm:$0xff] %v6571_v39  ;;  %1750 = vperm.xlu1 %6310, %v1648_v36   ;;  %1745 = vperm.xlu0 %6309, %v1647_v37   ;;  %v6634_v37 = vshrl.u32 %v620_v13, 7  ;;  %v424_v13 = vmul.f32 %v6593_v50, %v385_v52  ;;  %v2134_v39 = vld [vmem:[#allocation5 + $0x380] sm:$0xff] }
  0xeb   : > { %vm1597_vm3 = vcmp.lt.s32.totalorder %v6634_v37, 7 }
  0xec   : > { %v6576_v42 = vpop.permute.xlu1 %784  ;;  %v6578_v43 = vpop.permute.xlu0 %779 }
  0xed   : > { %8249 = vst [vmem:[#allocation14_spill] sm:$0xff] %v6576_v42  ;;  %8250 = vst [vmem:[#allocation15_spill] sm:$0xff] %v6578_v43  ;;  %1760 = vperm.xlu1 %6310, %v1650_v40   ;;  %1755 = vperm.xlu0 %6309, %v1649_v41   ;;  %v384_v40 = vld [vmem:[%s6584_s28 + $0x18] sm:$0xff]  ;;  %v459_v41 = vadd.f32 %v6606_v59, %v420_v17  ;;  %v2118_v17 = vld [vmem:[#allocation5 + $0x300] sm:$0xff] }
  0xee   : > { %v423_v62 = vmul.f32 %v6593_v50, %v384_v40  ;;  %v403_v43 = vld [vmem:[%s6584_s28 + $0xb0] sm:$0xff] }
  0xef   : > { %v524_v3 = vmul.f32 %v6616_v4, %v459_v41  ;;  %vm491_vm5 = vcmp.ge.f32.partialorder %v459_v41, 0.0  ;;  %v2135_v42 = vld [vmem:[#allocation5 + $0x388] sm:$0xff] }
  0xf0   : > { %v6586_v46 = vpop.permute.xlu1 %794  ;;  %v6588_v47 = vpop.permute.xlu0 %789 }
  0xf1   : > { %8251 = vst [vmem:[#allocation16_spill] sm:$0xff] %v6586_v46  ;;  %8252 = vst [vmem:[#allocation17_spill] sm:$0xff] %v6588_v47  ;;  %1770 = vperm.xlu1 %6310, %v1652_v44   ;;  %1765 = vperm.xlu0 %6309, %v1651_v45   ;;  %v6638_v44 = vsel %vm520_vm1, %v488_v63, %v553_v20  ;;  %v6640_v45 = vsel %vm521_vm2, %v489_v0, %v554_v21  ;;  %v386_v0 = vld [vmem:[%s6584_s28 + $0x28] sm:$0xff] }
  0xf2   : > { %8261 = vst [vmem:[#allocation26_spill] sm:$0xff] %v6640_v45  ;;  %v8101_v55 = vrot.slane %v6640_v45, 1  ;;  %v8100_v56 = vrot.slane %v6638_v44, 1 }
  0xf4   : > { %v6597_v53 = vpop.permute.xlu1 %804  ;;  %v6599_v54 = vpop.permute.xlu0 %799 }
  0xf5   : > { %8253 = vst [vmem:[#allocation18_spill] sm:$0xff] %v6597_v53  ;;  %8254 = vst [vmem:[#allocation19_spill] sm:$0xff] %v6599_v54  ;;  %1780 = vperm.xlu1 %6310, %v1654_v48   ;;  %1775 = vperm.xlu0 %6309, %v1653_v49   ;;  %v422_v48 = vmul.f32 %v6593_v50, %v383_v28  ;;  %v1662_v49 = vld [vmem:[#allocation5 + $0x2f8] sm:$0xff]  ;;  %v387_v28 = vld [vmem:[%s6584_s28 + $0x30] sm:$0xff] }
  0xf6   : > { %v396_v54 = vld [vmem:[%s6584_s28 + $0x78] sm:$0xff]  ;;  %v2130_v53 = vld [vmem:[#allocation5 + $0x360] sm:$0xff] }
  0xf7   : > { %v461_v7 = vadd.f32 %v6606_v59, %v422_v48  ;;  %v389_v48 = vld [vmem:[%s6584_s28 + $0x40] sm:$0xff] }
  0xf8   : > { %v6608_v60 = vpop.permute.xlu1 %814  ;;  %v6610_v61 = vpop.permute.xlu0 %809 }
  0xf9   : > { %8255 = vst [vmem:[#allocation20_spill] sm:$0xff] %v6608_v60  ;;  %8256 = vst [vmem:[#allocation21_spill] sm:$0xff] %v6610_v61  ;;  %1790 = vperm.xlu1 %6310, %v1656_v57   ;;  %1785 = vperm.xlu0 %6309, %v1655_v58   ;;  %v555_v57 = vmul.f32 %v6616_v4, %v490_v29  ;;  %v460_v58 = vadd.f32 %v6606_v59, %v421_v32  ;;  %v388_v32 = vld [vmem:[%s6584_s28 + $0x38] sm:$0xff]  ;;  %vm493_vm7 = vcmp.ge.f32.partialorder %v461_v7, 0.0 }
  0xfb   : > { %v6666_v20 = vsel %vm522_vm4, %v490_v29, %v555_v57  ;;  %v525_v21 = vmul.f32 %v6616_v4, %v460_v58  ;;  %vm492_vm6 = vcmp.ge.f32.partialorder %v460_v58, 0.0  ;;  %v6676_v29 = vsel %vm491_vm5, %v459_v41, %v524_v3 }
  0xfc   : > { %v6619_v8 = vpop.permute.xlu1 %824  ;;  %v6621_v12 = vpop.permute.xlu0 %819  ;;  %8265 = vst [vmem:[#allocation30_spill] sm:$0xff] %v6666_v20  ;;  %8266 = vst [vmem:[#allocation31_spill] sm:$0xff] %v6676_v29  ;;  %v526_v57 = vmul.f32 %v6616_v4, %v461_v7 }
  0xfd   : > { %8257 = vst [vmem:[#allocation22_spill] sm:$0xff] %v6619_v8  ;;  %8258 = vst [vmem:[#allocation23_spill] sm:$0xff] %v6621_v12  ;;  %1800 = vperm.xlu1 %6310, %v1658_v1   ;;  %1795 = vperm.xlu0 %6309, %v1657_v2   ;;  %v6661_v2 = vsel %vm1597_vm3, %v8100_v56, %v8101_v55  ;;  %v2121_v56 = vld [vmem:[#allocation5 + $0x318] sm:$0xff]  ;;  %v2120_v55 = vld [vmem:[#allocation5 + $0x310] sm:$0xff] }
  0xfe   : > { %8264 = vst [vmem:[#allocation29_spill] sm:$0xff] %v6661_v2  ;;  %v426_v2 = vmul.f32 %v6593_v50, %v387_v28  ;;  %v2126_v12 = vld [vmem:[#allocation5 + $0x340] sm:$0xff] }
 0x100   : > { %v6630_v33 = vpop.permute.xlu1 %834  ;;  %v6632_v36 = vpop.permute.xlu0 %829 }
 0x101   : > { %8259 = vst [vmem:[#allocation24_spill] sm:$0xff] %v6630_v33  ;;  %8260 = vst [vmem:[#allocation25_spill] sm:$0xff] %v6632_v36  ;;  %1810 = vperm.xlu1 %6310, %v1660_v24   ;;  %1805 = vperm.xlu0 %6309, %v1659_v25   ;;  %v462_v24 = vadd.f32 %v6606_v59, %v423_v62  ;;  %v425_v25 = vmul.f32 %v6593_v50, %v386_v0  ;;  %v390_v0 = vld [vmem:[%s6584_s28 + $0x48] sm:$0xff] }
 0x102   : > { %v463_v62 = vadd.f32 %v6606_v59, %v424_v13 }
 0x103   : > { %v527_v41 = vmul.f32 %v6616_v4, %v462_v24  ;;  %v464_v3 = vadd.f32 %v6606_v59, %v425_v25  ;;  %vm494_vm9 = vcmp.ge.f32.partialorder %v462_v24, 0.0  ;;  %v2123_v25 = vld [vmem:[#allocation5 + $0x328] sm:$0xff] }
 0x104   : > { %v6649_v1 = vpop.permute.xlu1 %844  ;;  %v6651_v63 = vpop.permute.xlu0 %839  ;;  %vm495_vm10 = vcmp.ge.f32.partialorder %v463_v62, 0.0 }
 0x105   : > { %8262 = vst [vmem:[#allocation27_spill] sm:$0xff] %v6649_v1  ;;  %8263 = vst [vmem:[#allocation28_spill] sm:$0xff] %v6651_v63  ;;  %1820 = vperm.xlu1 %6310, %v1662_v49   ;;  %1815 = vperm.xlu0 %6309, %v1661_v51   ;;  %v427_v63 = vmul.f32 %v6593_v50, %v388_v32  ;;  %vm496_vm11 = vcmp.ge.f32.partialorder %v464_v3, 0.0 }
 0x108   : > { %v937_v40 = vpop.permute.xlu1 %936  ;;  %v932_v49 = vpop.permute.xlu0 %931 }
 0x109   : > { %v1090_v51 = vmul.f32 %v937_v40, %v6666_v20  ;;  %v1089_v52 = vmul.f32 %v932_v49, %v6640_v45  ;;  %2157 = vperm.xlu1 %6310, %v2119_v16   ;;  %2152 = vperm.xlu0 %6309, %v2118_v17   ;;  %v6684_v40 = vsel %vm492_vm6, %v460_v58, %v525_v21 }
 0x10a   : > { %8267 = vst [vmem:[#allocation32_spill] sm:$0xff] %v6684_v40  ;;  %v428_v16 = vmul.f32 %v6593_v50, %v389_v48  ;;  %v429_v49 = vmul.f32 %v6593_v50, %v390_v0  ;;  %v6693_v58 = vsel %vm493_vm7, %v461_v7, %v526_v57  ;;  %v528_v21 = vmul.f32 %v6616_v4, %v463_v62  ;;  %v2122_v48 = vld [vmem:[#allocation5 + $0x320] sm:$0xff]  ;;  %v391_v0 = vld [vmem:[%s6584_s28 + $0x50] sm:$0xff]  ;;  %v392_v7 = vld [vmem:[%s6584_s28 + $0x58] sm:$0xff] }
 0x10b   : > { %v1121_v1 = vpack.c.bf16 %v1090_v51, %v1089_v52  ;;  %8268 = vst [vmem:[#allocation33_spill] sm:$0xff] %v6693_v58  ;;  %v465_v51 = vadd.f32 %v6606_v59, %v426_v2  ;;  %v466_v52 = vadd.f32 %v6606_v59, %v427_v63 }
 0x10c   : > { %v947_v17 = vpop.permute.xlu1 %946  ;;  %v942_v13 = vpop.permute.xlu0 %941  ;;  %v468_v2 = vadd.f32 %v6606_v59, %v429_v49  ;;  %v2124_v49 = vld [vmem:[#allocation5 + $0x330] sm:$0xff] }
 0x10d   : > { %v1092_v28 = vmul.f32 %v947_v17, %v6684_v40  ;;  %v1091_v32 = vmul.f32 %v942_v13, %v6676_v29  ;;  %2167 = vperm.xlu1 %6310, %v2121_v56   ;;  %2162 = vperm.xlu0 %6309, %v2120_v55   ;;  %v6701_v13 = vsel %vm494_vm9, %v462_v24, %v527_v41  ;;  %v6714_v24 = vld [vmem:[%s8092_s4 + $0x8] sm:$0xf]  ;;  %vm497_vm12 = vcmp.ge.f32.partialorder %v465_v51, 0.0 }
 0x10e   : > { %5705 = vmatprep.mubr.msk.bf16.mxu1 %vm1139_vm8, %v1121_v1  ;;  %8269 = vst [vmem:[#allocation34_spill] sm:$0xff] %v6701_v13  ;;  %v529_v55 = vmul.f32 %v6616_v4, %v464_v3  ;;  %v467_v56 = vadd.f32 %v6606_v59, %v428_v16  ;;  %v1402_v1 = vsel %vm1188_vm0, %v6540_v11, 0  ;;  %v6717_v41 = vsel %vm495_vm10, %v463_v62, %v528_v21  ;;  %v2125_v16 = vld [vmem:[#allocation5 + $0x338] sm:$0xff] }
 0x10f   : > { %v1122_v17 = vpack.c.bf16 %v1092_v28, %v1091_v32  ;;  %8270 = vst [vmem:[#allocation35_spill] sm:$0xff] %v6717_v41  ;;  %v430_v11 = vmul.f32 %v6593_v50, %v391_v0  ;;  %vm498_vm13 = vcmp.ge.f32.partialorder %v466_v52, 0.0  ;;  %v393_v32 = vld [vmem:[%s6584_s28 + $0x60] sm:$0xff]  ;;  %v531_v62 = vmul.f32 %v6616_v4, %v466_v52  ;;  %v394_v0 = vld [vmem:[%s6584_s28 + $0x68] sm:$0xff] }
 0x110   : > { %v957_v57 = vpop.permute.xlu1 %956  ;;  %v952_v36 = vpop.permute.xlu0 %951  ;;  %v532_v21 = vmul.f32 %v6616_v4, %v467_v56  ;;  %vm499_vm14 = vcmp.ge.f32.partialorder %v467_v56, 0.0  ;;  %vm500_vm15 = vcmp.ge.f32.partialorder %v468_v2, 0.0  ;;  %v433_v61 = vmul.f32 %v6593_v50, %v394_v0 }
 0x111   : > { %v1094_v63 = vmul.f32 %v957_v57, %v6701_v13  ;;  %v1093_v28 = vmul.f32 %v952_v36, %v6693_v58  ;;  %2177 = vperm.xlu1 %6310, %v2123_v25   ;;  %2172 = vperm.xlu0 %6309, %v2122_v48   ;;  %v431_v36 = vmul.f32 %v6593_v50, %v392_v7 }
 0x112   : > { %5706 = vmatmul.mubr.msk.bf16.vlgmr.msra.gmra.mrb[0].mxu1 %vm1139_vm8, %v1122_v17  ;;  %v6724_v48 = vsel %vm496_vm11, %v464_v3, %v529_v55  ;;  %v530_v57 = vmul.f32 %v6616_v4, %v465_v51  ;;  %v533_v7 = vmul.f32 %v6616_v4, %v468_v2  ;;  %v469_v55 = vadd.f32 %v6606_v59, %v430_v11 }
 0x113   : > { %v1123_v25 = vpack.c.bf16 %v1094_v63, %v1093_v28  ;;  %5738 = vmatpush3.bf16.msra.mxu1 %v1402_v1  ;;  %8271 = vst [vmem:[#allocation36_spill] sm:$0xff] %v6724_v48  ;;  %v432_v63 = vmul.f32 %v6593_v50, %v393_v32  ;;  %v2127_v28 = vld [vmem:[#allocation5 + $0x348] sm:$0xff]  ;;  %v470_v8 = vadd.f32 %v6606_v59, %v431_v36 }
 0x114   : > { %v967_v17 = vpop.permute.xlu1 %966  ;;  %v962_v33 = vpop.permute.xlu0 %961  ;;  %6269 = vmatprep.subr.msk.bf16.mxu1 %vm1188_vm0, %v6714_v24  ;;  %v6749_v60 = vsel %vm500_vm15, %v468_v2, %v533_v7  ;;  %vm501_vm1 = vcmp.ge.f32.partialorder %v469_v55, 0.0  ;;  %v2129_v2 = vld [vmem:[#allocation5 + $0x358] sm:$0xff] }
 0x115   : > { %v1096_v1 = vmul.f32 %v967_v17, %v6724_v48  ;;  %v1095_v3 = vmul.f32 %v962_v33, %v6717_v41  ;;  %2187 = vperm.xlu1 %6310, %v2125_v16   ;;  %2182 = vperm.xlu0 %6309, %v2124_v49   ;;  %v6741_v33 = vsel %vm497_vm12, %v465_v51, %v530_v57  ;;  %v5396_v51 = vld [vmem:[%s8092_s4 + $0x10] sm:$0xf]  ;;  %v397_v7 = vld [vmem:[%s6584_s28 + $0x80] sm:$0xff]  ;;  %vm502_vm2 = vcmp.ge.f32.partialorder %v470_v8, 0.0 }
 0x116   : > { %5709 = vmatprep.mubr.msk.bf16.mxu1 %vm1139_vm8, %v1123_v25  ;;  %8272 = vst [vmem:[#allocation37_spill] sm:$0xff] %v6741_v33  ;;  %v6744_v16 = vsel %vm498_vm13, %v466_v52, %v531_v62  ;;  %v6747_v49 = vsel %vm499_vm14, %v467_v56, %v532_v21  ;;  %8275 = vst [vmem:[#allocation40_spill] sm:$0xff] %v6749_v60  ;;  %v395_v25 = vld [vmem:[%s6584_s28 + $0x70] sm:$0xff]  ;;  %v534_v52 = vmul.f32 %v6616_v4, %v469_v55 }
 0x117   : > { %v1124_v17 = vpack.c.bf16 %v1096_v1, %v1095_v3  ;;  %8273 = vst [vmem:[#allocation38_spill] sm:$0xff] %v6744_v16  ;;  %8274 = vst [vmem:[#allocation39_spill] sm:$0xff] %v6747_v49  ;;  %v471_v56 = vadd.f32 %v6606_v59, %v432_v63  ;;  %v2128_v57 = vld [vmem:[#allocation5 + $0x350] sm:$0xff]  ;;  %6271 = vmatprep.subr.msk.bf16.mxu0 %vm1188_vm0, %v5396_v51  ;;  %v6763_v62 = vsel %vm1188_vm0, %v5396_v51, 0  ;;  %v398_v51 = vld [vmem:[%s6584_s28 + $0x88] sm:$0xff] }
 0x118   : > { %v977_v11 = vpop.permute.xlu1 %976  ;;  %v972_v32 = vpop.permute.xlu0 %971  ;;  %8276 = vst [vmem:[#allocation41_spill] sm:$0xff] %v6763_v62  ;;  %v472_v21 = vadd.f32 %v6606_v59, %v433_v61  ;;  %5840 = vmatpush3.bf16.msra.mxu0 %v6763_v62  ;;  %v2604_v3 = vpack.c.bf16 %v6684_v40, %v6676_v29  ;;  %v434_v63 = vmul.f32 %v6593_v50, %v395_v25  ;;  %v2131_v62 = vld [vmem:[#allocation5 + $0x368] sm:$0xff] }
 0x119   : > { %v1098_v36 = vmul.f32 %v977_v11, %v6744_v16  ;;  %v1097_v0 = vmul.f32 %v972_v32, %v6741_v33  ;;  %2197 = vperm.xlu1 %6310, %v2127_v28   ;;  %2192 = vperm.xlu0 %6309, %v2126_v12   ;;  %v535_v12 = vmul.f32 %v6616_v4, %v470_v8  ;;  %vm503_vm4 = vcmp.ge.f32.partialorder %v471_v56, 0.0 }
 0x11a   : > { %5710 = vmatmul.mubr.msk.bf16.gmra.mrb[4].mxu1 %vm1139_vm8, %v1124_v17  ;;  %v435_v28 = vmul.f32 %v6593_v50, %v396_v54  ;;  %v2605_v32 = vpack.c.bf16 %v6701_v13, %v6693_v58  ;;  %v536_v25 = vmul.f32 %v6616_v4, %v471_v56  ;;  %v436_v54 = vmul.f32 %v6593_v50, %v397_v7 }
 0x11b   : > { %v1125_v1 = vpack.c.bf16 %v1098_v36, %v1097_v0  ;;  %v6779_v0 = vsel %vm501_vm1, %v469_v55, %v534_v52  ;;  %5841 = vmatprep.mubr.msk.bf16.mxu0 %vm1139_vm8, %v2604_v3  ;;  %vm504_vm5 = vcmp.ge.f32.partialorder %v472_v21, 0.0  ;;  %v473_v52 = vadd.f32 %v6606_v59, %v434_v63 }
 0x11c   : > { %v987_v17 = vpop.permute.xlu1 %986  ;;  %v982_v11 = vpop.permute.xlu0 %981  ;;  %8277 = vst [vmem:[#allocation42_spill] sm:$0xff] %v6779_v0  ;;  %5842 = vmatmul.mubr.msk.bf16.vlgmr.msra.gmra.mrb[0].mxu0 %vm1139_vm8, %v2605_v32  ;;  %v474_v7 = vadd.f32 %v6606_v59, %v435_v28  ;;  %v6798_v32 = vsel %vm503_vm4, %v471_v56, %v536_v25  ;;  %v475_v63 = vadd.f32 %v6606_v59, %v436_v54 }
 0x11d   : > { %v1100_v61 = vmul.f32 %v987_v17, %v6749_v60  ;;  %v1099_v36 = vmul.f32 %v982_v11, %v6747_v49  ;;  %2207 = vperm.xlu1 %6310, %v2129_v2   ;;  %2202 = vperm.xlu0 %6309, %v2128_v57   ;;  %v6786_v17 = vsel %vm502_vm2, %v470_v8, %v535_v12  ;;  %v399_v57 = vld [vmem:[%s6584_s28 + $0x90] sm:$0xff]  ;;  %v400_v11 = vld [vmem:[%s6584_s28 + $0x98] sm:$0xff]  ;;  %vm505_vm6 = vcmp.ge.f32.partialorder %v473_v52, 0.0 }
 0x11e   : > { %5713 = vmatprep.mubr.msk.bf16.mxu1 %vm1139_vm8, %v1125_v1  ;;  %8278 = vst [vmem:[#allocation43_spill] sm:$0xff] %v6786_v17  ;;  %v537_v2 = vmul.f32 %v6616_v4, %v472_v21  ;;  %v437_v1 = vmul.f32 %v6593_v50, %v398_v51  ;;  %8279 = vst [vmem:[#allocation44_spill] sm:$0xff] %v6798_v32  ;;  %v438_v28 = vmul.f32 %v6593_v50, %v399_v57  ;;  %v2133_v51 = vld [vmem:[#allocation5 + $0x378] sm:$0xff]  ;;  %v402_v57 = vld [vmem:[%s6584_s28 + $0xa8] sm:$0xff] }
 0x11f   : > { %v1126_v55 = vpack.c.bf16 %v1100_v61, %v1099_v36  ;;  %v2132_v61 = vld [vmem:[#allocation5 + $0x370] sm:$0xff]  ;;  %v538_v56 = vmul.f32 %v6616_v4, %v473_v52  ;;  %v539_v25 = vmul.f32 %v6616_v4, %v474_v7  ;;  %vm506_vm7 = vcmp.ge.f32.partialorder %v474_v7, 0.0 }
 0x120   : > { %v997_v3 = vpop.permute.xlu1 %996  ;;  %v992_v47 = vpop.permute.xlu0 %991  ;;  %v6804_v36 = vsel %vm504_vm5, %v472_v21, %v537_v2  ;;  %v476_v54 = vadd.f32 %v6606_v59, %v437_v1  ;;  %v2607_v21 = vpack.c.bf16 %v6744_v16, %v6741_v33  ;;  %vm507_vm9 = vcmp.ge.f32.partialorder %v475_v63, 0.0 }
 0x121   : > { %v1102_v8 = vmul.f32 %v997_v3, %v6786_v17  ;;  %v1101_v12 = vmul.f32 %v992_v47, %v6779_v0  ;;  %2217 = vperm.xlu1 %6310, %v2131_v62   ;;  %2212 = vperm.xlu0 %6309, %v2130_v53   ;;  %8280 = vst [vmem:[#allocation45_spill] sm:$0xff] %v6804_v36  ;;  %v401_v47 = vld [vmem:[%s6584_s28 + $0xa0] sm:$0xff] }
 0x122   : > { %5714 = vmatmul.mubr.msk.bf16.gmra.mrb[8].mxu1 %vm1139_vm8, %v1126_v55  ;;  %v439_v3 = vmul.f32 %v6593_v50, %v400_v11  ;;  %v2606_v53 = vpack.c.bf16 %v6724_v48, %v6717_v41  ;;  %v440_v1 = vmul.f32 %v6593_v50, %v401_v47  ;;  %vm508_vm10 = vcmp.ge.f32.partialorder %v476_v54, 0.0 }
 0x123   : > { %v1127_v62 = vpack.c.bf16 %v1102_v8, %v1101_v12  ;;  %v540_v8 = vmul.f32 %v6616_v4, %v475_v63  ;;  %v477_v12 = vadd.f32 %v6606_v59, %v438_v28  ;;  %v6830_v28 = vsel %vm506_vm7, %v474_v7, %v539_v25  ;;  %v2136_v25 = vld [vmem:[#allocation5 + $0x390] sm:$0xff] }
 0x124   : > { %v1007_v55 = vpop.permute.xlu1 %1006  ;;  %v1002_v46 = vpop.permute.xlu0 %1001  ;;  %5845 = vmatprep.mubr.msk.bf16.mxu0 %vm1139_vm8, %v2606_v53  ;;  %8282 = vst [vmem:[#allocation47_spill] sm:$0xff] %v6830_v28  ;;  %v478_v47 = vadd.f32 %v6606_v59, %v439_v3  ;;  %v479_v3 = vadd.f32 %v6606_v59, %v440_v1  ;;  %vm622_vm7 = vcmp.lt.s32.totalorder %v6634_v37, 1  ;;  %v3850_v37 = vld [vmem:[#allocation5 + $0x748] sm:$0xff] }
 0x125   : > { %v1104_v2 = vmul.f32 %v1007_v55, %v6804_v36  ;;  %v1103_v11 = vmul.f32 %v1002_v46, %v6798_v32  ;;  %2227 = vperm.xlu1 %6310, %v2133_v51   ;;  %2222 = vperm.xlu0 %6309, %v2132_v61   ;;  %v441_v55 = vmul.f32 %v6593_v50, %v402_v57  ;;  %vm509_vm11 = vcmp.ge.f32.partialorder %v477_v12, 0.0 }
 0x126   : > { %5717 = vmatprep.mubr.msk.bf16.mxu1 %vm1139_vm8, %v1127_v62  ;;  %5846 = vmatmul.mubr.msk.bf16.gmra.mrb[4].mxu0 %vm1139_vm8, %v2607_v21  ;;  %v6827_v51 = vsel %vm505_vm6, %v473_v52, %v538_v56  ;;  %v541_v61 = vmul.f32 %v6616_v4, %v476_v54  ;;  %v404_v62 = vld [vmem:[%s6584_s28 + $0xb8] sm:$0xff]  ;;  %v442_v57 = vmul.f32 %v6593_v50, %v403_v43  ;;  %vm510_vm12 = vcmp.ge.f32.partialorder %v478_v47, 0.0 }
 0x127   : > { %v1128_v46 = vpack.c.bf16 %v1104_v2, %v1103_v11  ;;  %8281 = vst [vmem:[#allocation46_spill] sm:$0xff] %v6827_v51  ;;  %v6839_v7 = vsel %vm507_vm9, %v475_v63, %v540_v8  ;;  %v2137_v56 = vld [vmem:[#allocation5 + $0x398] sm:$0xff]  ;;  %v480_v2 = vadd.f32 %v6606_v59, %v441_v55  ;;  %v443_v43 = vmul.f32 %v6593_v50, %v404_v62 }
 0x128   : > { %v1017_v38 = vpop.permute.xlu1 %1016  ;;  %v1012_v53 = vpop.permute.xlu0 %1011  ;;  %8283 = vst [vmem:[#allocation48_spill] sm:$0xff] %v6839_v7  ;;  %v405_v11 = vld [vmem:[%s6584_s28 + $0xc0] sm:$0xff]  ;;  %v542_v63 = vmul.f32 %v6616_v4, %v477_v12  ;;  %v543_v8 = vmul.f32 %v6616_v4, %v478_v47  ;;  %v2609_v55 = vpack.c.bf16 %v6786_v17, %v6779_v0  ;;  %v481_v62 = vadd.f32 %v6606_v59, %v442_v57 }
 0x129   : > { %v1106_v21 = vmul.f32 %v1017_v38, %v6830_v28  ;;  %v1105_v52 = vmul.f32 %v1012_v53, %v6827_v51  ;;  %2237 = vperm.xlu1 %6310, %v2135_v42   ;;  %2232 = vperm.xlu0 %6309, %v2134_v39   ;;  %v406_v38 = vld [vmem:[%s6584_s28 + $0xc8] sm:$0xff]  ;;  %v2608_v39 = vpack.c.bf16 %v6749_v60, %v6747_v49  ;;  %vm511_vm13 = vcmp.ge.f32.partialorder %v479_v3, 0.0 }
 0x12a   : > { %5718 = vmatmul.mubr.msk.bf16.gmra.mrb[12].mxu1 %vm1139_vm8, %v1128_v46  ;;  %v6850_v42 = vsel %vm508_vm10, %v476_v54, %v541_v61  ;;  %v544_v54 = vmul.f32 %v6616_v4, %v479_v3  ;;  %v444_v61 = vmul.f32 %v6593_v50, %v405_v11  ;;  %v545_v57 = vmul.f32 %v6616_v4, %v480_v2  ;;  %v5413_v11 = vld [vmem:[%s8092_s4 + $0x14] sm:$0xf] }
 0x12b   : > { %v1129_v35 = vpack.c.bf16 %v1106_v21, %v1105_v52  ;;  %8284 = vst [vmem:[#allocation49_spill] sm:$0xff] %v6850_v42  ;;  %v445_v52 = vmul.f32 %v6593_v50, %v406_v38  ;;  %5849 = vmatprep.mubr.msk.bf16.mxu0 %vm1139_vm8, %v2608_v39  ;;  %v6874_v38 = vsel %vm510_vm12, %v478_v47, %v543_v8  ;;  %vm512_vm14 = vcmp.ge.f32.partialorder %v480_v2, 0.0  ;;  %v2869_v8 = vld [vmem:[#allocation5 + $0x510] sm:$0xff] }
 0x12c   : > { %v1027_v1 = vpop.permute.xlu1 %1026  ;;  %v1022_v46 = vpop.permute.xlu0 %1021  ;;  %8286 = vst [vmem:[#allocation51_spill] sm:$0xff] %v6874_v38  ;;  %6273 = vmatprep.subr.msk.bf16.mxu0 %vm1188_vm0, %v5413_v11  ;;  %vm513_vm15 = vcmp.ge.f32.partialorder %v481_v62, 0.0  ;;  %v483_v47 = vadd.f32 %v6606_v59, %v444_v61 }
 0x12d   : > { %v1108_v53 = vmul.f32 %v1027_v1, %v6850_v42  ;;  %v1107_v21 = vmul.f32 %v1022_v46, %v6839_v7  ;;  %2247 = vperm.xlu1 %6310, %v2137_v56   ;;  %2242 = vperm.xlu0 %6309, %v2136_v25   ;;  %v482_v56 = vadd.f32 %v6606_v59, %v443_v43  ;;  %v407_v46 = vld [vmem:[%s6584_s28 + $0xd0] sm:$0xff]  ;;  %v3158_v7 = vsel %vm1188_vm0, %v5413_v11, 0 }
 0x12e   : > { %5721 = vmatprep.mubr.msk.bf16.mxu1 %vm1139_vm8, %v1129_v35  ;;  %5850 = vmatmul.mubr.msk.bf16.gmra.mrb[8].mxu0 %vm1139_vm8, %v2609_v55  ;;  %v6871_v35 = vsel %vm509_vm11, %v477_v12, %v542_v63  ;;  %v546_v43 = vmul.f32 %v6616_v4, %v481_v62  ;;  %v408_v55 = vld [vmem:[%s6584_s28 + $0xd8] sm:$0xff]  ;;  %v6883_v12 = vsel %vm511_vm13, %v479_v3, %v544_v54  ;;  %v2868_v42 = vld [vmem:[#allocation5 + $0x508] sm:$0xff]  ;;  %vm515_vm2 = vcmp.ge.f32.partialorder %v483_v47, 0.0 }
 0x12f   : > { %v1130_v25 = vpack.c.bf16 %v1108_v53, %v1107_v21  ;;  %8285 = vst [vmem:[#allocation50_spill] sm:$0xff] %v6871_v35  ;;  %8287 = vst [vmem:[#allocation52_spill] sm:$0xff] %v6883_v12  ;;  %v484_v63 = vadd.f32 %v6606_v59, %v445_v52  ;;  %5874 = vmatpush3.bf16.msra.mxu0 %v3158_v7  ;;  %v2610_v3 = vpack.c.bf16 %v6804_v36, %v6798_v32 }
 0x130   : > { %v1037_v39 = vpop.permute.xlu1 %1036  ;;  %v1032_v1 = vpop.permute.xlu0 %1031  ;;  %vm514_vm1 = vcmp.ge.f32.partialorder %v482_v56, 0.0  ;;  %v446_v54 = vmul.f32 %v6593_v50, %v407_v46  ;;  %v447_v61 = vmul.f32 %v6593_v50, %v408_v55  ;;  %v2611_v11 = vpack.c.bf16 %v6830_v28, %v6827_v51  ;;  %v2871_v46 = vld [vmem:[#allocation5 + $0x520] sm:$0xff] }
 0x131   : > { %v1110_v53 = vmul.f32 %v1037_v39, %v6874_v38  ;;  %v1109_v21 = vmul.f32 %v1032_v1, %v6871_v35  ;;  %2901 = vperm.xlu1 %6310, %v2867_v34   ;;  %2252 = vperm.xlu0 %6309, %v2138_v31   ;;  %v6890_v39 = vsel %vm512_vm14, %v480_v2, %v545_v57  ;;  %v409_v1 = vld [vmem:[%s6584_s28 + $0xe0] sm:$0xff]  ;;  %vm516_vm4 = vcmp.ge.f32.partialorder %v484_v63, 0.0 }
 0x132   : > { %5722 = vmatmul.mubr.msk.bf16.gmra.mrb[16].mxu1 %vm1139_vm8, %v1130_v25  ;;  %8288 = vst [vmem:[#allocation53_spill] sm:$0xff] %v6890_v39  ;;  %v547_v34 = vmul.f32 %v6616_v4, %v482_v56  ;;  %v6903_v7 = vsel %vm513_vm15, %v481_v62, %v546_v43  ;;  %5853 = vmatprep.mubr.msk.bf16.mxu0 %vm1139_vm8, %v2610_v3  ;;  %v2873_v3 = vld [vmem:[#allocation5 + $0x530] sm:$0xff] }
 0x133   : > { %v1131_v31 = vpack.c.bf16 %v1110_v53, %v1109_v21  ;;  %8289 = vst [vmem:[#allocation54_spill] sm:$0xff] %v6903_v7  ;;  %v2870_v53 = vld [vmem:[#allocation5 + $0x518] sm:$0xff]  ;;  %v548_v21 = vmul.f32 %v6616_v4, %v483_v47  ;;  %v485_v62 = vadd.f32 %v6606_v59, %v446_v54  ;;  %v486_v43 = vadd.f32 %v6606_v59, %v447_v61 }
 0x134   : > { %v1047_v52 = vpop.permute.xlu1 %1046  ;;  %v1042_v25 = vpop.permute.xlu0 %1041  ;;  %v6908_v55 = vsel %vm514_vm1, %v482_v56, %v547_v34 }
 0x135   : > { %v1112_v2 = vmul.f32 %v1047_v52, %v6890_v39  ;;  %v1111_v57 = vmul.f32 %v1042_v25, %v6883_v12  ;;  %2911 = vperm.xlu1 %6310, %v2869_v8   ;;  %2906 = vperm.xlu0 %6309, %v2868_v42   ;;  %8290 = vst [vmem:[#allocation55_spill] sm:$0xff] %v6908_v55  ;;  %vm517_vm5 = vcmp.ge.f32.partialorder %v485_v62, 0.0  ;;  %vm518_vm6 = vcmp.ge.f32.partialorder %v486_v43, 0.0 }
 0x136   : > { %5725 = vmatprep.mubr.msk.bf16.mxu1 %vm1139_vm8, %v1131_v31  ;;  %5854 = vmatmul.mubr.msk.bf16.gmra.mrb[12].mxu0 %vm1139_vm8, %v2611_v11  ;;  %v549_v42 = vmul.f32 %v6616_v4, %v484_v63  ;;  %v448_v8 = vmul.f32 %v6593_v50, %v409_v1  ;;  %v2872_v11 = vld [vmem:[#allocation5 + $0x528] sm:$0xff]  ;;  %v550_v50 = vmul.f32 %v6616_v4, %v485_v62 }
 0x137   : > { %v1132_v52 = vpack.c.bf16 %v1112_v2, %v1111_v57  ;;  %v6920_v2 = vsel %vm515_vm2, %v483_v47, %v548_v21  ;;  %v551_v1 = vmul.f32 %v6616_v4, %v486_v43  ;;  %v2875_v47 = vld [vmem:[#allocation5 + $0x540] sm:$0xff]  ;;  %v619_v21 = vrot.slane %v6666_v20, 7 }
 0x138   : > { %v1057_v31 = vpop.permute.xlu1 %1056  ;;  %v1052_v25 = vpop.permute.xlu0 %1051  ;;  %8291 = vst [vmem:[#allocation56_spill] sm:$0xff] %v6920_v2  ;;  %v6922_v61 = vsel %vm516_vm4, %v484_v63, %v549_v42  ;;  %v487_v57 = vadd.f32 %v6606_v59, %v448_v8  ;;  %v2874_v63 = vld [vmem:[#allocation5 + $0x538] sm:$0xff]  ;;  %v618_v59 = vrot.slane %v6640_v45, 7  ;;  %v6933_v8 = vsel %vm517_vm5, %v485_v62, %v550_v50  ;;  %v2877_v62 = vld [vmem:[#allocation5 + $0x550] sm:$0xff] }
 0x139   : > { %v1114_v56 = vmul.f32 %v1057_v31, %v6908_v55  ;;  %v1113_v34 = vmul.f32 %v1052_v25, %v6903_v7  ;;  %2921 = vperm.xlu1 %6310, %v2871_v46   ;;  %2916 = vperm.xlu0 %6309, %v2870_v53   ;;  %8292 = vst [vmem:[#allocation57_spill] sm:$0xff] %v6922_v61  ;;  %8293 = vst [vmem:[#allocation58_spill] sm:$0xff] %v6933_v8 }
 0x13a   : > { %5726 = vmatmul.mubr.msk.bf16.gmra.mrb[20].mxu1 %vm1139_vm8, %v1132_v52  ;;  %v8108_v52 = vrot.slane %v6638_v44, 7  ;;  %vm519_vm9 = vcmp.ge.f32.partialorder %v487_v57, 0.0 }
 0x13b   : > { %v1133_v54 = vpack.c.bf16 %v1114_v56, %v1113_v34  ;;  %v6935_v56 = vsel %vm518_vm6, %v486_v43, %v551_v1  ;;  %v552_v34 = vmul.f32 %v6616_v4, %v487_v57  ;;  %v2876_v43 = vld [vmem:[#allocation5 + $0x548] sm:$0xff] }
 0x13c   : > { %v1067_v31 = vpop.permute.xlu1 %1066  ;;  %v1062_v25 = vpop.permute.xlu0 %1061  ;;  %8294 = vst [vmem:[#allocation59_spill] sm:$0xff] %v6935_v56  ;;  %v6950_v50 = vsel %vm622_vm7, %v8108_v52, %v618_v59 }
 0x13d   : > { %v1116_v46 = vmul.f32 %v1067_v31, %v6922_v61  ;;  %v1115_v53 = vmul.f32 %v1062_v25, %v6920_v2  ;;  %2931 = vperm.xlu1 %6310, %v2873_v3   ;;  %2926 = vperm.xlu0 %6309, %v2872_v11   ;;  %v6943_v25 = vsel %vm622_vm7, %v618_v59, %v619_v21  ;;  %v591_v59 = vrot.slane %v6701_v13, 7 }
 0x13e   : > { %5729 = vmatprep.mubr.msk.bf16.mxu1 %vm1139_vm8, %v1133_v54  ;;  %8295 = vst [vmem:[#allocation60_spill] sm:$0xff] %v6943_v25  ;;  %8296 = vst [vmem:[#allocation61_spill] sm:$0xff] %v6950_v50  ;;  %v6952_v1 = vsel %vm519_vm9, %v487_v57, %v552_v34  ;;  %v2879_v57 = vld [vmem:[#allocation5 + $0x560] sm:$0xff]  ;;  %v2878_v34 = vld [vmem:[#allocation5 + $0x558] sm:$0xff] }
 0x13f   : > { %v1134_v42 = vpack.c.bf16 %v1116_v46, %v1115_v53  ;;  %8297 = vst [vmem:[#allocation62_spill] sm:$0xff] %v6952_v1 }
 0x140   : > { %v1077_v31 = vpop.permute.xlu1 %1076  ;;  %v1072_v3 = vpop.permute.xlu0 %1071 }
 0x141   : > { %v1118_v11 = vmul.f32 %v1077_v31, %v6935_v56  ;;  %v1117_v54 = vmul.f32 %v1072_v3, %v6933_v8  ;;  %2941 = vperm.xlu1 %6310, %v2875_v47   ;;  %2936 = vperm.xlu0 %6309, %v2874_v63   ;;  %v589_v47 = vrot.slane %v6684_v40, 7  ;;  %v848_v63 = vmul.f32 %v6535_v10, %v6943_v25  ;;  %v2882_v25 = vld [vmem:[#allocation5 + $0x578] sm:$0xff] }
 0x142   : > { %5730 = vmatmul.mubr.msk.bf16.gmra.mrb[24].mxu1 %vm1139_vm8, %v1134_v42  ;;  %v590_v3 = vrot.slane %v6693_v58, 7 }
 0x143   : > { %v1135_v4 = vpack.c.bf16 %v1118_v11, %v1117_v54  ;;  %v588_v11 = vrot.slane %v6676_v29, 7  ;;  %v847_v54 = vmul.f32 %v6531_v6, %v6950_v50  ;;  %v2881_v6 = vld [vmem:[#allocation5 + $0x570] sm:$0xff] }
 0x144   : > { %v1087_v46 = vpop.permute.xlu1 %1086  ;;  %v1082_v53 = vpop.permute.xlu0 %1081 }
 0x145   : > { %v1120_v42 = vmul.f32 %v1087_v46, %v6638_v44  ;;  %v1119_v31 = vmul.f32 %v1082_v53, %v6952_v1  ;;  %2951 = vperm.xlu1 %6310, %v2877_v62   ;;  %2946 = vperm.xlu0 %6309, %v2876_v43   ;;  %v6971_v62 = vsel %vm622_vm7, %v588_v11, %v589_v47 }
 0x146   : > { %5733 = vmatprep.mubr.msk.bf16.mxu1 %vm1139_vm8, %v1135_v4  ;;  %8298 = vst [vmem:[#allocation63_spill] sm:$0xff] %v6971_v62  ;;  %v879_v43 = vpack.c.bf16 %v848_v63, %v847_v54  ;;  %v6975_v4 = vsel %vm622_vm7, %v590_v3, %v591_v59  ;;  %v6979_v53 = vsel %vm622_vm7, %v589_v47, %v590_v3  ;;  %v592_v54 = vrot.slane %v6717_v41, 7 }
 0x147   : > { %v1136_v10 = vpack.c.bf16 %v1120_v42, %v1119_v31  ;;  %8299 = vst [vmem:[#allocation64_spill] sm:$0xff] %v6975_v4  ;;  %8300 = vst [vmem:[#allocation65_spill] sm:$0xff] %v6979_v53  ;;  %v2880_v42 = vld [vmem:[#allocation5 + $0x568] sm:$0xff]  ;;  %v6984_v31 = vsel %vm622_vm7, %v619_v21, %v588_v11  ;;  %v850_v63 = vmul.f32 %v6533_v9, %v6971_v62  ;;  %v593_v21 = vrot.slane %v6724_v48, 7 }
 0x148   : > { %v6965_v52 = vpop.permute.xlu1 %1670  ;;  %v6967_v46 = vpop.permute.xlu0 %1665  ;;  %8301 = vst [vmem:[#allocation66_spill] sm:$0xff] %v6984_v31  ;;  %v852_v47 = vmul.f32 %v6544_v14, %v6975_v4  ;;  %v851_v3 = vmul.f32 %v6546_v15, %v6979_v53  ;;  %v849_v11 = vmul.f32 %v6529_v5, %v6984_v31  ;;  %v594_v9 = vrot.slane %v6741_v33, 7 }
 0x149   : > { %2961 = vperm.xlu1 %6310, %v2879_v57   ;;  %2956 = vperm.xlu0 %6309, %v2878_v34   ;;  %v1922_v15 = vsel %vm1188_vm0, %v6714_v24, 0  ;;  %v7015_v5 = vsel %vm622_vm7, %v591_v59, %v592_v54  ;;  %v2884_v59 = vld [vmem:[#allocation5 + $0x588] sm:$0xff] }
 0x14a   : > { %5734 = vmatmul.mubr.msk.bf16.gmra.mrb[28].mxu1 %vm1139_vm8, %v1136_v10  ;;  %v595_v10 = vrot.slane %v6744_v16, 7  ;;  %v880_v50 = vpack.c.bf16 %v850_v63, %v849_v11  ;;  %v881_v53 = vpack.c.bf16 %v852_v47, %v851_v3  ;;  %8303 = vst [vmem:[#allocation68_spill] sm:$0xff] %v7015_v5  ;;  %v7028_v24 = vsel %vm622_vm7, %v593_v21, %v594_v9  ;;  %v2885_v47 = vld [vmem:[#allocation5 + $0x590] sm:$0xff] }
 0x14b   : > { %5739 = vmatprep.mubr.msk.bf16.mxu1 %vm1139_vm8, %v879_v43  ;;  %v2883_v43 = vld [vmem:[#allocation5 + $0x580] sm:$0xff]  ;;  %8305 = vst [vmem:[#allocation70_spill] sm:$0xff] %v7028_v24 }
 0x14c   : > { %v6989_v57 = vpop.permute.xlu1 %1680  ;;  %v6991_v34 = vpop.permute.xlu0 %1675  ;;  %v7024_v63 = vsel %vm622_vm7, %v594_v9, %v595_v10  ;;  %v598_v9 = vrot.slane %v6779_v0, 7 }
 0x14d   : > { %2971 = vperm.xlu1 %6310, %v2881_v6   ;;  %2966 = vperm.xlu0 %6309, %v2880_v42   ;;  %v7011_v6 = vsel %vm622_vm7, %v592_v54, %v593_v21  ;;  %v7020_v42 = vld [vmem:[%s8092_s4 + $0xc] sm:$0xf]  ;;  %8304 = vst [vmem:[#allocation69_spill] sm:$0xff] %v7024_v63  ;;  %v853_v54 = vmul.f32 %v6550_v19, %v7015_v5  ;;  %v597_v19 = vrot.slane %v6749_v60, 7  ;;  %v2886_v5 = vld [vmem:[#allocation5 + $0x598] sm:$0xff] }
 0x14e   : > { %8302 = vst [vmem:[#allocation67_spill] sm:$0xff] %v7011_v6  ;;  %v854_v3 = vmul.f32 %v6548_v18, %v7011_v6  ;;  %v596_v18 = vrot.slane %v6747_v49, 7 }
 0x150   : > { %v7003_v14 = vpop.permute.xlu1 %1690  ;;  %v7005_v4 = vpop.permute.xlu0 %1685  ;;  %v882_v6 = vpack.c.bf16 %v854_v3, %v853_v54  ;;  %v7075_v3 = vsel %vm622_vm7, %v597_v19, %v598_v9  ;;  %v2889_v54 = vld [vmem:[#allocation5 + $0x5b0] sm:$0xff] }
 0x151   : > { %2981 = vperm.xlu1 %6310, %v2883_v43   ;;  %2976 = vperm.xlu0 %6309, %v2882_v25   ;;  %v7035_v25 = vld [vmem:[%s8092_s4 + $0x18] sm:$0xf]  ;;  %v599_v43 = vrot.slane %v6786_v17, 7  ;;  %8310 = vst [vmem:[#allocation75_spill] sm:$0xff] %v7075_v3 }
 0x152   : > { %5740 = vmatmul.mubr.msk.bf16.vlgmr.msra.gmra.mrb[0].mxu1 %vm1139_vm8, %v880_v50  ;;  %8306 = vst [vmem:[#allocation71_spill] sm:$0xff] %v7035_v25  ;;  %6274 = vmatprep.subr.msk.bf16.mxu0 %vm1188_vm0, %v7035_v25  ;;  %v856_v50 = vmul.f32 %v6552_v22, %v7024_v63 }
 0x153   : > { %5743 = vmatprep.mubr.msk.bf16.mxu1 %vm1139_vm8, %v881_v53  ;;  %5772 = vmatpush3.bf16.msra.mxu1 %v1922_v15  ;;  %v855_v53 = vmul.f32 %v6554_v23, %v7028_v24  ;;  %v2887_v15 = vld [vmem:[#allocation5 + $0x5a0] sm:$0xff]  ;;  %v7063_v23 = vsel %vm622_vm7, %v596_v18, %v597_v19 }
 0x154   : > { %v7041_v21 = vpop.permute.xlu1 %1700  ;;  %v7043_v11 = vpop.permute.xlu0 %1695  ;;  %6270 = vmatprep.subr.msk.bf16.mxu1 %vm1188_vm0, %v7020_v42  ;;  %8307 = vst [vmem:[#allocation72_spill] sm:$0xff] %v7063_v23 }
 0x155   : > { %2991 = vperm.xlu1 %6310, %v2885_v47   ;;  %2986 = vperm.xlu0 %6309, %v2884_v59   ;;  %v883_v22 = vpack.c.bf16 %v856_v50, %v855_v53  ;;  %v7067_v47 = vsel %vm622_vm7, %v595_v10, %v596_v18  ;;  %v7071_v59 = vsel %vm622_vm7, %v598_v9, %v599_v43  ;;  %v2888_v50 = vld [vmem:[#allocation5 + $0x5a8] sm:$0xff]  ;;  %v8311_v9 = vld [vmem:[#allocation9_spill] sm:$0xff] }
 0x156   : > { %8308 = vst [vmem:[#allocation73_spill] sm:$0xff] %v7067_v47  ;;  %8309 = vst [vmem:[#allocation74_spill] sm:$0xff] %v7071_v59  ;;  %v858_v10 = vmul.f32 %v6556_v26, %v7063_v23  ;;  %v860_v19 = vmul.f32 %v6560_v30, %v7071_v59  ;;  %v602_v26 = vrot.slane %v6827_v51, 7  ;;  %v2890_v23 = vld [vmem:[#allocation5 + $0x5b8] sm:$0xff] }
 0x157   : > { %v8321_v59 = vld [vmem:[#allocation12_spill] sm:$0xff] }
 0x158   : > { %v7057_v31 = vpop.permute.xlu1 %1710  ;;  %v7059_v62 = vpop.permute.xlu0 %1705 }
 0x159   : > { %3001 = vperm.xlu1 %6310, %v2887_v15   ;;  %2996 = vperm.xlu0 %6309, %v2886_v5   ;;  %v857_v5 = vmul.f32 %v6558_v27, %v7067_v47  ;;  %v600_v15 = vrot.slane %v6798_v32, 7  ;;  %v603_v27 = vrot.slane %v6830_v28, 7  ;;  %v2891_v47 = vld [vmem:[#allocation5 + $0x5c0] sm:$0xff]  ;;  %v8323_v28 = vld [vmem:[#allocation48_spill] sm:$0xff] }
 0x15a   : > { %5744 = vmatmul.mubr.msk.bf16.gmra.mrb[4].mxu1 %vm1139_vm8, %v882_v6  ;;  %v859_v6 = vmul.f32 %v8311_v9, %v7075_v3  ;;  %v604_v51 = vrot.slane %v8323_v28, 7 }
 0x15b   : > { %5747 = vmatprep.mubr.msk.bf16.mxu1 %vm1139_vm8, %v883_v22  ;;  %v601_v22 = vrot.slane %v6804_v36, 7  ;;  %v884_v24 = vpack.c.bf16 %v858_v10, %v857_v5  ;;  %v2893_v5 = vld [vmem:[#allocation5 + $0x5d0] sm:$0xff]  ;;  %v8324_v36 = vld [vmem:[#allocation49_spill] sm:$0xff] }
 0x15c   : > { %v7083_v53 = vpop.permute.xlu1 %1720  ;;  %v7085_v18 = vpop.permute.xlu0 %1715  ;;  %v885_v30 = vpack.c.bf16 %v860_v19, %v859_v6  ;;  %v2892_v19 = vld [vmem:[#allocation5 + $0x5c8] sm:$0xff] }
 0x15d   : > { %3011 = vperm.xlu1 %6310, %v2889_v54   ;;  %3006 = vperm.xlu0 %6309, %v2888_v50   ;;  %v7101_v9 = vsel %vm622_vm7, %v600_v15, %v601_v22  ;;  %v7105_v54 = vsel %vm622_vm7, %v599_v43, %v600_v15  ;;  %v7109_v50 = vsel %vm622_vm7, %v602_v26, %v603_v27  ;;  %v8317_v6 = vld [vmem:[#allocation10_spill] sm:$0xff] }
 0x15e   : > { %8313 = vst [vmem:[#allocation76_spill] sm:$0xff] %v7101_v9  ;;  %8314 = vst [vmem:[#allocation77_spill] sm:$0xff] %v7105_v54  ;;  %v7113_v10 = vsel %vm622_vm7, %v601_v22, %v602_v26  ;;  %v862_v43 = vmul.f32 %v8317_v6, %v7101_v9  ;;  %v864_v22 = vmul.f32 %v8321_v59, %v7109_v50  ;;  %v8322_v26 = vld [vmem:[#allocation13_spill] sm:$0xff]  ;;  %v606_v6 = vrot.slane %v6871_v35, 7  ;;  %v2894_v9 = vld [vmem:[#allocation5 + $0x5d8] sm:$0xff] }
 0x15f   : > { %8315 = vst [vmem:[#allocation78_spill] sm:$0xff] %v7109_v50  ;;  %8316 = vst [vmem:[#allocation79_spill] sm:$0xff] %v7113_v10  ;;  %v8333_v50 = vld [vmem:[#allocation16_spill] sm:$0xff] }
 0x160   : > { %v7095_v63 = vpop.permute.xlu1 %1730  ;;  %v7097_v25 = vpop.permute.xlu0 %1725 }
 0x161   : > { %8312 = vst [vmem:[#allocation9_spill] sm:$0xff] %v7097_v25  ;;  %3021 = vperm.xlu1 %6310, %v2891_v47   ;;  %3016 = vperm.xlu0 %6309, %v2890_v23   ;;  %v8318_v47 = vld [vmem:[#allocation11_spill] sm:$0xff] }
 0x162   : > { %5748 = vmatmul.mubr.msk.bf16.gmra.mrb[8].mxu1 %vm1139_vm8, %v884_v24  ;;  %v861_v23 = vmul.f32 %v8318_v47, %v7105_v54  ;;  %v863_v24 = vmul.f32 %v8322_v26, %v7113_v10  ;;  %v607_v47 = vrot.slane %v6874_v38, 7  ;;  %v2895_v54 = vld [vmem:[#allocation5 + $0x5e0] sm:$0xff]  ;;  %v608_v38 = vrot.slane %v6883_v12, 7 }
 0x163   : > { %5751 = vmatprep.mubr.msk.bf16.mxu1 %vm1139_vm8, %v885_v30  ;;  %v605_v30 = vrot.slane %v8324_v36, 7 }
 0x164   : > { %v7121_v15 = vpop.permute.xlu1 %1740  ;;  %v7123_v3 = vpop.permute.xlu0 %1735  ;;  %v887_v59 = vpack.c.bf16 %v864_v22, %v863_v24  ;;  %v2896_v22 = vld [vmem:[#allocation5 + $0x5e8] sm:$0xff] }
 0x165   : > { %8319 = vst [vmem:[#allocation10_spill] sm:$0xff] %v7121_v15  ;;  %8320 = vst [vmem:[#allocation11_spill] sm:$0xff] %v7123_v3  ;;  %3031 = vperm.xlu1 %6310, %v2893_v5   ;;  %3026 = vperm.xlu0 %6309, %v2892_v19   ;;  %v886_v15 = vpack.c.bf16 %v862_v43, %v861_v23  ;;  %v7139_v26 = vsel %vm622_vm7, %v604_v51, %v605_v30  ;;  %v2897_v23 = vld [vmem:[#allocation5 + $0x5f0] sm:$0xff]  ;;  %v8329_v24 = vld [vmem:[#allocation14_spill] sm:$0xff] }
 0x166   : > { %8325 = vst [vmem:[#allocation12_spill] sm:$0xff] %v7139_v26  ;;  %v7143_v5 = vsel %vm622_vm7, %v603_v27, %v604_v51  ;;  %v7147_v19 = vsel %vm622_vm7, %v606_v6, %v607_v47  ;;  %v7151_v43 = vsel %vm622_vm7, %v605_v30, %v606_v6  ;;  %v866_v51 = vmul.f32 %v8329_v24, %v7139_v26  ;;  %v8330_v27 = vld [vmem:[#allocation15_spill] sm:$0xff]  ;;  %v8334_v6 = vld [vmem:[#allocation17_spill] sm:$0xff]  ;;  %v2898_v26 = vld [vmem:[#allocation5 + $0x5f8] sm:$0xff] }
 0x167   : > { %8326 = vst [vmem:[#allocation13_spill] sm:$0xff] %v7143_v5  ;;  %8327 = vst [vmem:[#allocation80_spill] sm:$0xff] %v7147_v19  ;;  %v868_v30 = vmul.f32 %v8333_v50, %v7147_v19  ;;  %v610_v24 = vrot.slane %v6903_v7, 7  ;;  %v8344_v19 = vld [vmem:[#allocation20_spill] sm:$0xff] }
 0x168   : > { %v7133_v3 = vpop.permute.xlu1 %1750  ;;  %v7135_v25 = vpop.permute.xlu0 %1745  ;;  %8328 = vst [vmem:[#allocation81_spill] sm:$0xff] %v7151_v43 }
 0x169   : > { %3041 = vperm.xlu1 %6310, %v2895_v54   ;;  %3036 = vperm.xlu0 %6309, %v2894_v9   ;;  %v865_v9 = vmul.f32 %v8330_v27, %v7143_v5  ;;  %v611_v27 = vrot.slane %v6908_v55, 7  ;;  %v3354_v5 = vld [vmem:[#allocation5 + $0x600] sm:$0xff]  ;;  %v612_v55 = vrot.slane %v6920_v2, 7 }
 0x16a   : > { %5752 = vmatmul.mubr.msk.bf16.gmra.mrb[12].mxu1 %vm1139_vm8, %v886_v15  ;;  %v867_v15 = vmul.f32 %v8334_v6, %v7151_v43 }
 0x16b   : > { %5755 = vmatprep.mubr.msk.bf16.mxu1 %vm1139_vm8, %v887_v59  ;;  %v609_v59 = vrot.slane %v6890_v39, 7 }
 0x16c   : > { %v7159_v54 = vpop.permute.xlu1 %1760  ;;  %v7161_v10 = vpop.permute.xlu0 %1755  ;;  %v889_v50 = vpack.c.bf16 %v868_v30, %v867_v15  ;;  %v3355_v30 = vld [vmem:[#allocation5 + $0x608] sm:$0xff] }
 0x16d   : > { %8331 = vst [vmem:[#allocation14_spill] sm:$0xff] %v7159_v54  ;;  %8332 = vst [vmem:[#allocation15_spill] sm:$0xff] %v7161_v10  ;;  %3051 = vperm.xlu1 %6310, %v2897_v23   ;;  %3046 = vperm.xlu0 %6309, %v2896_v22   ;;  %v888_v54 = vpack.c.bf16 %v866_v51, %v865_v9  ;;  %v7177_v6 = vsel %vm622_vm7, %v608_v38, %v609_v59  ;;  %v3356_v9 = vld [vmem:[#allocation5 + $0x610] sm:$0xff]  ;;  %v8340_v15 = vld [vmem:[#allocation18_spill] sm:$0xff] }
 0x16e   : > { %8336 = vst [vmem:[#allocation17_spill] sm:$0xff] %v7177_v6  ;;  %v7181_v23 = vsel %vm622_vm7, %v607_v47, %v608_v38  ;;  %v7185_v22 = vsel %vm622_vm7, %v610_v24, %v611_v27  ;;  %v7189_v51 = vsel %vm622_vm7, %v609_v59, %v610_v24  ;;  %v870_v38 = vmul.f32 %v8340_v15, %v7177_v6  ;;  %v8341_v47 = vld [vmem:[#allocation19_spill] sm:$0xff]  ;;  %v8345_v24 = vld [vmem:[#allocation21_spill] sm:$0xff] }
 0x16f   : > { %8337 = vst [vmem:[#allocation82_spill] sm:$0xff] %v7181_v23  ;;  %8338 = vst [vmem:[#allocation83_spill] sm:$0xff] %v7185_v22  ;;  %v872_v59 = vmul.f32 %v8344_v19, %v7185_v22  ;;  %v614_v15 = vrot.slane %v6933_v8, 7  ;;  %v3358_v6 = vld [vmem:[#allocation5 + $0x620] sm:$0xff] }
 0x170   : > { %v7171_v10 = vpop.permute.xlu1 %1770  ;;  %v7173_v35 = vpop.permute.xlu0 %1765  ;;  %8339 = vst [vmem:[#allocation84_spill] sm:$0xff] %v7189_v51 }
 0x171   : > { %8335 = vst [vmem:[#allocation16_spill] sm:$0xff] %v7173_v35  ;;  %3388 = vperm.xlu1 %6310, %v3354_v5   ;;  %3056 = vperm.xlu0 %6309, %v2898_v26   ;;  %v869_v26 = vmul.f32 %v8341_v47, %v7181_v23  ;;  %v615_v47 = vrot.slane %v6935_v56, 7  ;;  %v3357_v23 = vld [vmem:[#allocation5 + $0x618] sm:$0xff] }
 0x172   : > { %5756 = vmatmul.mubr.msk.bf16.gmra.mrb[16].mxu1 %vm1139_vm8, %v888_v54  ;;  %v871_v54 = vmul.f32 %v8345_v24, %v7189_v51  ;;  %v8356_v51 = vld [vmem:[#allocation24_spill] sm:$0xff] }
 0x173   : > { %5759 = vmatprep.mubr.msk.bf16.mxu1 %vm1139_vm8, %v889_v50  ;;  %v613_v50 = vrot.slane %v6922_v61, 7 }
 0x174   : > { %v7197_v5 = vpop.permute.xlu1 %1780  ;;  %v7199_v43 = vpop.permute.xlu0 %1775  ;;  %v891_v19 = vpack.c.bf16 %v872_v59, %v871_v54  ;;  %v3359_v59 = vld [vmem:[#allocation5 + $0x628] sm:$0xff] }
 0x175   : > { %8342 = vst [vmem:[#allocation18_spill] sm:$0xff] %v7197_v5  ;;  %8343 = vst [vmem:[#allocation19_spill] sm:$0xff] %v7199_v43  ;;  %3398 = vperm.xlu1 %6310, %v3356_v9   ;;  %3393 = vperm.xlu0 %6309, %v3355_v30   ;;  %v890_v5 = vpack.c.bf16 %v870_v38, %v869_v26  ;;  %v7215_v24 = vsel %vm622_vm7, %v612_v55, %v613_v50  ;;  %v3360_v26 = vld [vmem:[#allocation5 + $0x630] sm:$0xff]  ;;  %v8352_v54 = vld [vmem:[#allocation22_spill] sm:$0xff] }
 0x176   : > { %8348 = vst [vmem:[#allocation85_spill] sm:$0xff] %v7215_v24  ;;  %v7219_v9 = vsel %vm622_vm7, %v611_v27, %v612_v55  ;;  %v7223_v30 = vsel %vm622_vm7, %v614_v15, %v615_v47  ;;  %v7227_v38 = vsel %vm622_vm7, %v613_v50, %v614_v15  ;;  %v874_v55 = vmul.f32 %v8352_v54, %v7215_v24  ;;  %v8353_v27 = vld [vmem:[#allocation23_spill] sm:$0xff]  ;;  %v8357_v15 = vld [vmem:[#allocation25_spill] sm:$0xff] }
 0x177   : > { %8349 = vst [vmem:[#allocation86_spill] sm:$0xff] %v7219_v9  ;;  %8350 = vst [vmem:[#allocation87_spill] sm:$0xff] %v7223_v30  ;;  %v876_v50 = vmul.f32 %v8356_v51, %v7223_v30  ;;  %v1596_v54 = vrot.slane %v6666_v20, 1  ;;  %v3362_v24 = vld [vmem:[#allocation5 + $0x640] sm:$0xff]  ;;  %v8358_v51 = vrot.slane %v6638_v44, 7 }
 0x178   : > { %v7209_v43 = vpop.permute.xlu1 %1790  ;;  %v7211_v35 = vpop.permute.xlu0 %1785  ;;  %8351 = vst [vmem:[#allocation88_spill] sm:$0xff] %v7227_v38  ;;  %v3366_v20 = vld [vmem:[#allocation5 + $0x660] sm:$0xff] }
 0x179   : > { %8346 = vst [vmem:[#allocation20_spill] sm:$0xff] %v7209_v43  ;;  %8347 = vst [vmem:[#allocation21_spill] sm:$0xff] %v7211_v35  ;;  %3408 = vperm.xlu1 %6310, %v3358_v6   ;;  %3403 = vperm.xlu0 %6309, %v3357_v23   ;;  %v873_v6 = vmul.f32 %v8353_v27, %v7219_v9  ;;  %v616_v35 = vrot.slane %v6952_v1, 7  ;;  %v3361_v27 = vld [vmem:[#allocation5 + $0x638] sm:$0xff] }
 0x17a   : > { %5760 = vmatmul.mubr.msk.bf16.gmra.mrb[20].mxu1 %vm1139_vm8, %v890_v5  ;;  %v875_v5 = vmul.f32 %v8357_v15, %v7227_v38 }
 0x17b   : > { %5763 = vmatprep.mubr.msk.bf16.mxu1 %vm1139_vm8, %v891_v19  ;;  %v1565_v19 = vrot.slane %v6676_v29, 1  ;;  %v892_v9 = vpack.c.bf16 %v874_v55, %v873_v6  ;;  %v7254_v15 = vsel %vm622_vm7, %v616_v35, %v8358_v51  ;;  %v8362_v55 = vrot.slane %v6640_v45, 1  ;;  %v3365_v45 = vld [vmem:[#allocation5 + $0x658] sm:$0xff] }
 0x17c   : > { %v7235_v23 = vpop.permute.xlu1 %1800  ;;  %v7237_v22 = vpop.permute.xlu0 %1795  ;;  %v893_v43 = vpack.c.bf16 %v876_v50, %v875_v5  ;;  %8359 = vst [vmem:[#allocation24_spill] sm:$0xff] %v7254_v15  ;;  %v3364_v50 = vld [vmem:[#allocation5 + $0x650] sm:$0xff]  ;;  %v3363_v5 = vld [vmem:[#allocation5 + $0x648] sm:$0xff] }
 0x17d   : > { %8354 = vst [vmem:[#allocation22_spill] sm:$0xff] %v7235_v23  ;;  %8355 = vst [vmem:[#allocation23_spill] sm:$0xff] %v7237_v22  ;;  %3418 = vperm.xlu1 %6310, %v3360_v26   ;;  %3413 = vperm.xlu0 %6309, %v3359_v59   ;;  %v7258_v26 = vsel %vm622_vm7, %v615_v47, %v616_v35  ;;  %v7262_v59 = vsel %vm1597_vm3, %v1596_v54, %v1565_v19  ;;  %v8364_v35 = vld [vmem:[#allocation27_spill] sm:$0xff] }
 0x17e   : > { %8360 = vst [vmem:[#allocation25_spill] sm:$0xff] %v7258_v26  ;;  %8361 = vst [vmem:[#allocation89_spill] sm:$0xff] %v7262_v59  ;;  %v7268_v6 = vsel %vm1597_vm3, %v8362_v55, %v1596_v54  ;;  %v878_v47 = vmul.f32 %v8364_v35, %v7254_v15  ;;  %v1824_v54 = vmul.f32 %v6965_v52, %v7262_v59  ;;  %v1566_v55 = vrot.slane %v6684_v40, 1  ;;  %v3369_v40 = vld [vmem:[#allocation5 + $0x678] sm:$0xff] }
 0x17f   : > { %8363 = vst [vmem:[#allocation90_spill] sm:$0xff] %v7268_v6  ;;  %v1568_v35 = vrot.slane %v6701_v13, 1 }
 0x180   : > { %v7246_v23 = vpop.permute.xlu1 %1810  ;;  %v7248_v22 = vpop.permute.xlu0 %1805 }
 0x181   : > { %3428 = vperm.xlu1 %6310, %v3362_v24   ;;  %3423 = vperm.xlu0 %6309, %v3361_v27   ;;  %v8365_v24 = vld [vmem:[#allocation28_spill] sm:$0xff] }
 0x182   : > { %5764 = vmatmul.mubr.msk.bf16.gmra.mrb[24].mxu1 %vm1139_vm8, %v892_v9  ;;  %v877_v27 = vmul.f32 %v8365_v24, %v7258_v26  ;;  %v1823_v9 = vmul.f32 %v6967_v46, %v7268_v6  ;;  %v1569_v24 = vrot.slane %v6717_v41, 1 }
 0x183   : > { %5767 = vmatprep.mubr.msk.bf16.mxu1 %vm1139_vm8, %v893_v43  ;;  %v1567_v43 = vrot.slane %v6693_v58, 1 }
 0x184   : > { %v7276_v51 = vpop.permute.xlu1 %1820  ;;  %v7278_v29 = vpop.permute.xlu0 %1815  ;;  %v894_v15 = vpack.c.bf16 %v878_v47, %v877_v27  ;;  %v1855_v52 = vpack.c.bf16 %v1824_v54, %v1823_v9  ;;  %v3368_v27 = vld [vmem:[#allocation5 + $0x670] sm:$0xff]  ;;  %v3367_v54 = vld [vmem:[#allocation5 + $0x668] sm:$0xff] }
 0x185   : > { %3438 = vperm.xlu1 %6310, %v3364_v50   ;;  %3433 = vperm.xlu0 %6309, %v3363_v5   ;;  %v7294_v46 = vsel %vm1597_vm3, %v1566_v55, %v1567_v43  ;;  %v7298_v50 = vsel %vm1597_vm3, %v1565_v19, %v1566_v55  ;;  %v7302_v5 = vsel %vm1597_vm3, %v1568_v35, %v1569_v24 }
 0x186   : > { %8366 = vst [vmem:[#allocation27_spill] sm:$0xff] %v7294_v46  ;;  %8367 = vst [vmem:[#allocation28_spill] sm:$0xff] %v7298_v50  ;;  %v7306_v47 = vsel %vm1597_vm3, %v1567_v43, %v1568_v35  ;;  %v1826_v19 = vmul.f32 %v6989_v57, %v7294_v46  ;;  %v1828_v55 = vmul.f32 %v7003_v14, %v7302_v5  ;;  %v1570_v43 = vrot.slane %v6724_v48, 1  ;;  %v3377_v48 = vld [vmem:[#allocation5 + $0x6b8] sm:$0xff] }
 0x187   : > { %v1571_v35 = vrot.slane %v6741_v33, 1  ;;  %v1572_v57 = vrot.slane %v6744_v16, 1 }
 0x188   : > { %v7288_v26 = vpop.permute.xlu1 %2157  ;;  %v7290_v30 = vpop.permute.xlu0 %2152 }
 0x189   : > { %3448 = vperm.xlu1 %6310, %v3366_v20   ;;  %3443 = vperm.xlu0 %6309, %v3365_v45   ;;  %v1825_v45 = vmul.f32 %v6991_v34, %v7298_v50  ;;  %v1573_v34 = vrot.slane %v6747_v49, 1  ;;  %v7334_v33 = vsel %vm1597_vm3, %v1570_v43, %v1571_v35 }
 0x18a   : > { %5768 = vmatmul.mubr.msk.bf16.gmra.mrb[28].mxu1 %vm1139_vm8, %v894_v15  ;;  %v1827_v15 = vmul.f32 %v7005_v4, %v7306_v47  ;;  %v2409_v4 = vsel %vm1188_vm0, %v7020_v42, 0  ;;  %v3372_v42 = vld [vmem:[#allocation5 + $0x690] sm:$0xff] }
 0x18b   : > { %5773 = vmatprep.mubr.msk.bf16.mxu1 %vm1139_vm8, %v1855_v52  ;;  %v3370_v52 = vld [vmem:[#allocation5 + $0x680] sm:$0xff]  ;;  %v1856_v41 = vpack.c.bf16 %v1826_v19, %v1825_v45  ;;  %v7346_v19 = vsel %vm1597_vm3, %v1571_v35, %v1572_v57  ;;  %v3371_v45 = vld [vmem:[#allocation5 + $0x688] sm:$0xff] }
 0x18c   : > { %v7314_v20 = vpop.permute.xlu1 %2167  ;;  %v7316_v9 = vpop.permute.xlu0 %2162  ;;  %v1857_v14 = vpack.c.bf16 %v1828_v55, %v1827_v15  ;;  %v1831_v35 = vmul.f32 %v7059_v62, %v7346_v19 }
 0x18d   : > { %3458 = vperm.xlu1 %6310, %v3368_v27   ;;  %3453 = vperm.xlu0 %6309, %v3367_v54   ;;  %v7338_v27 = vsel %vm1597_vm3, %v1569_v24, %v1570_v43  ;;  %v7342_v54 = vsel %vm1597_vm3, %v1572_v57, %v1573_v34  ;;  %v1830_v24 = vmul.f32 %v7041_v21, %v7334_v33  ;;  %v6311_v43 = vld [vmem:[%s8092_s4 + $0x10] sm:$0xf]  ;;  %v1574_v21 = vrot.slane %v6749_v60, 1  ;;  %v3378_v60 = vld [vmem:[#allocation5 + $0x6c0] sm:$0xff] }
 0x18e   : > { %v1576_v57 = vrot.slane %v6786_v17, 1  ;;  %v8370_v17 = vld [vmem:[#allocation46_spill] sm:$0xff] }
 0x190   : > { %v7326_v13 = vpop.permute.xlu1 %2177  ;;  %v7328_v58 = vpop.permute.xlu0 %2172 }
 0x191   : > { %3468 = vperm.xlu1 %6310, %v3370_v52   ;;  %3463 = vperm.xlu0 %6309, %v3369_v40   ;;  %v1829_v40 = vmul.f32 %v7043_v11, %v7338_v27  ;;  %v1575_v11 = vrot.slane %v6779_v0, 1  ;;  %v1577_v52 = vrot.slane %v6798_v32, 1 }
 0x192   : > { %5774 = vmatmul.mubr.msk.bf16.vlgmr.msra.gmra.mrb[0].mxu1 %vm1139_vm8, %v1856_v41  ;;  %v1832_v41 = vmul.f32 %v7057_v31, %v7342_v54 }
 0x193   : > { %5777 = vmatprep.mubr.msk.bf16.mxu1 %vm1139_vm8, %v1857_v14  ;;  %5806 = vmatpush3.bf16.msra.mxu1 %v2409_v4  ;;  %v3374_v4 = vld [vmem:[#allocation5 + $0x6a0] sm:$0xff]  ;;  %v3373_v14 = vld [vmem:[#allocation5 + $0x698] sm:$0xff]  ;;  %v1858_v49 = vpack.c.bf16 %v1830_v24, %v1829_v40  ;;  %v7376_v62 = vsel %vm1597_vm3, %v1574_v21, %v1575_v11  ;;  %v7388_v24 = vsel %vm1597_vm3, %v1575_v11, %v1576_v57  ;;  %v3376_v40 = vld [vmem:[#allocation5 + $0x6b0] sm:$0xff] }
 0x194   : > { %v7354_v55 = vpop.permute.xlu1 %2187  ;;  %v7356_v15 = vpop.permute.xlu0 %2182  ;;  %6272 = vmatprep.subr.msk.bf16.mxu1 %vm1188_vm0, %v6311_v43  ;;  %v1859_v31 = vpack.c.bf16 %v1832_v41, %v1831_v35  ;;  %v3375_v41 = vld [vmem:[#allocation5 + $0x6a8] sm:$0xff] }
 0x195   : > { %3478 = vperm.xlu1 %6310, %v3372_v42   ;;  %3473 = vperm.xlu0 %6309, %v3371_v45   ;;  %v7380_v42 = vsel %vm1597_vm3, %v1573_v34, %v1574_v21  ;;  %v7384_v45 = vsel %vm1597_vm3, %v1576_v57, %v1577_v52  ;;  %v1834_v34 = vmul.f32 %v7083_v53, %v7376_v62  ;;  %v8368_v57 = vld [vmem:[#allocation9_spill] sm:$0xff]  ;;  %v8371_v53 = vld [vmem:[#allocation47_spill] sm:$0xff] }
 0x196   : > { %v1833_v35 = vmul.f32 %v7085_v18, %v7380_v42  ;;  %v1836_v11 = vmul.f32 %v7095_v63, %v7384_v45  ;;  %v1580_v0 = vrot.slane %v8371_v53, 1  ;;  %v1581_v18 = vrot.slane %v8323_v28, 1  ;;  %v8378_v53 = vld [vmem:[#allocation50_spill] sm:$0xff] }
 0x198   : > { %v7370_v43 = vpop.permute.xlu1 %2197  ;;  %v7372_v16 = vpop.permute.xlu0 %2192  ;;  %v1860_v38 = vpack.c.bf16 %v1834_v34, %v1833_v35  ;;  %v3380_v35 = vld [vmem:[#allocation5 + $0x6d0] sm:$0xff] }
 0x199   : > { %3488 = vperm.xlu1 %6310, %v3374_v4   ;;  %3483 = vperm.xlu0 %6309, %v3373_v14   ;;  %v8369_v14 = vld [vmem:[#allocation45_spill] sm:$0xff] }
 0x19a   : > { %5778 = vmatmul.mubr.msk.bf16.gmra.mrb[4].mxu1 %vm1139_vm8, %v1858_v49  ;;  %v1835_v49 = vmul.f32 %v8368_v57, %v7388_v24  ;;  %v1578_v32 = vrot.slane %v8369_v14, 1  ;;  %v3382_v14 = vld [vmem:[#allocation5 + $0x6e0] sm:$0xff] }
 0x19b   : > { %5781 = vmatprep.mubr.msk.bf16.mxu1 %vm1139_vm8, %v1859_v31  ;;  %v1579_v31 = vrot.slane %v8370_v17, 1 }
 0x19c   : > { %v7396_v21 = vpop.permute.xlu1 %2207  ;;  %v7398_v4 = vpop.permute.xlu0 %2202  ;;  %v1861_v63 = vpack.c.bf16 %v1836_v11, %v1835_v49  ;;  %v3379_v11 = vld [vmem:[#allocation5 + $0x6c8] sm:$0xff] }
 0x19d   : > { %3498 = vperm.xlu1 %6310, %v3376_v40   ;;  %3493 = vperm.xlu0 %6309, %v3375_v41   ;;  %v7414_v57 = vsel %vm1597_vm3, %v1578_v32, %v1579_v31  ;;  %v7418_v40 = vsel %vm1597_vm3, %v1577_v52, %v1578_v32  ;;  %v7422_v41 = vsel %vm1597_vm3, %v1580_v0, %v1581_v18  ;;  %v8374_v49 = vld [vmem:[#allocation10_spill] sm:$0xff] }
 0x19e   : > { %v7426_v34 = vsel %vm1597_vm3, %v1579_v31, %v1580_v0  ;;  %v1838_v32 = vmul.f32 %v8374_v49, %v7414_v57  ;;  %v1840_v0 = vmul.f32 %v7133_v3, %v7422_v41  ;;  %v1582_v31 = vrot.slane %v8324_v36, 1  ;;  %v8379_v49 = vld [vmem:[#allocation51_spill] sm:$0xff] }
 0x19f   : > { %v1584_v17 = vrot.slane %v8379_v49, 1 }
 0x1a0   : > { %v7408_v59 = vpop.permute.xlu1 %2217  ;;  %v7410_v6 = vpop.permute.xlu0 %2212 }
 0x1a1   : > { %8372 = vst [vmem:[#allocation9_spill] sm:$0xff] %v7408_v59  ;;  %8373 = vst [vmem:[#allocation91_spill] sm:$0xff] %v7410_v6  ;;  %3508 = vperm.xlu1 %6310, %v3378_v60   ;;  %3503 = vperm.xlu0 %6309, %v3377_v48   ;;  %v8375_v60 = vld [vmem:[#allocation11_spill] sm:$0xff] }
 0x1a2   : > { %5782 = vmatmul.mubr.msk.bf16.gmra.mrb[8].mxu1 %vm1139_vm8, %v1860_v38  ;;  %v1837_v48 = vmul.f32 %v8375_v60, %v7418_v40  ;;  %v1839_v38 = vmul.f32 %v7135_v25, %v7426_v34  ;;  %v1585_v60 = vrot.slane %v6883_v12, 1  ;;  %v1587_v12 = vrot.slane %v6903_v7, 1 }
 0x1a3   : > { %5785 = vmatprep.mubr.msk.bf16.mxu1 %vm1139_vm8, %v1861_v63  ;;  %v1583_v63 = vrot.slane %v8378_v53, 1  ;;  %v8389_v53 = vld [vmem:[#allocation55_spill] sm:$0xff] }
 0x1a4   : > { %v7434_v52 = vpop.permute.xlu1 %2227  ;;  %v7436_v28 = vpop.permute.xlu0 %2222  ;;  %v1862_v6 = vpack.c.bf16 %v1838_v32, %v1837_v48  ;;  %v1863_v3 = vpack.c.bf16 %v1840_v0, %v1839_v38  ;;  %v3384_v48 = vld [vmem:[#allocation5 + $0x6f0] sm:$0xff]  ;;  %v3383_v0 = vld [vmem:[#allocation5 + $0x6e8] sm:$0xff]  ;;  %v1588_v36 = vrot.slane %v8389_v53, 1 }
 0x1a5   : > { %8376 = vst [vmem:[#allocation10_spill] sm:$0xff] %v7434_v52  ;;  %8377 = vst [vmem:[#allocation11_spill] sm:$0xff] %v7436_v28  ;;  %3518 = vperm.xlu1 %6310, %v3380_v35   ;;  %3513 = vperm.xlu0 %6309, %v3379_v11   ;;  %v3381_v52 = vld [vmem:[#allocation5 + $0x6d8] sm:$0xff]  ;;  %v7452_v25 = vsel %vm1597_vm3, %v1582_v31, %v1583_v63  ;;  %v7456_v35 = vsel %vm1597_vm3, %v1581_v18, %v1582_v31  ;;  %v8384_v38 = vld [vmem:[#allocation14_spill] sm:$0xff]  ;;  %v1586_v31 = vrot.slane %v6890_v39, 1 }
 0x1a6   : > { %v7460_v11 = vsel %vm1597_vm3, %v1584_v17, %v1585_v60  ;;  %v7464_v32 = vsel %vm1597_vm3, %v1583_v63, %v1584_v17  ;;  %v1842_v18 = vmul.f32 %v8384_v38, %v7452_v25  ;;  %v8388_v63 = vld [vmem:[#allocation16_spill] sm:$0xff]  ;;  %v1589_v38 = vrot.slane %v6920_v2, 1 }
 0x1a7   : > { %8382 = vst [vmem:[#allocation94_spill] sm:$0xff] %v7460_v11  ;;  %8383 = vst [vmem:[#allocation95_spill] sm:$0xff] %v7464_v32  ;;  %v3385_v39 = vld [vmem:[#allocation5 + $0x6f8] sm:$0xff]  ;;  %v7486_v7 = vsel %vm1597_vm3, %v1586_v31, %v1587_v12 }
 0x1a8   : > { %v7446_v28 = vpop.permute.xlu1 %2237  ;;  %v7448_v59 = vpop.permute.xlu0 %2232  ;;  %8390 = vst [vmem:[#allocation16_spill] sm:$0xff] %v7486_v7  ;;  %v7496_v2 = vsel %vm1597_vm3, %v1588_v36, %v1589_v38 }
 0x1a9   : > { %8380 = vst [vmem:[#allocation92_spill] sm:$0xff] %v7446_v28  ;;  %8381 = vst [vmem:[#allocation93_spill] sm:$0xff] %v7448_v59  ;;  %3528 = vperm.xlu1 %6310, %v3382_v14   ;;  %3523 = vperm.xlu0 %6309, %v3381_v52   ;;  %v8385_v14 = vld [vmem:[#allocation15_spill] sm:$0xff]  ;;  %v3844_v28 = vld [vmem:[#allocation5 + $0x718] sm:$0xff] }
 0x1aa   : > { %5786 = vmatmul.mubr.msk.bf16.gmra.mrb[12].mxu1 %vm1139_vm8, %v1862_v6  ;;  %v1841_v52 = vmul.f32 %v8385_v14, %v7456_v35  ;;  %v1844_v6 = vmul.f32 %v7171_v10, %v7460_v11  ;;  %v3841_v14 = vld [vmem:[#allocation5 + $0x700] sm:$0xff]  ;;  %8393 = vst [vmem:[#allocation98_spill] sm:$0xff] %v7496_v2 }
 0x1ab   : > { %5789 = vmatprep.mubr.msk.bf16.mxu1 %vm1139_vm8, %v1863_v3  ;;  %v1843_v3 = vmul.f32 %v8388_v63, %v7464_v32  ;;  %v7492_v63 = vsel %vm1597_vm3, %v1585_v60, %v1586_v31  ;;  %v1592_v60 = vrot.slane %v6935_v56, 1  ;;  %v8395_v31 = vld [vmem:[#allocation18_spill] sm:$0xff] }
 0x1ac   : > { %v7474_v49 = vpop.permute.xlu1 %2247  ;;  %v7476_v17 = vpop.permute.xlu0 %2242  ;;  %v1864_v59 = vpack.c.bf16 %v1842_v18, %v1841_v52  ;;  %8392 = vst [vmem:[#allocation97_spill] sm:$0xff] %v7492_v63  ;;  %v3842_v18 = vld [vmem:[#allocation5 + $0x708] sm:$0xff]  ;;  %v1590_v52 = vrot.slane %v6922_v61, 1  ;;  %v8398_v61 = vld [vmem:[#allocation21_spill] sm:$0xff] }
 0x1ad   : > { %8386 = vst [vmem:[#allocation14_spill] sm:$0xff] %v7474_v49  ;;  %8387 = vst [vmem:[#allocation15_spill] sm:$0xff] %v7476_v17  ;;  %3538 = vperm.xlu1 %6310, %v3384_v48   ;;  %3533 = vperm.xlu0 %6309, %v3383_v0   ;;  %v1865_v10 = vpack.c.bf16 %v1844_v6, %v1843_v3  ;;  %v7500_v48 = vsel %vm1597_vm3, %v1587_v12, %v1588_v36  ;;  %v3843_v0 = vld [vmem:[#allocation5 + $0x710] sm:$0xff]  ;;  %v1591_v6 = vrot.slane %v6933_v8, 1  ;;  %v8397_v36 = vld [vmem:[#allocation20_spill] sm:$0xff] }
 0x1ae   : > { %8394 = vst [vmem:[#allocation99_spill] sm:$0xff] %v7500_v48  ;;  %v1846_v3 = vmul.f32 %v8395_v31, %v7486_v7  ;;  %v1848_v12 = vmul.f32 %v8397_v36, %v7496_v2  ;;  %v1847_v8 = vmul.f32 %v8398_v61, %v7500_v48  ;;  %v3845_v31 = vld [vmem:[#allocation5 + $0x720] sm:$0xff] }
 0x1af   : > { %v7520_v36 = vsel %vm1597_vm3, %v1590_v52, %v1591_v6 }
 0x1b0   : > { %v2902_v17 = vpop.permute.xlu1 %2901  ;;  %v7488_v49 = vpop.permute.xlu0 %2252 }
 0x1b1   : > { %8391 = vst [vmem:[#allocation96_spill] sm:$0xff] %v7488_v49  ;;  %3875 = vperm.xlu1 %6310, %v3841_v14   ;;  %3543 = vperm.xlu0 %6309, %v3385_v39   ;;  %v8396_v39 = vld [vmem:[#allocation19_spill] sm:$0xff]  ;;  %v3059_v56 = vmul.f32 %v2902_v17, %v7298_v50 }
 0x1b2   : > { %5790 = vmatmul.mubr.msk.bf16.gmra.mrb[16].mxu1 %vm1139_vm8, %v1864_v59  ;;  %v1845_v14 = vmul.f32 %v8396_v39, %v7492_v63  ;;  %v1593_v59 = vrot.slane %v6952_v1, 1  ;;  %v7524_v1 = vsel %vm1597_vm3, %v1589_v38, %v1590_v52  ;;  %v3847_v38 = vld [vmem:[#allocation5 + $0x730] sm:$0xff]  ;;  %v3846_v52 = vld [vmem:[#allocation5 + $0x728] sm:$0xff] }
 0x1b3   : > { %5793 = vmatprep.mubr.msk.bf16.mxu1 %vm1139_vm8, %v1865_v10 }
 0x1b4   : > { %v2912_v49 = vpop.permute.xlu1 %2911  ;;  %v2907_v53 = vpop.permute.xlu0 %2906  ;;  %v1866_v39 = vpack.c.bf16 %v1846_v3, %v1845_v14  ;;  %v7528_v61 = vsel %vm1597_vm3, %v1592_v60, %v1593_v59  ;;  %v7534_v3 = vsel %vm1597_vm3, %v1591_v6, %v1592_v60 }
 0x1b5   : > { %v3060_v10 = vmul.f32 %v2907_v53, %v7294_v46  ;;  %3885 = vperm.xlu1 %6310, %v3843_v0   ;;  %3880 = vperm.xlu0 %6309, %v3842_v18   ;;  %v1867_v0 = vpack.c.bf16 %v1848_v12, %v1847_v8  ;;  %v3061_v18 = vmul.f32 %v2912_v49, %v7306_v47  ;;  %v8400_v8 = vld [vmem:[#allocation22_spill] sm:$0xff]  ;;  %v8401_v12 = vld [vmem:[#allocation23_spill] sm:$0xff] }
 0x1b6   : > { %8399 = vst [vmem:[#allocation18_spill] sm:$0xff] %v7534_v3  ;;  %v1850_v49 = vmul.f32 %v8400_v8, %v7520_v36 }
 0x1b7   : > { %v3091_v7 = vpack.c.bf16 %v3060_v10, %v3059_v56  ;;  %v1849_v10 = vmul.f32 %v8401_v12, %v7524_v1 }
 0x1b8   : > { %v2922_v17 = vpop.permute.xlu1 %2921  ;;  %v2917_v53 = vpop.permute.xlu0 %2916 }
 0x1b9   : > { %v3062_v56 = vmul.f32 %v2917_v53, %v7302_v5  ;;  %3895 = vperm.xlu1 %6310, %v3845_v31   ;;  %3890 = vperm.xlu0 %6309, %v3844_v28   ;;  %v1852_v28 = vmul.f32 %v7246_v23, %v7528_v61  ;;  %v8402_v31 = vld [vmem:[#allocation71_spill] sm:$0xff]  ;;  %v3063_v53 = vmul.f32 %v2922_v17, %v7338_v27  ;;  %v3849_v23 = vld [vmem:[#allocation5 + $0x740] sm:$0xff] }
 0x1ba   : > { %5794 = vmatmul.mubr.msk.bf16.gmra.mrb[20].mxu1 %vm1139_vm8, %v1866_v39  ;;  %5875 = vmatprep.mubr.msk.bf16.mxu0 %vm1139_vm8, %v3091_v7  ;;  %v3645_v39 = vsel %vm1188_vm0, %v8402_v31, 0  ;;  %v1851_v7 = vmul.f32 %v7248_v22, %v7534_v3  ;;  %v1868_v12 = vpack.c.bf16 %v1850_v49, %v1849_v10  ;;  %v8403_v22 = vrot.slane %v6638_v44, 1  ;;  %v3851_v49 = vld [vmem:[#allocation5 + $0x750] sm:$0xff]  ;;  %v8405_v10 = vld [vmem:[#allocation29_spill] sm:$0xff] }
 0x1bb   : > { %v3092_v14 = vpack.c.bf16 %v3062_v56, %v3061_v18  ;;  %5797 = vmatprep.mubr.msk.bf16.mxu1 %vm1139_vm8, %v1867_v0  ;;  %v7554_v18 = vld [vmem:[%s8092_s4 + $0x1c] sm:$0xf] }
 0x1bc   : > { %v2932_v6 = vpop.permute.xlu1 %2931  ;;  %v2927_v60 = vpop.permute.xlu0 %2926  ;;  %v3848_v56 = vld [vmem:[#allocation5 + $0x738] sm:$0xff]  ;;  %v7561_v17 = vsel %vm1597_vm3, %v1593_v59, %v8403_v22  ;;  %vm5083_vm3 = vcmask 57344  }
 0x1bd   : > { %v3064_v0 = vmul.f32 %v2927_v60, %v7334_v33  ;;  %3905 = vperm.xlu1 %6310, %v3847_v38   ;;  %3900 = vperm.xlu0 %6309, %v3846_v52   ;;  %8404 = vst [vmem:[#allocation19_spill] sm:$0xff] %v7561_v17  ;;  %v1869_v60 = vpack.c.bf16 %v1852_v28, %v1851_v7  ;;  %v3852_v22 = vld [vmem:[#allocation5 + $0x758] sm:$0xff] }
 0x1be   : > { %5876 = vmatmul.mubr.msk.bf16.vlgmr.msra.gmra.mrb[0].mxu0 %vm1139_vm8, %v3092_v14  ;;  %v3065_v31 = vmul.f32 %v2932_v6, %v7346_v19  ;;  %v1853_v28 = vmul.f32 %v7278_v29, %v7561_v17  ;;  %v8406_v6 = vld [vmem:[#allocation63_spill] sm:$0xff] }
 0x1bf   : > { %v3093_v8 = vpack.c.bf16 %v3064_v0, %v3063_v53  ;;  %5908 = vmatpush3.bf16.msra.mxu0 %v3645_v39  ;;  %v1854_v39 = vmul.f32 %v7276_v51, %v8405_v10  ;;  %v2311_v7 = vmul.f32 %v7288_v26, %v8406_v6  ;;  %v3853_v51 = vld [vmem:[#allocation5 + $0x760] sm:$0xff] }
 0x1c0   : > { %v2942_v38 = vpop.permute.xlu1 %2941  ;;  %v2937_v52 = vpop.permute.xlu0 %2936  ;;  %6275 = vmatprep.subr.msk.bf16.mxu0 %vm1188_vm0, %v7554_v18 }
 0x1c1   : > { %v3066_v14 = vmul.f32 %v2937_v52, %v7342_v54  ;;  %3915 = vperm.xlu1 %6310, %v3849_v23   ;;  %3910 = vperm.xlu0 %6309, %v3848_v56   ;;  %v8407_v23 = vld [vmem:[#allocation66_spill] sm:$0xff]  ;;  %v1870_v29 = vpack.c.bf16 %v1854_v39, %v1853_v28  ;;  %v8409_v39 = vld [vmem:[#allocation65_spill] sm:$0xff] }
 0x1c2   : > { %5798 = vmatmul.mubr.msk.bf16.gmra.mrb[24].mxu1 %vm1139_vm8, %v1868_v12  ;;  %5879 = vmatprep.mubr.msk.bf16.mxu0 %vm1139_vm8, %v3093_v8  ;;  %v2310_v56 = vmul.f32 %v7290_v30, %v8407_v23  ;;  %v3067_v8 = vmul.f32 %v2942_v38, %v7380_v42  ;;  %v3855_v30 = vld [vmem:[#allocation5 + $0x770] sm:$0xff]  ;;  %v3854_v38 = vld [vmem:[#allocation5 + $0x768] sm:$0xff]  ;;  %v2312_v28 = vmul.f32 %v7316_v9, %v8409_v39 }
 0x1c3   : > { %v3094_v59 = vpack.c.bf16 %v3066_v14, %v3065_v31  ;;  %5801 = vmatprep.mubr.msk.bf16.mxu1 %vm1139_vm8, %v1869_v60 }
 0x1c4   : > { %v2952_v53 = vpop.permute.xlu1 %2951  ;;  %v2947_v0 = vpop.permute.xlu0 %2946  ;;  %v2342_v26 = vpack.c.bf16 %v2311_v7, %v2310_v56  ;;  %v8410_v7 = vld [vmem:[#allocation67_spill] sm:$0xff] }
 0x1c5   : > { %v3068_v12 = vmul.f32 %v2947_v0, %v7376_v62  ;;  %3925 = vperm.xlu1 %6310, %v3851_v49   ;;  %3920 = vperm.xlu0 %6309, %v3850_v37   ;;  %v3069_v14 = vmul.f32 %v2952_v53, %v7388_v24  ;;  %v8408_v37 = vld [vmem:[#allocation64_spill] sm:$0xff]  ;;  %v2315_v53 = vmul.f32 %v7326_v13, %v8410_v7 }
 0x1c6   : > { %5880 = vmatmul.mubr.msk.bf16.gmra.mrb[4].mxu0 %vm1139_vm8, %v3094_v59  ;;  %v2313_v59 = vmul.f32 %v7314_v20, %v8408_v37  ;;  %v3857_v20 = vld [vmem:[#allocation5 + $0x780] sm:$0xff] }
 0x1c7   : > { %v3095_v52 = vpack.c.bf16 %v3068_v12, %v3067_v8  ;;  %v8411_v8 = vld [vmem:[#allocation68_spill] sm:$0xff] }
 0x1c8   : > { %v2962_v60 = vpop.permute.xlu1 %2961  ;;  %v2957_v31 = vpop.permute.xlu0 %2956  ;;  %v2314_v12 = vmul.f32 %v7328_v58, %v8411_v8  ;;  %v2343_v9 = vpack.c.bf16 %v2313_v59, %v2312_v28  ;;  %v3859_v58 = vld [vmem:[#allocation5 + $0x790] sm:$0xff]  ;;  %v8414_v28 = vld [vmem:[#allocation70_spill] sm:$0xff] }
 0x1c9   : > { %v3070_v50 = vmul.f32 %v2957_v31, %v7384_v45  ;;  %3935 = vperm.xlu1 %6310, %v3853_v51   ;;  %3930 = vperm.xlu0 %6309, %v3852_v22   ;;  %v3071_v51 = vmul.f32 %v2962_v60, %v7418_v40  ;;  %v3856_v22 = vld [vmem:[#allocation5 + $0x778] sm:$0xff]  ;;  %v3858_v60 = vld [vmem:[#allocation5 + $0x788] sm:$0xff] }
 0x1ca   : > { %5802 = vmatmul.mubr.msk.bf16.gmra.mrb[28].mxu1 %vm1139_vm8, %v1870_v29  ;;  %5883 = vmatprep.mubr.msk.bf16.mxu0 %vm1139_vm8, %v3095_v52  ;;  %v2344_v13 = vpack.c.bf16 %v2315_v53, %v2314_v12  ;;  %v2316_v53 = vmul.f32 %v7356_v15, %v8414_v28 }
 0x1cb   : > { %v3096_v49 = vpack.c.bf16 %v3070_v50, %v3069_v14  ;;  %5807 = vmatprep.mubr.msk.bf16.mxu1 %vm1139_vm8, %v2342_v26 }
 0x1cc   : > { %v2972_v0 = vpop.permute.xlu1 %2971  ;;  %v2967_v56 = vpop.permute.xlu0 %2966 }
 0x1cd   : > { %v3072_v50 = vmul.f32 %v2967_v56, %v7414_v57  ;;  %3945 = vperm.xlu1 %6310, %v3855_v30   ;;  %3940 = vperm.xlu0 %6309, %v3854_v38   ;;  %v3073_v26 = vmul.f32 %v2972_v0, %v7426_v34  ;;  %v8412_v38 = vld [vmem:[#allocation41_spill] sm:$0xff]  ;;  %v8415_v0 = vld [vmem:[#allocation72_spill] sm:$0xff] }
 0x1ce   : > { %5884 = vmatmul.mubr.msk.bf16.gmra.mrb[8].mxu0 %vm1139_vm8, %v3096_v49  ;;  %v8413_v49 = vld [vmem:[#allocation69_spill] sm:$0xff]  ;;  %v2319_v56 = vmul.f32 %v7370_v43, %v8415_v0 }
 0x1cf   : > { %v3097_v52 = vpack.c.bf16 %v3072_v50, %v3071_v51  ;;  %v2317_v59 = vmul.f32 %v7354_v55, %v8413_v49  ;;  %v8416_v50 = vld [vmem:[#allocation73_spill] sm:$0xff] }
 0x1d0   : > { %v2982_v29 = vpop.permute.xlu1 %2981  ;;  %v2977_v31 = vpop.permute.xlu0 %2976  ;;  %v3861_v55 = vld [vmem:[#allocation5 + $0x7a0] sm:$0xff] }
 0x1d1   : > { %v3074_v14 = vmul.f32 %v2977_v31, %v7422_v41  ;;  %3955 = vperm.xlu1 %6310, %v3857_v20   ;;  %3950 = vperm.xlu0 %6309, %v3856_v22   ;;  %v2318_v20 = vmul.f32 %v7372_v16, %v8416_v50  ;;  %v3075_v22 = vmul.f32 %v2982_v29, %v7456_v35  ;;  %v3863_v16 = vld [vmem:[#allocation5 + $0x7b0] sm:$0xff]  ;;  %v3862_v29 = vld [vmem:[#allocation5 + $0x7a8] sm:$0xff] }
 0x1d2   : > { %5808 = vmatmul.mubr.msk.bf16.vlgmr.msra.gmra.mrb[0].mxu1 %vm1139_vm8, %v2343_v9  ;;  %5887 = vmatprep.mubr.msk.bf16.mxu0 %vm1139_vm8, %v3097_v52  ;;  %v3860_v9 = vld [vmem:[#allocation5 + $0x798] sm:$0xff]  ;;  %v2345_v15 = vpack.c.bf16 %v2317_v59, %v2316_v53  ;;  %v8418_v59 = vld [vmem:[#allocation75_spill] sm:$0xff] }
 0x1d3   : > { %v3098_v30 = vpack.c.bf16 %v3074_v14, %v3073_v26  ;;  %5811 = vmatprep.mubr.msk.bf16.mxu1 %vm1139_vm8, %v2344_v13  ;;  %6010 = vmatpush3.bf16.msra.mxu1 %v8412_v38  ;;  %v2346_v43 = vpack.c.bf16 %v2319_v56, %v2318_v20  ;;  %v2320_v53 = vmul.f32 %v7398_v4, %v8418_v59  ;;  %v8419_v56 = vld [vmem:[#allocation76_spill] sm:$0xff] }
 0x1d4   : > { %v2992_v12 = vpop.permute.xlu1 %2991  ;;  %v2987_v51 = vpop.permute.xlu0 %2986 }
 0x1d5   : > { %v3076_v52 = vmul.f32 %v2987_v51, %v7452_v25  ;;  %3965 = vperm.xlu1 %6310, %v3859_v58   ;;  %3960 = vperm.xlu0 %6309, %v3858_v60   ;;  %v3077_v14 = vmul.f32 %v2992_v12, %v7464_v32  ;;  %v8417_v60 = vld [vmem:[#allocation74_spill] sm:$0xff]  ;;  %v8420_v12 = vld [vmem:[#allocation9_spill] sm:$0xff] }
 0x1d6   : > { %5888 = vmatmul.mubr.msk.bf16.gmra.mrb[12].mxu0 %vm1139_vm8, %v3098_v30  ;;  %v2321_v30 = vmul.f32 %v7396_v21, %v8417_v60  ;;  %v2323_v51 = vmul.f32 %v8420_v12, %v8419_v56  ;;  %v3865_v21 = vld [vmem:[#allocation5 + $0x7c0] sm:$0xff] }
 0x1d7   : > { %v3099_v31 = vpack.c.bf16 %v3076_v52, %v3075_v22  ;;  %v8421_v52 = vld [vmem:[#allocation77_spill] sm:$0xff] }
 0x1d8   : > { %v3002_v13 = vpop.permute.xlu1 %3001  ;;  %v2997_v26 = vpop.permute.xlu0 %2996  ;;  %v2347_v4 = vpack.c.bf16 %v2321_v30, %v2320_v53  ;;  %v8425_v30 = vld [vmem:[#allocation10_spill] sm:$0xff] }
 0x1d9   : > { %v3078_v38 = vmul.f32 %v2997_v26, %v7460_v11  ;;  %3975 = vperm.xlu1 %6310, %v3861_v55   ;;  %3970 = vperm.xlu0 %6309, %v3860_v9   ;;  %v8422_v55 = vld [vmem:[#allocation91_spill] sm:$0xff] }
 0x1da   : > { %5812 = vmatmul.mubr.msk.bf16.gmra.mrb[4].mxu1 %vm1139_vm8, %v2345_v15  ;;  %5891 = vmatprep.mubr.msk.bf16.mxu0 %vm1139_vm8, %v3099_v31  ;;  %v2322_v9 = vmul.f32 %v8422_v55, %v8421_v52  ;;  %v3079_v31 = vmul.f32 %v3002_v13, %v7492_v63  ;;  %v8423_v15 = vld [vmem:[#allocation16_spill] sm:$0xff]  ;;  %v3867_v13 = vld [vmem:[#allocation5 + $0x7d0] sm:$0xff] }
 0x1db   : > { %v3100_v58 = vpack.c.bf16 %v3078_v38, %v3077_v14  ;;  %5815 = vmatprep.mubr.msk.bf16.mxu1 %vm1139_vm8, %v2346_v43  ;;  %v3864_v43 = vld [vmem:[#allocation5 + $0x7b8] sm:$0xff] }
 0x1dc   : > { %v3012_v20 = vpop.permute.xlu1 %3011  ;;  %v3007_v22 = vpop.permute.xlu0 %3006  ;;  %v2348_v12 = vpack.c.bf16 %v2323_v51, %v2322_v9  ;;  %v8427_v51 = vld [vmem:[#allocation11_spill] sm:$0xff]  ;;  %v8429_v9 = vld [vmem:[#allocation92_spill] sm:$0xff] }
 0x1dd   : > { %v3080_v26 = vmul.f32 %v3007_v22, %v8423_v15  ;;  %3985 = vperm.xlu1 %6310, %v3863_v16   ;;  %3980 = vperm.xlu0 %6309, %v3862_v29   ;;  %v3081_v32 = vmul.f32 %v3012_v20, %v7500_v48  ;;  %v3866_v16 = vld [vmem:[#allocation5 + $0x7c8] sm:$0xff]  ;;  %v8426_v22 = vld [vmem:[#allocation79_spill] sm:$0xff]  ;;  %v8428_v20 = vld [vmem:[#allocation12_spill] sm:$0xff] }
 0x1de   : > { %5892 = vmatmul.mubr.msk.bf16.gmra.mrb[16].mxu0 %vm1139_vm8, %v3100_v58  ;;  %v8424_v58 = vld [vmem:[#allocation78_spill] sm:$0xff]  ;;  %v2324_v55 = vmul.f32 %v8427_v51, %v8426_v22 }
 0x1df   : > { %v3101_v14 = vpack.c.bf16 %v3080_v26, %v3079_v31  ;;  %v2325_v53 = vmul.f32 %v8425_v30, %v8424_v58 }
 0x1e0   : > { %v3022_v38 = vpop.permute.xlu1 %3021  ;;  %v3017_v46 = vpop.permute.xlu0 %3016 }
 0x1e1   : > { %v3082_v11 = vmul.f32 %v3017_v46, %v7496_v2  ;;  %3995 = vperm.xlu1 %6310, %v3865_v21   ;;  %3990 = vperm.xlu0 %6309, %v3864_v43   ;;  %v2327_v46 = vmul.f32 %v8429_v9, %v8428_v20  ;;  %v8430_v21 = vld [vmem:[#allocation13_spill] sm:$0xff]  ;;  %v2349_v51 = vpack.c.bf16 %v2325_v53, %v2324_v55  ;;  %v8433_v53 = vld [vmem:[#allocation14_spill] sm:$0xff] }
 0x1e2   : > { %5816 = vmatmul.mubr.msk.bf16.gmra.mrb[8].mxu1 %vm1139_vm8, %v2347_v4  ;;  %5895 = vmatprep.mubr.msk.bf16.mxu0 %vm1139_vm8, %v3101_v14  ;;  %v8431_v43 = vld [vmem:[#allocation93_spill] sm:$0xff]  ;;  %v3083_v14 = vmul.f32 %v3022_v38, %v7524_v1  ;;  %v3871_v38 = vld [vmem:[#allocation5 + $0x7f0] sm:$0xff] }
 0x1e3   : > { %v3102_v29 = vpack.c.bf16 %v3082_v11, %v3081_v32  ;;  %5819 = vmatprep.mubr.msk.bf16.mxu1 %vm1139_vm8, %v2348_v12  ;;  %v2326_v4 = vmul.f32 %v8431_v43, %v8430_v21  ;;  %v3869_v32 = vld [vmem:[#allocation5 + $0x7e0] sm:$0xff]  ;;  %v3868_v12 = vld [vmem:[#allocation5 + $0x7d8] sm:$0xff] }
 0x1e4   : > { %v3032_v31 = vpop.permute.xlu1 %3031  ;;  %v3027_v26 = vpop.permute.xlu0 %3026 }
 0x1e5   : > { %v3084_v11 = vmul.f32 %v3027_v26, %v7520_v36  ;;  %4005 = vperm.xlu1 %6310, %v3867_v13   ;;  %4000 = vperm.xlu0 %6309, %v3866_v16   ;;  %v2350_v9 = vpack.c.bf16 %v2327_v46, %v2326_v4  ;;  %v3085_v63 = vmul.f32 %v3032_v31, %v7534_v3  ;;  %v3870_v13 = vld [vmem:[#allocation5 + $0x7e8] sm:$0xff]  ;;  %v8434_v26 = vld [vmem:[#allocation81_spill] sm:$0xff]  ;;  %v8435_v46 = vld [vmem:[#allocation15_spill] sm:$0xff] }
 0x1e6   : > { %5896 = vmatmul.mubr.msk.bf16.gmra.mrb[20].mxu0 %vm1139_vm8, %v3102_v29  ;;  %v8432_v29 = vld [vmem:[#allocation80_spill] sm:$0xff]  ;;  %v2328_v43 = vmul.f32 %v8435_v46, %v8434_v26 }
 0x1e7   : > { %v3103_v30 = vpack.c.bf16 %v3084_v11, %v3083_v14  ;;  %v2329_v55 = vmul.f32 %v8433_v53, %v8432_v29  ;;  %v4328_v11 = vld [vmem:[#allocation5 + $0x800] sm:$0xff]  ;;  %v8480_v3 = vld [vmem:[#allocation32_spill] sm:$0xff] }
 0x1e8   : > { %v3042_v48 = vpop.permute.xlu1 %3041  ;;  %v3037_v2 = vpop.permute.xlu0 %3036  ;;  %v8437_v53 = vld [vmem:[#allocation89_spill] sm:$0xff] }
 0x1e9   : > { %v3086_v15 = vmul.f32 %v3037_v2, %v7528_v61  ;;  %4015 = vperm.xlu1 %6310, %v3869_v32   ;;  %4010 = vperm.xlu0 %6309, %v3868_v12   ;;  %v3087_v2 = vmul.f32 %v3042_v48, %v7561_v17  ;;  %v2351_v32 = vpack.c.bf16 %v2329_v55, %v2328_v43  ;;  %v4330_v48 = vld [vmem:[#allocation5 + $0x810] sm:$0xff]  ;;  %v2139_v43 = vld [vmem:[#allocation5 + $0x3a8] sm:$0xff] }
 0x1ea   : > { %5820 = vmatmul.mubr.msk.bf16.gmra.mrb[12].mxu1 %vm1139_vm8, %v2349_v51  ;;  %5899 = vmatprep.mubr.msk.bf16.mxu0 %vm1139_vm8, %v3103_v30  ;;  %v8436_v51 = vld [vmem:[#allocation90_spill] sm:$0xff] }
 0x1eb   : > { %v3104_v16 = vpack.c.bf16 %v3086_v15, %v3085_v63  ;;  %5823 = vmatprep.mubr.msk.bf16.mxu1 %vm1139_vm8, %v2350_v9  ;;  %v3872_v63 = vld [vmem:[#allocation5 + $0x7f8] sm:$0xff]  ;;  %v8478_v17 = vld [vmem:[#allocation30_spill] sm:$0xff] }
 0x1ec   : > { %v3052_v31 = vpop.permute.xlu1 %3051  ;;  %v3047_v4 = vpop.permute.xlu0 %3046 }
 0x1ed   : > { %v3088_v14 = vmul.f32 %v3047_v4, %v8405_v10  ;;  %4025 = vperm.xlu1 %6310, %v3871_v38   ;;  %4020 = vperm.xlu0 %6309, %v3870_v13   ;;  %v3089_v9 = vmul.f32 %v3052_v31, %v8436_v51  ;;  %v4329_v38 = vld [vmem:[#allocation5 + $0x808] sm:$0xff]  ;;  %v4331_v31 = vld [vmem:[#allocation5 + $0x818] sm:$0xff] }
 0x1ee   : > { %5900 = vmatmul.mubr.msk.bf16.gmra.mrb[24].mxu0 %vm1139_vm8, %v3104_v16 }
 0x1ef   : > { %v3105_v15 = vpack.c.bf16 %v3088_v14, %v3087_v2 }
 0x1f0   : > { %v3389_v12 = vpop.permute.xlu1 %3388  ;;  %v3057_v30 = vpop.permute.xlu0 %3056 }
 0x1f1   : > { %v3090_v46 = vmul.f32 %v3057_v30, %v8437_v53  ;;  %4362 = vperm.xlu1 %6310, %v4328_v11   ;;  %4030 = vperm.xlu0 %6309, %v3872_v63   ;;  %v3546_v2 = vmul.f32 %v3389_v12, %v8409_v39  ;;  %v4333_v39 = vld [vmem:[#allocation5 + $0x828] sm:$0xff]  ;;  %v4332_v12 = vld [vmem:[#allocation5 + $0x820] sm:$0xff] }
 0x1f2   : > { %5824 = vmatmul.mubr.msk.bf16.gmra.mrb[16].mxu1 %vm1139_vm8, %v2351_v32  ;;  %5903 = vmatprep.mubr.msk.bf16.mxu0 %vm1139_vm8, %v3105_v15 }
 0x1f3   : > { %v3106_v13 = vpack.c.bf16 %v3090_v46, %v3089_v9  ;;  %v4132_v46 = vsel %vm1188_vm0, %v7554_v18, 0 }
 0x1f4   : > { %v3399_v16 = vpop.permute.xlu1 %3398  ;;  %v3394_v4 = vpop.permute.xlu0 %3393 }
 0x1f5   : > { %v3547_v55 = vmul.f32 %v3394_v4, %v8408_v37  ;;  %4372 = vperm.xlu1 %6310, %v4330_v48   ;;  %4367 = vperm.xlu0 %6309, %v4329_v38   ;;  %v3548_v15 = vmul.f32 %v3399_v16, %v8411_v8  ;;  %v2141_v8 = vld [vmem:[#allocation5 + $0x3b8] sm:$0xff] }
 0x1f6   : > { %5904 = vmatmul.mubr.msk.bf16.gmra.mrb[28].mxu0 %vm1139_vm8, %v3106_v13  ;;  %v2140_v13 = vld [vmem:[#allocation5 + $0x3b0] sm:$0xff] }
 0x1f7   : > { %v3578_v14 = vpack.c.bf16 %v3547_v55, %v3546_v2  ;;  %v4334_v55 = vld [vmem:[#allocation5 + $0x830] sm:$0xff] }
 0x1f8   : > { %v3409_v11 = vpop.permute.xlu1 %3408  ;;  %v3404_v63 = vpop.permute.xlu0 %3403 }
 0x1f9   : > { %v3549_v32 = vmul.f32 %v3404_v63, %v8410_v7  ;;  %2257 = vperm.xlu1 %6310, %v2139_v43   ;;  %4377 = vperm.xlu0 %6309, %v4331_v31   ;;  %v3550_v48 = vmul.f32 %v3409_v11, %v8414_v28  ;;  %v7675_v7 = vld [vmem:[%s8092_s4 + $0x20] sm:$0xf] }
 0x1fa   : > { %5909 = vmatprep.mubr.msk.bf16.mxu0 %vm1139_vm8, %v3578_v14  ;;  %v4335_v28 = vld [vmem:[#allocation5 + $0x838] sm:$0xff] }
 0x1fb   : > { %v3579_v37 = vpack.c.bf16 %v3549_v32, %v3548_v15  ;;  %v2142_v15 = vld [vmem:[#allocation5 + $0x3c0] sm:$0xff] }
 0x1fc   : > { %v3419_v30 = vpop.permute.xlu1 %3418  ;;  %v3414_v9 = vpop.permute.xlu0 %3413 }
 0x1fd   : > { %v3551_v38 = vmul.f32 %v3414_v9, %v8413_v49  ;;  %4387 = vperm.xlu1 %6310, %v4333_v39   ;;  %4382 = vperm.xlu0 %6309, %v4332_v12   ;;  %v3552_v18 = vmul.f32 %v3419_v30, %v8416_v50  ;;  %v2143_v50 = vld [vmem:[#allocation5 + $0x3c8] sm:$0xff]  ;;  %v4336_v30 = vld [vmem:[#allocation5 + $0x840] sm:$0xff] }
 0x1fe   : > { %5910 = vmatmul.mubr.msk.bf16.vlgmr.msra.gmra.mrb[0].mxu0 %vm1139_vm8, %v3579_v37 }
 0x1ff   : > { %v3580_v16 = vpack.c.bf16 %v3551_v38, %v3550_v48  ;;  %5942 = vmatpush3.bf16.msra.mxu0 %v4132_v46 }
 0x200   : > { %v3429_v4 = vpop.permute.xlu1 %3428  ;;  %v3424_v2 = vpop.permute.xlu0 %3423  ;;  %6276 = vmatprep.subr.msk.bf16.mxu0 %vm1188_vm0, %v7675_v7 }
 0x201   : > { %v3553_v49 = vmul.f32 %v3424_v2, %v8415_v0  ;;  %2267 = vperm.xlu1 %6310, %v2141_v8   ;;  %2262 = vperm.xlu0 %6309, %v2140_v13   ;;  %v3554_v11 = vmul.f32 %v3429_v4, %v8418_v59  ;;  %v4337_v59 = vld [vmem:[#allocation5 + $0x848] sm:$0xff]  ;;  %v2144_v8 = vld [vmem:[#allocation5 + $0x3d0] sm:$0xff] }
 0x202   : > { %5913 = vmatprep.mubr.msk.bf16.mxu0 %vm1139_vm8, %v3580_v16 }
 0x203   : > { %v3581_v43 = vpack.c.bf16 %v3553_v49, %v3552_v18  ;;  %v4338_v18 = vld [vmem:[#allocation5 + $0x850] sm:$0xff] }
 0x204   : > { %v3439_v31 = vpop.permute.xlu1 %3438  ;;  %v3434_v14 = vpop.permute.xlu0 %3433 }
 0x205   : > { %v3555_v63 = vmul.f32 %v3434_v14, %v8417_v60  ;;  %4397 = vperm.xlu1 %6310, %v4335_v28   ;;  %4392 = vperm.xlu0 %6309, %v4334_v55   ;;  %v3556_v12 = vmul.f32 %v3439_v31, %v8421_v52  ;;  %v2145_v52 = vld [vmem:[#allocation5 + $0x3d8] sm:$0xff]  ;;  %v2146_v31 = vld [vmem:[#allocation5 + $0x3e0] sm:$0xff] }
 0x206   : > { %5914 = vmatmul.mubr.msk.bf16.gmra.mrb[4].mxu0 %vm1139_vm8, %v3581_v43 }
 0x207   : > { %v3582_v0 = vpack.c.bf16 %v3555_v63, %v3554_v11  ;;  %v8438_v63 = vld [vmem:[#allocation82_spill] sm:$0xff] }
 0x208   : > { %v3449_v32 = vpop.permute.xlu1 %3448  ;;  %v3444_v39 = vpop.permute.xlu0 %3443 }
 0x209   : > { %v3557_v37 = vmul.f32 %v3444_v39, %v8419_v56  ;;  %2277 = vperm.xlu1 %6310, %v2143_v50   ;;  %2272 = vperm.xlu0 %6309, %v2142_v15   ;;  %v3558_v48 = vmul.f32 %v3449_v32, %v8426_v22  ;;  %v4339_v22 = vld [vmem:[#allocation5 + $0x858] sm:$0xff]  ;;  %v8439_v15 = vld [vmem:[#allocation17_spill] sm:$0xff] }
 0x20a   : > { %5917 = vmatprep.mubr.msk.bf16.mxu0 %vm1139_vm8, %v3582_v0  ;;  %v4340_v32 = vld [vmem:[#allocation5 + $0x860] sm:$0xff] }
 0x20b   : > { %v3583_v60 = vpack.c.bf16 %v3557_v37, %v3556_v12  ;;  %v8440_v37 = vld [vmem:[#allocation84_spill] sm:$0xff] }
 0x20c   : > { %v3459_v9 = vpop.permute.xlu1 %3458  ;;  %v3454_v46 = vpop.permute.xlu0 %3453 }
 0x20d   : > { %v3559_v38 = vmul.f32 %v3454_v46, %v8424_v58  ;;  %4407 = vperm.xlu1 %6310, %v4337_v59   ;;  %4402 = vperm.xlu0 %6309, %v4336_v30   ;;  %v3560_v4 = vmul.f32 %v3459_v9, %v8430_v21  ;;  %v2147_v21 = vld [vmem:[#allocation5 + $0x3e8] sm:$0xff]  ;;  %v8441_v30 = vld [vmem:[#allocation83_spill] sm:$0xff]  ;;  %v2149_v9 = vld [vmem:[#allocation5 + $0x3f8] sm:$0xff] }
 0x20e   : > { %5918 = vmatmul.mubr.msk.bf16.gmra.mrb[8].mxu0 %vm1139_vm8, %v3583_v60  ;;  %v2148_v46 = vld [vmem:[#allocation5 + $0x3f0] sm:$0xff] }
 0x20f   : > { %v3584_v56 = vpack.c.bf16 %v3559_v38, %v3558_v48 }
 0x210   : > { %v3469_v13 = vpop.permute.xlu1 %3468  ;;  %v3464_v16 = vpop.permute.xlu0 %3463 }
 0x211   : > { %v3561_v2 = vmul.f32 %v3464_v16, %v8428_v20  ;;  %2287 = vperm.xlu1 %6310, %v2145_v52   ;;  %2282 = vperm.xlu0 %6309, %v2144_v8   ;;  %v3562_v55 = vmul.f32 %v3469_v13, %v8434_v26  ;;  %v4341_v26 = vld [vmem:[#allocation5 + $0x868] sm:$0xff]  ;;  %v8443_v13 = vld [vmem:[#allocation85_spill] sm:$0xff] }
 0x212   : > { %5921 = vmatprep.mubr.msk.bf16.mxu0 %vm1139_vm8, %v3584_v56  ;;  %v8442_v8 = vld [vmem:[#allocation86_spill] sm:$0xff] }
 0x213   : > { %v3585_v58 = vpack.c.bf16 %v3561_v2, %v3560_v4  ;;  %v4343_v4 = vld [vmem:[#allocation5 + $0x878] sm:$0xff]  ;;  %v4342_v2 = vld [vmem:[#allocation5 + $0x870] sm:$0xff] }
 0x214   : > { %v3479_v49 = vpop.permute.xlu1 %3478  ;;  %v3474_v28 = vpop.permute.xlu0 %3473 }
 0x215   : > { %v3563_v43 = vmul.f32 %v3474_v28, %v8432_v29  ;;  %4417 = vperm.xlu1 %6310, %v4339_v22   ;;  %4412 = vperm.xlu0 %6309, %v4338_v18   ;;  %v3564_v50 = vmul.f32 %v3479_v49, %v8438_v63  ;;  %v8444_v49 = vld [vmem:[#allocation88_spill] sm:$0xff] }
 0x216   : > { %5922 = vmatmul.mubr.msk.bf16.gmra.mrb[12].mxu0 %vm1139_vm8, %v3585_v58 }
 0x217   : > { %v3586_v20 = vpack.c.bf16 %v3563_v43, %v3562_v55  ;;  %v8445_v55 = vld [vmem:[#allocation87_spill] sm:$0xff] }
 0x218   : > { %v3489_v14 = vpop.permute.xlu1 %3488  ;;  %v3484_v11 = vpop.permute.xlu0 %3483 }
 0x219   : > { %v3565_v0 = vmul.f32 %v3484_v11, %v8439_v15  ;;  %2297 = vperm.xlu1 %6310, %v2147_v21   ;;  %2292 = vperm.xlu0 %6309, %v2146_v31   ;;  %v3566_v59 = vmul.f32 %v3489_v14, %v8440_v37  ;;  %v4345_v21 = vld [vmem:[#allocation5 + $0x888] sm:$0xff]  ;;  %v4344_v31 = vld [vmem:[#allocation5 + $0x880] sm:$0xff] }
 0x21a   : > { %5925 = vmatprep.mubr.msk.bf16.mxu0 %vm1139_vm8, %v3586_v20 }
 0x21b   : > { %v3587_v29 = vpack.c.bf16 %v3565_v0, %v3564_v50  ;;  %v8446_v50 = vld [vmem:[#allocation25_spill] sm:$0xff] }
 0x21c   : > { %v3499_v39 = vpop.permute.xlu1 %3498  ;;  %v3494_v12 = vpop.permute.xlu0 %3493 }
 0x21d   : > { %v3567_v60 = vmul.f32 %v3494_v12, %v8441_v30  ;;  %4427 = vperm.xlu1 %6310, %v4341_v26   ;;  %4422 = vperm.xlu0 %6309, %v4340_v32   ;;  %v3568_v56 = vmul.f32 %v3499_v39, %v8442_v8  ;;  %v8447_v26 = vld [vmem:[#allocation24_spill] sm:$0xff]  ;;  %v4346_v39 = vld [vmem:[#allocation5 + $0x890] sm:$0xff] }
 0x21e   : > { %5926 = vmatmul.mubr.msk.bf16.gmra.mrb[16].mxu0 %vm1139_vm8, %v3587_v29  ;;  %v4347_v29 = vld [vmem:[#allocation5 + $0x898] sm:$0xff] }
 0x21f   : > { %v3588_v48 = vpack.c.bf16 %v3567_v60, %v3566_v59 }
 0x220   : > { %v3509_v38 = vpop.permute.xlu1 %3508  ;;  %v3504_v52 = vpop.permute.xlu0 %3503 }
 0x221   : > { %v3569_v16 = vmul.f32 %v3504_v52, %v8443_v13  ;;  %2307 = vperm.xlu1 %6310, %v2149_v9   ;;  %2302 = vperm.xlu0 %6309, %v2148_v46   ;;  %v3570_v28 = vmul.f32 %v3509_v38, %v8444_v49  ;;  %v8448_v9 = vld [vmem:[#allocation61_spill] sm:$0xff]  ;;  %v4349_v52 = vld [vmem:[#allocation5 + $0x8a8] sm:$0xff] }
 0x222   : > { %5929 = vmatprep.mubr.msk.bf16.mxu0 %vm1139_vm8, %v3588_v48  ;;  %v8449_v48 = vld [vmem:[#allocation60_spill] sm:$0xff] }
 0x223   : > { %v3589_v22 = vpack.c.bf16 %v3569_v16, %v3568_v56  ;;  %v4348_v56 = vld [vmem:[#allocation5 + $0x8a0] sm:$0xff] }
 0x224   : > { %v3519_v18 = vpop.permute.xlu1 %3518  ;;  %v3514_v58 = vpop.permute.xlu0 %3513 }
 0x225   : > { %v3571_v43 = vmul.f32 %v3514_v58, %v8445_v55  ;;  %4437 = vperm.xlu1 %6310, %v4343_v4   ;;  %4432 = vperm.xlu0 %6309, %v4342_v2   ;;  %v3572_v0 = vmul.f32 %v3519_v18, %v8446_v50  ;;  %v4351_v58 = vld [vmem:[#allocation5 + $0x8b8] sm:$0xff] }
 0x226   : > { %5930 = vmatmul.mubr.msk.bf16.gmra.mrb[20].mxu0 %vm1139_vm8, %v3589_v22 }
 0x227   : > { %v3590_v20 = vpack.c.bf16 %v3571_v43, %v3570_v28  ;;  %v4350_v28 = vld [vmem:[#allocation5 + $0x8b0] sm:$0xff] }
 0x228   : > { %v3529_v14 = vpop.permute.xlu1 %3528  ;;  %v3524_v11 = vpop.permute.xlu0 %3523 }
 0x229   : > { %v3573_v32 = vmul.f32 %v3524_v11, %v8447_v26  ;;  %4447 = vperm.xlu1 %6310, %v4345_v21   ;;  %4442 = vperm.xlu0 %6309, %v4344_v31   ;;  %v3574_v46 = vmul.f32 %v3529_v14, %v8448_v9  ;;  %v8451_v11 = vld [vmem:[#allocation34_spill] sm:$0xff] }
 0x22a   : > { %5933 = vmatprep.mubr.msk.bf16.mxu0 %vm1139_vm8, %v3590_v20  ;;  %v8450_v20 = vld [vmem:[#allocation33_spill] sm:$0xff] }
 0x22b   : > { %v3591_v12 = vpack.c.bf16 %v3573_v32, %v3572_v0  ;;  %v4352_v32 = vld [vmem:[#allocation5 + $0x8c0] sm:$0xff] }
 0x22c   : > { %v3539_v59 = vpop.permute.xlu1 %3538  ;;  %v3534_v60 = vpop.permute.xlu0 %3533 }
 0x22d   : > { %v3575_v38 = vmul.f32 %v3534_v60, %v8449_v48  ;;  %4457 = vperm.xlu1 %6310, %v4347_v29   ;;  %4452 = vperm.xlu0 %6309, %v4346_v39   ;;  %v3576_v22 = vmul.f32 %v3539_v59, %v8407_v23  ;;  %v4353_v23 = vld [vmem:[#allocation5 + $0x8c8] sm:$0xff]  ;;  %v8453_v60 = vld [vmem:[#allocation36_spill] sm:$0xff] }
 0x22e   : > { %5934 = vmatmul.mubr.msk.bf16.gmra.mrb[24].mxu0 %vm1139_vm8, %v3591_v12  ;;  %v8452_v12 = vld [vmem:[#allocation35_spill] sm:$0xff] }
 0x22f   : > { %v3592_v16 = vpack.c.bf16 %v3575_v38, %v3574_v46  ;;  %v4355_v38 = vld [vmem:[#allocation5 + $0x8d8] sm:$0xff] }
 0x230   : > { %v3876_v4 = vpop.permute.xlu1 %3875  ;;  %v3544_v2 = vpop.permute.xlu0 %3543 }
 0x231   : > { %v3577_v18 = vmul.f32 %v3544_v2, %v8406_v6  ;;  %4467 = vperm.xlu1 %6310, %v4349_v52   ;;  %4462 = vperm.xlu0 %6309, %v4348_v56   ;;  %v4033_v14 = vmul.f32 %v3876_v4, %v8450_v20  ;;  %v4354_v52 = vld [vmem:[#allocation5 + $0x8d0] sm:$0xff]  ;;  %v4619_v2 = vsel %vm1188_vm0, %v7675_v7, 0  ;;  %v4359_v7 = vld [vmem:[#allocation5 + $0x8f8] sm:$0xff]  ;;  %vm4981_vm0 = vcmask 60416  }
 0x232   : > { %5937 = vmatprep.mubr.msk.bf16.mxu0 %vm1139_vm8, %v3592_v16 }
 0x233   : > { %v3593_v43 = vpack.c.bf16 %v3577_v18, %v3576_v22  ;;  %v8454_v22 = vld [vmem:[#allocation37_spill] sm:$0xff] }
 0x234   : > { %v3886_v21 = vpop.permute.xlu1 %3885  ;;  %v3881_v31 = vpop.permute.xlu0 %3880 }
 0x235   : > { %v4034_v0 = vmul.f32 %v3881_v31, %v8451_v11  ;;  %4477 = vperm.xlu1 %6310, %v4351_v58   ;;  %4472 = vperm.xlu0 %6309, %v4350_v28   ;;  %v4035_v59 = vmul.f32 %v3886_v21, %v8452_v12  ;;  %v8455_v58 = vld [vmem:[#allocation38_spill] sm:$0xff]  ;;  %v4356_v21 = vld [vmem:[#allocation5 + $0x8e0] sm:$0xff]  ;;  %v8456_v11 = vld [vmem:[#allocation39_spill] sm:$0xff] }
 0x236   : > { %5938 = vmatmul.mubr.msk.bf16.gmra.mrb[28].mxu0 %vm1139_vm8, %v3593_v43  ;;  %v4357_v43 = vld [vmem:[#allocation5 + $0x8e8] sm:$0xff] }
 0x237   : > { %v4065_v6 = vpack.c.bf16 %v4034_v0, %v4033_v14 }
 0x238   : > { %v3896_v29 = vpop.permute.xlu1 %3895  ;;  %v3891_v39 = vpop.permute.xlu0 %3890 }
 0x239   : > { %v4036_v46 = vmul.f32 %v3891_v39, %v8453_v60  ;;  %4487 = vperm.xlu1 %6310, %v4353_v23   ;;  %4482 = vperm.xlu0 %6309, %v4352_v32   ;;  %v4037_v18 = vmul.f32 %v3896_v29, %v8454_v22  ;;  %v8457_v23 = vld [vmem:[#allocation40_spill] sm:$0xff]  ;;  %v8461_v22 = vld [vmem:[#allocation45_spill] sm:$0xff] }
 0x23a   : > { %5943 = vmatprep.mubr.msk.bf16.mxu0 %vm1139_vm8, %v4065_v6  ;;  %v4358_v6 = vld [vmem:[#allocation5 + $0x8f0] sm:$0xff] }
 0x23b   : > { %v4066_v56 = vpack.c.bf16 %v4036_v46, %v4035_v59  ;;  %v8458_v59 = vld [vmem:[#allocation42_spill] sm:$0xff]  ;;  %v8459_v46 = vld [vmem:[#allocation43_spill] sm:$0xff] }
 0x23c   : > { %v3906_v16 = vpop.permute.xlu1 %3905  ;;  %v3901_v4 = vpop.permute.xlu0 %3900 }
 0x23d   : > { %v4038_v28 = vmul.f32 %v3901_v4, %v8455_v58  ;;  %4497 = vperm.xlu1 %6310, %v4355_v38   ;;  %4492 = vperm.xlu0 %6309, %v4354_v52   ;;  %v4039_v0 = vmul.f32 %v3906_v16, %v8456_v11  ;;  %v8460_v4 = vld [vmem:[#allocation44_spill] sm:$0xff] }
 0x23e   : > { %5944 = vmatmul.mubr.msk.bf16.vlgmr.msra.gmra.mrb[0].mxu0 %vm1139_vm8, %v4066_v56 }
 0x23f   : > { %v4067_v31 = vpack.c.bf16 %v4038_v28, %v4037_v18  ;;  %5976 = vmatpush3.bf16.msra.mxu0 %v4619_v2 }
 0x240   : > { %v3916_v20 = vpop.permute.xlu1 %3915  ;;  %v3911_v14 = vpop.permute.xlu0 %3910 }
 0x241   : > { %v4040_v32 = vmul.f32 %v3911_v14, %v8457_v23  ;;  %4507 = vperm.xlu1 %6310, %v4357_v43   ;;  %4502 = vperm.xlu0 %6309, %v4356_v21   ;;  %v4041_v60 = vmul.f32 %v3916_v20, %v8458_v59  ;;  %v8462_v21 = vld [vmem:[#allocation46_spill] sm:$0xff]  ;;  %v8463_v20 = vld [vmem:[#allocation47_spill] sm:$0xff] }
 0x242   : > { %5947 = vmatprep.mubr.msk.bf16.mxu0 %vm1139_vm8, %v4067_v31 }
 0x243   : > { %v4068_v29 = vpack.c.bf16 %v4040_v32, %v4039_v0  ;;  %v8464_v32 = vld [vmem:[#allocation48_spill] sm:$0xff] }
 0x244   : > { %v3926_v39 = vpop.permute.xlu1 %3925  ;;  %v3921_v12 = vpop.permute.xlu0 %3920 }
 0x245   : > { %v4042_v38 = vmul.f32 %v3921_v12, %v8459_v46  ;;  %4517 = vperm.xlu1 %6310, %v4359_v7   ;;  %4512 = vperm.xlu0 %6309, %v4358_v6   ;;  %v4043_v2 = vmul.f32 %v3926_v39, %v8460_v4  ;;  %v8465_v6 = vld [vmem:[#allocation49_spill] sm:$0xff] }
 0x246   : > { %5948 = vmatmul.mubr.msk.bf16.gmra.mrb[4].mxu0 %vm1139_vm8, %v4068_v29 }
 0x247   : > { %v4069_v52 = vpack.c.bf16 %v4042_v38, %v4041_v60  ;;  %v8466_v60 = vld [vmem:[#allocation50_spill] sm:$0xff]  ;;  %v8467_v38 = vld [vmem:[#allocation51_spill] sm:$0xff] }
 0x248   : > { %v3936_v56 = vpop.permute.xlu1 %3935  ;;  %v3931_v16 = vpop.permute.xlu0 %3930 }
 0x249   : > { %v4044_v18 = vmul.f32 %v3931_v16, %v8461_v22  ;;  %5951 = vmatprep.mubr.msk.bf16.mxu0 %vm1139_vm8, %v4069_v52  ;;  %v4045_v31 = vmul.f32 %v3936_v56, %v8462_v21 }
 0x24b   : > { %v4070_v58 = vpack.c.bf16 %v4044_v18, %v4043_v2  ;;  %v8468_v2 = vld [vmem:[#allocation52_spill] sm:$0xff]  ;;  %v8469_v18 = vld [vmem:[#allocation53_spill] sm:$0xff] }
 0x24c   : > { %v3946_v28 = vpop.permute.xlu1 %3945  ;;  %v3941_v43 = vpop.permute.xlu0 %3940 }
 0x24d   : > { %v4046_v14 = vmul.f32 %v3941_v43, %v8463_v20  ;;  %v4047_v7 = vmul.f32 %v3946_v28, %v8464_v32 }
 0x24e   : > { %5952 = vmatmul.mubr.msk.bf16.gmra.mrb[8].mxu0 %vm1139_vm8, %v4070_v58 }
 0x24f   : > { %v4071_v11 = vpack.c.bf16 %v4046_v14, %v4045_v31  ;;  %v8470_v31 = vld [vmem:[#allocation54_spill] sm:$0xff]  ;;  %v8471_v14 = vld [vmem:[#allocation55_spill] sm:$0xff] }
 0x250   : > { %v3956_v0 = vpop.permute.xlu1 %3955  ;;  %v3951_v23 = vpop.permute.xlu0 %3950 }
 0x251   : > { %v4048_v29 = vmul.f32 %v3951_v23, %v8465_v6  ;;  %5955 = vmatprep.mubr.msk.bf16.mxu0 %vm1139_vm8, %v4071_v11  ;;  %v4049_v46 = vmul.f32 %v3956_v0, %v8466_v60 }
 0x253   : > { %v4072_v39 = vpack.c.bf16 %v4048_v29, %v4047_v7  ;;  %v8472_v29 = vld [vmem:[#allocation56_spill] sm:$0xff] }
 0x254   : > { %v3966_v12 = vpop.permute.xlu1 %3965  ;;  %v3961_v59 = vpop.permute.xlu0 %3960 }
 0x255   : > { %v4050_v52 = vmul.f32 %v3961_v59, %v8467_v38  ;;  %v4051_v22 = vmul.f32 %v3966_v12, %v8468_v2  ;;  %v8473_v59 = vld [vmem:[#allocation57_spill] sm:$0xff] }
 0x256   : > { %5956 = vmatmul.mubr.msk.bf16.gmra.mrb[12].mxu0 %vm1139_vm8, %v4072_v39 }
 0x257   : > { %v4073_v56 = vpack.c.bf16 %v4050_v52, %v4049_v46 }
 0x258   : > { %v3976_v16 = vpop.permute.xlu1 %3975  ;;  %v3971_v4 = vpop.permute.xlu0 %3970 }
 0x259   : > { %v4052_v58 = vmul.f32 %v3971_v4, %v8469_v18  ;;  %5959 = vmatprep.mubr.msk.bf16.mxu0 %vm1139_vm8, %v4073_v56  ;;  %v4053_v20 = vmul.f32 %v3976_v16, %v8470_v31  ;;  %v8474_v4 = vld [vmem:[#allocation58_spill] sm:$0xff] }
 0x25b   : > { %v4074_v28 = vpack.c.bf16 %v4052_v58, %v4051_v22  ;;  %v8475_v58 = vld [vmem:[#allocation59_spill] sm:$0xff] }
 0x25c   : > { %v3986_v43 = vpop.permute.xlu1 %3985  ;;  %v3981_v21 = vpop.permute.xlu0 %3980 }
 0x25d   : > { %v4054_v11 = vmul.f32 %v3981_v21, %v8471_v14  ;;  %v4055_v39 = vmul.f32 %v3986_v43, %v8472_v29 }
 0x25e   : > { %5960 = vmatmul.mubr.msk.bf16.gmra.mrb[16].mxu0 %vm1139_vm8, %v4074_v28 }
 0x25f   : > { %v4075_v0 = vpack.c.bf16 %v4054_v11, %v4053_v20  ;;  %v8476_v11 = vld [vmem:[#allocation62_spill] sm:$0xff] }
 0x260   : > { %v3996_v23 = vpop.permute.xlu1 %3995  ;;  %v3991_v7 = vpop.permute.xlu0 %3990 }
 0x261   : > { %v4056_v12 = vmul.f32 %v3991_v7, %v8473_v59  ;;  %5963 = vmatprep.mubr.msk.bf16.mxu0 %vm1139_vm8, %v4075_v0  ;;  %v4057_v22 = vmul.f32 %v3996_v23, %v8474_v4 }
 0x263   : > { %v4076_v46 = vpack.c.bf16 %v4056_v12, %v4055_v39  ;;  %v8477_v12 = vld [vmem:[#allocation26_spill] sm:$0xff] }
 0x264   : > { %v4006_v52 = vpop.permute.xlu1 %4005  ;;  %v4001_v56 = vpop.permute.xlu0 %4000 }
 0x265   : > { %v4058_v16 = vmul.f32 %v4001_v56, %v8475_v58  ;;  %v4059_v51 = vmul.f32 %v4006_v52, %v8476_v11 }
 0x266   : > { %5964 = vmatmul.mubr.msk.bf16.gmra.mrb[20].mxu0 %vm1139_vm8, %v4076_v46 }
 0x267   : > { %v4077_v21 = vpack.c.bf16 %v4058_v16, %v4057_v22  ;;  %v8479_v16 = vld [vmem:[#allocation31_spill] sm:$0xff] }
 0x268   : > { %v4016_v28 = vpop.permute.xlu1 %4015  ;;  %v4011_v20 = vpop.permute.xlu0 %4010 }
 0x269   : > { %v4060_v43 = vmul.f32 %v4011_v20, %v6638_v44  ;;  %5967 = vmatprep.mubr.msk.bf16.mxu0 %vm1139_vm8, %v4077_v21  ;;  %v4061_v53 = vmul.f32 %v4016_v28, %v8477_v12 }
 0x26b   : > { %v4078_v7 = vpack.c.bf16 %v4060_v43, %v4059_v51 }
 0x26c   : > { %v4026_v0 = vpop.permute.xlu1 %4025  ;;  %v4021_v39 = vpop.permute.xlu0 %4020 }
 0x26d   : > { %v4062_v23 = vmul.f32 %v4021_v39, %v8478_v17  ;;  %v4063_v10 = vmul.f32 %v4026_v0, %v8479_v16 }
 0x26e   : > { %5968 = vmatmul.mubr.msk.bf16.gmra.mrb[24].mxu0 %vm1139_vm8, %v4078_v7 }
 0x26f   : > { %v4079_v56 = vpack.c.bf16 %v4062_v23, %v4061_v53  ;;  %v8481_v23 = vld [vmem:[#allocation96_spill] sm:$0xff] }
 0x270   : > { %v4363_v46 = vpop.permute.xlu1 %4362  ;;  %v4031_v22 = vpop.permute.xlu0 %4030  ;;  %v2330_v17 = vmul.f32 %v8481_v23, %v8438_v63 }
 0x271   : > { %v4064_v52 = vmul.f32 %v4031_v22, %v8480_v3  ;;  %5971 = vmatprep.mubr.msk.bf16.mxu0 %vm1139_vm8, %v4079_v56  ;;  %v4520_v43 = vmul.f32 %v4363_v46, %v7306_v47 }
 0x273   : > { %v4080_v20 = vpack.c.bf16 %v4064_v52, %v4063_v10 }
 0x274   : > { %v4373_v21 = vpop.permute.xlu1 %4372  ;;  %v4368_v51 = vpop.permute.xlu0 %4367 }
 0x275   : > { %v4521_v28 = vmul.f32 %v4368_v51, %v7302_v5  ;;  %v4522_v0 = vmul.f32 %v4373_v21, %v7338_v27 }
 0x276   : > { %5972 = vmatmul.mubr.msk.bf16.gmra.mrb[28].mxu0 %vm1139_vm8, %v4080_v20 }
 0x277   : > { %v4552_v39 = vpack.c.bf16 %v4521_v28, %v4520_v43 }
 0x278   : > { %v2258_v7 = vpop.permute.xlu1 %2257  ;;  %v4378_v53 = vpop.permute.xlu0 %4377 }
 0x279   : > { %v2331_v3 = vmul.f32 %v2258_v7, %v8439_v15  ;;  %v4523_v10 = vmul.f32 %v4378_v53, %v7334_v33  ;;  %5977 = vmatprep.mubr.msk.bf16.mxu0 %vm1139_vm8, %v4552_v39 }
 0x27b   : > { %v2352_v56 = vpack.c.bf16 %v2331_v3, %v2330_v17  ;;  %v4553_v47 = vpack.c.bf16 %v4523_v10, %v4522_v0 }
 0x27c   : > { %v4388_v46 = vpop.permute.xlu1 %4387  ;;  %v4383_v5 = vpop.permute.xlu0 %4382 }
 0x27d   : > { %v4525_v22 = vmul.f32 %v4388_v46, %v7342_v54  ;;  %v4524_v16 = vmul.f32 %v4383_v5, %v7346_v19  ;;  %5827 = vmatprep.mubr.msk.bf16.mxu1 %vm1139_vm8, %v2352_v56 }
 0x27e   : > { %5978 = vmatmul.mubr.msk.bf16.vlgmr.msra.gmra.mrb[0].mxu0 %vm1139_vm8, %v4553_v47 }
 0x27f   : > { %v4554_v63 = vpack.c.bf16 %v4525_v22, %v4524_v16 }
 0x280   : > { %v2268_v27 = vpop.permute.xlu1 %2267  ;;  %v2263_v52 = vpop.permute.xlu0 %2262 }
 0x281   : > { %v2333_v15 = vmul.f32 %v2268_v27, %v8441_v30  ;;  %v2332_v33 = vmul.f32 %v2263_v52, %v8440_v37  ;;  %5981 = vmatprep.mubr.msk.bf16.mxu0 %vm1139_vm8, %v4554_v63 }
 0x283   : > { %v2353_v17 = vpack.c.bf16 %v2333_v15, %v2332_v33 }
 0x284   : > { %v4398_v20 = vpop.permute.xlu1 %4397  ;;  %v4393_v21 = vpop.permute.xlu0 %4392 }
 0x285   : > { %v4527_v54 = vmul.f32 %v4398_v20, %v7376_v62  ;;  %v4526_v19 = vmul.f32 %v4393_v21, %v7380_v42  ;;  %5828 = vmatmul.mubr.msk.bf16.gmra.mrb[20].mxu1 %vm1139_vm8, %v2353_v17 }
 0x287   : > { %v4555_v51 = vpack.c.bf16 %v4527_v54, %v4526_v19 }
 0x288   : > { %v2278_v43 = vpop.permute.xlu1 %2277  ;;  %v2273_v28 = vpop.permute.xlu0 %2272 }
 0x289   : > { %v2335_v39 = vmul.f32 %v2278_v43, %v8443_v13  ;;  %v2334_v30 = vmul.f32 %v2273_v28, %v8442_v8  ;;  %5982 = vmatmul.mubr.msk.bf16.gmra.mrb[4].mxu0 %vm1139_vm8, %v4555_v51 }
 0x28b   : > { %v2354_v37 = vpack.c.bf16 %v2335_v39, %v2334_v30 }
 0x28c   : > { %v4408_v7 = vpop.permute.xlu1 %4407  ;;  %v4403_v53 = vpop.permute.xlu0 %4402 }
 0x28d   : > { %v4529_v23 = vmul.f32 %v4408_v7, %v7384_v45  ;;  %v4528_v62 = vmul.f32 %v4403_v53, %v7388_v24  ;;  %5831 = vmatprep.mubr.msk.bf16.mxu1 %vm1139_vm8, %v2354_v37  ;;  %v2614_v37 = vpack.c.bf16 %v8469_v18, %v8468_v2 }
 0x28f   : > { %v4556_v42 = vpack.c.bf16 %v4529_v23, %v4528_v62  ;;  %v8484_v23 = vld [vmem:[#allocation16_spill] sm:$0xff] }
 0x290   : > { %v2288_v0 = vpop.permute.xlu1 %2287  ;;  %v2283_v3 = vpop.permute.xlu0 %2282 }
 0x291   : > { %v2337_v10 = vmul.f32 %v2288_v0, %v8445_v55  ;;  %v2336_v13 = vmul.f32 %v2283_v3, %v8444_v49  ;;  %5985 = vmatprep.mubr.msk.bf16.mxu0 %vm1139_vm8, %v4556_v42  ;;  %v8485_v3 = vld [vmem:[#allocation97_spill] sm:$0xff] }
 0x293   : > { %v2355_v8 = vpack.c.bf16 %v2337_v10, %v2336_v13 }
 0x294   : > { %v4418_v56 = vpop.permute.xlu1 %4417  ;;  %v4413_v47 = vpop.permute.xlu0 %4412 }
 0x295   : > { %v4531_v46 = vmul.f32 %v4418_v56, %v7414_v57  ;;  %v4530_v45 = vmul.f32 %v4413_v47, %v7418_v40  ;;  %5832 = vmatmul.mubr.msk.bf16.gmra.mrb[24].mxu1 %vm1139_vm8, %v2355_v8  ;;  %v8486_v8 = vld [vmem:[#allocation98_spill] sm:$0xff] }
 0x297   : > { %v4557_v24 = vpack.c.bf16 %v4531_v46, %v4530_v45  ;;  %v2615_v46 = vpack.c.bf16 %v8471_v14, %v8470_v31  ;;  %v8487_v45 = vld [vmem:[#allocation99_spill] sm:$0xff] }
 0x298   : > { %v2298_v5 = vpop.permute.xlu1 %2297  ;;  %v2293_v22 = vpop.permute.xlu0 %2292 }
 0x299   : > { %v2339_v16 = vmul.f32 %v2298_v5, %v8447_v26  ;;  %v2338_v55 = vmul.f32 %v2293_v22, %v8446_v50  ;;  %5986 = vmatmul.mubr.msk.bf16.gmra.mrb[8].mxu0 %vm1139_vm8, %v4557_v24  ;;  %v2612_v50 = vpack.c.bf16 %v8465_v6, %v8464_v32  ;;  %v8482_v6 = vld [vmem:[#allocation94_spill] sm:$0xff]  ;;  %v2616_v5 = vpack.c.bf16 %v8473_v59, %v8472_v29 }
 0x29b   : > { %v2356_v49 = vpack.c.bf16 %v2339_v16, %v2338_v55 }
 0x29c   : > { %v4428_v63 = vpop.permute.xlu1 %4427  ;;  %v4423_v27 = vpop.permute.xlu0 %4422 }
 0x29d   : > { %v4533_v52 = vmul.f32 %v4428_v63, %v7422_v41  ;;  %v4532_v57 = vmul.f32 %v4423_v27, %v7426_v34  ;;  %5835 = vmatprep.mubr.msk.bf16.mxu1 %vm1139_vm8, %v2356_v49 }
 0x29f   : > { %v4558_v40 = vpack.c.bf16 %v4533_v52, %v4532_v57 }
 0x2a0   : > { %v2308_v15 = vpop.permute.xlu1 %2307  ;;  %v2303_v33 = vpop.permute.xlu0 %2302 }
 0x2a1   : > { %v2341_v17 = vmul.f32 %v2308_v15, %v8449_v48  ;;  %v2340_v26 = vmul.f32 %v2303_v33, %v8448_v9  ;;  %5989 = vmatprep.mubr.msk.bf16.mxu0 %vm1139_vm8, %v4558_v40  ;;  %v2617_v40 = vpack.c.bf16 %v8475_v58, %v8474_v4  ;;  %v8488_v15 = vld [vmem:[#allocation18_spill] sm:$0xff]  ;;  %v2618_v33 = vpack.c.bf16 %v6638_v44, %v8476_v11 }
 0x2a3   : > { %v2357_v20 = vpack.c.bf16 %v2341_v17, %v2340_v26 }
 0x2a4   : > { %v4438_v21 = vpop.permute.xlu1 %4437  ;;  %v4433_v54 = vpop.permute.xlu0 %4432 }
 0x2a5   : > { %v4535_v41 = vmul.f32 %v4438_v21, %v7452_v25  ;;  %v4534_v34 = vmul.f32 %v4433_v54, %v7456_v35  ;;  %v7813_v19 = vpop.f32.mrb[0].mxu1  ;;  %5836 = vmatmul.mubr.msk.bf16.gmra.mrb[28].mxu1 %vm1139_vm8, %v2357_v20  ;;  %v2613_v25 = vpack.c.bf16 %v8467_v38, %v8466_v60  ;;  %v8483_v35 = vld [vmem:[#allocation95_spill] sm:$0xff] }
 0x2a6   : > { %v7816_v51 = vpop.f32.mrb[1].mxu1  ;;  %5857 = vmatprep.mubr.msk.bf16.mxu1 %vm1139_vm8, %v2612_v50  ;;  %v8489_v50 = vld [vmem:[#allocation29_spill] sm:$0xff] }
 0x2a7   : > { %v4559_v9 = vpack.c.bf16 %v4535_v41, %v4534_v34  ;;  %v7819_v48 = vpop.f32.mrb[2].mxu1 }
 0x2a8   : > { %v7821_v43 = vpop.f32.mrb[3].mxu1  ;;  %v4448_v32 = vpop.permute.xlu1 %4447 }
 0x2a9   : > { %v4537_v28 = vmul.f32 %v4448_v32, %v8482_v6  ;;  %v4443_v39 = vpop.permute.xlu0 %4442  ;;  %5990 = vmatmul.mubr.msk.bf16.gmra.mrb[12].mxu0 %vm1139_vm8, %v4559_v9  ;;  %v8491_v9 = vld [vmem:[#allocation89_spill] sm:$0xff] }
 0x2aa   : > { %v4536_v30 = vmul.f32 %v4443_v39, %v8483_v35 }
 0x2ac   : > { %v4560_v7 = vpack.c.bf16 %v4537_v28, %v4536_v30  ;;  %v4458_v53 = vpop.permute.xlu1 %4457  ;;  %v8492_v28 = vld [vmem:[#allocation30_spill] sm:$0xff] }
 0x2ad   : > { %v4539_v62 = vmul.f32 %v4458_v53, %v8484_v23  ;;  %v4453_v42 = vpop.permute.xlu0 %4452  ;;  %v7831_v0 = vpop.f32.mrb[4].mxu1  ;;  %5858 = vmatmul.mubr.msk.bf16.vlgmr.msra.gmra.mrb[16].mxu1 %vm1139_vm8, %v2613_v25  ;;  %v2619_v39 = vpack.c.bf16 %v8492_v28, %v8477_v12  ;;  %v8493_v25 = vld [vmem:[#allocation90_spill] sm:$0xff]  ;;  %v7893_v12 = vld [vmem:[#allocation3] ss:$0 sm:$0xff] }
 0x2ae   : > { %v4538_v10 = vmul.f32 %v4453_v42, %v8485_v3  ;;  %v7835_v13 = vpop.f32.mrb[5].mxu1  ;;  %5993 = vmatprep.mubr.msk.bf16.mxu0 %vm1139_vm8, %v4560_v7  ;;  %5861 = vmatprep.mubr.msk.bf16.mxu1 %vm1139_vm8, %v2614_v37  ;;  %v8494_v7 = vld [vmem:[#allocation27_spill] sm:$0xff] }
 0x2af   : > { %v7839_v60 = vpop.f32.mrb[6].mxu1 }
 0x2b0   : > { %v4561_v38 = vpack.c.bf16 %v4539_v62, %v4538_v10  ;;  %v7841_v2 = vpop.f32.mrb[7].mxu1  ;;  %v4468_v18 = vpop.permute.xlu1 %4467  ;;  %v8495_v62 = vld [vmem:[#allocation28_spill] sm:$0xff] }
 0x2b1   : > { %v4541_v56 = vmul.f32 %v4468_v18, %v8486_v8  ;;  %v4463_v47 = vpop.permute.xlu0 %4462 }
 0x2b2   : > { %v4540_v24 = vmul.f32 %v4463_v47, %v8487_v45  ;;  %5994 = vmatmul.mubr.msk.bf16.gmra.mrb[16].mxu0 %vm1139_vm8, %v4561_v38 }
 0x2b4   : > { %v4562_v22 = vpack.c.bf16 %v4541_v56, %v4540_v24  ;;  %v4478_v16 = vpop.permute.xlu1 %4477 }
 0x2b5   : > { %v4543_v55 = vmul.f32 %v4478_v16, %v7520_v36  ;;  %v4473_v49 = vpop.permute.xlu0 %4472  ;;  %v7851_v63 = vpop.f32.mrb[8].mxu1  ;;  %5862 = vmatmul.mubr.msk.bf16.gmra.mrb[20].mxu1 %vm1139_vm8, %v2615_v46 }
 0x2b6   : > { %v4542_v27 = vmul.f32 %v4473_v49, %v7524_v1  ;;  %v7855_v52 = vpop.f32.mrb[9].mxu1  ;;  %5997 = vmatprep.mubr.msk.bf16.mxu0 %vm1139_vm8, %v4562_v22  ;;  %5865 = vmatprep.mubr.msk.bf16.mxu1 %vm1139_vm8, %v2616_v5 }
 0x2b7   : > { %v7859_v31 = vpop.f32.mrb[10].mxu1 }
 0x2b8   : > { %v4563_v14 = vpack.c.bf16 %v4543_v55, %v4542_v27  ;;  %v7861_v29 = vpop.f32.mrb[11].mxu1  ;;  %v4488_v59 = vpop.permute.xlu1 %4487 }
 0x2b9   : > { %v4545_v36 = vmul.f32 %v4488_v59, %v7528_v61  ;;  %v4483_v57 = vpop.permute.xlu0 %4482  ;;  %v8490_v61 = vld [vmem:[#allocation19_spill] sm:$0xff] }
 0x2ba   : > { %v4544_v1 = vmul.f32 %v4483_v57, %v8488_v15  ;;  %5998 = vmatmul.mubr.msk.bf16.gmra.mrb[20].mxu0 %vm1139_vm8, %v4563_v14 }
 0x2bc   : > { %v4564_v17 = vpack.c.bf16 %v4545_v36, %v4544_v1  ;;  %v4498_v26 = vpop.permute.xlu1 %4497 }
 0x2bd   : > { %v4547_v20 = vmul.f32 %v4498_v26, %v8489_v50  ;;  %v4493_v21 = vpop.permute.xlu0 %4492  ;;  %v7871_v54 = vpop.f32.mrb[12].mxu1  ;;  %5866 = vmatmul.mubr.msk.bf16.gmra.mrb[24].mxu1 %vm1139_vm8, %v2617_v40 }
 0x2be   : > { %v4546_v41 = vmul.f32 %v4493_v21, %v8490_v61  ;;  %v7875_v34 = vpop.f32.mrb[13].mxu1  ;;  %6001 = vmatprep.mubr.msk.bf16.mxu0 %vm1139_vm8, %v4564_v17  ;;  %5869 = vmatprep.mubr.msk.bf16.mxu1 %vm1139_vm8, %v2618_v33 }
 0x2bf   : > { %v7879_v4 = vpop.f32.mrb[14].mxu1 }
 0x2c0   : > { %v4565_v44 = vpack.c.bf16 %v4547_v20, %v4546_v41  ;;  %v7881_v58 = vpop.f32.mrb[15].mxu1  ;;  %v4508_v11 = vpop.permute.xlu1 %4507 }
 0x2c1   : > { %v4549_v32 = vmul.f32 %v4508_v11, %v8491_v9  ;;  %v4503_v6 = vpop.permute.xlu0 %4502 }
 0x2c2   : > { %v4548_v35 = vmul.f32 %v4503_v6, %v8493_v25  ;;  %6002 = vmatmul.mubr.msk.bf16.gmra.mrb[24].mxu0 %vm1139_vm8, %v4565_v44 }
 0x2c4   : > { %v4566_v30 = vpack.c.bf16 %v4549_v32, %v4548_v35  ;;  %v4518_v37 = vpop.permute.xlu1 %4517 }
 0x2c5   : > { %v4551_v53 = vmul.f32 %v4518_v37, %v8494_v7  ;;  %v4513_v23 = vpop.permute.xlu0 %4512  ;;  %5870 = vmatmul.mubr.msk.bf16.gmra.mrb[28].mxu1 %vm1139_vm8, %v2619_v39 }
 0x2c6   : > { %v4550_v42 = vmul.f32 %v4513_v23, %v8495_v62  ;;  %6005 = vmatprep.mubr.msk.bf16.mxu0 %vm1139_vm8, %v4566_v30 }
 0x2c8   : > { %v4567_v3 = vpack.c.bf16 %v4551_v53, %v4550_v42 }
 0x2ca   : > { %6006 = vmatmul.mubr.msk.bf16.gmra.mrb[28].mxu0 %vm1139_vm8, %v4567_v3 }
 0x351   : > { %v5979_v10 = vpop.f32.mrb[0].mxu0 }
 0x352   : > { %v6011_v38 = vadd.f32 %v5979_v10, %v7813_v19  ;;  %v4655_v18 = vpop.f32.mrb[1].mxu0 }
 0x353   : > { %v6012_v8 = vadd.f32 %v4655_v18, %v7816_v51  ;;  %v5980_v56 = vpop.f32.mrb[2].mxu0 }
 0x354   : > { %v4823_v47 = vadd.f32 %v6011_v38, %v7893_v12  ;;  %v6013_v46 = vadd.f32 %v5980_v56, %v7819_v48  ;;  %v4658_v45 = vpop.f32.mrb[3].mxu0 }
 0x355   : > { %v4821_v19 = vadd.f32 %v6012_v8, %v7893_v12  ;;  %v6014_v24 = vadd.f32 %v4658_v45, %v7821_v43 }
 0x356   : > { %v5520_v51 = vpack.c.bf16 %v4823_v47, %v4823_v47  ;;  %v4824_v5 = vadd.f32 %v6013_v46, %v7893_v12  ;;  %v5087_v55 = vmul.f32 %v4823_v47, %v4823_v47  ;;  %v5017_v57 = vsel %vm1139_vm8, %v4823_v47, 0.0 }
 0x357   : > { %v5518_v22 = vpack.c.bf16 %v4821_v19, %v4821_v19  ;;  %v5085_v48 = vmul.f32 %v4821_v19, %v4821_v19  ;;  %v4822_v16 = vadd.f32 %v6014_v24, %v7893_v12  ;;  %v5014_v27 = vsel %vm1139_vm8, %v4821_v19, 0.0 }
 0x358   : > { %4984 = vst.msk [vmem:[%s7903_s15 + $0x8] sm:$0xf] %vm4981_vm0, %v5520_v51  ;;  %v5521_v49 = vpack.c.bf16 %v4824_v5, %v4824_v5  ;;  %v5088_v15 = vmul.f32 %v4824_v5, %v4824_v5  ;;  %v5120_v50 = vsel %vm1139_vm8, %v5087_v55, 0.0  ;;  %v5019_v20 = vsel %vm1139_vm8, %v4824_v5, 0.0 }
 0x359   : > { %4982 = vst.msk [vmem:[%s7903_s15] sm:$0xf] %vm4981_vm0, %v5518_v22  ;;  %v5519_v14 = vpack.c.bf16 %v4822_v16, %v4822_v16  ;;  %v5015_v59 = vsel %vm1139_vm8, %v4822_v16, 0.0  ;;  %v5086_v43 = vmul.f32 %v4822_v16, %v4822_v16  ;;  %v5117_v40 = vsel %vm1139_vm8, %v5085_v48, 0.0 }
 0x35a   : > { %4985 = vst.msk [vmem:[%s7903_s15 + $0xc] sm:$0xf] %vm4981_vm0, %v5521_v49  ;;  %v5016_v36 = vadd.f32 %v5015_v59, %v5014_v27  ;;  %v5122_v32 = vsel %vm1139_vm8, %v5088_v15, 0.0 }
 0x35b   : > { %4983 = vst.msk [vmem:[%s7903_s15 + $0x4] sm:$0xf] %vm4981_vm0, %v5519_v14  ;;  %v5118_v1 = vsel %vm1139_vm8, %v5086_v43, 0.0 }
 0x35c   : > { %v5018_v33 = vadd.f32 %v5017_v57, %v5016_v36  ;;  %v5119_v17 = vadd.f32 %v5118_v1, %v5117_v40  ;;  %v5983_v26 = vpop.f32.mrb[4].mxu0 }
 0x35d   : > { %v6015_v21 = vadd.f32 %v5983_v26, %v7831_v0  ;;  %v4671_v61 = vpop.f32.mrb[5].mxu0 }
 0x35e   : > { %v5121_v41 = vadd.f32 %v5120_v50, %v5119_v17  ;;  %v6016_v44 = vadd.f32 %v4671_v61, %v7835_v13  ;;  %v5020_v11 = vadd.f32 %v5019_v20, %v5018_v33  ;;  %v5984_v9 = vpop.f32.mrb[6].mxu0 }
 0x35f   : > { %v4827_v6 = vadd.f32 %v6015_v21, %v7893_v12  ;;  %v6017_v28 = vadd.f32 %v5984_v9, %v7839_v60  ;;  %v4674_v39 = vpop.f32.mrb[7].mxu0 }
 0x360   : > { %v4825_v25 = vadd.f32 %v6016_v44, %v7893_v12  ;;  %v5123_v35 = vadd.f32 %v5122_v32, %v5121_v41  ;;  %v6018_v0 = vadd.f32 %v4674_v39, %v7841_v2 }
 0x361   : > { %v5524_v30 = vpack.c.bf16 %v4827_v6, %v4827_v6  ;;  %v4828_v13 = vadd.f32 %v6017_v28, %v7893_v12  ;;  %v5091_v10 = vmul.f32 %v4827_v6, %v4827_v6  ;;  %v5025_v56 = vsel %vm1139_vm8, %v4827_v6, 0.0 }
 0x362   : > { %v5522_v37 = vpack.c.bf16 %v4825_v25, %v4825_v25  ;;  %v5021_v7 = vsel %vm1139_vm8, %v4825_v25, 0.0  ;;  %v5089_v53 = vmul.f32 %v4825_v25, %v4825_v25  ;;  %v4826_v23 = vadd.f32 %v6018_v0, %v7893_v12 }
 0x363   : > { %4988 = vst.msk [vmem:[%s7903_s15 + $0x18] sm:$0xf] %vm4981_vm0, %v5524_v30  ;;  %v5022_v60 = vadd.f32 %v5021_v7, %v5020_v11  ;;  %v5525_v62 = vpack.c.bf16 %v4828_v13, %v4828_v13  ;;  %v5092_v47 = vmul.f32 %v4828_v13, %v4828_v13  ;;  %v5027_v19 = vsel %vm1139_vm8, %v4828_v13, 0.0 }
 0x364   : > { %4986 = vst.msk [vmem:[%s7903_s15 + $0x10] sm:$0xf] %vm4981_vm0, %v5522_v37  ;;  %v5124_v42 = vsel %vm1139_vm8, %v5089_v53, 0.0  ;;  %v5523_v2 = vpack.c.bf16 %v4826_v23, %v4826_v23  ;;  %v5023_v3 = vsel %vm1139_vm8, %v4826_v23, 0.0  ;;  %v5090_v8 = vmul.f32 %v4826_v23, %v4826_v23 }
 0x365   : > { %v5125_v38 = vadd.f32 %v5124_v42, %v5123_v35  ;;  %4989 = vst.msk [vmem:[%s7903_s15 + $0x1c] sm:$0xf] %vm4981_vm0, %v5525_v62  ;;  %v5024_v18 = vadd.f32 %v5023_v3, %v5022_v60  ;;  %v5128_v51 = vsel %vm1139_vm8, %v5091_v10, 0.0  ;;  %v5130_v48 = vsel %vm1139_vm8, %v5092_v47, 0.0 }
 0x366   : > { %4987 = vst.msk [vmem:[%s7903_s15 + $0x14] sm:$0xf] %vm4981_vm0, %v5523_v2  ;;  %v5126_v45 = vsel %vm1139_vm8, %v5090_v8, 0.0 }
 0x367   : > { %v5026_v46 = vadd.f32 %v5025_v56, %v5024_v18  ;;  %v5127_v24 = vadd.f32 %v5126_v45, %v5125_v38 }
 0x369   : > { %v5028_v5 = vadd.f32 %v5027_v19, %v5026_v46  ;;  %v5129_v22 = vadd.f32 %v5128_v51, %v5127_v24 }
 0x36b   : > { %v5131_v55 = vadd.f32 %v5130_v48, %v5129_v22 }
 0x36c   : > { %v5987_v16 = vpop.f32.mrb[8].mxu0 }
 0x36d   : > { %v6019_v49 = vadd.f32 %v5987_v16, %v7851_v63  ;;  %v4687_v27 = vpop.f32.mrb[9].mxu0 }
 0x36e   : > { %v6020_v14 = vadd.f32 %v4687_v27, %v7855_v52  ;;  %v5988_v59 = vpop.f32.mrb[10].mxu0 }
 0x36f   : > { %v4831_v43 = vadd.f32 %v6019_v49, %v7893_v12  ;;  %v6021_v36 = vadd.f32 %v5988_v59, %v7859_v31  ;;  %v4690_v57 = vpop.f32.mrb[11].mxu0 }
 0x370   : > { %v4829_v40 = vadd.f32 %v6020_v14, %v7893_v12  ;;  %v6022_v15 = vadd.f32 %v4690_v57, %v7861_v29 }
 0x371   : > { %v5528_v1 = vpack.c.bf16 %v4831_v43, %v4831_v43  ;;  %v4832_v33 = vadd.f32 %v6021_v36, %v7893_v12  ;;  %v5095_v61 = vmul.f32 %v4831_v43, %v4831_v43  ;;  %v5033_v9 = vsel %vm1139_vm8, %v4831_v43, 0.0 }
 0x372   : > { %v5526_v17 = vpack.c.bf16 %v4829_v40, %v4829_v40  ;;  %v5029_v63 = vsel %vm1139_vm8, %v4829_v40, 0.0  ;;  %v5093_v52 = vmul.f32 %v4829_v40, %v4829_v40  ;;  %v4830_v26 = vadd.f32 %v6022_v15, %v7893_v12 }
 0x373   : > { %4992 = vst.msk [vmem:[%s7903_s15 + $0x28] sm:$0xf] %vm4981_vm0, %v5528_v1  ;;  %v5030_v50 = vadd.f32 %v5029_v63, %v5028_v5  ;;  %v5529_v31 = vpack.c.bf16 %v4832_v33, %v4832_v33  ;;  %v5096_v32 = vmul.f32 %v4832_v33, %v4832_v33  ;;  %v5035_v39 = vsel %vm1139_vm8, %v4832_v33, 0.0 }
 0x374   : > { %4990 = vst.msk [vmem:[%s7903_s15 + $0x20] sm:$0xf] %vm4981_vm0, %v5526_v17  ;;  %v5132_v20 = vsel %vm1139_vm8, %v5093_v52, 0.0  ;;  %v5527_v29 = vpack.c.bf16 %v4830_v26, %v4830_v26  ;;  %v5031_v21 = vsel %vm1139_vm8, %v4830_v26, 0.0  ;;  %v5094_v11 = vmul.f32 %v4830_v26, %v4830_v26 }
 0x375   : > { %v5133_v41 = vadd.f32 %v5132_v20, %v5131_v55  ;;  %4993 = vst.msk [vmem:[%s7903_s15 + $0x2c] sm:$0xf] %vm4981_vm0, %v5529_v31  ;;  %v5032_v44 = vadd.f32 %v5031_v21, %v5030_v50  ;;  %v5136_v35 = vsel %vm1139_vm8, %v5095_v61, 0.0  ;;  %v5138_v13 = vsel %vm1139_vm8, %v5096_v32, 0.0 }
 0x376   : > { %4991 = vst.msk [vmem:[%s7903_s15 + $0x24] sm:$0xf] %vm4981_vm0, %v5527_v29  ;;  %v5134_v28 = vsel %vm1139_vm8, %v5094_v11, 0.0 }
 0x377   : > { %v5034_v6 = vadd.f32 %v5033_v9, %v5032_v44  ;;  %v5135_v25 = vadd.f32 %v5134_v28, %v5133_v41 }
 0x379   : > { %v5036_v0 = vadd.f32 %v5035_v39, %v5034_v6  ;;  %v5137_v30 = vadd.f32 %v5136_v35, %v5135_v25 }
 0x37b   : > { %v5139_v7 = vadd.f32 %v5138_v13, %v5137_v30 }
 0x37c   : > { %v5991_v37 = vpop.f32.mrb[12].mxu0 }
 0x37d   : > { %v6023_v53 = vadd.f32 %v5991_v37, %v7871_v54  ;;  %v4703_v23 = vpop.f32.mrb[13].mxu0 }
 0x37e   : > { %v6024_v60 = vadd.f32 %v4703_v23, %v7875_v34  ;;  %v5992_v62 = vpop.f32.mrb[14].mxu0 }
 0x37f   : > { %v4835_v42 = vadd.f32 %v6023_v53, %v7893_v12  ;;  %v6025_v2 = vadd.f32 %v5992_v62, %v7879_v4  ;;  %v4706_v3 = vpop.f32.mrb[15].mxu0 }
 0x380   : > { %v4833_v10 = vadd.f32 %v6024_v60, %v7893_v12  ;;  %v6026_v38 = vadd.f32 %v4706_v3, %v7881_v58  ;;  %v5859_v18 = vpop.f32.mrb[16].mxu1 }
 0x381   : > { %v5532_v8 = vpack.c.bf16 %v4835_v42, %v4835_v42  ;;  %v4836_v56 = vadd.f32 %v6025_v2, %v7893_v12  ;;  %v2771_v54 = vpop.f32.mrb[17].mxu1  ;;  %v5099_v48 = vmul.f32 %v4835_v42, %v4835_v42  ;;  %v5041_v14 = vsel %vm1139_vm8, %v4835_v42, 0.0 }
 0x382   : > { %v5530_v47 = vpack.c.bf16 %v4833_v10, %v4833_v10  ;;  %v5037_v34 = vsel %vm1139_vm8, %v4833_v10, 0.0  ;;  %v5097_v46 = vmul.f32 %v4833_v10, %v4833_v10  ;;  %v4834_v45 = vadd.f32 %v6026_v38, %v7893_v12  ;;  %v5860_v19 = vpop.f32.mrb[18].mxu1 }
 0x383   : > { %4996 = vst.msk [vmem:[%s7903_s15 + $0x38] sm:$0xf] %vm4981_vm0, %v5532_v8  ;;  %v5038_v4 = vadd.f32 %v5037_v34, %v5036_v0  ;;  %v5533_v24 = vpack.c.bf16 %v4836_v56, %v4836_v56  ;;  %v2774_v51 = vpop.f32.mrb[19].mxu1  ;;  %v5100_v59 = vmul.f32 %v4836_v56, %v4836_v56  ;;  %v5043_v33 = vsel %vm1139_vm8, %v4836_v56, 0.0 }
 0x384   : > { %4994 = vst.msk [vmem:[%s7903_s15 + $0x30] sm:$0xf] %vm4981_vm0, %v5530_v47  ;;  %v5140_v58 = vsel %vm1139_vm8, %v5097_v46, 0.0  ;;  %v5531_v5 = vpack.c.bf16 %v4834_v45, %v4834_v45  ;;  %v5039_v22 = vsel %vm1139_vm8, %v4834_v45, 0.0  ;;  %v5098_v49 = vmul.f32 %v4834_v45, %v4834_v45 }
 0x385   : > { %v5141_v16 = vadd.f32 %v5140_v58, %v5139_v7  ;;  %4997 = vst.msk [vmem:[%s7903_s15 + $0x3c] sm:$0xf] %vm4981_vm0, %v5533_v24  ;;  %v5040_v55 = vadd.f32 %v5039_v22, %v5038_v4  ;;  %v5995_v27 = vpop.f32.mrb[16].mxu0  ;;  %v5144_v31 = vsel %vm1139_vm8, %v5099_v48, 0.0  ;;  %v5146_v41 = vsel %vm1139_vm8, %v5100_v59, 0.0 }
 0x386   : > { %4995 = vst.msk [vmem:[%s7903_s15 + $0x34] sm:$0xf] %vm4981_vm0, %v5531_v5  ;;  %v6027_v43 = vadd.f32 %v5995_v27, %v5859_v18  ;;  %v4719_v36 = vpop.f32.mrb[17].mxu0  ;;  %v5142_v40 = vsel %vm1139_vm8, %v5098_v49, 0.0 }
 0x387   : > { %v5042_v57 = vadd.f32 %v5041_v14, %v5040_v55  ;;  %v6028_v15 = vadd.f32 %v4719_v36, %v2771_v54  ;;  %v5996_v1 = vpop.f32.mrb[18].mxu0  ;;  %v5143_v17 = vadd.f32 %v5142_v40, %v5141_v16 }
 0x388   : > { %v4839_v63 = vadd.f32 %v6027_v43, %v7893_v12  ;;  %v6029_v52 = vadd.f32 %v5996_v1, %v5860_v19  ;;  %v4722_v26 = vpop.f32.mrb[19].mxu0  ;;  %v5863_v50 = vpop.f32.mrb[20].mxu1 }
 0x389   : > { %v4837_v20 = vadd.f32 %v6028_v15, %v7893_v12  ;;  %v5044_v29 = vadd.f32 %v5043_v33, %v5042_v57  ;;  %v6030_v21 = vadd.f32 %v4722_v26, %v2774_v51  ;;  %v2787_v61 = vpop.f32.mrb[21].mxu1  ;;  %v5145_v44 = vadd.f32 %v5144_v31, %v5143_v17 }
 0x38a   : > { %v5536_v11 = vpack.c.bf16 %v4839_v63, %v4839_v63  ;;  %v5864_v9 = vpop.f32.mrb[22].mxu1  ;;  %v4840_v39 = vadd.f32 %v6029_v52, %v7893_v12  ;;  %v5103_v13 = vmul.f32 %v4839_v63, %v4839_v63  ;;  %v5049_v56 = vsel %vm1139_vm8, %v4839_v63, 0.0 }
 0x38b   : > { %v5534_v32 = vpack.c.bf16 %v4837_v20, %v4837_v20  ;;  %v5045_v6 = vsel %vm1139_vm8, %v4837_v20, 0.0  ;;  %v5101_v28 = vmul.f32 %v4837_v20, %v4837_v20  ;;  %v2790_v25 = vpop.f32.mrb[23].mxu1  ;;  %v5147_v0 = vadd.f32 %v5146_v41, %v5145_v44 }
 0x38c   : > { %5000 = vst.msk [vmem:[%s7903_s15 + $0x48] sm:$0xf] %vm4981_vm0, %v5536_v11  ;;  %v5046_v35 = vadd.f32 %v5045_v6, %v5044_v29  ;;  %v4838_v30 = vadd.f32 %v6030_v21, %v7893_v12  ;;  %v5537_v7 = vpack.c.bf16 %v4840_v39, %v4840_v39  ;;  %v5104_v3 = vmul.f32 %v4840_v39, %v4840_v39 }
 0x38d   : > { %4998 = vst.msk [vmem:[%s7903_s15 + $0x40] sm:$0xf] %vm4981_vm0, %v5534_v32  ;;  %v5148_v37 = vsel %vm1139_vm8, %v5101_v28, 0.0  ;;  %v5999_v53 = vpop.f32.mrb[20].mxu0  ;;  %v5152_v58 = vsel %vm1139_vm8, %v5103_v13, 0.0  ;;  %v5051_v16 = vsel %vm1139_vm8, %v4840_v39, 0.0 }
 0x38e   : > { %v5149_v23 = vadd.f32 %v5148_v37, %v5147_v0  ;;  %v5535_v60 = vpack.c.bf16 %v4838_v30, %v4838_v30  ;;  %v5047_v62 = vsel %vm1139_vm8, %v4838_v30, 0.0  ;;  %v5102_v42 = vmul.f32 %v4838_v30, %v4838_v30  ;;  %v4735_v2 = vpop.f32.mrb[21].mxu0  ;;  %5001 = vst.msk [vmem:[%s7903_s15 + $0x4c] sm:$0xf] %vm4981_vm0, %v5537_v7 }
 0x38f   : > { %v5048_v10 = vadd.f32 %v5047_v62, %v5046_v35  ;;  %v6031_v38 = vadd.f32 %v5999_v53, %v5863_v50  ;;  %v6032_v18 = vadd.f32 %v4735_v2, %v2787_v61  ;;  %v6000_v8 = vpop.f32.mrb[22].mxu0  ;;  %v5154_v55 = vsel %vm1139_vm8, %v5104_v3, 0.0 }
 0x390   : > { %4999 = vst.msk [vmem:[%s7903_s15 + $0x44] sm:$0xf] %vm4981_vm0, %v5535_v60  ;;  %v5150_v54 = vsel %vm1139_vm8, %v5102_v42, 0.0  ;;  %v6033_v47 = vadd.f32 %v6000_v8, %v5864_v9  ;;  %v4738_v34 = vpop.f32.mrb[23].mxu0  ;;  %v5867_v46 = vpop.f32.mrb[24].mxu1 }
 0x391   : > { %v5050_v45 = vadd.f32 %v5049_v56, %v5048_v10  ;;  %v5151_v19 = vadd.f32 %v5150_v54, %v5149_v23  ;;  %v4843_v4 = vadd.f32 %v6031_v38, %v7893_v12  ;;  %v4841_v24 = vadd.f32 %v6032_v18, %v7893_v12  ;;  %v2803_v51 = vpop.f32.mrb[25].mxu1 }
 0x392   : > { %v4844_v5 = vadd.f32 %v6033_v47, %v7893_v12  ;;  %v6034_v22 = vadd.f32 %v4738_v34, %v2790_v25  ;;  %v5868_v48 = vpop.f32.mrb[26].mxu1 }
 0x393   : > { %v5153_v49 = vadd.f32 %v5152_v58, %v5151_v19  ;;  %v5540_v27 = vpack.c.bf16 %v4843_v4, %v4843_v4  ;;  %v2806_v14 = vpop.f32.mrb[27].mxu1  ;;  %v5538_v59 = vpack.c.bf16 %v4841_v24, %v4841_v24  ;;  %v5052_v43 = vadd.f32 %v5051_v16, %v5050_v45 }
 0x394   : > { %v5053_v36 = vsel %vm1139_vm8, %v4841_v24, 0.0  ;;  %v5105_v57 = vmul.f32 %v4841_v24, %v4841_v24  ;;  %v5541_v15 = vpack.c.bf16 %v4844_v5, %v4844_v5  ;;  %v4842_v63 = vadd.f32 %v6034_v22, %v7893_v12 }
 0x395   : > { %5004 = vst.msk [vmem:[%s7903_s15 + $0x58] sm:$0xf] %vm4981_vm0, %v5540_v27  ;;  %v5155_v40 = vadd.f32 %v5154_v55, %v5153_v49  ;;  %v6003_v1 = vpop.f32.mrb[24].mxu0  ;;  %5002 = vst.msk [vmem:[%s7903_s15 + $0x50] sm:$0xf] %vm4981_vm0, %v5538_v59  ;;  %v5054_v33 = vadd.f32 %v5053_v36, %v5052_v43  ;;  %v5107_v26 = vmul.f32 %v4843_v4, %v4843_v4  ;;  %v5057_v25 = vsel %vm1139_vm8, %v4843_v4, 0.0 }
 0x396   : > { %v5156_v17 = vsel %vm1139_vm8, %v5105_v57, 0.0  ;;  %v4751_v52 = vpop.f32.mrb[25].mxu0  ;;  %5005 = vst.msk [vmem:[%s7903_s15 + $0x5c] sm:$0xf] %vm4981_vm0, %v5541_v15  ;;  %v6035_v31 = vadd.f32 %v6003_v1, %v5867_v46  ;;  %v5539_v21 = vpack.c.bf16 %v4842_v63, %v4842_v63  ;;  %v5055_v61 = vsel %vm1139_vm8, %v4842_v63, 0.0 }
 0x397   : > { %v5157_v50 = vadd.f32 %v5156_v17, %v5155_v40  ;;  %v6036_v20 = vadd.f32 %v4751_v52, %v2803_v51  ;;  %v6004_v29 = vpop.f32.mrb[26].mxu0  ;;  %v5106_v41 = vmul.f32 %v4842_v63, %v4842_v63  ;;  %v5056_v9 = vadd.f32 %v5055_v61, %v5054_v33 }
 0x398   : > { %v4754_v44 = vpop.f32.mrb[27].mxu0  ;;  %v5871_v11 = vpop.f32.mrb[28].mxu1  ;;  %v4847_v32 = vadd.f32 %v6035_v31, %v7893_v12  ;;  %v6037_v28 = vadd.f32 %v6004_v29, %v5868_v48  ;;  %v5108_v35 = vmul.f32 %v4844_v5, %v4844_v5  ;;  %5003 = vst.msk [vmem:[%s7903_s15 + $0x54] sm:$0xf] %vm4981_vm0, %v5539_v21  ;;  %v5160_v37 = vsel %vm1139_vm8, %v5107_v26, 0.0 }
 0x399   : > { %v4845_v6 = vadd.f32 %v6036_v20, %v7893_v12  ;;  %v2819_v39 = vpop.f32.mrb[29].mxu1  ;;  %v5158_v0 = vsel %vm1139_vm8, %v5106_v41, 0.0  ;;  %v6038_v30 = vadd.f32 %v4754_v44, %v2806_v14  ;;  %v5058_v7 = vadd.f32 %v5057_v25, %v5056_v9 }
 0x39a   : > { %v5872_v13 = vpop.f32.mrb[30].mxu1  ;;  %v5159_v53 = vadd.f32 %v5158_v0, %v5157_v50  ;;  %v5544_v23 = vpack.c.bf16 %v4847_v32, %v4847_v32  ;;  %v5059_v62 = vsel %vm1139_vm8, %v4844_v5, 0.0  ;;  %v4848_v18 = vadd.f32 %v6037_v28, %v7893_v12 }
 0x39b   : > { %v2822_v60 = vpop.f32.mrb[31].mxu1  ;;  %v5542_v42 = vpack.c.bf16 %v4845_v6, %v4845_v6  ;;  %v5061_v2 = vsel %vm1139_vm8, %v4845_v6, 0.0  ;;  %v5109_v3 = vmul.f32 %v4845_v6, %v4845_v6  ;;  %v5060_v38 = vadd.f32 %v5059_v62, %v5058_v7 }
 0x39c   : > { %v5161_v10 = vadd.f32 %v5160_v37, %v5159_v53  ;;  %5008 = vst.msk [vmem:[%s7903_s15 + $0x68] sm:$0xf] %vm4981_vm0, %v5544_v23  ;;  %v4846_v8 = vadd.f32 %v6038_v30, %v7893_v12  ;;  %v5162_v54 = vsel %vm1139_vm8, %v5108_v35, 0.0  ;;  %v5111_v45 = vmul.f32 %v4847_v32, %v4847_v32 }
 0x39d   : > { %v6007_v56 = vpop.f32.mrb[28].mxu0  ;;  %5006 = vst.msk [vmem:[%s7903_s15 + $0x60] sm:$0xf] %vm4981_vm0, %v5542_v42  ;;  %v5164_v47 = vsel %vm1139_vm8, %v5109_v3, 0.0  ;;  %v5062_v19 = vadd.f32 %v5061_v2, %v5060_v38  ;;  %v5545_v24 = vpack.c.bf16 %v4848_v18, %v4848_v18  ;;  %v5065_v58 = vsel %vm1139_vm8, %v4847_v32, 0.0 }
 0x39e   : > { %v6039_v34 = vadd.f32 %v6007_v56, %v5871_v11  ;;  %v4767_v46 = vpop.f32.mrb[29].mxu0  ;;  %v5163_v4 = vadd.f32 %v5162_v54, %v5161_v10  ;;  %v5543_v5 = vpack.c.bf16 %v4846_v8, %v4846_v8  ;;  %v5063_v22 = vsel %vm1139_vm8, %v4846_v8, 0.0 }
 0x39f   : > { %v6008_v51 = vpop.f32.mrb[30].mxu0  ;;  %v5110_v48 = vmul.f32 %v4846_v8, %v4846_v8  ;;  %5009 = vst.msk [vmem:[%s7903_s15 + $0x6c] sm:$0xf] %vm4981_vm0, %v5545_v24  ;;  %v5064_v49 = vadd.f32 %v5063_v22, %v5062_v19  ;;  %v6040_v14 = vadd.f32 %v4767_v46, %v2819_v39  ;;  %v5112_v59 = vmul.f32 %v4848_v18, %v4848_v18 }
 0x3a0   : > { %v4770_v16 = vpop.f32.mrb[31].mxu0  ;;  %v5165_v55 = vadd.f32 %v5164_v47, %v5163_v4  ;;  %v4851_v27 = vadd.f32 %v6039_v34, %v7893_v12  ;;  %5007 = vst.msk [vmem:[%s7903_s15 + $0x64] sm:$0xf] %vm4981_vm0, %v5543_v5  ;;  %v6041_v36 = vadd.f32 %v6008_v51, %v5872_v13  ;;  %v5168_v40 = vsel %vm1139_vm8, %v5111_v45, 0.0 }
 0x3a1   : > { %v5166_v43 = vsel %vm1139_vm8, %v5110_v48, 0.0  ;;  %v6042_v57 = vadd.f32 %v4770_v16, %v2822_v60  ;;  %v5066_v15 = vadd.f32 %v5065_v58, %v5064_v49  ;;  %v5067_v17 = vsel %vm1139_vm8, %v4848_v18, 0.0 }
 0x3a2   : > { %v5167_v1 = vadd.f32 %v5166_v43, %v5165_v55  ;;  %v5548_v33 = vpack.c.bf16 %v4851_v27, %v4851_v27  ;;  %v4849_v63 = vadd.f32 %v6040_v14, %v7893_v12  ;;  %v4852_v52 = vadd.f32 %v6041_v36, %v7893_v12 }
 0x3a3   : > { %v4850_v26 = vadd.f32 %v6042_v57, %v7893_v12  ;;  %v5068_v31 = vadd.f32 %v5067_v17, %v5066_v15  ;;  %v5170_v20 = vsel %vm1139_vm8, %v5112_v59, 0.0  ;;  %v5115_v6 = vmul.f32 %v4851_v27, %v4851_v27 }
 0x3a4   : > { %v5169_v50 = vadd.f32 %v5168_v40, %v5167_v1  ;;  %5012 = vst.msk [vmem:[%s7903_s15 + $0x78] sm:$0xf] %vm4981_vm0, %v5548_v33  ;;  %v5546_v29 = vpack.c.bf16 %v4849_v63, %v4849_v63  ;;  %v5069_v21 = vsel %vm1139_vm8, %v4849_v63, 0.0  ;;  %v5113_v61 = vmul.f32 %v4849_v63, %v4849_v63 }
 0x3a5   : > { %v5070_v41 = vadd.f32 %v5069_v21, %v5068_v31  ;;  %v5549_v11 = vpack.c.bf16 %v4852_v52, %v4852_v52  ;;  %v5547_v12 = vpack.c.bf16 %v4850_v26, %v4850_v26  ;;  %v5071_v32 = vsel %vm1139_vm8, %v4850_v26, 0.0 }
 0x3a6   : > { %v5171_v44 = vadd.f32 %v5170_v20, %v5169_v50  ;;  %5010 = vst.msk [vmem:[%s7903_s15 + $0x70] sm:$0xf] %vm4981_vm0, %v5546_v29  ;;  %v5172_v9 = vsel %vm1139_vm8, %v5113_v61, 0.0  ;;  %v5114_v25 = vmul.f32 %v4850_v26, %v4850_v26  ;;  %v5073_v35 = vsel %vm1139_vm8, %v4851_v27, 0.0 }
 0x3a7   : > { %5013 = vst.msk [vmem:[%s7903_s15 + $0x7c] sm:$0xf] %vm4981_vm0, %v5549_v11  ;;  %v5072_v39 = vadd.f32 %v5071_v32, %v5070_v41  ;;  %5011 = vst.msk [vmem:[%s7903_s15 + $0x74] sm:$0xf] %vm4981_vm0, %v5547_v12  ;;  %v5116_v0 = vmul.f32 %v4852_v52, %v4852_v52  ;;  %v5075_v37 = vsel %vm1139_vm8, %v4852_v52, 0.0  ;;  %v5176_v53 = vsel %vm1139_vm8, %v5115_v6, 0.0 }
 0x3a8   : > { %v5173_v28 = vadd.f32 %v5172_v9, %v5171_v44  ;;  %v5174_v13 = vsel %vm1139_vm8, %v5114_v25, 0.0 }
 0x3a9   : > { %v5074_v30 = vadd.f32 %v5073_v35, %v5072_v39  ;;  %v5178_v62 = vsel %vm1139_vm8, %v5116_v0, 0.0 }
 0x3aa   : > { %v5175_v7 = vadd.f32 %v5174_v13, %v5173_v28 }
 0x3ab   : > { %v5076_v23 = vadd.f32 %v5075_v37, %v5074_v30 }
 0x3ac   : > { %v5177_v60 = vadd.f32 %v5176_v53, %v5175_v7 }
 0x3ad   : > { %v5077_v42 = vrot.slane %v5076_v23, 4 }
 0x3ae   : > { %v5179_v2 = vadd.f32 %v5178_v62, %v5177_v60 }
 0x3af   : > { %v5078_v3 = vadd.f32 %v5077_v42, %v5076_v23 }
 0x3b0   : > { %v5180_v10 = vrot.slane %v5179_v2, 4 }
 0x3b1   : > { %v5079_v38 = vrot.slane %v5078_v3, 2 }
 0x3b2   : > { %v5181_v18 = vadd.f32 %v5180_v10, %v5179_v2 }
 0x3b3   : > { %v5080_v8 = vadd.f32 %v5079_v38, %v5078_v3 }
 0x3b4   : > { %v5182_v56 = vrot.slane %v5181_v18, 2 }
 0x3b5   : > { %v5081_v54 = vrot.slane %v5080_v8, 1 }
 0x3b6   : > { %v5183_v47 = vadd.f32 %v5182_v56, %v5181_v18 }
 0x3b7   : > { %v5082_v34 = vadd.f32 %v5081_v54, %v5080_v8 }
 0x3b8   : > { %v5184_v46 = vrot.slane %v5183_v47, 1 }
 0x3b9   : > { %5084 = vst.msk [vmem:[%s375_s13] sm:$0x1] %vm5083_vm3, %v5082_v34 }
 0x3ba   : > { %v5185_v45 = vadd.f32 %v5184_v46, %v5183_v47 }
 0x3bc   : > { %5186 = vst.msk [vmem:[%s378_s22] sm:$0x1] %vm5083_vm3, %v5185_v45 }
 0x3bd PF: > { %s23_s11 = sadd.s32 1, %s6382_s11  }
 0x3be   : > { %p20_p9 = scmp.ge.s32.totalorder %s23_s11, 4  }
 0x3c0   :  { %22 = sbr.rel (!%p20_p9) target bundleno = 4 (0x4), region = 126 }
 0x3c7   :  { %5232 = vsyncpa [#allocation4], 1 }
 0x3c8   :  { %5234 = vsyncpa [#allocation4 + $0x1], 1 }
 0x3c9   :  { %5235 = vsyncpa [#allocation6], 1 }

// kernel: residual_block.4
= control target key start
LH: loop header
LB: loop body
LE: loop exit
PB: predicated region body
PF: predicated region fallthrough
CT: control target
= control target key end

     0   :  { %s6632_s11 = smov 0   ;;  %s8987_s0 = inlined_call_operand.vmem [shape: bf16[2,256,8], index: 0, kind: input, shape index: {}]   ;;  %s8988_s1 = inlined_call_operand.vmem [shape: f32[1,8], index: 1, kind: input, shape index: {}]   ;;  %s8989_s2 = inlined_call_operand.vmem [shape: f32[1,8], index: 2, kind: input, shape index: {}]   ;;  %s8990_s3 = inlined_call_operand.<no memory space> [shape: f32[1], index: 3, kind: input, shape index: {}]   ;;  %s8991_s4 = inlined_call_operand.vmem [shape: bf16[9,8,8], index: 4, kind: input, shape index: {}]   ;;  %s8992_s5 = inlined_call_operand.vmem [shape: f32[1,8], index: 5, kind: input, shape index: {}]   ;;  %s8993_s6 = inlined_call_operand.vmem [shape: f32[9,256,1], index: 6, kind: input, shape index: {}]   ;;  %s8994_s7 = inlined_call_operand.vmem [shape: bf16[2,256,8], index: 7, kind: output, shape index: {0}]   ;;  %s8995_s8 = inlined_call_operand.vmem [shape: f32[2,1,8], index: 8, kind: output, shape index: {1}]   ;;  %s8996_s9 = inlined_call_operand.vmem [shape: f32[2,1,8], index: 9, kind: output, shape index: {2}]  }
   0x1   :  { %15 = sst [smem:[#allocation2]] %s8990_s3 }
   0x2 LB: > { %s5296_s12 = sadd.s32 4294967295, %s6576_s11   ;;  %p5300_p0 = scmp.ge.s32.totalorder %s6576_s11, 1  ;;  %s6576_s11 = sphi %s6632_s11, %s21_s11  }
   0x3   : > { %p293_p1 = scmp.lt.s32.totalorder %s6576_s11, 3 }
   0x5   : > { %p294_p2 = pnand %p5300_p0, %p293_p1 }
   0x7   : > { %297 = sbr.rel (%p294_p2) target bundleno = 900 (0x384), region = 48 }
   0xe   : > { %v661_v0 = vld [vmem:[%s8993_s6 + $0x10] sm:$0xff]  ;;  %v659_v1 = vld [vmem:[%s8993_s6] sm:$0xff]  ;;  %v6578_v2 = vmov 0   ;;  %v662_v3 = vld [vmem:[%s8993_s6 + $0x18] sm:$0xff]  ;;  %vm1192_vm0 = vcmask 1043456   ;;  %p335_p3 = scmp.lt.s32.totalorder %s5296_s12, 1 }
   0xf   : > { %6568 = vset.pattern.permute.xlu1 %v6578_v2  ;;  %6567 = vset.pattern.permute.xlu0 %v6578_v2  ;;  %v660_v4 = vld [vmem:[%s8993_s6 + $0x8] sm:$0xff]  ;;  %v663_v6 = vld [vmem:[%s8993_s6 + $0x20] sm:$0xff]  ;;  %v666_v7 = vld [vmem:[%s8993_s6 + $0x38] sm:$0xff]  ;;  %s352_s16 = sld [smem:[#allocation2]]  ;;  %vm1143_vm9 = vcmask 64512  }
  0x10   : > { %703 = vperm.xlu1 %6568, %v661_v0   ;;  %693 = vperm.xlu0 %6567, %v659_v1   ;;  %v664_v5 = vld [vmem:[%s8993_s6 + $0x28] sm:$0xff]  ;;  %v665_v8 = vld [vmem:[%s8993_s6 + $0x30] sm:$0xff]  ;;  %v667_v10 = vld [vmem:[%s8993_s6 + $0x40] sm:$0xff]  ;;  %s9378_s12 = smov (!%p335_p3, %s5296_s12), 1 }
  0x11   : > { %v668_v9 = vld [vmem:[%s8993_s6 + $0x48] sm:$0xff]  ;;  %v670_v11 = vld [vmem:[%s8993_s6 + $0x58] sm:$0xff]  ;;  %v669_v12 = vld [vmem:[%s8993_s6 + $0x50] sm:$0xff]  ;;  %s5718_s20 = sshll.u32 %s9378_s12, 7  ;;  %s347_s22 = scalar_lea.vmem %s8995_s8, %s9378_s12 }
  0x12   : > { %v672_v13 = vld [vmem:[%s8993_s6 + $0x68] sm:$0xff]  ;;  %v671_v14 = vld [vmem:[%s8993_s6 + $0x60] sm:$0xff]  ;;  %v674_v15 = vld [vmem:[%s8993_s6 + $0x78] sm:$0xff]  ;;  %s6952_s27 = scalar_lea.vmem %s8987_s0, %s5718_s20  ;;  %s8802_s19 = scalar_lea.vmem %s8994_s7, %s5718_s20 }
  0x13   : > { %v673_v16 = vld [vmem:[%s8993_s6 + $0x70] sm:$0xff]  ;;  %v676_v17 = vld [vmem:[%s8993_s6 + $0x88] sm:$0xff]  ;;  %v675_v18 = vld [vmem:[%s8993_s6 + $0x80] sm:$0xff]  ;;  %s350_s25 = scalar_lea.vmem %s8996_s9, %s9378_s12 }
  0x14   : > { %708 = vperm.xlu1 %6568, %v662_v3   ;;  %698 = vperm.xlu0 %6567, %v660_v4   ;;  %v678_v19 = vld [vmem:[%s8993_s6 + $0x98] sm:$0xff]  ;;  %v677_v20 = vld [vmem:[%s8993_s6 + $0x90] sm:$0xff]  ;;  %v680_v21 = vld [vmem:[%s8993_s6 + $0xa8] sm:$0xff] }
  0x15   : > { %v679_v22 = vld [vmem:[%s8993_s6 + $0xa0] sm:$0xff]  ;;  %v682_v23 = vld [vmem:[%s8993_s6 + $0xb8] sm:$0xff]  ;;  %v681_v24 = vld [vmem:[%s8993_s6 + $0xb0] sm:$0xff] }
  0x16   : > { %v684_v25 = vld [vmem:[%s8993_s6 + $0xc8] sm:$0xff]  ;;  %v683_v26 = vld [vmem:[%s8993_s6 + $0xc0] sm:$0xff]  ;;  %v686_v27 = vld [vmem:[%s8993_s6 + $0xd8] sm:$0xff] }
  0x17   : > { %v685_v28 = vld [vmem:[%s8993_s6 + $0xd0] sm:$0xff]  ;;  %v688_v29 = vld [vmem:[%s8993_s6 + $0xe8] sm:$0xff]  ;;  %v687_v30 = vld [vmem:[%s8993_s6 + $0xe0] sm:$0xff] }
  0x18   : > { %718 = vperm.xlu1 %6568, %v664_v5   ;;  %713 = vperm.xlu0 %6567, %v663_v6   ;;  %v690_v31 = vld [vmem:[%s8993_s6 + $0xf8] sm:$0xff]  ;;  %v689_v32 = vld [vmem:[%s8993_s6 + $0xf0] sm:$0xff]  ;;  %v5308_v33 = vld [vmem:[%s8993_s6 + $0x108] sm:$0xff] }
  0x19   : > { %v5307_v34 = vld [vmem:[%s8993_s6 + $0x100] sm:$0xff]  ;;  %v5310_v35 = vld [vmem:[%s8993_s6 + $0x118] sm:$0xff]  ;;  %v5309_v36 = vld [vmem:[%s8993_s6 + $0x110] sm:$0xff] }
  0x1a   : > { %v5312_v37 = vld [vmem:[%s8993_s6 + $0x128] sm:$0xff]  ;;  %v5311_v38 = vld [vmem:[%s8993_s6 + $0x120] sm:$0xff]  ;;  %v5314_v39 = vld [vmem:[%s8993_s6 + $0x138] sm:$0xff] }
  0x1b   : > { %v5313_v40 = vld [vmem:[%s8993_s6 + $0x130] sm:$0xff]  ;;  %v5316_v41 = vld [vmem:[%s8993_s6 + $0x148] sm:$0xff]  ;;  %v5315_v42 = vld [vmem:[%s8993_s6 + $0x140] sm:$0xff] }
  0x1c   : > { %728 = vperm.xlu1 %6568, %v666_v7   ;;  %723 = vperm.xlu0 %6567, %v665_v8   ;;  %v5339_v43 = vld [vmem:[%s8991_s4 + $0x4] sm:$0xf]  ;;  %v5318_v44 = vld [vmem:[%s8993_s6 + $0x158] sm:$0xff]  ;;  %v5317_v45 = vld [vmem:[%s8993_s6 + $0x150] sm:$0xff] }
  0x1d   : > { %6548 = vmatprep.subr.msk.bf16.mxu1 %vm1192_vm0, %v5339_v43  ;;  %v1194_v46 = vsel %vm1192_vm0, %v5339_v43, 0  ;;  %v5320_v47 = vld [vmem:[%s8993_s6 + $0x168] sm:$0xff]  ;;  %v5319_v48 = vld [vmem:[%s8993_s6 + $0x160] sm:$0xff]  ;;  %v5322_v49 = vld [vmem:[%s8993_s6 + $0x178] sm:$0xff] }
  0x1e   : > { %5985 = vmatpush3.bf16.msra.mxu1 %v1194_v46  ;;  %v5321_v50 = vld [vmem:[%s8993_s6 + $0x170] sm:$0xff]  ;;  %v5324_v51 = vld [vmem:[%s8993_s6 + $0x188] sm:$0xff]  ;;  %v5323_v52 = vld [vmem:[%s8993_s6 + $0x180] sm:$0xff] }
  0x1f   : > { %v5326_v53 = vld [vmem:[%s8993_s6 + $0x198] sm:$0xff]  ;;  %v5325_v54 = vld [vmem:[%s8993_s6 + $0x190] sm:$0xff]  ;;  %v5328_v55 = vld [vmem:[%s8993_s6 + $0x1a8] sm:$0xff] }
  0x20   : > { %738 = vperm.xlu1 %6568, %v668_v9   ;;  %733 = vperm.xlu0 %6567, %v667_v10   ;;  %v5327_v56 = vld [vmem:[%s8993_s6 + $0x1a0] sm:$0xff]  ;;  %v5330_v57 = vld [vmem:[%s8993_s6 + $0x1b8] sm:$0xff]  ;;  %v5329_v58 = vld [vmem:[%s8993_s6 + $0x1b0] sm:$0xff] }
  0x21   : > { %v5332_v59 = vld [vmem:[%s8993_s6 + $0x1c8] sm:$0xff]  ;;  %v5331_v60 = vld [vmem:[%s8993_s6 + $0x1c0] sm:$0xff]  ;;  %v5334_v61 = vld [vmem:[%s8993_s6 + $0x1d8] sm:$0xff] }
  0x22   : > { %v5333_v62 = vld [vmem:[%s8993_s6 + $0x1d0] sm:$0xff]  ;;  %v5336_v63 = vld [vmem:[%s8993_s6 + $0x1e8] sm:$0xff]  ;;  %v5335_v0 = vld [vmem:[%s8993_s6 + $0x1e0] sm:$0xff] }
  0x23   : > { %v5338_v1 = vld [vmem:[%s8993_s6 + $0x1f8] sm:$0xff]  ;;  %v5337_v2 = vld [vmem:[%s8993_s6 + $0x1f0] sm:$0xff]  ;;  %v5373_v3 = vld [vmem:[%s8993_s6 + $0x208] sm:$0xff] }
  0x24   : > { %748 = vperm.xlu1 %6568, %v670_v11   ;;  %743 = vperm.xlu0 %6567, %v669_v12   ;;  %v5372_v4 = vld [vmem:[%s8993_s6 + $0x200] sm:$0xff]  ;;  %v5375_v7 = vld [vmem:[%s8993_s6 + $0x218] sm:$0xff]  ;;  %v5374_v8 = vld [vmem:[%s8993_s6 + $0x210] sm:$0xff] }
  0x25   : > { %v6860_v11 = vld [vmem:[%s8991_s4] sm:$0xf]  ;;  %v5377_v12 = vld [vmem:[%s8993_s6 + $0x228] sm:$0xff]  ;;  %v5830_v46 = vld [vmem:[%s6952_s27 + $0x78] sm:$0xff]  }
  0x26   : > { %6549 = vmatprep.subr.msk.bf16.mxu1 %vm1192_vm0, %v6860_v11 }
  0x28   : > { %758 = vperm.xlu1 %6568, %v672_v13   ;;  %753 = vperm.xlu0 %6567, %v671_v14   ;;  %v5376_v13 = vld [vmem:[%s8993_s6 + $0x220] sm:$0xff] }
  0x2c   : > { %768 = vperm.xlu1 %6568, %v674_v15   ;;  %763 = vperm.xlu0 %6567, %v673_v16   ;;  %v5379_v16 = vld [vmem:[%s8993_s6 + $0x238] sm:$0xff] }
  0x30   : > { %778 = vperm.xlu1 %6568, %v676_v17   ;;  %773 = vperm.xlu0 %6567, %v675_v18   ;;  %v5378_v17 = vld [vmem:[%s8993_s6 + $0x230] sm:$0xff] }
  0x34   : > { %788 = vperm.xlu1 %6568, %v678_v19   ;;  %783 = vperm.xlu0 %6567, %v677_v20   ;;  %v5381_v20 = vld [vmem:[%s8993_s6 + $0x248] sm:$0xff] }
  0x38   : > { %798 = vperm.xlu1 %6568, %v680_v21   ;;  %793 = vperm.xlu0 %6567, %v679_v22   ;;  %v5380_v21 = vld [vmem:[%s8993_s6 + $0x240] sm:$0xff] }
  0x3c   : > { %808 = vperm.xlu1 %6568, %v682_v23   ;;  %803 = vperm.xlu0 %6567, %v681_v24   ;;  %v5383_v24 = vld [vmem:[%s8993_s6 + $0x258] sm:$0xff] }
  0x40   : > { %818 = vperm.xlu1 %6568, %v684_v25   ;;  %813 = vperm.xlu0 %6567, %v683_v26   ;;  %v5382_v25 = vld [vmem:[%s8993_s6 + $0x250] sm:$0xff] }
  0x44   : > { %828 = vperm.xlu1 %6568, %v686_v27   ;;  %823 = vperm.xlu0 %6567, %v685_v28   ;;  %v5385_v28 = vld [vmem:[%s8993_s6 + $0x268] sm:$0xff] }
  0x48   : > { %838 = vperm.xlu1 %6568, %v688_v29   ;;  %833 = vperm.xlu0 %6567, %v687_v30   ;;  %v5384_v29 = vld [vmem:[%s8993_s6 + $0x260] sm:$0xff] }
  0x4c   : > { %848 = vperm.xlu1 %6568, %v690_v31   ;;  %843 = vperm.xlu0 %6567, %v689_v32   ;;  %v5387_v32 = vld [vmem:[%s8993_s6 + $0x278] sm:$0xff] }
  0x50   : > { %940 = vperm.xlu1 %6568, %v5308_v33   ;;  %935 = vperm.xlu0 %6567, %v5307_v34   ;;  %v5386_v33 = vld [vmem:[%s8993_s6 + $0x270] sm:$0xff] }
  0x54   : > { %950 = vperm.xlu1 %6568, %v5310_v35   ;;  %945 = vperm.xlu0 %6567, %v5309_v36   ;;  %v5389_v36 = vld [vmem:[%s8993_s6 + $0x288] sm:$0xff] }
  0x58   : > { %960 = vperm.xlu1 %6568, %v5312_v37   ;;  %955 = vperm.xlu0 %6567, %v5311_v38   ;;  %v5388_v37 = vld [vmem:[%s8993_s6 + $0x280] sm:$0xff] }
  0x5c   : > { %970 = vperm.xlu1 %6568, %v5314_v39   ;;  %965 = vperm.xlu0 %6567, %v5313_v40   ;;  %v5391_v40 = vld [vmem:[%s8993_s6 + $0x298] sm:$0xff] }
  0x60   : > { %980 = vperm.xlu1 %6568, %v5316_v41   ;;  %975 = vperm.xlu0 %6567, %v5315_v42   ;;  %v5390_v41 = vld [vmem:[%s8993_s6 + $0x290] sm:$0xff] }
  0x64   : > { %990 = vperm.xlu1 %6568, %v5318_v44   ;;  %985 = vperm.xlu0 %6567, %v5317_v45   ;;  %v5393_v44 = vld [vmem:[%s8993_s6 + $0x2a8] sm:$0xff]  ;;  %v5392_v45 = vld [vmem:[%s8993_s6 + $0x2a0] sm:$0xff] }
  0x68   : > { %1000 = vperm.xlu1 %6568, %v5320_v47   ;;  %995 = vperm.xlu0 %6567, %v5319_v48   ;;  %v6966_v47 = vld [vmem:[%s6952_s27 + $0x70] sm:$0xff]  }
  0x6c   : > { %1010 = vperm.xlu1 %6568, %v5322_v49   ;;  %1005 = vperm.xlu0 %6567, %v5321_v50   ;;  %v5811_v50 = vunpack.c.h.bf16 %v6966_v47 }
  0x70   : > { %1020 = vperm.xlu1 %6568, %v5324_v51   ;;  %1015 = vperm.xlu0 %6567, %v5323_v52   ;;  %v5814_v51 = vunpack.c.l.bf16 %v5830_v46  ;;  %v5395_v52 = vld [vmem:[%s8993_s6 + $0x2b8] sm:$0xff] }
  0x74   : > { %1030 = vperm.xlu1 %6568, %v5326_v53   ;;  %1025 = vperm.xlu0 %6567, %v5325_v54   ;;  %v5394_v53 = vld [vmem:[%s8993_s6 + $0x2b0] sm:$0xff]  ;;  %v5753_v54 = vld [vmem:[%s6952_s27] sm:$0xff]  }
  0x78   : > { %1040 = vperm.xlu1 %6568, %v5328_v55   ;;  %1035 = vperm.xlu0 %6567, %v5327_v56   ;;  %v6983_v55 = vld [vmem:[%s8988_s1] ss:$0 sm:$0xff] }
  0x7c   : > { %1050 = vperm.xlu1 %6568, %v5330_v57   ;;  %1045 = vperm.xlu0 %6567, %v5329_v58   ;;  %v5754_v58 = vunpack.c.l.bf16 %v5753_v54 }
  0x80   : > { %1060 = vperm.xlu1 %6568, %v5332_v59   ;;  %1055 = vperm.xlu0 %6567, %v5331_v60   ;;  %v453_v59 = vmul.f32 %v5811_v50, %v6983_v55  ;;  %v454_v60 = vmul.f32 %v5814_v51, %v6983_v55 }
  0x84   : > { %1070 = vperm.xlu1 %6568, %v5334_v61   ;;  %1065 = vperm.xlu0 %6567, %v5333_v62   ;;  %v5397_v61 = vld [vmem:[%s8993_s6 + $0x2c8] sm:$0xff]  ;;  %v5396_v62 = vld [vmem:[%s8993_s6 + $0x2c0] sm:$0xff] }
  0x88   : > { %1080 = vperm.xlu1 %6568, %v5336_v63   ;;  %1075 = vperm.xlu0 %6567, %v5335_v0   ;;  %v5815_v63 = vunpack.c.h.bf16 %v5830_v46  ;;  %v7000_v0 = vld [vmem:[%s8989_s2] ss:$0 sm:$0xff] }
  0x8c   : > { %1090 = vperm.xlu1 %6568, %v5338_v1   ;;  %1085 = vperm.xlu0 %6567, %v5337_v2   ;;  %v5755_v1 = vunpack.c.h.bf16 %v5753_v54 }
  0x8f   : > { %v6843_v5 = vpop.permute.xlu1 %703  ;;  %v6845_v6 = vpop.permute.xlu0 %693 }
  0x90   : > { %1674 = vperm.xlu1 %6568, %v5373_v3   ;;  %1669 = vperm.xlu0 %6567, %v5372_v4   ;;  %v5816_v4 = vld [vmem:[%s6952_s27 + $0x8] sm:$0xff]  }
  0x93   : > { %v6853_v9 = vpop.permute.xlu1 %708  ;;  %v6855_v10 = vpop.permute.xlu0 %698 }
  0x94   : > { %1684 = vperm.xlu1 %6568, %v5375_v7   ;;  %1679 = vperm.xlu0 %6567, %v5374_v8   ;;  %v424_v7 = vmul.f32 %v5754_v58, %v6983_v55  ;;  %v492_v8 = vadd.f32 %v7000_v0, %v453_v59 }
  0x96   : > { %vm524_vm1 = vcmp.ge.f32.partialorder %v492_v8, 0.0 }
  0x97   : > { %v6870_v14 = vpop.permute.xlu1 %718  ;;  %v6872_v15 = vpop.permute.xlu0 %713 }
  0x98   : > { %1694 = vperm.xlu1 %6568, %v5377_v12   ;;  %1689 = vperm.xlu0 %6567, %v5376_v13   ;;  %v493_v12 = vadd.f32 %v7000_v0, %v454_v60  ;;  %v5399_v13 = vld [vmem:[%s8993_s6 + $0x2d8] sm:$0xff] }
  0x9a   : > { %vm525_vm2 = vcmp.ge.f32.partialorder %v493_v12, 0.0 }
  0x9b   : > { %v6880_v18 = vpop.permute.xlu1 %728  ;;  %v6882_v19 = vpop.permute.xlu0 %723 }
  0x9c   : > { %1704 = vperm.xlu1 %6568, %v5379_v16   ;;  %1699 = vperm.xlu0 %6567, %v5378_v17   ;;  %v5398_v16 = vld [vmem:[%s8993_s6 + $0x2d0] sm:$0xff]  ;;  %v455_v17 = vmul.f32 %v5815_v63, %v6983_v55  ;;  %v5818_v63 = vld [vmem:[%s6952_s27 + $0x18] sm:$0xff]  }
  0x9e   : > { %v494_v46 = vadd.f32 %v7000_v0, %v455_v17 }
  0x9f   : > { %v6890_v22 = vpop.permute.xlu1 %738  ;;  %v6892_v23 = vpop.permute.xlu0 %733 }
  0xa0   : > { %1714 = vperm.xlu1 %6568, %v5381_v20   ;;  %1709 = vperm.xlu0 %6567, %v5380_v21   ;;  %v7017_v20 = vstv %s352_s16  ;;  %v5817_v21 = vld [vmem:[%s6952_s27 + $0x10] sm:$0xff]   ;;  %vm526_vm5 = vcmp.ge.f32.partialorder %v494_v46, 0.0 }
  0xa3   : > { %v6900_v26 = vpop.permute.xlu1 %748  ;;  %v6902_v27 = vpop.permute.xlu0 %743 }
  0xa4   : > { %9130 = vst [vmem:[#allocation3_spill] sm:$0xff] %v6902_v27  ;;  %1724 = vperm.xlu1 %6568, %v5383_v24   ;;  %1719 = vperm.xlu0 %6567, %v5382_v25   ;;  %v425_v24 = vmul.f32 %v5755_v1, %v6983_v55  ;;  %v5758_v25 = vunpack.c.l.bf16 %v5816_v4  ;;  %v5403_v1 = vld [vmem:[%s8993_s6 + $0x2f8] sm:$0xff]  ;;  %v5441_v27 = vld [vmem:[%s8993_s6 + $0x3a0] sm:$0xff] }
  0xa6   : > { %v464_v50 = vadd.f32 %v7000_v0, %v425_v24  ;;  %v426_v51 = vmul.f32 %v5758_v25, %v6983_v55  ;;  %v5819_v24 = vld [vmem:[%s6952_s27 + $0x20] sm:$0xff]  }
  0xa7   : > { %v6910_v30 = vpop.permute.xlu1 %758  ;;  %v6912_v31 = vpop.permute.xlu0 %753 }
  0xa8   : > { %9131 = vst [vmem:[#allocation4_spill] sm:$0xff] %v6910_v30  ;;  %9132 = vst [vmem:[#allocation5_spill] sm:$0xff] %v6912_v31  ;;  %1734 = vperm.xlu1 %6568, %v5385_v28   ;;  %1729 = vperm.xlu0 %6567, %v5384_v29   ;;  %v465_v17 = vadd.f32 %v7000_v0, %v426_v51  ;;  %vm496_vm6 = vcmp.ge.f32.partialorder %v464_v50, 0.0  ;;  %v5421_v51 = vld [vmem:[%s8993_s6 + $0x300] sm:$0xff] }
  0xaa   : > { %vm497_vm7 = vcmp.ge.f32.partialorder %v465_v17, 0.0 }
  0xab   : > { %v6922_v34 = vpop.permute.xlu1 %768  ;;  %v6924_v35 = vpop.permute.xlu0 %763 }
  0xac   : > { %9133 = vst [vmem:[#allocation6_spill] sm:$0xff] %v6922_v34  ;;  %9134 = vst [vmem:[#allocation7_spill] sm:$0xff] %v6924_v35  ;;  %1744 = vperm.xlu1 %6568, %v5387_v32   ;;  %1739 = vperm.xlu0 %6567, %v5386_v33   ;;  %v624_v32 = vlaneseq  ;;  %v5759_v33 = vunpack.c.h.bf16 %v5816_v4  ;;  %v5402_v4 = vld [vmem:[%s8993_s6 + $0x2f0] sm:$0xff] }
  0xae   : > { %v7041_v58 = vshrl.u32 %v624_v32, 7  ;;  %v427_v59 = vmul.f32 %v5759_v33, %v6983_v55  ;;  %v5766_v33 = vunpack.c.l.bf16 %v5818_v63 }
  0xaf   : > { %v6936_v38 = vpop.permute.xlu1 %778  ;;  %v6938_v39 = vpop.permute.xlu0 %773 }
  0xb0   : > { %9135 = vst [vmem:[#allocation8_spill] sm:$0xff] %v6936_v38  ;;  %9136 = vst [vmem:[#allocation9_spill] sm:$0xff] %v6938_v39  ;;  %1754 = vperm.xlu1 %6568, %v5389_v36   ;;  %1749 = vperm.xlu0 %6567, %v5388_v37   ;;  %v463_v36 = vadd.f32 %v7000_v0, %v424_v7  ;;  %v557_v37 = vmul.f32 %v7017_v20, %v492_v8  ;;  %vm1601_vm4 = vcmp.lt.s32.totalorder %v7041_v58, 7 }
  0xb2   : > { %vm495_vm3 = vcmp.ge.f32.partialorder %v463_v36, 0.0  ;;  %v7044_v60 = vsel %vm524_vm1, %v492_v8, %v557_v37  ;;  %v528_v7 = vmul.f32 %v7017_v20, %v463_v36 }
  0xb3   : > { %v6954_v42 = vpop.permute.xlu1 %788  ;;  %v6956_v43 = vpop.permute.xlu0 %783 }
  0xb4   : > { %9137 = vst [vmem:[#allocation10_spill] sm:$0xff] %v6954_v42  ;;  %9138 = vst [vmem:[#allocation11_spill] sm:$0xff] %v6956_v43  ;;  %1764 = vperm.xlu1 %6568, %v5391_v40   ;;  %1759 = vperm.xlu0 %6567, %v5390_v41   ;;  %v558_v40 = vmul.f32 %v7017_v20, %v493_v12  ;;  %v5762_v41 = vunpack.c.l.bf16 %v5817_v21 }
  0xb7   : > { %v6968_v48 = vpop.permute.xlu1 %798  ;;  %v6970_v49 = vpop.permute.xlu0 %793 }
  0xb8   : > { %9139 = vst [vmem:[#allocation12_spill] sm:$0xff] %v6968_v48  ;;  %9140 = vst [vmem:[#allocation13_spill] sm:$0xff] %v6970_v49  ;;  %1774 = vperm.xlu1 %6568, %v5393_v44   ;;  %1769 = vperm.xlu0 %6567, %v5392_v45   ;;  %v5401_v44 = vld [vmem:[%s8993_s6 + $0x2e8] sm:$0xff]  ;;  %v5400_v45 = vld [vmem:[%s8993_s6 + $0x2e0] sm:$0xff] }
  0xbb   : > { %v6985_v56 = vpop.permute.xlu1 %808  ;;  %v6987_v57 = vpop.permute.xlu0 %803 }
  0xbc   : > { %9141 = vst [vmem:[#allocation14_spill] sm:$0xff] %v6985_v56  ;;  %9142 = vst [vmem:[#allocation15_spill] sm:$0xff] %v6987_v57  ;;  %1784 = vperm.xlu1 %6568, %v5395_v52   ;;  %1779 = vperm.xlu0 %6567, %v5394_v53   ;;  %v5763_v52 = vunpack.c.h.bf16 %v5817_v21 }
  0xbe   : > { %v429_v21 = vmul.f32 %v5763_v52, %v6983_v55  ;;  %v7086_v52 = vsel %vm495_vm3, %v463_v36, %v528_v7 }
  0xbf   : > { %v7002_v2 = vpop.permute.xlu1 %818  ;;  %v7004_v3 = vpop.permute.xlu0 %813  ;;  %9153 = vst [vmem:[#allocation26_spill] sm:$0xff] %v7086_v52 }
  0xc0   : > { %9143 = vst [vmem:[#allocation16_spill] sm:$0xff] %v7002_v2  ;;  %9144 = vst [vmem:[#allocation17_spill] sm:$0xff] %v7004_v3  ;;  %1794 = vperm.xlu1 %6568, %v5397_v61   ;;  %1789 = vperm.xlu0 %6567, %v5396_v62   ;;  %v7046_v61 = vsel %vm525_vm2, %v493_v12, %v558_v40  ;;  %v428_v62 = vmul.f32 %v5762_v41, %v6983_v55  ;;  %v8997_v12 = vrot.slane %v7044_v60, 1 }
  0xc1   : > { %9149 = vst [vmem:[#allocation22_spill] sm:$0xff] %v7046_v61  ;;  %v8998_v8 = vrot.slane %v7046_v61, 1  ;;  %v466_v40 = vadd.f32 %v7000_v0, %v427_v59  ;;  %v1406_v3 = vsel %vm1192_vm0, %v6860_v11, 0 }
  0xc2   : > { %v467_v41 = vadd.f32 %v7000_v0, %v428_v62  ;;  %v530_v62 = vmul.f32 %v7017_v20, %v465_v17 }
  0xc3   : > { %v7021_v28 = vpop.permute.xlu1 %828  ;;  %v7023_v29 = vpop.permute.xlu0 %823  ;;  %v7075_v37 = vsel %vm1601_vm4, %v8997_v12, %v8998_v8  ;;  %vm498_vm8 = vcmp.ge.f32.partialorder %v466_v40, 0.0 }
  0xc4   : > { %9145 = vst [vmem:[#allocation18_spill] sm:$0xff] %v7021_v28  ;;  %9146 = vst [vmem:[#allocation19_spill] sm:$0xff] %v7023_v29  ;;  %1804 = vperm.xlu1 %6568, %v5399_v13   ;;  %1799 = vperm.xlu0 %6567, %v5398_v16   ;;  %v559_v13 = vmul.f32 %v7017_v20, %v494_v46  ;;  %v529_v16 = vmul.f32 %v7017_v20, %v464_v50  ;;  %vm499_vm10 = vcmp.ge.f32.partialorder %v467_v41, 0.0 }
  0xc5   : > { %9152 = vst [vmem:[#allocation25_spill] sm:$0xff] %v7075_v37 }
  0xc6   : > { %v7088_v12 = vsel %vm526_vm5, %v494_v46, %v559_v13  ;;  %v7090_v59 = vsel %vm496_vm6, %v464_v50, %v529_v16  ;;  %v531_v46 = vmul.f32 %v7017_v20, %v466_v40  ;;  %v532_v50 = vmul.f32 %v7017_v20, %v467_v41  ;;  %v5424_v16 = vld [vmem:[%s8993_s6 + $0x318] sm:$0xff] }
  0xc7   : > { %v7037_v53 = vpop.permute.xlu1 %838  ;;  %v7039_v54 = vpop.permute.xlu0 %833  ;;  %9154 = vst [vmem:[#allocation27_spill] sm:$0xff] %v7088_v12  ;;  %9155 = vst [vmem:[#allocation28_spill] sm:$0xff] %v7090_v59 }
  0xc8   : > { %9147 = vst [vmem:[#allocation20_spill] sm:$0xff] %v7037_v53  ;;  %9148 = vst [vmem:[#allocation21_spill] sm:$0xff] %v7039_v54  ;;  %1814 = vperm.xlu1 %6568, %v5401_v44   ;;  %1809 = vperm.xlu0 %6567, %v5400_v45   ;;  %v5767_v44 = vunpack.c.h.bf16 %v5818_v63  ;;  %v5422_v45 = vld [vmem:[%s8993_s6 + $0x308] sm:$0xff]  ;;  %v468_v63 = vadd.f32 %v7000_v0, %v429_v21  ;;  %v5423_v21 = vld [vmem:[%s8993_s6 + $0x310] sm:$0xff] }
  0xca   : > { %v431_v13 = vmul.f32 %v5767_v44, %v6983_v55  ;;  %v533_v44 = vmul.f32 %v7017_v20, %v468_v63  ;;  %vm500_vm11 = vcmp.ge.f32.partialorder %v468_v63, 0.0 }
  0xcb   : > { %v7064_v25 = vpop.permute.xlu1 %848  ;;  %v7066_v32 = vpop.permute.xlu0 %843 }
  0xcc   : > { %9150 = vst [vmem:[#allocation23_spill] sm:$0xff] %v7064_v25  ;;  %9151 = vst [vmem:[#allocation24_spill] sm:$0xff] %v7066_v32  ;;  %1824 = vperm.xlu1 %6568, %v5403_v1   ;;  %1819 = vperm.xlu0 %6567, %v5402_v4   ;;  %v5770_v1 = vunpack.c.l.bf16 %v5819_v24  ;;  %v5771_v4 = vunpack.c.h.bf16 %v5819_v24  ;;  %v430_v32 = vmul.f32 %v5766_v33, %v6983_v55  ;;  %v5820_v25 = vld [vmem:[%s6952_s27 + $0x28] sm:$0xff]   ;;  %v5821_v33 = vld [vmem:[%s6952_s27 + $0x30] sm:$0xff]  }
  0xce   : > { %v433_v24 = vmul.f32 %v5771_v4, %v6983_v55  ;;  %v469_v29 = vadd.f32 %v7000_v0, %v430_v32  ;;  %v7118_v4 = vsel %vm498_vm8, %v466_v40, %v531_v46  ;;  %v5426_v32 = vld [vmem:[%s8993_s6 + $0x328] sm:$0xff]  ;;  %v7134_v46 = vsel %vm500_vm11, %v468_v63, %v533_v44  ;;  %v5428_v44 = vld [vmem:[%s8993_s6 + $0x338] sm:$0xff] }
  0xcf   : > { %v941_v8 = vpop.permute.xlu1 %940  ;;  %v936_v37 = vpop.permute.xlu0 %935  ;;  %9157 = vst [vmem:[#allocation30_spill] sm:$0xff] %v7118_v4  ;;  %9159 = vst [vmem:[#allocation32_spill] sm:$0xff] %v7134_v46 }
  0xd0   : > { %v1094_v36 = vmul.f32 %v941_v8, %v7088_v12  ;;  %v1093_v7 = vmul.f32 %v936_v37, %v7046_v61  ;;  %2161 = vperm.xlu1 %6568, %v5422_v45   ;;  %2156 = vperm.xlu0 %6567, %v5421_v51   ;;  %v432_v8 = vmul.f32 %v5770_v1, %v6983_v55  ;;  %v5774_v51 = vunpack.c.l.bf16 %v5820_v25 }
  0xd1   : > { %v7111_v45 = vsel %vm497_vm7, %v465_v17, %v530_v62  ;;  %v470_v17 = vadd.f32 %v7000_v0, %v431_v13  ;;  %v5775_v62 = vunpack.c.h.bf16 %v5820_v25  ;;  %vm501_vm12 = vcmp.ge.f32.partialorder %v469_v29, 0.0 }
  0xd2   : > { %v1125_v37 = vpack.c.bf16 %v1094_v36, %v1093_v7  ;;  %9156 = vst [vmem:[#allocation29_spill] sm:$0xff] %v7111_v45  ;;  %v5778_v36 = vunpack.c.l.bf16 %v5821_v33  ;;  %v471_v40 = vadd.f32 %v7000_v0, %v432_v8  ;;  %v472_v7 = vadd.f32 %v7000_v0, %v433_v24 }
  0xd3   : > { %v951_v54 = vpop.permute.xlu1 %950  ;;  %v946_v53 = vpop.permute.xlu0 %945  ;;  %v434_v13 = vmul.f32 %v5774_v51, %v6983_v55  ;;  %vm502_vm13 = vcmp.ge.f32.partialorder %v470_v17, 0.0  ;;  %v535_v63 = vmul.f32 %v7017_v20, %v470_v17  ;;  %v435_v11 = vmul.f32 %v5775_v62, %v6983_v55  ;;  %v5427_v51 = vld [vmem:[%s8993_s6 + $0x330] sm:$0xff] }
  0xd4   : > { %v1096_v28 = vmul.f32 %v951_v54, %v7090_v59  ;;  %v1095_v1 = vmul.f32 %v946_v53, %v7086_v52  ;;  %2171 = vperm.xlu1 %6568, %v5424_v16   ;;  %2166 = vperm.xlu0 %6567, %v5423_v21   ;;  %v5425_v53 = vld [vmem:[%s8993_s6 + $0x320] sm:$0xff]  ;;  %v7129_v54 = vsel %vm499_vm10, %v467_v41, %v532_v50  ;;  %v5779_v16 = vunpack.c.h.bf16 %v5821_v33  ;;  %v5822_v50 = vld [vmem:[%s6952_s27 + $0x38] sm:$0xff]  }
  0xd5   : > { %5986 = vmatprep.mubr.msk.bf16.mxu1 %vm1143_vm9, %v1125_v37  ;;  %9158 = vst [vmem:[#allocation31_spill] sm:$0xff] %v7129_v54  ;;  %v534_v41 = vmul.f32 %v7017_v20, %v469_v29  ;;  %v436_v33 = vmul.f32 %v5778_v36, %v6983_v55  ;;  %vm503_vm14 = vcmp.ge.f32.partialorder %v471_v40, 0.0  ;;  %vm504_vm15 = vcmp.ge.f32.partialorder %v472_v7, 0.0 }
  0xd6   : > { %v1126_v25 = vpack.c.bf16 %v1096_v28, %v1095_v1  ;;  %v7146_v28 = vld [vmem:[%s8991_s4 + $0x8] sm:$0xf]  ;;  %v536_v1 = vmul.f32 %v7017_v20, %v471_v40  ;;  %v7161_v62 = vadd.f32 %v7000_v0, %v434_v13  ;;  %v437_v36 = vmul.f32 %v5779_v16, %v6983_v55 }
  0xd7   : > { %v961_v21 = vpop.permute.xlu1 %960  ;;  %v956_v37 = vpop.permute.xlu0 %955  ;;  %v5783_v57 = vunpack.c.h.bf16 %v5822_v50  ;;  %v7173_v13 = vsel %vm502_vm13, %v470_v17, %v535_v63  ;;  %v474_v16 = vadd.f32 %v7000_v0, %v435_v11  ;;  %v2609_v43 = vpack.c.bf16 %v7118_v4, %v7111_v45 }
  0xd8   : > { %v1098_v8 = vmul.f32 %v961_v21, %v7118_v4  ;;  %v1097_v24 = vmul.f32 %v956_v37, %v7111_v45  ;;  %2181 = vperm.xlu1 %6568, %v5426_v32   ;;  %2176 = vperm.xlu0 %6567, %v5425_v53   ;;  %v537_v32 = vmul.f32 %v7017_v20, %v472_v7  ;;  %v5823_v21 = vld [vmem:[%s6952_s27 + $0x40] sm:$0xff]   ;;  %vm505_vm1 = vcmp.ge.f32.partialorder %v7161_v62, 0.0 }
  0xd9   : > { %5987 = vmatmul.mubr.msk.bf16.vlgmr.msra.gmra.mrb[0].mxu1 %vm1143_vm9, %v1126_v25  ;;  %v5782_v25 = vunpack.c.l.bf16 %v5822_v50  ;;  %9161 = vst [vmem:[#allocation34_spill] sm:$0xff] %v7173_v13  ;;  %v5430_v50 = vld [vmem:[%s8993_s6 + $0x348] sm:$0xff]  ;;  %v538_v63 = vmul.f32 %v7017_v20, %v7161_v62  ;;  %v476_v11 = vadd.f32 %v7000_v0, %v437_v36  ;;  %vm506_vm2 = vcmp.ge.f32.partialorder %v474_v16, 0.0 }
  0xda   : > { %v1127_v53 = vpack.c.bf16 %v1098_v8, %v1097_v24  ;;  %6019 = vmatpush3.bf16.msra.mxu1 %v1406_v3  ;;  %v7170_v3 = vsel %vm501_vm12, %v469_v29, %v534_v41  ;;  %v475_v8 = vadd.f32 %v7000_v0, %v436_v33  ;;  %v7185_v29 = vsel %vm503_vm14, %v471_v40, %v536_v1 }
  0xdb   : > { %v971_v37 = vpop.permute.xlu1 %970  ;;  %v966_v2 = vpop.permute.xlu0 %965  ;;  %6550 = vmatprep.subr.msk.bf16.mxu1 %vm1192_vm0, %v7146_v28  ;;  %9160 = vst [vmem:[#allocation33_spill] sm:$0xff] %v7170_v3  ;;  %9162 = vst [vmem:[#allocation35_spill] sm:$0xff] %v7185_v29  ;;  %v7188_v17 = vsel %vm504_vm15, %v472_v7, %v537_v32  ;;  %v5786_v41 = vunpack.c.l.bf16 %v5823_v21  ;;  %v438_v33 = vmul.f32 %v5782_v25, %v6983_v55  ;;  %v5431_v32 = vld [vmem:[%s8993_s6 + $0x350] sm:$0xff]  ;;  %vm508_vm5 = vcmp.ge.f32.partialorder %v476_v11, 0.0 }
  0xdc   : > { %v1100_v56 = vmul.f32 %v971_v37, %v7134_v46  ;;  %v1099_v49 = vmul.f32 %v966_v2, %v7129_v54  ;;  %2191 = vperm.xlu1 %6568, %v5428_v44   ;;  %2186 = vperm.xlu0 %6567, %v5427_v51   ;;  %v5429_v2 = vld [vmem:[%s8993_s6 + $0x340] sm:$0xff]  ;;  %9163 = vst [vmem:[#allocation36_spill] sm:$0xff] %v7188_v17  ;;  %v5787_v44 = vunpack.c.h.bf16 %v5823_v21  ;;  %vm507_vm3 = vcmp.ge.f32.partialorder %v475_v8, 0.0  ;;  %v5824_v37 = vld [vmem:[%s6952_s27 + $0x48] sm:$0xff]  }
  0xdd   : > { %5990 = vmatprep.mubr.msk.bf16.mxu1 %vm1143_vm9, %v1127_v53  ;;  %v439_v40 = vmul.f32 %v5783_v57, %v6983_v55  ;;  %v5432_v57 = vld [vmem:[%s8993_s6 + $0x358] sm:$0xff]  ;;  %v540_v25 = vmul.f32 %v7017_v20, %v475_v8  ;;  %v440_v21 = vmul.f32 %v5786_v41, %v6983_v55  ;;  %v5791_v42 = vunpack.c.h.bf16 %v5824_v37 }
  0xde   : > { %v1128_v24 = vpack.c.bf16 %v1100_v56, %v1099_v49  ;;  %v5470_v49 = vld [vmem:[%s8991_s4 + $0x10] sm:$0xf]  ;;  %v539_v56 = vmul.f32 %v7017_v20, %v474_v16 }
  0xdf   : > { %v981_v51 = vpop.permute.xlu1 %980  ;;  %v976_v53 = vpop.permute.xlu0 %975  ;;  %6552 = vmatprep.subr.msk.bf16.mxu0 %vm1192_vm0, %v5470_v49  ;;  %v7211_v36 = vsel %vm1192_vm0, %v5470_v49, 0  ;;  %v7227_v41 = vadd.f32 %v7000_v0, %v439_v40  ;;  %v5434_v40 = vld [vmem:[%s8993_s6 + $0x368] sm:$0xff] }
  0xe0   : > { %v1102_v7 = vmul.f32 %v981_v51, %v7173_v13  ;;  %v1101_v1 = vmul.f32 %v976_v53, %v7170_v3  ;;  %2201 = vperm.xlu1 %6568, %v5430_v50   ;;  %2196 = vperm.xlu0 %6567, %v5429_v2   ;;  %9164 = vst [vmem:[#allocation37_spill] sm:$0xff] %v7211_v36 }
  0xe1   : > { %5991 = vmatmul.mubr.msk.bf16.gmra.mrb[4].mxu1 %vm1143_vm9, %v1128_v24  ;;  %6121 = vmatpush3.bf16.msra.mxu0 %v7211_v36  ;;  %v2608_v2 = vpack.c.bf16 %v7090_v59, %v7086_v52  ;;  %v541_v24 = vmul.f32 %v7017_v20, %v476_v11  ;;  %v7221_v51 = vadd.f32 %v7000_v0, %v438_v33  ;;  %vm510_vm7 = vcmp.ge.f32.partialorder %v7227_v41, 0.0 }
  0xe2   : > { %v1129_v50 = vpack.c.bf16 %v1102_v7, %v1101_v1  ;;  %v441_v53 = vmul.f32 %v5787_v44, %v6983_v55  ;;  %v5825_v7 = vld [vmem:[%s6952_s27 + $0x50] sm:$0xff]   ;;  %v7235_v33 = vsel %vm505_vm1, %v7161_v62, %v538_v63  ;;  %v5790_v44 = vunpack.c.l.bf16 %v5824_v37 }
  0xe3   : > { %v991_v49 = vpop.permute.xlu1 %990  ;;  %v986_v48 = vpop.permute.xlu0 %985  ;;  %9165 = vst [vmem:[#allocation38_spill] sm:$0xff] %v7235_v33  ;;  %6122 = vmatprep.mubr.msk.bf16.mxu0 %vm1143_vm9, %v2608_v2  ;;  %v7249_v62 = vsel %vm507_vm3, %v475_v8, %v540_v25  ;;  %v479_v63 = vadd.f32 %v7000_v0, %v440_v21  ;;  %v5795_v39 = vunpack.c.h.bf16 %v5825_v7  ;;  %vm509_vm6 = vcmp.ge.f32.partialorder %v7221_v51, 0.0  ;;  %v5826_v25 = vld [vmem:[%s6952_s27 + $0x58] sm:$0xff]  }
  0xe4   : > { %v1104_v1 = vmul.f32 %v991_v49, %v7188_v17  ;;  %v1103_v36 = vmul.f32 %v986_v48, %v7185_v29  ;;  %2211 = vperm.xlu1 %6568, %v5432_v57   ;;  %2206 = vperm.xlu0 %6567, %v5431_v32   ;;  %v5433_v49 = vld [vmem:[%s8993_s6 + $0x360] sm:$0xff]  ;;  %v7246_v48 = vsel %vm506_vm2, %v474_v16, %v539_v56  ;;  %v5436_v21 = vld [vmem:[%s8993_s6 + $0x378] sm:$0xff]  ;;  %v5799_v34 = vunpack.c.h.bf16 %v5826_v25 }
  0xe5   : > { %5994 = vmatprep.mubr.msk.bf16.mxu1 %vm1143_vm9, %v1129_v50  ;;  %9166 = vst [vmem:[#allocation39_spill] sm:$0xff] %v7246_v48  ;;  %9167 = vst [vmem:[#allocation40_spill] sm:$0xff] %v7249_v62  ;;  %6123 = vmatmul.mubr.msk.bf16.vlgmr.msra.gmra.mrb[0].mxu0 %vm1143_vm9, %v2609_v43  ;;  %v7254_v32 = vsel %vm508_vm5, %v476_v11, %v541_v24  ;;  %v480_v37 = vadd.f32 %v7000_v0, %v441_v53  ;;  %v5794_v50 = vunpack.c.l.bf16 %v5825_v7 }
  0xe6   : > { %v1130_v57 = vpack.c.bf16 %v1104_v1, %v1103_v36  ;;  %9168 = vst [vmem:[#allocation41_spill] sm:$0xff] %v7254_v32  ;;  %v542_v43 = vmul.f32 %v7017_v20, %v7221_v51  ;;  %v543_v11 = vmul.f32 %v7017_v20, %v7227_v41  ;;  %v442_v56 = vmul.f32 %v5790_v44, %v6983_v55 }
  0xe7   : > { %v1001_v2 = vpop.permute.xlu1 %1000  ;;  %v996_v38 = vpop.permute.xlu0 %995  ;;  %v443_v36 = vmul.f32 %v5791_v42, %v6983_v55  ;;  %vm511_vm8 = vcmp.ge.f32.partialorder %v479_v63, 0.0  ;;  %v544_v24 = vmul.f32 %v7017_v20, %v479_v63  ;;  %v2610_v7 = vpack.c.bf16 %v7134_v46, %v7129_v54 }
  0xe8   : > { %v1106_v16 = vmul.f32 %v1001_v2, %v7246_v48  ;;  %v1105_v8 = vmul.f32 %v996_v38, %v7235_v33  ;;  %2221 = vperm.xlu1 %6568, %v5434_v40   ;;  %2216 = vperm.xlu0 %6567, %v5433_v49   ;;  %v5435_v38 = vld [vmem:[%s8993_s6 + $0x370] sm:$0xff]  ;;  %v545_v42 = vmul.f32 %v7017_v20, %v480_v37  ;;  %vm512_vm10 = vcmp.ge.f32.partialorder %v480_v37, 0.0 }
  0xe9   : > { %5995 = vmatmul.mubr.msk.bf16.gmra.mrb[8].mxu1 %vm1143_vm9, %v1130_v57  ;;  %v444_v1 = vmul.f32 %v5794_v50, %v6983_v55  ;;  %v445_v44 = vmul.f32 %v5795_v39, %v6983_v55  ;;  %v2611_v57 = vpack.c.bf16 %v7173_v13, %v7170_v3  ;;  %v5798_v2 = vunpack.c.l.bf16 %v5826_v25  ;;  %v5438_v39 = vld [vmem:[%s8993_s6 + $0x388] sm:$0xff]  ;;  %6126 = vmatprep.mubr.msk.bf16.mxu0 %vm1143_vm9, %v2610_v7 }
  0xea   : > { %v1131_v53 = vpack.c.bf16 %v1106_v16, %v1105_v8  ;;  %v481_v8 = vadd.f32 %v7000_v0, %v442_v56  ;;  %v482_v50 = vadd.f32 %v7000_v0, %v443_v36  ;;  %v7303_v56 = vsel %vm510_vm7, %v7227_v41, %v543_v11  ;;  %v5440_v11 = vld [vmem:[%s8993_s6 + $0x398] sm:$0xff] }
  0xeb   : > { %v1011_v40 = vpop.permute.xlu1 %1010  ;;  %v1006_v49 = vpop.permute.xlu0 %1005  ;;  %9170 = vst [vmem:[#allocation43_spill] sm:$0xff] %v7303_v56  ;;  %v7307_v25 = vsel %vm511_vm8, %v479_v63, %v544_v24  ;;  %v484_v7 = vadd.f32 %v7000_v0, %v445_v44  ;;  %v446_v31 = vmul.f32 %v5798_v2, %v6983_v55  ;;  %v5439_v24 = vld [vmem:[%s8993_s6 + $0x390] sm:$0xff]  ;;  %vm626_vm7 = vcmp.lt.s32.totalorder %v7041_v58, 1 }
  0xec   : > { %v1108_v35 = vmul.f32 %v1011_v40, %v7254_v32  ;;  %v1107_v16 = vmul.f32 %v1006_v49, %v7249_v62  ;;  %2231 = vperm.xlu1 %6568, %v5436_v21   ;;  %2226 = vperm.xlu0 %6567, %v5435_v38   ;;  %v5437_v40 = vld [vmem:[%s8993_s6 + $0x380] sm:$0xff]  ;;  %v7298_v21 = vsel %vm509_vm6, %v7221_v51, %v542_v43  ;;  %vm513_vm11 = vcmp.ge.f32.partialorder %v481_v8, 0.0  ;;  %v5595_v58 = vld [vmem:[%s8993_s6 + $0x750] sm:$0xff] }
  0xed   : > { %5998 = vmatprep.mubr.msk.bf16.mxu1 %vm1143_vm9, %v1131_v53  ;;  %9169 = vst [vmem:[#allocation42_spill] sm:$0xff] %v7298_v21  ;;  %6127 = vmatmul.mubr.msk.bf16.gmra.mrb[4].mxu0 %vm1143_vm9, %v2611_v57  ;;  %9171 = vst [vmem:[#allocation44_spill] sm:$0xff] %v7307_v25  ;;  %v7310_v38 = vsel %vm512_vm10, %v480_v37, %v545_v42  ;;  %v483_v53 = vadd.f32 %v7000_v0, %v444_v1  ;;  %v5827_v51 = vld [vmem:[%s6952_s27 + $0x60] sm:$0xff]   ;;  %vm514_vm12 = vcmp.ge.f32.partialorder %v482_v50, 0.0 }
  0xee   : > { %v1132_v36 = vpack.c.bf16 %v1108_v35, %v1107_v16  ;;  %9172 = vst [vmem:[#allocation45_spill] sm:$0xff] %v7310_v38  ;;  %v546_v63 = vmul.f32 %v7017_v20, %v481_v8  ;;  %v447_v37 = vmul.f32 %v5799_v34, %v6983_v55  ;;  %v547_v42 = vmul.f32 %v7017_v20, %v482_v50 }
  0xef   : > { %v1021_v43 = vpop.permute.xlu1 %1020  ;;  %v1016_v49 = vpop.permute.xlu0 %1015  ;;  %v5802_v1 = vunpack.c.l.bf16 %v5827_v51  ;;  %v2612_v57 = vpack.c.bf16 %v7188_v17, %v7185_v29  ;;  %v548_v2 = vmul.f32 %v7017_v20, %v483_v53  ;;  %v549_v34 = vmul.f32 %v7017_v20, %v484_v7 }
  0xf0   : > { %v1110_v41 = vmul.f32 %v1021_v43, %v7303_v56  ;;  %v1109_v35 = vmul.f32 %v1016_v49, %v7298_v21  ;;  %2241 = vperm.xlu1 %6568, %v5438_v39   ;;  %2236 = vperm.xlu0 %6567, %v5437_v40   ;;  %v5803_v16 = vunpack.c.h.bf16 %v5827_v51  ;;  %v5828_v39 = vld [vmem:[%s6952_s27 + $0x68] sm:$0xff]   ;;  %v2613_v43 = vpack.c.bf16 %v7246_v48, %v7235_v33  ;;  %v5487_v51 = vld [vmem:[%s8993_s6 + $0x500] sm:$0xff] }
  0xf1   : > { %5999 = vmatmul.mubr.msk.bf16.gmra.mrb[12].mxu1 %vm1143_vm9, %v1132_v36  ;;  %vm515_vm13 = vcmp.ge.f32.partialorder %v483_v53, 0.0  ;;  %v485_v49 = vadd.f32 %v7000_v0, %v446_v31  ;;  %vm516_vm14 = vcmp.ge.f32.partialorder %v484_v7, 0.0  ;;  %6130 = vmatprep.mubr.msk.bf16.mxu0 %vm1143_vm9, %v2612_v57  ;;  %v7348_v31 = vsel %vm513_vm11, %v481_v8, %v546_v63 }
  0xf2   : > { %v1133_v44 = vpack.c.bf16 %v1110_v41, %v1109_v35  ;;  %v486_v35 = vadd.f32 %v7000_v0, %v447_v37  ;;  %9173 = vst [vmem:[#allocation46_spill] sm:$0xff] %v7348_v31  ;;  %v5519_v37 = vld [vmem:[%s8991_s4 + $0x14] sm:$0xf]  ;;  %v449_v57 = vmul.f32 %v5803_v16, %v6983_v55  ;;  %v5807_v8 = vunpack.c.h.bf16 %v5828_v39 }
  0xf3   : > { %v1031_v40 = vpop.permute.xlu1 %1030  ;;  %v1026_v36 = vpop.permute.xlu0 %1025  ;;  %6554 = vmatprep.subr.msk.bf16.mxu0 %vm1192_vm0, %v5519_v37  ;;  %vm517_vm15 = vcmp.ge.f32.partialorder %v485_v49, 0.0  ;;  %v2614_v16 = vpack.c.bf16 %v7254_v32, %v7249_v62 }
  0xf4   : > { %v1112_v30 = vmul.f32 %v1031_v40, %v7310_v38  ;;  %v1111_v41 = vmul.f32 %v1026_v36, %v7307_v25  ;;  %2251 = vperm.xlu1 %6568, %v5440_v11   ;;  %2246 = vperm.xlu0 %6567, %v5439_v24   ;;  %v448_v11 = vmul.f32 %v5802_v1, %v6983_v55  ;;  %v5806_v24 = vunpack.c.l.bf16 %v5828_v39 }
  0xf5   : > { %6002 = vmatprep.mubr.msk.bf16.mxu1 %vm1143_vm9, %v1133_v44  ;;  %6131 = vmatmul.mubr.msk.bf16.gmra.mrb[8].mxu0 %vm1143_vm9, %v2613_v43  ;;  %v7356_v44 = vsel %vm514_vm12, %v482_v50, %v547_v42  ;;  %v7359_v36 = vsel %vm515_vm13, %v483_v53, %v548_v2  ;;  %vm518_vm1 = vcmp.ge.f32.partialorder %v486_v35, 0.0  ;;  %v550_v50 = vmul.f32 %v7017_v20, %v485_v49  ;;  %v5489_v42 = vld [vmem:[%s8993_s6 + $0x510] sm:$0xff] }
  0xf6   : > { %v1134_v40 = vpack.c.bf16 %v1112_v30, %v1111_v41  ;;  %9174 = vst [vmem:[#allocation47_spill] sm:$0xff] %v7356_v44  ;;  %9175 = vst [vmem:[#allocation48_spill] sm:$0xff] %v7359_v36  ;;  %v7364_v30 = vsel %vm516_vm14, %v484_v7, %v549_v34  ;;  %v551_v53 = vmul.f32 %v7017_v20, %v486_v35  ;;  %v5488_v7 = vld [vmem:[%s8993_s6 + $0x508] sm:$0xff]  ;;  %v3162_v2 = vsel %vm1192_vm0, %v5519_v37, 0 }
  0xf7   : > { %v1041_v63 = vpop.permute.xlu1 %1040  ;;  %v1036_v38 = vpop.permute.xlu0 %1035  ;;  %9176 = vst [vmem:[#allocation49_spill] sm:$0xff] %v7364_v30  ;;  %6155 = vmatpush3.bf16.msra.mxu0 %v3162_v2  ;;  %v488_v39 = vadd.f32 %v7000_v0, %v449_v57  ;;  %v451_v41 = vmul.f32 %v5807_v8, %v6983_v55  ;;  %v2615_v37 = vpack.c.bf16 %v7303_v56, %v7298_v21  ;;  %v5490_v57 = vld [vmem:[%s8993_s6 + $0x518] sm:$0xff] }
  0xf8   : > { %v1114_v1 = vmul.f32 %v1041_v63, %v7356_v44  ;;  %v1113_v43 = vmul.f32 %v1036_v38, %v7348_v31  ;;  %2905 = vperm.xlu1 %6568, %v5487_v51   ;;  %2256 = vperm.xlu0 %6567, %v5441_v27   ;;  %v487_v38 = vadd.f32 %v7000_v0, %v448_v11  ;;  %v5810_v51 = vunpack.c.l.bf16 %v6966_v47  ;;  %v5491_v47 = vld [vmem:[%s8993_s6 + $0x520] sm:$0xff] }
  0xf9   : > { %6003 = vmatmul.mubr.msk.bf16.gmra.mrb[16].mxu1 %vm1143_vm9, %v1134_v40  ;;  %v450_v27 = vmul.f32 %v5806_v24, %v6983_v55  ;;  %6134 = vmatprep.mubr.msk.bf16.mxu0 %vm1143_vm9, %v2614_v16  ;;  %v7401_v8 = vsel %vm518_vm1, %v486_v35, %v551_v53  ;;  %vm520_vm3 = vcmp.ge.f32.partialorder %v488_v39, 0.0  ;;  %v5493_v16 = vld [vmem:[%s8993_s6 + $0x530] sm:$0xff] }
  0xfa   : > { %v1135_v34 = vpack.c.bf16 %v1114_v1, %v1113_v43  ;;  %v7390_v1 = vsel %vm517_vm15, %v485_v49, %v550_v50  ;;  %9178 = vst [vmem:[#allocation51_spill] sm:$0xff] %v7401_v8  ;;  %vm519_vm2 = vcmp.ge.f32.partialorder %v487_v38, 0.0  ;;  %v552_v43 = vmul.f32 %v7017_v20, %v487_v38 }
  0xfb   : > { %v1051_v40 = vpop.permute.xlu1 %1050  ;;  %v1046_v63 = vpop.permute.xlu0 %1045  ;;  %9177 = vst [vmem:[#allocation50_spill] sm:$0xff] %v7390_v1  ;;  %v553_v50 = vmul.f32 %v7017_v20, %v488_v39  ;;  %v452_v2 = vmul.f32 %v5810_v51, %v6983_v55 }
  0xfc   : > { %v1116_v11 = vmul.f32 %v1051_v40, %v7364_v30  ;;  %v1115_v24 = vmul.f32 %v1046_v63, %v7359_v36  ;;  %2915 = vperm.xlu1 %6568, %v5489_v42   ;;  %2910 = vperm.xlu0 %6567, %v5488_v7   ;;  %v489_v42 = vadd.f32 %v7000_v0, %v450_v27  ;;  %v5492_v27 = vld [vmem:[%s8993_s6 + $0x528] sm:$0xff] }
  0xfd   : > { %6006 = vmatprep.mubr.msk.bf16.mxu1 %vm1143_vm9, %v1135_v34  ;;  %6135 = vmatmul.mubr.msk.bf16.gmra.mrb[12].mxu0 %vm1143_vm9, %v2615_v37  ;;  %v490_v7 = vadd.f32 %v7000_v0, %v451_v41  ;;  %v7419_v55 = vsel %vm519_vm2, %v487_v38, %v552_v43  ;;  %v7421_v51 = vsel %vm520_vm3, %v488_v39, %v553_v50  ;;  %v5495_v38 = vld [vmem:[%s8993_s6 + $0x540] sm:$0xff]  ;;  %v623_v39 = vrot.slane %v7088_v12, 7 }
  0xfe   : > { %v1136_v49 = vpack.c.bf16 %v1116_v11, %v1115_v24  ;;  %9179 = vst [vmem:[#allocation52_spill] sm:$0xff] %v7419_v55  ;;  %9180 = vst [vmem:[#allocation53_spill] sm:$0xff] %v7421_v51  ;;  %v554_v63 = vmul.f32 %v7017_v20, %v489_v42  ;;  %v491_v11 = vadd.f32 %v7000_v0, %v452_v2  ;;  %vm521_vm5 = vcmp.ge.f32.partialorder %v489_v42, 0.0  ;;  %v5494_v0 = vld [vmem:[%s8993_s6 + $0x538] sm:$0xff] }
  0xff   : > { %v1061_v34 = vpop.permute.xlu1 %1060  ;;  %v1056_v40 = vpop.permute.xlu0 %1055  ;;  %v555_v37 = vmul.f32 %v7017_v20, %v490_v7  ;;  %vm522_vm6 = vcmp.ge.f32.partialorder %v490_v7, 0.0  ;;  %v9003_v43 = vrot.slane %v7044_v60, 7  ;;  %v622_v2 = vrot.slane %v7046_v61, 7 }
 0x100   : > { %v1118_v35 = vmul.f32 %v1061_v34, %v7401_v8  ;;  %v1117_v53 = vmul.f32 %v1056_v40, %v7390_v1  ;;  %2925 = vperm.xlu1 %6568, %v5491_v47   ;;  %2920 = vperm.xlu0 %6567, %v5490_v57   ;;  %v7438_v34 = vsel %vm521_vm5, %v489_v42, %v554_v63  ;;  %vm523_vm8 = vcmp.ge.f32.partialorder %v491_v11, 0.0  ;;  %v5496_v42 = vld [vmem:[%s8993_s6 + $0x548] sm:$0xff] }
 0x101   : > { %6007 = vmatmul.mubr.msk.bf16.gmra.mrb[20].mxu1 %vm1143_vm9, %v1136_v49  ;;  %9181 = vst [vmem:[#allocation54_spill] sm:$0xff] %v7438_v34  ;;  %v7440_v40 = vsel %vm522_vm6, %v490_v7, %v555_v37  ;;  %v7461_v63 = vsel %vm626_vm7, %v9003_v43, %v622_v2 }
 0x102   : > { %v1137_v41 = vpack.c.bf16 %v1118_v35, %v1117_v53  ;;  %9182 = vst [vmem:[#allocation55_spill] sm:$0xff] %v7440_v40  ;;  %v556_v35 = vmul.f32 %v7017_v20, %v491_v11  ;;  %v5497_v20 = vld [vmem:[%s8993_s6 + $0x550] sm:$0xff]  ;;  %9184 = vst [vmem:[#allocation57_spill] sm:$0xff] %v7461_v63 }
 0x103   : > { %v1071_v24 = vpop.permute.xlu1 %1070  ;;  %v1066_v47 = vpop.permute.xlu0 %1065 }
 0x104   : > { %v1120_v57 = vmul.f32 %v1071_v24, %v7421_v51  ;;  %v1119_v49 = vmul.f32 %v1066_v47, %v7419_v55  ;;  %2935 = vperm.xlu1 %6568, %v5493_v16   ;;  %2930 = vperm.xlu0 %6567, %v5492_v27   ;;  %v7448_v24 = vsel %vm626_vm7, %v622_v2, %v623_v39  ;;  %v595_v2 = vrot.slane %v7118_v4, 7 }
 0x105   : > { %6010 = vmatprep.mubr.msk.bf16.mxu1 %vm1143_vm9, %v1137_v41  ;;  %9183 = vst [vmem:[#allocation56_spill] sm:$0xff] %v7448_v24  ;;  %v7463_v37 = vsel %vm523_vm8, %v491_v11, %v556_v35  ;;  %v5499_v11 = vld [vmem:[%s8993_s6 + $0x560] sm:$0xff]  ;;  %v592_v35 = vrot.slane %v7086_v52, 7 }
 0x106   : > { %v1138_v50 = vpack.c.bf16 %v1120_v57, %v1119_v49  ;;  %9185 = vst [vmem:[#allocation58_spill] sm:$0xff] %v7463_v37  ;;  %v593_v49 = vrot.slane %v7090_v59, 7 }
 0x107   : > { %v1081_v53 = vpop.permute.xlu1 %1080  ;;  %v1076_v16 = vpop.permute.xlu0 %1075 }
 0x108   : > { %v1122_v27 = vmul.f32 %v1081_v53, %v7440_v40  ;;  %v1121_v41 = vmul.f32 %v1076_v16, %v7438_v34  ;;  %2945 = vperm.xlu1 %6568, %v5495_v38   ;;  %2940 = vperm.xlu0 %6567, %v5494_v0   ;;  %v852_v38 = vmul.f32 %v6855_v10, %v7448_v24  ;;  %v594_v53 = vrot.slane %v7111_v45, 7  ;;  %v5498_v10 = vld [vmem:[%s8993_s6 + $0x558] sm:$0xff] }
 0x109   : > { %6011 = vmatmul.mubr.msk.bf16.gmra.mrb[24].mxu1 %vm1143_vm9, %v1138_v50  ;;  %v851_v16 = vmul.f32 %v6845_v6, %v7461_v63  ;;  %v5501_v6 = vld [vmem:[%s8993_s6 + $0x570] sm:$0xff] }
 0x10a   : > { %v1139_v7 = vpack.c.bf16 %v1122_v27, %v1121_v41 }
 0x10b   : > { %v1091_v47 = vpop.permute.xlu1 %1090  ;;  %v1086_v57 = vpop.permute.xlu0 %1085 }
 0x10c   : > { %v1124_v0 = vmul.f32 %v1091_v47, %v7044_v60  ;;  %v1123_v50 = vmul.f32 %v1086_v57, %v7463_v37  ;;  %2955 = vperm.xlu1 %6568, %v5497_v20   ;;  %2950 = vperm.xlu0 %6567, %v5496_v42   ;;  %v7488_v42 = vsel %vm626_vm7, %v592_v35, %v593_v49 }
 0x10d   : > { %6014 = vmatprep.mubr.msk.bf16.mxu1 %vm1143_vm9, %v1139_v7  ;;  %9186 = vst [vmem:[#allocation59_spill] sm:$0xff] %v7488_v42  ;;  %v883_v7 = vpack.c.bf16 %v852_v38, %v851_v16  ;;  %v7492_v47 = vsel %vm626_vm7, %v594_v53, %v595_v2  ;;  %v7496_v57 = vsel %vm626_vm7, %v593_v49, %v594_v53  ;;  %v5500_v38 = vld [vmem:[%s8993_s6 + $0x568] sm:$0xff]  ;;  %v596_v16 = vrot.slane %v7129_v54, 7 }
 0x10e   : > { %v1140_v27 = vpack.c.bf16 %v1124_v0, %v1123_v50  ;;  %9187 = vst [vmem:[#allocation60_spill] sm:$0xff] %v7492_v47  ;;  %9188 = vst [vmem:[#allocation61_spill] sm:$0xff] %v7496_v57  ;;  %v7507_v0 = vsel %vm626_vm7, %v623_v39, %v592_v35  ;;  %v854_v49 = vmul.f32 %v6853_v9, %v7488_v42  ;;  %v597_v39 = vrot.slane %v7134_v46, 7 }
 0x10f   : > { %v7482_v41 = vpop.permute.xlu1 %1674  ;;  %v7484_v20 = vpop.permute.xlu0 %1669  ;;  %9189 = vst [vmem:[#allocation62_spill] sm:$0xff] %v7507_v0  ;;  %v853_v35 = vmul.f32 %v6843_v5, %v7507_v0  ;;  %v598_v9 = vrot.slane %v7170_v3, 7  ;;  %v1926_v5 = vsel %vm1192_vm0, %v7146_v28, 0  ;;  %v7544_v63 = vsel %vm626_vm7, %v595_v2, %v596_v16  ;;  %v5505_v2 = vld [vmem:[%s8993_s6 + $0x590] sm:$0xff] }
 0x110   : > { %2965 = vperm.xlu1 %6568, %v5499_v11   ;;  %2960 = vperm.xlu0 %6567, %v5498_v10   ;;  %v856_v11 = vmul.f32 %v6870_v14, %v7492_v47  ;;  %v855_v10 = vmul.f32 %v6872_v15, %v7496_v57  ;;  %v5503_v14 = vld [vmem:[%s8993_s6 + $0x580] sm:$0xff]  ;;  %v5502_v15 = vld [vmem:[%s8993_s6 + $0x578] sm:$0xff]  ;;  %v7540_v24 = vsel %vm626_vm7, %v596_v16, %v597_v39  ;;  %v604_v0 = vrot.slane %v7249_v62, 7 }
 0x111   : > { %6015 = vmatmul.mubr.msk.bf16.gmra.mrb[28].mxu1 %vm1143_vm9, %v1140_v27  ;;  %v599_v27 = vrot.slane %v7173_v13, 7  ;;  %9190 = vst [vmem:[#allocation63_spill] sm:$0xff] %v7540_v24  ;;  %9191 = vst [vmem:[#allocation64_spill] sm:$0xff] %v7544_v63  ;;  %v7557_v28 = vsel %vm626_vm7, %v597_v39, %v598_v9  ;;  %v858_v16 = vmul.f32 %v6880_v18, %v7540_v24  ;;  %v600_v18 = vrot.slane %v7185_v29, 7 }
 0x112   : > { %6020 = vmatprep.mubr.msk.bf16.mxu1 %vm1143_vm9, %v883_v7  ;;  %v884_v7 = vpack.c.bf16 %v854_v49, %v853_v35  ;;  %v7549_v49 = vld [vmem:[%s8991_s4 + $0xc] sm:$0xf]  ;;  %9193 = vst [vmem:[#allocation66_spill] sm:$0xff] %v7557_v28  ;;  %v857_v39 = vmul.f32 %v6882_v19, %v7544_v63  ;;  %v601_v19 = vrot.slane %v7188_v17, 7  ;;  %v5507_v63 = vld [vmem:[%s8993_s6 + $0x5a0] sm:$0xff] }
 0x113   : > { %v7512_v50 = vpop.permute.xlu1 %1684  ;;  %v7514_v53 = vpop.permute.xlu0 %1679  ;;  %v7553_v35 = vsel %vm626_vm7, %v598_v9, %v599_v27 }
 0x114   : > { %2975 = vperm.xlu1 %6568, %v5501_v6   ;;  %2970 = vperm.xlu0 %6567, %v5500_v38   ;;  %v885_v38 = vpack.c.bf16 %v856_v11, %v855_v10  ;;  %9192 = vst [vmem:[#allocation65_spill] sm:$0xff] %v7553_v35  ;;  %v5504_v11 = vld [vmem:[%s8993_s6 + $0x588] sm:$0xff]  ;;  %v7570_v10 = vld [vmem:[%s8991_s4 + $0x18] sm:$0xf] }
 0x115   : > { %9194 = vst [vmem:[#allocation67_spill] sm:$0xff] %v7570_v10  ;;  %6555 = vmatprep.subr.msk.bf16.mxu0 %vm1192_vm0, %v7570_v10  ;;  %v9209_v10 = vld [vmem:[#allocation9_spill] sm:$0xff] }
 0x117   : > { %v7532_v43 = vpop.permute.xlu1 %1694  ;;  %v7534_v6 = vpop.permute.xlu0 %1689 }
 0x118   : > { %2985 = vperm.xlu1 %6568, %v5503_v14   ;;  %2980 = vperm.xlu0 %6567, %v5502_v15   ;;  %v860_v15 = vmul.f32 %v6890_v22, %v7553_v35  ;;  %v5506_v22 = vld [vmem:[%s8993_s6 + $0x598] sm:$0xff]  ;;  %v886_v35 = vpack.c.bf16 %v858_v16, %v857_v39  ;;  %v5509_v39 = vld [vmem:[%s8993_s6 + $0x5b0] sm:$0xff] }
 0x119   : > { %6021 = vmatmul.mubr.msk.bf16.vlgmr.msra.gmra.mrb[0].mxu1 %vm1143_vm9, %v884_v7  ;;  %v859_v7 = vmul.f32 %v6892_v23, %v7557_v28 }
 0x11a   : > { %6024 = vmatprep.mubr.msk.bf16.mxu1 %vm1143_vm9, %v885_v38  ;;  %6053 = vmatpush3.bf16.msra.mxu1 %v1926_v5  ;;  %v602_v5 = vrot.slane %v7235_v33, 7  ;;  %v603_v38 = vrot.slane %v7246_v48, 7 }
 0x11b   : > { %v7576_v9 = vpop.permute.xlu1 %1704  ;;  %v7578_v14 = vpop.permute.xlu0 %1699  ;;  %6551 = vmatprep.subr.msk.bf16.mxu1 %vm1192_vm0, %v7549_v49  ;;  %v887_v24 = vpack.c.bf16 %v860_v15, %v859_v7  ;;  %v9199_v15 = vld [vmem:[#allocation3_spill] sm:$0xff] }
 0x11c   : > { %2995 = vperm.xlu1 %6568, %v5505_v2   ;;  %2990 = vperm.xlu0 %6567, %v5504_v11   ;;  %v7604_v2 = vsel %vm626_vm7, %v600_v18, %v601_v19  ;;  %v7608_v11 = vsel %vm626_vm7, %v599_v27, %v600_v18  ;;  %v7612_v57 = vsel %vm626_vm7, %v602_v5, %v603_v38  ;;  %v5508_v27 = vld [vmem:[%s8993_s6 + $0x5a8] sm:$0xff] }
 0x11d   : > { %9195 = vst [vmem:[#allocation68_spill] sm:$0xff] %v7604_v2  ;;  %9196 = vst [vmem:[#allocation69_spill] sm:$0xff] %v7608_v11  ;;  %v7616_v16 = vsel %vm626_vm7, %v601_v19, %v602_v5  ;;  %v861_v7 = vmul.f32 %v9199_v15, %v7608_v11  ;;  %v607_v15 = vrot.slane %v7303_v56, 7  ;;  %v5511_v11 = vld [vmem:[%s8993_s6 + $0x5c0] sm:$0xff] }
 0x11e   : > { %9197 = vst [vmem:[#allocation70_spill] sm:$0xff] %v7612_v57  ;;  %9198 = vst [vmem:[#allocation71_spill] sm:$0xff] %v7616_v16 }
 0x11f   : > { %v7598_v23 = vpop.permute.xlu1 %1714  ;;  %v7600_v28 = vpop.permute.xlu0 %1709 }
 0x120   : > { %3005 = vperm.xlu1 %6568, %v5507_v63   ;;  %3000 = vperm.xlu0 %6567, %v5506_v22   ;;  %v862_v63 = vmul.f32 %v6900_v26, %v7604_v2  ;;  %v9201_v22 = vld [vmem:[#allocation5_spill] sm:$0xff]  ;;  %v606_v26 = vrot.slane %v7298_v21, 7  ;;  %v608_v21 = vrot.slane %v7307_v25, 7 }
 0x121   : > { %6025 = vmatmul.mubr.msk.bf16.gmra.mrb[4].mxu1 %vm1143_vm9, %v886_v35  ;;  %v9200_v35 = vld [vmem:[#allocation4_spill] sm:$0xff]  ;;  %v863_v47 = vmul.f32 %v9201_v22, %v7616_v16 }
 0x122   : > { %6028 = vmatprep.mubr.msk.bf16.mxu1 %vm1143_vm9, %v887_v24  ;;  %v864_v5 = vmul.f32 %v9200_v35, %v7612_v57  ;;  %v605_v24 = vrot.slane %v7254_v32, 7  ;;  %v5510_v35 = vld [vmem:[%s8993_s6 + $0x5b8] sm:$0xff]  ;;  %v888_v57 = vpack.c.bf16 %v862_v63, %v861_v7  ;;  %v7662_v42 = vsel %vm626_vm7, %v606_v26, %v607_v15  ;;  %v9207_v7 = vld [vmem:[#allocation7_spill] sm:$0xff]  ;;  %v9210_v32 = vld [vmem:[#allocation45_spill] sm:$0xff] }
 0x123   : > { %v7630_v18 = vpop.permute.xlu1 %1724  ;;  %v7632_v19 = vpop.permute.xlu0 %1719  ;;  %9204 = vst [vmem:[#allocation5_spill] sm:$0xff] %v7662_v42 }
 0x124   : > { %3015 = vperm.xlu1 %6568, %v5509_v39   ;;  %3010 = vperm.xlu0 %6567, %v5508_v27   ;;  %v889_v2 = vpack.c.bf16 %v864_v5, %v863_v47  ;;  %v7654_v39 = vsel %vm626_vm7, %v604_v0, %v605_v24  ;;  %v7658_v27 = vsel %vm626_vm7, %v603_v38, %v604_v0  ;;  %v5513_v47 = vld [vmem:[%s8993_s6 + $0x5d0] sm:$0xff]  ;;  %v5512_v0 = vld [vmem:[%s8993_s6 + $0x5c8] sm:$0xff]  ;;  %v9206_v38 = vld [vmem:[#allocation6_spill] sm:$0xff] }
 0x125   : > { %9202 = vst [vmem:[#allocation3_spill] sm:$0xff] %v7654_v39  ;;  %9203 = vst [vmem:[#allocation4_spill] sm:$0xff] %v7658_v27  ;;  %v7666_v63 = vsel %vm626_vm7, %v605_v24, %v606_v26  ;;  %v865_v5 = vmul.f32 %v9207_v7, %v7658_v27  ;;  %v611_v7 = vrot.slane %v7356_v44, 7  ;;  %v5515_v27 = vld [vmem:[%s8993_s6 + $0x5e0] sm:$0xff] }
 0x126   : > { %9205 = vst [vmem:[#allocation72_spill] sm:$0xff] %v7666_v63  ;;  %v867_v56 = vmul.f32 %v9209_v10, %v7666_v63 }
 0x127   : > { %v7648_v22 = vpop.permute.xlu1 %1734  ;;  %v7650_v16 = vpop.permute.xlu0 %1729 }
 0x128   : > { %3025 = vperm.xlu1 %6568, %v5511_v11   ;;  %3020 = vperm.xlu0 %6567, %v5510_v35   ;;  %v866_v11 = vmul.f32 %v9206_v38, %v7654_v39  ;;  %v610_v38 = vrot.slane %v7348_v31, 7  ;;  %v9219_v31 = vld [vmem:[#allocation13_spill] sm:$0xff] }
 0x129   : > { %6029 = vmatmul.mubr.msk.bf16.gmra.mrb[8].mxu1 %vm1143_vm9, %v888_v57  ;;  %v9208_v57 = vld [vmem:[#allocation8_spill] sm:$0xff] }
 0x12a   : > { %6032 = vmatprep.mubr.msk.bf16.mxu1 %vm1143_vm9, %v889_v2  ;;  %v868_v35 = vmul.f32 %v9208_v57, %v7662_v42  ;;  %v609_v2 = vrot.slane %v9210_v32, 7  ;;  %v5514_v57 = vld [vmem:[%s8993_s6 + $0x5d8] sm:$0xff]  ;;  %v890_v42 = vpack.c.bf16 %v866_v11, %v865_v5  ;;  %v7712_v44 = vsel %vm626_vm7, %v610_v38, %v611_v7  ;;  %v9217_v5 = vld [vmem:[#allocation11_spill] sm:$0xff] }
 0x12b   : > { %v7680_v24 = vpop.permute.xlu1 %1744  ;;  %v7682_v26 = vpop.permute.xlu0 %1739  ;;  %9214 = vst [vmem:[#allocation9_spill] sm:$0xff] %v7712_v44 }
 0x12c   : > { %3035 = vperm.xlu1 %6568, %v5513_v47   ;;  %3030 = vperm.xlu0 %6567, %v5512_v0   ;;  %v891_v39 = vpack.c.bf16 %v868_v35, %v867_v56  ;;  %v7704_v47 = vsel %vm626_vm7, %v608_v21, %v609_v2  ;;  %v7708_v0 = vsel %vm626_vm7, %v607_v15, %v608_v21  ;;  %v5517_v56 = vld [vmem:[%s8993_s6 + $0x5f0] sm:$0xff]  ;;  %v5516_v21 = vld [vmem:[%s8993_s6 + $0x5e8] sm:$0xff]  ;;  %v9216_v15 = vld [vmem:[#allocation10_spill] sm:$0xff] }
 0x12d   : > { %9212 = vst [vmem:[#allocation7_spill] sm:$0xff] %v7704_v47  ;;  %9213 = vst [vmem:[#allocation8_spill] sm:$0xff] %v7708_v0  ;;  %v7716_v11 = vsel %vm626_vm7, %v609_v2, %v610_v38  ;;  %v869_v35 = vmul.f32 %v9217_v5, %v7708_v0  ;;  %v615_v5 = vrot.slane %v7401_v8, 7  ;;  %v5536_v0 = vld [vmem:[%s8993_s6 + $0x600] sm:$0xff] }
 0x12e   : > { %9215 = vst [vmem:[#allocation73_spill] sm:$0xff] %v7716_v11  ;;  %v871_v32 = vmul.f32 %v9219_v31, %v7716_v11 }
 0x12f   : > { %v7698_v10 = vpop.permute.xlu1 %1754  ;;  %v7700_v63 = vpop.permute.xlu0 %1749 }
 0x130   : > { %9211 = vst [vmem:[#allocation6_spill] sm:$0xff] %v7700_v63  ;;  %3045 = vperm.xlu1 %6568, %v5515_v27   ;;  %3040 = vperm.xlu0 %6567, %v5514_v57   ;;  %v870_v27 = vmul.f32 %v9216_v15, %v7704_v47  ;;  %v612_v63 = vrot.slane %v7359_v36, 7  ;;  %v614_v15 = vrot.slane %v7390_v1, 7  ;;  %v616_v1 = vrot.slane %v7419_v55, 7 }
 0x131   : > { %6033 = vmatmul.mubr.msk.bf16.gmra.mrb[12].mxu1 %vm1143_vm9, %v890_v42  ;;  %v9218_v42 = vld [vmem:[#allocation12_spill] sm:$0xff] }
 0x132   : > { %6036 = vmatprep.mubr.msk.bf16.mxu1 %vm1143_vm9, %v891_v39  ;;  %v872_v57 = vmul.f32 %v9218_v42, %v7712_v44  ;;  %v613_v39 = vrot.slane %v7364_v30, 7  ;;  %v5518_v42 = vld [vmem:[%s8993_s6 + $0x5f8] sm:$0xff]  ;;  %v892_v44 = vpack.c.bf16 %v870_v27, %v869_v35  ;;  %v7762_v8 = vsel %vm626_vm7, %v614_v15, %v615_v5  ;;  %v9227_v35 = vld [vmem:[#allocation15_spill] sm:$0xff] }
 0x133   : > { %v7730_v2 = vpop.permute.xlu1 %1764  ;;  %v7732_v38 = vpop.permute.xlu0 %1759  ;;  %9224 = vst [vmem:[#allocation74_spill] sm:$0xff] %v7762_v8 }
 0x134   : > { %3055 = vperm.xlu1 %6568, %v5517_v56   ;;  %3050 = vperm.xlu0 %6567, %v5516_v21   ;;  %v893_v47 = vpack.c.bf16 %v872_v57, %v871_v32  ;;  %v7754_v56 = vsel %vm626_vm7, %v612_v63, %v613_v39  ;;  %v7758_v21 = vsel %vm626_vm7, %v611_v7, %v612_v63  ;;  %v5538_v32 = vld [vmem:[%s8993_s6 + $0x610] sm:$0xff]  ;;  %v5537_v63 = vld [vmem:[%s8993_s6 + $0x608] sm:$0xff]  ;;  %v9226_v7 = vld [vmem:[#allocation14_spill] sm:$0xff] }
 0x135   : > { %9222 = vst [vmem:[#allocation12_spill] sm:$0xff] %v7754_v56  ;;  %9223 = vst [vmem:[#allocation13_spill] sm:$0xff] %v7758_v21  ;;  %v7766_v27 = vsel %vm626_vm7, %v613_v39, %v614_v15  ;;  %v873_v57 = vmul.f32 %v9227_v35, %v7758_v21  ;;  %v619_v35 = vrot.slane %v7440_v40, 7 }
 0x136   : > { %9225 = vst [vmem:[#allocation75_spill] sm:$0xff] %v7766_v27 }
 0x137   : > { %v7748_v31 = vpop.permute.xlu1 %1774  ;;  %v7750_v11 = vpop.permute.xlu0 %1769 }
 0x138   : > { %9220 = vst [vmem:[#allocation10_spill] sm:$0xff] %v7748_v31  ;;  %9221 = vst [vmem:[#allocation11_spill] sm:$0xff] %v7750_v11  ;;  %3392 = vperm.xlu1 %6568, %v5536_v0   ;;  %3060 = vperm.xlu0 %6567, %v5518_v42   ;;  %v874_v0 = vmul.f32 %v9226_v7, %v7754_v56  ;;  %v9231_v11 = vld [vmem:[#allocation17_spill] sm:$0xff]  ;;  %v618_v7 = vrot.slane %v7438_v34, 7  ;;  %v5540_v56 = vld [vmem:[%s8993_s6 + $0x620] sm:$0xff] }
 0x139   : > { %6037 = vmatmul.mubr.msk.bf16.gmra.mrb[16].mxu1 %vm1143_vm9, %v892_v44  ;;  %v9230_v44 = vld [vmem:[#allocation16_spill] sm:$0xff]  ;;  %v875_v31 = vmul.f32 %v9231_v11, %v7766_v27 }
 0x13a   : > { %6040 = vmatprep.mubr.msk.bf16.mxu1 %vm1143_vm9, %v893_v47  ;;  %v876_v42 = vmul.f32 %v9230_v44, %v7762_v8  ;;  %v617_v47 = vrot.slane %v7421_v51, 7  ;;  %v5539_v44 = vld [vmem:[%s8993_s6 + $0x618] sm:$0xff]  ;;  %v894_v8 = vpack.c.bf16 %v874_v0, %v873_v57  ;;  %v9239_v57 = vld [vmem:[#allocation19_spill] sm:$0xff] }
 0x13b   : > { %v7780_v39 = vpop.permute.xlu1 %1784  ;;  %v7782_v15 = vpop.permute.xlu0 %1779 }
 0x13c   : > { %9228 = vst [vmem:[#allocation14_spill] sm:$0xff] %v7780_v39  ;;  %9229 = vst [vmem:[#allocation15_spill] sm:$0xff] %v7782_v15  ;;  %3402 = vperm.xlu1 %6568, %v5538_v32   ;;  %3397 = vperm.xlu0 %6567, %v5537_v63   ;;  %v895_v21 = vpack.c.bf16 %v876_v42, %v875_v31  ;;  %v7804_v32 = vsel %vm626_vm7, %v616_v1, %v617_v47  ;;  %v5542_v31 = vld [vmem:[%s8993_s6 + $0x630] sm:$0xff]  ;;  %v620_v39 = vrot.slane %v7463_v37, 7 }
 0x13d   : > { %9234 = vst [vmem:[#allocation76_spill] sm:$0xff] %v7804_v32  ;;  %v7808_v63 = vsel %vm626_vm7, %v615_v5, %v616_v1  ;;  %v7812_v15 = vsel %vm626_vm7, %v618_v7, %v619_v35  ;;  %v7816_v0 = vsel %vm626_vm7, %v617_v47, %v618_v7  ;;  %v5541_v1 = vld [vmem:[%s8993_s6 + $0x628] sm:$0xff]  ;;  %v9238_v5 = vld [vmem:[#allocation18_spill] sm:$0xff] }
 0x13e   : > { %9235 = vst [vmem:[#allocation77_spill] sm:$0xff] %v7808_v63  ;;  %9236 = vst [vmem:[#allocation78_spill] sm:$0xff] %v7812_v15  ;;  %v877_v42 = vmul.f32 %v9239_v57, %v7808_v63  ;;  %v5544_v57 = vld [vmem:[%s8993_s6 + $0x640] sm:$0xff] }
 0x13f   : > { %v7798_v11 = vpop.permute.xlu1 %1794  ;;  %v7800_v27 = vpop.permute.xlu0 %1789  ;;  %9237 = vst [vmem:[#allocation79_spill] sm:$0xff] %v7816_v0  ;;  %v5560_v63 = vld [vmem:[%s8993_s6 + $0x6c0] sm:$0xff] }
 0x140   : > { %9232 = vst [vmem:[#allocation16_spill] sm:$0xff] %v7798_v11  ;;  %9233 = vst [vmem:[#allocation17_spill] sm:$0xff] %v7800_v27  ;;  %3412 = vperm.xlu1 %6568, %v5540_v56   ;;  %3407 = vperm.xlu0 %6567, %v5539_v44   ;;  %v878_v56 = vmul.f32 %v9238_v5, %v7804_v32  ;;  %v9241_v27 = vld [vmem:[#allocation21_spill] sm:$0xff]  ;;  %v1600_v5 = vrot.slane %v7088_v12, 1  ;;  %v5543_v32 = vld [vmem:[%s8993_s6 + $0x638] sm:$0xff] }
 0x141   : > { %6041 = vmatmul.mubr.msk.bf16.gmra.mrb[20].mxu1 %vm1143_vm9, %v894_v8  ;;  %v9240_v8 = vld [vmem:[#allocation20_spill] sm:$0xff]  ;;  %v879_v11 = vmul.f32 %v9241_v27, %v7816_v0 }
 0x142   : > { %6044 = vmatprep.mubr.msk.bf16.mxu1 %vm1143_vm9, %v895_v21  ;;  %v880_v44 = vmul.f32 %v9240_v8, %v7812_v15  ;;  %v1569_v21 = vrot.slane %v7086_v52, 1  ;;  %v896_v8 = vpack.c.bf16 %v878_v56, %v877_v42  ;;  %v7859_v52 = vsel %vm626_vm7, %v619_v35, %v620_v39  ;;  %v9248_v35 = vld [vmem:[#allocation23_spill] sm:$0xff] }
 0x143   : > { %v7830_v47 = vpop.permute.xlu1 %1804  ;;  %v7832_v7 = vpop.permute.xlu0 %1799  ;;  %9244 = vst [vmem:[#allocation19_spill] sm:$0xff] %v7859_v52  ;;  %v9246_v42 = vrot.slane %v7046_v61, 1  ;;  %v1570_v61 = vrot.slane %v7090_v59, 1 }
 0x144   : > { %3422 = vperm.xlu1 %6568, %v5542_v31   ;;  %3417 = vperm.xlu0 %6567, %v5541_v1   ;;  %v897_v0 = vpack.c.bf16 %v880_v44, %v879_v11  ;;  %v9242_v31 = vrot.slane %v7044_v60, 7  ;;  %v7863_v56 = vsel %vm1601_vm4, %v1600_v5, %v1569_v21  ;;  %v5546_v44 = vld [vmem:[%s8993_s6 + $0x650] sm:$0xff] }
 0x145   : > { %9245 = vst [vmem:[#allocation20_spill] sm:$0xff] %v7863_v56  ;;  %v7869_v11 = vsel %vm1601_vm4, %v9246_v42, %v1600_v5 }
 0x146   : > { %v7855_v1 = vsel %vm626_vm7, %v620_v39, %v9242_v31  ;;  %9247 = vst [vmem:[#allocation21_spill] sm:$0xff] %v7869_v11  ;;  %v5545_v39 = vld [vmem:[%s8993_s6 + $0x648] sm:$0xff]  ;;  %v1827_v12 = vmul.f32 %v7484_v20, %v7869_v11  ;;  %v9262_v11 = vld [vmem:[#allocation46_spill] sm:$0xff] }
 0x147   : > { %v7847_v15 = vpop.permute.xlu1 %1814  ;;  %v7849_v27 = vpop.permute.xlu0 %1809  ;;  %9243 = vst [vmem:[#allocation18_spill] sm:$0xff] %v7855_v1 }
 0x148   : > { %3432 = vperm.xlu1 %6568, %v5544_v57   ;;  %3427 = vperm.xlu0 %6567, %v5543_v32   ;;  %v882_v32 = vmul.f32 %v9248_v35, %v7855_v1  ;;  %v9249_v57 = vld [vmem:[#allocation24_spill] sm:$0xff]  ;;  %v1572_v35 = vrot.slane %v7118_v4, 1  ;;  %v5548_v1 = vld [vmem:[%s8993_s6 + $0x660] sm:$0xff] }
 0x149   : > { %6045 = vmatmul.mubr.msk.bf16.gmra.mrb[24].mxu1 %vm1143_vm9, %v896_v8  ;;  %v881_v31 = vmul.f32 %v9249_v57, %v7859_v52  ;;  %v1828_v8 = vmul.f32 %v7482_v41, %v7863_v56  ;;  %v1573_v57 = vrot.slane %v7129_v54, 1  ;;  %v5547_v41 = vld [vmem:[%s8993_s6 + $0x658] sm:$0xff] }
 0x14a   : > { %6048 = vmatprep.mubr.msk.bf16.mxu1 %vm1143_vm9, %v897_v0  ;;  %v1571_v0 = vrot.slane %v7111_v45, 1 }
 0x14b   : > { %v7883_v5 = vpop.permute.xlu1 %1824  ;;  %v7885_v42 = vpop.permute.xlu0 %1819  ;;  %v898_v52 = vpack.c.bf16 %v882_v32, %v881_v31  ;;  %v1859_v45 = vpack.c.bf16 %v1828_v8, %v1827_v12  ;;  %v7915_v54 = vsel %vm1601_vm4, %v1572_v35, %v1573_v57  ;;  %v5550_v12 = vld [vmem:[%s8993_s6 + $0x670] sm:$0xff] }
 0x14c   : > { %3442 = vperm.xlu1 %6568, %v5546_v44   ;;  %3437 = vperm.xlu0 %6567, %v5545_v39   ;;  %v7907_v44 = vsel %vm1601_vm4, %v1570_v61, %v1571_v0  ;;  %v7911_v39 = vsel %vm1601_vm4, %v1569_v21, %v1570_v61  ;;  %v7919_v32 = vsel %vm1601_vm4, %v1571_v0, %v1572_v35  ;;  %v5549_v61 = vld [vmem:[%s8993_s6 + $0x668] sm:$0xff]  ;;  %v1574_v35 = vrot.slane %v7134_v46, 1 }
 0x14d   : > { %9250 = vst [vmem:[#allocation23_spill] sm:$0xff] %v7907_v44  ;;  %9251 = vst [vmem:[#allocation24_spill] sm:$0xff] %v7911_v39  ;;  %v1830_v21 = vmul.f32 %v7512_v50, %v7907_v44  ;;  %v1831_v0 = vmul.f32 %v7534_v6, %v7919_v32  ;;  %v1576_v50 = vrot.slane %v7173_v13, 1 }
 0x14e   : > { %v7963_v13 = vsel %vm1601_vm4, %v1573_v57, %v1574_v35  ;;  %v5553_v57 = vld [vmem:[%s8993_s6 + $0x688] sm:$0xff] }
 0x14f   : > { %v7901_v20 = vpop.permute.xlu1 %2161  ;;  %v7903_v59 = vpop.permute.xlu0 %2156 }
 0x150   : > { %3452 = vperm.xlu1 %6568, %v5548_v1   ;;  %3447 = vperm.xlu0 %6567, %v5547_v41   ;;  %v1829_v1 = vmul.f32 %v7514_v53, %v7911_v39  ;;  %v1577_v53 = vrot.slane %v7185_v29, 1  ;;  %v5552_v41 = vld [vmem:[%s8993_s6 + $0x680] sm:$0xff] }
 0x151   : > { %6049 = vmatmul.mubr.msk.bf16.gmra.mrb[28].mxu1 %vm1143_vm9, %v898_v52  ;;  %v1832_v52 = vmul.f32 %v7532_v43, %v7915_v54  ;;  %v5551_v43 = vld [vmem:[%s8993_s6 + $0x678] sm:$0xff] }
 0x152   : > { %6054 = vmatprep.mubr.msk.bf16.mxu1 %vm1143_vm9, %v1859_v45  ;;  %v1575_v45 = vrot.slane %v7170_v3, 1  ;;  %v1860_v4 = vpack.c.bf16 %v1830_v21, %v1829_v1  ;;  %v7967_v21 = vsel %vm1601_vm4, %v1576_v50, %v1577_v53 }
 0x153   : > { %v7933_v31 = vpop.permute.xlu1 %2171  ;;  %v7935_v8 = vpop.permute.xlu0 %2166 }
 0x154   : > { %3462 = vperm.xlu1 %6568, %v5550_v12   ;;  %3457 = vperm.xlu0 %6567, %v5549_v61   ;;  %v2413_v12 = vsel %vm1192_vm0, %v7549_v49, 0  ;;  %v1861_v61 = vpack.c.bf16 %v1832_v52, %v1831_v0  ;;  %v7959_v29 = vsel %vm1601_vm4, %v1574_v35, %v1575_v45  ;;  %v7971_v1 = vsel %vm1601_vm4, %v1575_v45, %v1576_v50  ;;  %v5554_v49 = vld [vmem:[%s8993_s6 + $0x690] sm:$0xff] }
 0x155   : > { %v1834_v52 = vmul.f32 %v7576_v9, %v7959_v29  ;;  %v1833_v0 = vmul.f32 %v7578_v14, %v7963_v13  ;;  %v6569_v45 = vld [vmem:[%s8991_s4 + $0x10] sm:$0xf]  ;;  %v1836_v50 = vmul.f32 %v7598_v23, %v7967_v21  ;;  %v1578_v9 = vrot.slane %v7188_v17, 1  ;;  %v5555_v23 = vld [vmem:[%s8993_s6 + $0x698] sm:$0xff] }
 0x156   : > { %v1579_v14 = vrot.slane %v7235_v33, 1 }
 0x157   : > { %v7951_v6 = vpop.permute.xlu1 %2181  ;;  %v7953_v46 = vpop.permute.xlu0 %2176 }
 0x158   : > { %3472 = vperm.xlu1 %6568, %v5552_v41   ;;  %3467 = vperm.xlu0 %6567, %v5551_v43   ;;  %v1835_v41 = vmul.f32 %v7600_v28, %v7971_v1  ;;  %v1580_v43 = vrot.slane %v7246_v48, 1  ;;  %v9254_v48 = vld [vmem:[#allocation42_spill] sm:$0xff] }
 0x159   : > { %6055 = vmatmul.mubr.msk.bf16.vlgmr.msra.gmra.mrb[0].mxu1 %vm1143_vm9, %v1860_v4 }
 0x15a   : > { %6058 = vmatprep.mubr.msk.bf16.mxu1 %vm1143_vm9, %v1861_v61  ;;  %6087 = vmatpush3.bf16.msra.mxu1 %v2413_v12  ;;  %v1581_v12 = vrot.slane %v7249_v62, 1  ;;  %v5556_v61 = vld [vmem:[%s8993_s6 + $0x6a0] sm:$0xff]  ;;  %v1863_v33 = vpack.c.bf16 %v1836_v50, %v1835_v41 }
 0x15b   : > { %v7985_v35 = vpop.permute.xlu1 %2191  ;;  %v7987_v4 = vpop.permute.xlu0 %2186  ;;  %6553 = vmatprep.subr.msk.bf16.mxu1 %vm1192_vm0, %v6569_v45  ;;  %v1862_v45 = vpack.c.bf16 %v1834_v52, %v1833_v0  ;;  %v8025_v52 = vsel %vm1601_vm4, %v1579_v14, %v1580_v43  ;;  %v5558_v0 = vld [vmem:[%s8993_s6 + $0x6b0] sm:$0xff] }
 0x15c   : > { %3482 = vperm.xlu1 %6568, %v5554_v49   ;;  %3477 = vperm.xlu0 %6567, %v5553_v57   ;;  %v8013_v49 = vsel %vm1601_vm4, %v1578_v9, %v1579_v14  ;;  %v8017_v57 = vsel %vm1601_vm4, %v1577_v53, %v1578_v9  ;;  %v8021_v62 = vsel %vm1601_vm4, %v1580_v43, %v1581_v12  ;;  %v5557_v53 = vld [vmem:[%s8993_s6 + $0x6a8] sm:$0xff] }
 0x15d   : > { %v1838_v50 = vmul.f32 %v7630_v18, %v8013_v49  ;;  %v1837_v41 = vmul.f32 %v7632_v19, %v8017_v57  ;;  %v1840_v43 = vmul.f32 %v7648_v22, %v8021_v62  ;;  %v9255_v18 = vld [vmem:[#allocation43_spill] sm:$0xff]  ;;  %v1585_v19 = vrot.slane %v7307_v25, 1  ;;  %v5559_v22 = vld [vmem:[%s8993_s6 + $0x6b8] sm:$0xff] }
 0x15e   : > { %v1584_v3 = vrot.slane %v9255_v18, 1 }
 0x15f   : > { %v8007_v28 = vpop.permute.xlu1 %2201  ;;  %v8009_v17 = vpop.permute.xlu0 %2196  ;;  %v1864_v56 = vpack.c.bf16 %v1838_v50, %v1837_v41  ;;  %v5562_v41 = vld [vmem:[%s8993_s6 + $0x6d0] sm:$0xff] }
 0x160   : > { %3492 = vperm.xlu1 %6568, %v5556_v61   ;;  %3487 = vperm.xlu0 %6567, %v5555_v23   ;;  %v1839_v61 = vmul.f32 %v7650_v16, %v8025_v52  ;;  %v9253_v23 = vld [vmem:[#allocation41_spill] sm:$0xff]  ;;  %v8071_v25 = vsel %vm1601_vm4, %v1584_v3, %v1585_v19 }
 0x161   : > { %6059 = vmatmul.mubr.msk.bf16.gmra.mrb[4].mxu1 %vm1143_vm9, %v1862_v45  ;;  %v1582_v45 = vrot.slane %v9253_v23, 1 }
 0x162   : > { %6062 = vmatprep.mubr.msk.bf16.mxu1 %vm1143_vm9, %v1863_v33  ;;  %v1583_v33 = vrot.slane %v9254_v48, 1  ;;  %v1865_v48 = vpack.c.bf16 %v1840_v43, %v1839_v61 }
 0x163   : > { %v8039_v9 = vpop.permute.xlu1 %2211  ;;  %v8041_v14 = vpop.permute.xlu0 %2206 }
 0x164   : > { %9252 = vst [vmem:[#allocation80_spill] sm:$0xff] %v8041_v14  ;;  %3502 = vperm.xlu1 %6568, %v5558_v0   ;;  %3497 = vperm.xlu0 %6567, %v5557_v53   ;;  %v8063_v0 = vsel %vm1601_vm4, %v1582_v45, %v1583_v33  ;;  %v8067_v53 = vsel %vm1601_vm4, %v1581_v12, %v1582_v45  ;;  %v5561_v12 = vld [vmem:[%s8993_s6 + $0x6c8] sm:$0xff]  ;;  %v9260_v45 = vld [vmem:[#allocation6_spill] sm:$0xff] }
 0x165   : > { %v8075_v50 = vsel %vm1601_vm4, %v1583_v33, %v1584_v3  ;;  %v1841_v43 = vmul.f32 %v7682_v26, %v8067_v53  ;;  %v1589_v26 = vrot.slane %v7359_v36, 1 }
 0x166   : > { %v1843_v33 = vmul.f32 %v9260_v45, %v8075_v50 }
 0x167   : > { %v8057_v16 = vpop.permute.xlu1 %2221  ;;  %v8059_v23 = vpop.permute.xlu0 %2216 }
 0x168   : > { %9256 = vst [vmem:[#allocation81_spill] sm:$0xff] %v8057_v16  ;;  %9257 = vst [vmem:[#allocation82_spill] sm:$0xff] %v8059_v23  ;;  %3512 = vperm.xlu1 %6568, %v5560_v63   ;;  %3507 = vperm.xlu0 %6567, %v5559_v22   ;;  %v1842_v63 = vmul.f32 %v7680_v24, %v8063_v0  ;;  %v9261_v22 = vld [vmem:[#allocation45_spill] sm:$0xff]  ;;  %v9263_v24 = vld [vmem:[#allocation47_spill] sm:$0xff] }
 0x169   : > { %6063 = vmatmul.mubr.msk.bf16.gmra.mrb[8].mxu1 %vm1143_vm9, %v1864_v56  ;;  %v1844_v56 = vmul.f32 %v7698_v10, %v8071_v25  ;;  %v1586_v18 = vrot.slane %v9261_v22, 1  ;;  %v1588_v23 = vrot.slane %v9263_v24, 1  ;;  %v5563_v10 = vld [vmem:[%s8993_s6 + $0x6d8] sm:$0xff] }
 0x16a   : > { %6066 = vmatprep.mubr.msk.bf16.mxu1 %vm1143_vm9, %v1865_v48  ;;  %v1587_v48 = vrot.slane %v9262_v11, 1 }
 0x16b   : > { %v8089_v3 = vpop.permute.xlu1 %2231  ;;  %v8091_v61 = vpop.permute.xlu0 %2226  ;;  %v1867_v11 = vpack.c.bf16 %v1844_v56, %v1843_v33  ;;  %v8121_v36 = vsel %vm1601_vm4, %v1588_v23, %v1589_v26  ;;  %v9266_v56 = vld [vmem:[#allocation50_spill] sm:$0xff] }
 0x16c   : > { %9258 = vst [vmem:[#allocation83_spill] sm:$0xff] %v8089_v3  ;;  %9259 = vst [vmem:[#allocation84_spill] sm:$0xff] %v8091_v61  ;;  %3522 = vperm.xlu1 %6568, %v5562_v41   ;;  %3517 = vperm.xlu0 %6567, %v5561_v12   ;;  %v5564_v61 = vld [vmem:[%s8993_s6 + $0x6e0] sm:$0xff]  ;;  %v1866_v3 = vpack.c.bf16 %v1842_v63, %v1841_v43  ;;  %v8113_v41 = vsel %vm1601_vm4, %v1586_v18, %v1587_v48  ;;  %v5566_v43 = vld [vmem:[%s8993_s6 + $0x6f0] sm:$0xff] }
 0x16d   : > { %v8117_v12 = vsel %vm1601_vm4, %v1585_v19, %v1586_v18  ;;  %v8125_v63 = vsel %vm1601_vm4, %v1587_v48, %v1588_v23  ;;  %v5565_v18 = vld [vmem:[%s8993_s6 + $0x6e8] sm:$0xff]  ;;  %v1846_v19 = vmul.f32 %v7730_v2, %v8113_v41  ;;  %v1590_v23 = vrot.slane %v7364_v30, 1 }
 0x16e   : > { %v1593_v2 = vrot.slane %v7419_v55, 1  ;;  %v1597_v55 = vrot.slane %v7463_v37, 1 }
 0x16f   : > { %v8107_v45 = vpop.permute.xlu1 %2241  ;;  %v8109_v22 = vpop.permute.xlu0 %2236 }
 0x170   : > { %9264 = vst [vmem:[#allocation6_spill] sm:$0xff] %v8107_v45  ;;  %9265 = vst [vmem:[#allocation85_spill] sm:$0xff] %v8109_v22  ;;  %3532 = vperm.xlu1 %6568, %v5564_v61   ;;  %3527 = vperm.xlu0 %6567, %v5563_v10   ;;  %v1845_v61 = vmul.f32 %v7732_v38, %v8117_v12  ;;  %v9269_v10 = vld [vmem:[#allocation10_spill] sm:$0xff]  ;;  %v9270_v22 = vld [vmem:[#allocation11_spill] sm:$0xff] }
 0x171   : > { %6067 = vmatmul.mubr.msk.bf16.gmra.mrb[12].mxu1 %vm1143_vm9, %v1866_v3  ;;  %v1591_v3 = vrot.slane %v9266_v56, 1  ;;  %v1848_v24 = vmul.f32 %v9269_v10, %v8121_v36  ;;  %v9271_v45 = vld [vmem:[#allocation51_spill] sm:$0xff]  ;;  %v5567_v56 = vld [vmem:[%s8993_s6 + $0x6f8] sm:$0xff] }
 0x172   : > { %6070 = vmatprep.mubr.msk.bf16.mxu1 %vm1143_vm9, %v1867_v11  ;;  %v1847_v11 = vmul.f32 %v9270_v22, %v8125_v63  ;;  %v1592_v16 = vrot.slane %v9271_v45, 1  ;;  %v5585_v38 = vld [vmem:[%s8993_s6 + $0x700] sm:$0xff]  ;;  %v1868_v30 = vpack.c.bf16 %v1846_v19, %v1845_v61  ;;  %v1594_v61 = vrot.slane %v7421_v51, 1  ;;  %v9279_v51 = vld [vmem:[#allocation17_spill] sm:$0xff] }
 0x173   : > { %v8141_v33 = vpop.permute.xlu1 %2251  ;;  %v8143_v48 = vpop.permute.xlu0 %2246  ;;  %v8159_v10 = vsel %vm1601_vm4, %v1590_v23, %v1591_v3 }
 0x174   : > { %9267 = vst [vmem:[#allocation86_spill] sm:$0xff] %v8141_v33  ;;  %9268 = vst [vmem:[#allocation87_spill] sm:$0xff] %v8143_v48  ;;  %3542 = vperm.xlu1 %6568, %v5566_v43   ;;  %3537 = vperm.xlu0 %6567, %v5565_v18   ;;  %v1869_v45 = vpack.c.bf16 %v1848_v24, %v1847_v11  ;;  %v8165_v43 = vsel %vm1601_vm4, %v1589_v26, %v1590_v23  ;;  %v5587_v24 = vld [vmem:[%s8993_s6 + $0x710] sm:$0xff]  ;;  %v5586_v26 = vld [vmem:[%s8993_s6 + $0x708] sm:$0xff]  ;;  %v1595_v23 = vrot.slane %v7438_v34, 1 }
 0x175   : > { %9273 = vst [vmem:[#allocation11_spill] sm:$0xff] %v8165_v43  ;;  %v8169_v18 = vsel %vm1601_vm4, %v1592_v16, %v1593_v2  ;;  %v8173_v19 = vsel %vm1601_vm4, %v1591_v3, %v1592_v16  ;;  %v9276_v16 = vld [vmem:[#allocation14_spill] sm:$0xff] }
 0x176   : > { %9274 = vst [vmem:[#allocation88_spill] sm:$0xff] %v8169_v18  ;;  %9275 = vst [vmem:[#allocation89_spill] sm:$0xff] %v8173_v19  ;;  %v1850_v3 = vmul.f32 %v9276_v16, %v8159_v10  ;;  %v1851_v34 = vmul.f32 %v9279_v51, %v8173_v19  ;;  %v5589_v16 = vld [vmem:[%s8993_s6 + $0x720] sm:$0xff]  ;;  %v8209_v51 = vsel %vm1601_vm4, %v1593_v2, %v1594_v61  ;;  %v5591_v2 = vld [vmem:[%s8993_s6 + $0x730] sm:$0xff] }
 0x177   : > { %v2906_v22 = vpop.permute.xlu1 %2905  ;;  %v8161_v48 = vpop.permute.xlu0 %2256 }
 0x178   : > { %9272 = vst [vmem:[#allocation10_spill] sm:$0xff] %v8161_v48  ;;  %3879 = vperm.xlu1 %6568, %v5585_v38   ;;  %3547 = vperm.xlu0 %6567, %v5567_v56   ;;  %v1596_v56 = vrot.slane %v7440_v40, 1  ;;  %v9278_v38 = vld [vmem:[#allocation16_spill] sm:$0xff]  ;;  %v3063_v40 = vmul.f32 %v2906_v22, %v7911_v39 }
 0x179   : > { %6071 = vmatmul.mubr.msk.bf16.gmra.mrb[16].mxu1 %vm1143_vm9, %v1868_v30  ;;  %v9277_v30 = vld [vmem:[#allocation15_spill] sm:$0xff]  ;;  %v1852_v48 = vmul.f32 %v9278_v38, %v8169_v18  ;;  %v8205_v18 = vsel %vm1601_vm4, %v1594_v61, %v1595_v23  ;;  %v1853_v61 = vmul.f32 %v7832_v7, %v8209_v51  ;;  %v5592_v7 = vld [vmem:[%s8993_s6 + $0x738] sm:$0xff] }
 0x17a   : > { %6074 = vmatprep.mubr.msk.bf16.mxu1 %vm1143_vm9, %v1869_v45  ;;  %v1849_v11 = vmul.f32 %v9277_v30, %v8165_v43  ;;  %v5588_v30 = vld [vmem:[%s8993_s6 + $0x718] sm:$0xff] }
 0x17b   : > { %v2916_v33 = vpop.permute.xlu1 %2915  ;;  %v2911_v14 = vpop.permute.xlu0 %2910 }
 0x17c   : > { %v3064_v45 = vmul.f32 %v2911_v14, %v7907_v44  ;;  %3889 = vperm.xlu1 %6568, %v5587_v24   ;;  %3884 = vperm.xlu0 %6567, %v5586_v26   ;;  %v1870_v37 = vpack.c.bf16 %v1850_v3, %v1849_v11  ;;  %v8213_v14 = vsel %vm1601_vm4, %v1596_v56, %v1597_v55  ;;  %v9282_v11 = vld [vmem:[#allocation67_spill] sm:$0xff]  ;;  %v9312_v44 = vld [vmem:[#allocation85_spill] sm:$0xff] }
 0x17d   : > { %9280 = vst [vmem:[#allocation14_spill] sm:$0xff] %v8213_v14  ;;  %v1871_v26 = vpack.c.bf16 %v1852_v48, %v1851_v34  ;;  %v3065_v39 = vmul.f32 %v2916_v33, %v7919_v32  ;;  %v8219_v3 = vsel %vm1601_vm4, %v1595_v23, %v1596_v56  ;;  %v5590_v34 = vld [vmem:[%s8993_s6 + $0x728] sm:$0xff]  ;;  %v1854_v48 = vmul.f32 %v7830_v47, %v8205_v18  ;;  %v8245_v47 = vld [vmem:[%s8991_s4 + $0x1c] sm:$0xf] }
 0x17e   : > { %v3095_v38 = vpack.c.bf16 %v3064_v45, %v3063_v40  ;;  %9281 = vst [vmem:[#allocation15_spill] sm:$0xff] %v8219_v3  ;;  %v3649_v45 = vsel %vm1192_vm0, %v9282_v11, 0 }
 0x17f   : > { %v2926_v22 = vpop.permute.xlu1 %2925  ;;  %v2921_v24 = vpop.permute.xlu0 %2920 }
 0x180   : > { %v3066_v40 = vmul.f32 %v2921_v24, %v7915_v54  ;;  %3899 = vperm.xlu1 %6568, %v5589_v16   ;;  %3894 = vperm.xlu0 %6567, %v5588_v30   ;;  %v1855_v16 = vmul.f32 %v7849_v27, %v8219_v3 }
 0x181   : > { %6075 = vmatmul.mubr.msk.bf16.gmra.mrb[20].mxu1 %vm1143_vm9, %v1870_v37  ;;  %6156 = vmatprep.mubr.msk.bf16.mxu0 %vm1143_vm9, %v3095_v38  ;;  %v1856_v37 = vmul.f32 %v7847_v15, %v8213_v14  ;;  %v5593_v15 = vld [vmem:[%s8993_s6 + $0x740] sm:$0xff]  ;;  %v1872_v38 = vpack.c.bf16 %v1854_v48, %v1853_v61  ;;  %v9285_v61 = vld [vmem:[#allocation25_spill] sm:$0xff] }
 0x182   : > { %v3096_v33 = vpack.c.bf16 %v3066_v40, %v3065_v39  ;;  %6078 = vmatprep.mubr.msk.bf16.mxu1 %vm1143_vm9, %v1871_v26  ;;  %v3067_v39 = vmul.f32 %v2926_v22, %v7963_v13  ;;  %v9283_v22 = vrot.slane %v7044_v60, 1 }
 0x183   : > { %v2936_v23 = vpop.permute.xlu1 %2935  ;;  %v2931_v56 = vpop.permute.xlu0 %2930 }
 0x184   : > { %v3068_v30 = vmul.f32 %v2931_v56, %v7959_v29  ;;  %3909 = vperm.xlu1 %6568, %v5591_v2   ;;  %3904 = vperm.xlu0 %6567, %v5590_v34   ;;  %v8258_v24 = vsel %vm1601_vm4, %v1597_v55, %v9283_v22  ;;  %v1873_v2 = vpack.c.bf16 %v1856_v37, %v1855_v16  ;;  %v5594_v55 = vld [vmem:[%s8993_s6 + $0x748] sm:$0xff]  ;;  %v9286_v56 = vld [vmem:[#allocation59_spill] sm:$0xff]  ;;  %vm5087_vm4 = vcmask 57344  }
 0x185   : > { %6157 = vmatmul.mubr.msk.bf16.vlgmr.msra.gmra.mrb[0].mxu0 %vm1143_vm9, %v3096_v33  ;;  %9284 = vst [vmem:[#allocation16_spill] sm:$0xff] %v8258_v24  ;;  %v3069_v34 = vmul.f32 %v2936_v23, %v7971_v1  ;;  %v1858_v37 = vmul.f32 %v7883_v5, %v9285_v61  ;;  %v1857_v23 = vmul.f32 %v7885_v42, %v8258_v24  ;;  %v5597_v5 = vld [vmem:[%s8993_s6 + $0x760] sm:$0xff]  ;;  %v5596_v42 = vld [vmem:[%s8993_s6 + $0x758] sm:$0xff] }
 0x186   : > { %v3097_v27 = vpack.c.bf16 %v3068_v30, %v3067_v39  ;;  %6189 = vmatpush3.bf16.msra.mxu0 %v3649_v45  ;;  %v2315_v11 = vmul.f32 %v7901_v20, %v9286_v56  ;;  %v9287_v39 = vld [vmem:[#allocation62_spill] sm:$0xff] }
 0x187   : > { %v2946_v26 = vpop.permute.xlu1 %2945  ;;  %v2941_v40 = vpop.permute.xlu0 %2940  ;;  %6556 = vmatprep.subr.msk.bf16.mxu0 %vm1192_vm0, %v8245_v47  ;;  %v2314_v30 = vmul.f32 %v7903_v59, %v9287_v39 }
 0x188   : > { %v3070_v33 = vmul.f32 %v2941_v40, %v7967_v21  ;;  %3919 = vperm.xlu1 %6568, %v5593_v15   ;;  %3914 = vperm.xlu0 %6567, %v5592_v7   ;;  %v3071_v15 = vmul.f32 %v2946_v26, %v8017_v57 }
 0x189   : > { %6079 = vmatmul.mubr.msk.bf16.gmra.mrb[24].mxu1 %vm1143_vm9, %v1872_v38  ;;  %6160 = vmatprep.mubr.msk.bf16.mxu0 %vm1143_vm9, %v3097_v27  ;;  %v1874_v27 = vpack.c.bf16 %v1858_v37, %v1857_v23  ;;  %v2346_v22 = vpack.c.bf16 %v2315_v11, %v2314_v30  ;;  %v9290_v23 = vld [vmem:[#allocation63_spill] sm:$0xff]  ;;  %v9291_v30 = vld [vmem:[#allocation64_spill] sm:$0xff] }
 0x18a   : > { %v3098_v48 = vpack.c.bf16 %v3070_v33, %v3069_v34  ;;  %6082 = vmatprep.mubr.msk.bf16.mxu1 %vm1143_vm9, %v1873_v2  ;;  %v5599_v2 = vld [vmem:[%s8993_s6 + $0x770] sm:$0xff]  ;;  %v5598_v34 = vld [vmem:[%s8993_s6 + $0x768] sm:$0xff]  ;;  %v2319_v11 = vmul.f32 %v7951_v6, %v9290_v23 }
 0x18b   : > { %v2956_v45 = vpop.permute.xlu1 %2955  ;;  %v2951_v16 = vpop.permute.xlu0 %2950 }
 0x18c   : > { %v3072_v7 = vmul.f32 %v2951_v16, %v8013_v49  ;;  %3929 = vperm.xlu1 %6568, %v5595_v58   ;;  %3924 = vperm.xlu0 %6567, %v5594_v55   ;;  %v3073_v26 = vmul.f32 %v2956_v45, %v8025_v52  ;;  %v9288_v58 = vld [vmem:[#allocation60_spill] sm:$0xff] }
 0x18d   : > { %6161 = vmatmul.mubr.msk.bf16.gmra.mrb[4].mxu0 %vm1143_vm9, %v3098_v48  ;;  %v2317_v55 = vmul.f32 %v7933_v31, %v9288_v58  ;;  %v9289_v48 = vld [vmem:[#allocation61_spill] sm:$0xff]  ;;  %v5601_v31 = vld [vmem:[%s8993_s6 + $0x780] sm:$0xff] }
 0x18e   : > { %v3099_v20 = vpack.c.bf16 %v3072_v7, %v3071_v15  ;;  %v2316_v37 = vmul.f32 %v7935_v8, %v9289_v48  ;;  %v2318_v15 = vmul.f32 %v7953_v46, %v9291_v30  ;;  %v5600_v8 = vld [vmem:[%s8993_s6 + $0x778] sm:$0xff] }
 0x18f   : > { %v2966_v38 = vpop.permute.xlu1 %2965  ;;  %v2961_v59 = vpop.permute.xlu0 %2960 }
 0x190   : > { %v3074_v40 = vmul.f32 %v2961_v59, %v8021_v62  ;;  %3939 = vperm.xlu1 %6568, %v5597_v5   ;;  %3934 = vperm.xlu0 %6567, %v5596_v42   ;;  %v3075_v7 = vmul.f32 %v2966_v38, %v8067_v53  ;;  %v2347_v42 = vpack.c.bf16 %v2317_v55, %v2316_v37  ;;  %v9294_v55 = vld [vmem:[#allocation66_spill] sm:$0xff] }
 0x191   : > { %6083 = vmatmul.mubr.msk.bf16.gmra.mrb[28].mxu1 %vm1143_vm9, %v1874_v27  ;;  %6164 = vmatprep.mubr.msk.bf16.mxu0 %vm1143_vm9, %v3099_v20  ;;  %v2348_v27 = vpack.c.bf16 %v2319_v11, %v2318_v15  ;;  %v2320_v37 = vmul.f32 %v7987_v4, %v9294_v55  ;;  %v9295_v11 = vld [vmem:[#allocation68_spill] sm:$0xff]  ;;  %v5604_v4 = vld [vmem:[%s8993_s6 + $0x798] sm:$0xff] }
 0x192   : > { %v3100_v33 = vpack.c.bf16 %v3074_v40, %v3073_v26  ;;  %6088 = vmatprep.mubr.msk.bf16.mxu1 %vm1143_vm9, %v2346_v22  ;;  %v5603_v22 = vld [vmem:[%s8993_s6 + $0x790] sm:$0xff]  ;;  %v5602_v26 = vld [vmem:[%s8993_s6 + $0x788] sm:$0xff] }
 0x193   : > { %v2976_v45 = vpop.permute.xlu1 %2975  ;;  %v2971_v16 = vpop.permute.xlu0 %2970 }
 0x194   : > { %v3076_v5 = vmul.f32 %v2971_v16, %v8063_v0  ;;  %3949 = vperm.xlu1 %6568, %v5599_v2   ;;  %3944 = vperm.xlu0 %6567, %v5598_v34   ;;  %v3077_v38 = vmul.f32 %v2976_v45, %v8075_v50  ;;  %v9292_v2 = vld [vmem:[#allocation37_spill] sm:$0xff]  ;;  %v2323_v45 = vmul.f32 %v8007_v28, %v9295_v11 }
 0x195   : > { %6165 = vmatmul.mubr.msk.bf16.gmra.mrb[8].mxu0 %vm1143_vm9, %v3100_v33  ;;  %v9293_v34 = vld [vmem:[#allocation65_spill] sm:$0xff] }
 0x196   : > { %v3101_v6 = vpack.c.bf16 %v3076_v5, %v3075_v7  ;;  %v2321_v33 = vmul.f32 %v7985_v35, %v9293_v34  ;;  %v9296_v7 = vld [vmem:[#allocation69_spill] sm:$0xff]  ;;  %v5605_v35 = vld [vmem:[%s8993_s6 + $0x7a0] sm:$0xff] }
 0x197   : > { %v2986_v20 = vpop.permute.xlu1 %2985  ;;  %v2981_v46 = vpop.permute.xlu0 %2980  ;;  %v2322_v5 = vmul.f32 %v8009_v17, %v9296_v7 }
 0x198   : > { %v3078_v59 = vmul.f32 %v2981_v46, %v8071_v25  ;;  %3959 = vperm.xlu1 %6568, %v5601_v31   ;;  %3954 = vperm.xlu0 %6567, %v5600_v8   ;;  %v3079_v31 = vmul.f32 %v2986_v20, %v8117_v12 }
 0x199   : > { %6089 = vmatmul.mubr.msk.bf16.vlgmr.msra.gmra.mrb[0].mxu1 %vm1143_vm9, %v2347_v42  ;;  %6168 = vmatprep.mubr.msk.bf16.mxu0 %vm1143_vm9, %v3101_v6  ;;  %v2349_v6 = vpack.c.bf16 %v2321_v33, %v2320_v37  ;;  %v2350_v46 = vpack.c.bf16 %v2323_v45, %v2322_v5  ;;  %v9299_v33 = vld [vmem:[#allocation80_spill] sm:$0xff]  ;;  %v9300_v45 = vld [vmem:[#allocation3_spill] sm:$0xff] }
 0x19a   : > { %v3102_v40 = vpack.c.bf16 %v3078_v59, %v3077_v38  ;;  %6092 = vmatprep.mubr.msk.bf16.mxu1 %vm1143_vm9, %v2348_v27  ;;  %6291 = vmatpush3.bf16.msra.mxu1 %v9292_v2  ;;  %v5607_v38 = vld [vmem:[%s8993_s6 + $0x7b0] sm:$0xff]  ;;  %v5606_v59 = vld [vmem:[%s8993_s6 + $0x7a8] sm:$0xff]  ;;  %v9298_v2 = vld [vmem:[#allocation71_spill] sm:$0xff] }
 0x19b   : > { %v2996_v16 = vpop.permute.xlu1 %2995  ;;  %v2991_v15 = vpop.permute.xlu0 %2990  ;;  %v2324_v37 = vmul.f32 %v9299_v33, %v9298_v2 }
 0x19c   : > { %v3080_v8 = vmul.f32 %v2991_v15, %v8113_v41  ;;  %3969 = vperm.xlu1 %6568, %v5603_v22   ;;  %3964 = vperm.xlu0 %6567, %v5602_v26   ;;  %v3081_v20 = vmul.f32 %v2996_v16, %v8125_v63  ;;  %v9297_v26 = vld [vmem:[#allocation70_spill] sm:$0xff]  ;;  %v9301_v16 = vld [vmem:[#allocation81_spill] sm:$0xff] }
 0x19d   : > { %6169 = vmatmul.mubr.msk.bf16.gmra.mrb[12].mxu0 %vm1143_vm9, %v3102_v40  ;;  %v2325_v40 = vmul.f32 %v8039_v9, %v9297_v26  ;;  %v2327_v15 = vmul.f32 %v9301_v16, %v9300_v45  ;;  %v5609_v9 = vld [vmem:[%s8993_s6 + $0x7c0] sm:$0xff] }
 0x19e   : > { %v3103_v28 = vpack.c.bf16 %v3080_v8, %v3079_v31  ;;  %v9302_v8 = vld [vmem:[#allocation4_spill] sm:$0xff] }
 0x19f   : > { %v3006_v42 = vpop.permute.xlu1 %3005  ;;  %v3001_v17 = vpop.permute.xlu0 %3000 }
 0x1a0   : > { %v3082_v27 = vmul.f32 %v3001_v17, %v8121_v36  ;;  %3979 = vperm.xlu1 %6568, %v5605_v35   ;;  %3974 = vperm.xlu0 %6567, %v5604_v4   ;;  %v9303_v35 = vld [vmem:[#allocation82_spill] sm:$0xff] }
 0x1a1   : > { %6093 = vmatmul.mubr.msk.bf16.gmra.mrb[4].mxu1 %vm1143_vm9, %v2349_v6  ;;  %6172 = vmatprep.mubr.msk.bf16.mxu0 %vm1143_vm9, %v3103_v28  ;;  %v2326_v4 = vmul.f32 %v9303_v35, %v9302_v8  ;;  %v3083_v28 = vmul.f32 %v3006_v42, %v8165_v43  ;;  %v5608_v17 = vld [vmem:[%s8993_s6 + $0x7b8] sm:$0xff]  ;;  %v9307_v35 = vld [vmem:[#allocation72_spill] sm:$0xff] }
 0x1a2   : > { %v3104_v22 = vpack.c.bf16 %v3082_v27, %v3081_v20  ;;  %6096 = vmatprep.mubr.msk.bf16.mxu1 %vm1143_vm9, %v2350_v46  ;;  %v2351_v20 = vpack.c.bf16 %v2325_v40, %v2324_v37  ;;  %v9305_v37 = vld [vmem:[#allocation5_spill] sm:$0xff] }
 0x1a3   : > { %v3016_v5 = vpop.permute.xlu1 %3015  ;;  %v3011_v31 = vpop.permute.xlu0 %3010  ;;  %v2352_v16 = vpack.c.bf16 %v2327_v15, %v2326_v4  ;;  %v9306_v15 = vld [vmem:[#allocation83_spill] sm:$0xff]  ;;  %v9308_v4 = vld [vmem:[#allocation84_spill] sm:$0xff] }
 0x1a4   : > { %v3084_v6 = vmul.f32 %v3011_v31, %v8159_v10  ;;  %3989 = vperm.xlu1 %6568, %v5607_v38   ;;  %3984 = vperm.xlu0 %6567, %v5606_v59   ;;  %v3085_v42 = vmul.f32 %v3016_v5, %v8173_v19  ;;  %v9304_v31 = vld [vmem:[#allocation88_spill] sm:$0xff]  ;;  %v5611_v59 = vld [vmem:[%s8993_s6 + $0x7d0] sm:$0xff]  ;;  %v2329_v5 = vmul.f32 %v9306_v15, %v9305_v37 }
 0x1a5   : > { %6173 = vmatmul.mubr.msk.bf16.gmra.mrb[16].mxu0 %vm1143_vm9, %v3104_v22  ;;  %v5610_v22 = vld [vmem:[%s8993_s6 + $0x7c8] sm:$0xff] }
 0x1a6   : > { %v3105_v46 = vpack.c.bf16 %v3084_v6, %v3083_v28  ;;  %v2328_v28 = vmul.f32 %v9308_v4, %v9307_v35  ;;  %v9309_v6 = vld [vmem:[#allocation7_spill] sm:$0xff] }
 0x1a7   : > { %v3026_v27 = vpop.permute.xlu1 %3025  ;;  %v3021_v33 = vpop.permute.xlu0 %3020 }
 0x1a8   : > { %v3086_v38 = vmul.f32 %v3021_v33, %v9304_v31  ;;  %3999 = vperm.xlu1 %6568, %v5609_v9   ;;  %3994 = vperm.xlu0 %6567, %v5608_v17   ;;  %v9310_v9 = vld [vmem:[#allocation6_spill] sm:$0xff]  ;;  %v9311_v33 = vld [vmem:[#allocation8_spill] sm:$0xff]  ;;  %v3087_v31 = vmul.f32 %v3026_v27, %v8209_v51  ;;  %v2353_v4 = vpack.c.bf16 %v2329_v5, %v2328_v28 }
 0x1a9   : > { %6097 = vmatmul.mubr.msk.bf16.gmra.mrb[8].mxu1 %vm1143_vm9, %v2351_v20  ;;  %6176 = vmatprep.mubr.msk.bf16.mxu0 %vm1143_vm9, %v3105_v46  ;;  %v2331_v17 = vmul.f32 %v9310_v9, %v9309_v6  ;;  %v2330_v19 = vmul.f32 %v9312_v44, %v9311_v33  ;;  %v9314_v5 = vld [vmem:[#allocation86_spill] sm:$0xff] }
 0x1aa   : > { %v3106_v40 = vpack.c.bf16 %v3086_v38, %v3085_v42  ;;  %6100 = vmatprep.mubr.msk.bf16.mxu1 %vm1143_vm9, %v2352_v16  ;;  %v5613_v16 = vld [vmem:[%s8993_s6 + $0x7e0] sm:$0xff]  ;;  %v5612_v38 = vld [vmem:[%s8993_s6 + $0x7d8] sm:$0xff] }
 0x1ab   : > { %v3036_v46 = vpop.permute.xlu1 %3035  ;;  %v3031_v20 = vpop.permute.xlu0 %3030  ;;  %v2354_v43 = vpack.c.bf16 %v2331_v17, %v2330_v19  ;;  %v9313_v19 = vld [vmem:[#allocation9_spill] sm:$0xff] }
 0x1ac   : > { %v3088_v42 = vmul.f32 %v3031_v20, %v8205_v18  ;;  %4009 = vperm.xlu1 %6568, %v5611_v59   ;;  %4004 = vperm.xlu0 %6567, %v5610_v22   ;;  %v3089_v27 = vmul.f32 %v3036_v46, %v8219_v3  ;;  %v5615_v22 = vld [vmem:[%s8993_s6 + $0x7f0] sm:$0xff]  ;;  %v2333_v28 = vmul.f32 %v9314_v5, %v9313_v19  ;;  %v9316_v46 = vld [vmem:[#allocation87_spill] sm:$0xff] }
 0x1ad   : > { %6177 = vmatmul.mubr.msk.bf16.gmra.mrb[20].mxu0 %vm1143_vm9, %v3106_v40  ;;  %v9315_v17 = vld [vmem:[#allocation73_spill] sm:$0xff] }
 0x1ae   : > { %v3107_v15 = vpack.c.bf16 %v3088_v42, %v3087_v31  ;;  %v5614_v31 = vld [vmem:[%s8993_s6 + $0x7e8] sm:$0xff]  ;;  %v2332_v20 = vmul.f32 %v9316_v46, %v9315_v17  ;;  %v9317_v46 = vld [vmem:[#allocation21_spill] sm:$0xff] }
 0x1af   : > { %v3046_v9 = vpop.permute.xlu1 %3045  ;;  %v3041_v44 = vpop.permute.xlu0 %3040 }
 0x1b0   : > { %v3090_v59 = vmul.f32 %v3041_v44, %v8213_v14  ;;  %4019 = vperm.xlu1 %6568, %v5613_v16   ;;  %4014 = vperm.xlu0 %6567, %v5612_v38   ;;  %v3091_v38 = vmul.f32 %v3046_v9, %v8258_v24  ;;  %v9318_v24 = vld [vmem:[#allocation20_spill] sm:$0xff]  ;;  %v9359_v14 = vld [vmem:[#allocation27_spill] sm:$0xff] }
 0x1b1   : > { %6101 = vmatmul.mubr.msk.bf16.gmra.mrb[12].mxu1 %vm1143_vm9, %v2353_v4  ;;  %6180 = vmatprep.mubr.msk.bf16.mxu0 %vm1143_vm9, %v3107_v15  ;;  %v5616_v4 = vld [vmem:[%s8993_s6 + $0x7f8] sm:$0xff] }
 0x1b2   : > { %v3108_v40 = vpack.c.bf16 %v3090_v59, %v3089_v27  ;;  %6104 = vmatprep.mubr.msk.bf16.mxu1 %vm1143_vm9, %v2354_v43  ;;  %v5634_v43 = vld [vmem:[%s8993_s6 + $0x800] sm:$0xff]  ;;  %v2355_v27 = vpack.c.bf16 %v2333_v28, %v2332_v20 }
 0x1b3   : > { %v3056_v42 = vpop.permute.xlu1 %3055  ;;  %v3051_v16 = vpop.permute.xlu0 %3050 }
 0x1b4   : > { %v3092_v15 = vmul.f32 %v3051_v16, %v9285_v61  ;;  %4029 = vperm.xlu1 %6568, %v5615_v22   ;;  %4024 = vperm.xlu0 %6567, %v5614_v31   ;;  %v3093_v9 = vmul.f32 %v3056_v42, %v9317_v46  ;;  %v5636_v22 = vld [vmem:[%s8993_s6 + $0x810] sm:$0xff]  ;;  %v5635_v31 = vld [vmem:[%s8993_s6 + $0x808] sm:$0xff] }
 0x1b5   : > { %6181 = vmatmul.mubr.msk.bf16.gmra.mrb[24].mxu0 %vm1143_vm9, %v3108_v40 }
 0x1b6   : > { %v3109_v44 = vpack.c.bf16 %v3092_v15, %v3091_v38  ;;  %v5442_v15 = vld [vmem:[%s8993_s6 + $0x3a8] sm:$0xff] }
 0x1b7   : > { %v3393_v59 = vpop.permute.xlu1 %3392  ;;  %v3061_v5 = vpop.permute.xlu0 %3060 }
 0x1b8   : > { %v3094_v16 = vmul.f32 %v3061_v5, %v9318_v24  ;;  %4366 = vperm.xlu1 %6568, %v5634_v43   ;;  %4034 = vperm.xlu0 %6567, %v5616_v4   ;;  %v3550_v42 = vmul.f32 %v3393_v59, %v9289_v48  ;;  %v5637_v43 = vld [vmem:[%s8993_s6 + $0x818] sm:$0xff]  ;;  %v5638_v59 = vld [vmem:[%s8993_s6 + $0x820] sm:$0xff] }
 0x1b9   : > { %6105 = vmatmul.mubr.msk.bf16.gmra.mrb[16].mxu1 %vm1143_vm9, %v2355_v27  ;;  %6184 = vmatprep.mubr.msk.bf16.mxu0 %vm1143_vm9, %v3109_v44  ;;  %v9356_v24 = vld [vmem:[#allocation55_spill] sm:$0xff] }
 0x1ba   : > { %v3110_v40 = vpack.c.bf16 %v3094_v16, %v3093_v9 }
 0x1bb   : > { %v3403_v28 = vpop.permute.xlu1 %3402  ;;  %v3398_v20 = vpop.permute.xlu0 %3397 }
 0x1bc   : > { %v3551_v38 = vmul.f32 %v3398_v20, %v9288_v58  ;;  %4376 = vperm.xlu1 %6568, %v5636_v22   ;;  %4371 = vperm.xlu0 %6567, %v5635_v31   ;;  %v3552_v5 = vmul.f32 %v3403_v28, %v9291_v30  ;;  %v5639_v58 = vld [vmem:[%s8993_s6 + $0x828] sm:$0xff]  ;;  %v4136_v30 = vsel %vm1192_vm0, %v8245_v47, 0  ;;  %v5444_v28 = vld [vmem:[%s8993_s6 + $0x3b8] sm:$0xff]  ;;  %v5443_v47 = vld [vmem:[%s8993_s6 + $0x3b0] sm:$0xff] }
 0x1bd   : > { %6185 = vmatmul.mubr.msk.bf16.gmra.mrb[28].mxu0 %vm1143_vm9, %v3110_v40  ;;  %v8462_v40 = vld [vmem:[%s8991_s4 + $0x20] sm:$0xf] }
 0x1be   : > { %v3582_v4 = vpack.c.bf16 %v3551_v38, %v3550_v42 }
 0x1bf   : > { %v3413_v44 = vpop.permute.xlu1 %3412  ;;  %v3408_v27 = vpop.permute.xlu0 %3407 }
 0x1c0   : > { %v3553_v48 = vmul.f32 %v3408_v27, %v9290_v23  ;;  %2261 = vperm.xlu1 %6568, %v5442_v15   ;;  %4381 = vperm.xlu0 %6567, %v5637_v43   ;;  %v3554_v23 = vmul.f32 %v3413_v44, %v9294_v55  ;;  %v5641_v15 = vld [vmem:[%s8993_s6 + $0x838] sm:$0xff]  ;;  %v5640_v43 = vld [vmem:[%s8993_s6 + $0x830] sm:$0xff] }
 0x1c1   : > { %6190 = vmatprep.mubr.msk.bf16.mxu0 %vm1143_vm9, %v3582_v4 }
 0x1c2   : > { %v3583_v9 = vpack.c.bf16 %v3553_v48, %v3552_v5  ;;  %v5445_v48 = vld [vmem:[%s8993_s6 + $0x3c0] sm:$0xff] }
 0x1c3   : > { %v3423_v16 = vpop.permute.xlu1 %3422  ;;  %v3418_v22 = vpop.permute.xlu0 %3417 }
 0x1c4   : > { %v3555_v31 = vmul.f32 %v3418_v22, %v9293_v34  ;;  %4391 = vperm.xlu1 %6568, %v5639_v58   ;;  %4386 = vperm.xlu0 %6567, %v5638_v59   ;;  %v3556_v42 = vmul.f32 %v3423_v16, %v9296_v7  ;;  %v5642_v22 = vld [vmem:[%s8993_s6 + $0x840] sm:$0xff] }
 0x1c5   : > { %6191 = vmatmul.mubr.msk.bf16.vlgmr.msra.gmra.mrb[0].mxu0 %vm1143_vm9, %v3583_v9 }
 0x1c6   : > { %v3584_v55 = vpack.c.bf16 %v3555_v31, %v3554_v23  ;;  %6223 = vmatpush3.bf16.msra.mxu0 %v4136_v30 }
 0x1c7   : > { %v3433_v34 = vpop.permute.xlu1 %3432  ;;  %v3428_v20 = vpop.permute.xlu0 %3427  ;;  %6557 = vmatprep.subr.msk.bf16.mxu0 %vm1192_vm0, %v8462_v40 }
 0x1c8   : > { %v3557_v38 = vmul.f32 %v3428_v20, %v9295_v11  ;;  %2271 = vperm.xlu1 %6568, %v5444_v28   ;;  %2266 = vperm.xlu0 %6567, %v5443_v47   ;;  %v3558_v5 = vmul.f32 %v3433_v34, %v9298_v2  ;;  %v5446_v11 = vld [vmem:[%s8993_s6 + $0x3c8] sm:$0xff]  ;;  %v5447_v47 = vld [vmem:[%s8993_s6 + $0x3d0] sm:$0xff] }
 0x1c9   : > { %6194 = vmatprep.mubr.msk.bf16.mxu0 %vm1143_vm9, %v3584_v55 }
 0x1ca   : > { %v3585_v4 = vpack.c.bf16 %v3557_v38, %v3556_v42  ;;  %v5644_v38 = vld [vmem:[%s8993_s6 + $0x850] sm:$0xff] }
 0x1cb   : > { %v3443_v44 = vpop.permute.xlu1 %3442  ;;  %v3438_v27 = vpop.permute.xlu0 %3437 }
 0x1cc   : > { %v3559_v7 = vmul.f32 %v3438_v27, %v9297_v26  ;;  %4401 = vperm.xlu1 %6568, %v5641_v15   ;;  %4396 = vperm.xlu0 %6567, %v5640_v43   ;;  %v3560_v16 = vmul.f32 %v3443_v44, %v9302_v8  ;;  %v5643_v26 = vld [vmem:[%s8993_s6 + $0x848] sm:$0xff]  ;;  %v5449_v27 = vld [vmem:[%s8993_s6 + $0x3e0] sm:$0xff] }
 0x1cd   : > { %6195 = vmatmul.mubr.msk.bf16.gmra.mrb[4].mxu0 %vm1143_vm9, %v3585_v4 }
 0x1ce   : > { %v3586_v58 = vpack.c.bf16 %v3559_v7, %v3558_v5 }
 0x1cf   : > { %v3453_v59 = vpop.permute.xlu1 %3452  ;;  %v3448_v9 = vpop.permute.xlu0 %3447 }
 0x1d0   : > { %v3561_v2 = vmul.f32 %v3448_v9, %v9300_v45  ;;  %2281 = vperm.xlu1 %6568, %v5446_v11   ;;  %2276 = vperm.xlu0 %6567, %v5445_v48   ;;  %v3562_v28 = vmul.f32 %v3453_v59, %v9307_v35  ;;  %v5448_v45 = vld [vmem:[%s8993_s6 + $0x3d8] sm:$0xff]  ;;  %v9319_v48 = vld [vmem:[#allocation13_spill] sm:$0xff]  ;;  %v5646_v9 = vld [vmem:[%s8993_s6 + $0x860] sm:$0xff] }
 0x1d1   : > { %6198 = vmatprep.mubr.msk.bf16.mxu0 %vm1143_vm9, %v3586_v58 }
 0x1d2   : > { %v3587_v30 = vpack.c.bf16 %v3561_v2, %v3560_v16 }
 0x1d3   : > { %v3463_v23 = vpop.permute.xlu1 %3462  ;;  %v3458_v31 = vpop.permute.xlu0 %3457 }
 0x1d4   : > { %v3563_v8 = vmul.f32 %v3458_v31, %v9305_v37  ;;  %4411 = vperm.xlu1 %6568, %v5643_v26   ;;  %4406 = vperm.xlu0 %6567, %v5642_v22   ;;  %v3564_v42 = vmul.f32 %v3463_v23, %v9311_v33  ;;  %v5645_v37 = vld [vmem:[%s8993_s6 + $0x858] sm:$0xff]  ;;  %v9321_v22 = vld [vmem:[#allocation75_spill] sm:$0xff] }
 0x1d5   : > { %6199 = vmatmul.mubr.msk.bf16.gmra.mrb[8].mxu0 %vm1143_vm9, %v3587_v30  ;;  %v9322_v23 = vld [vmem:[#allocation74_spill] sm:$0xff] }
 0x1d6   : > { %v3588_v55 = vpack.c.bf16 %v3563_v8, %v3562_v28  ;;  %v5452_v28 = vld [vmem:[%s8993_s6 + $0x3f8] sm:$0xff]  ;;  %v5451_v8 = vld [vmem:[%s8993_s6 + $0x3f0] sm:$0xff] }
 0x1d7   : > { %v3473_v34 = vpop.permute.xlu1 %3472  ;;  %v3468_v20 = vpop.permute.xlu0 %3467 }
 0x1d8   : > { %v3565_v35 = vmul.f32 %v3468_v20, %v9309_v6  ;;  %2291 = vperm.xlu1 %6568, %v5448_v45   ;;  %2286 = vperm.xlu0 %6567, %v5447_v47   ;;  %v3566_v44 = vmul.f32 %v3473_v34, %v9315_v17  ;;  %v5450_v6 = vld [vmem:[%s8993_s6 + $0x3e8] sm:$0xff]  ;;  %v9323_v34 = vld [vmem:[#allocation77_spill] sm:$0xff] }
 0x1d9   : > { %6202 = vmatprep.mubr.msk.bf16.mxu0 %vm1143_vm9, %v3588_v55  ;;  %v9320_v17 = vld [vmem:[#allocation12_spill] sm:$0xff] }
 0x1da   : > { %v3589_v15 = vpack.c.bf16 %v3565_v35, %v3564_v42  ;;  %v9324_v42 = vld [vmem:[#allocation76_spill] sm:$0xff] }
 0x1db   : > { %v3483_v43 = vpop.permute.xlu1 %3482  ;;  %v3478_v4 = vpop.permute.xlu0 %3477 }
 0x1dc   : > { %v3567_v33 = vmul.f32 %v3478_v4, %v9313_v19  ;;  %4421 = vperm.xlu1 %6568, %v5645_v37   ;;  %4416 = vperm.xlu0 %6567, %v5644_v38   ;;  %v3568_v58 = vmul.f32 %v3483_v43, %v9319_v48  ;;  %v5647_v19 = vld [vmem:[%s8993_s6 + $0x868] sm:$0xff]  ;;  %v5649_v37 = vld [vmem:[%s8993_s6 + $0x878] sm:$0xff]  ;;  %v5648_v38 = vld [vmem:[%s8993_s6 + $0x870] sm:$0xff] }
 0x1dd   : > { %6203 = vmatmul.mubr.msk.bf16.gmra.mrb[12].mxu0 %vm1143_vm9, %v3589_v15 }
 0x1de   : > { %v3590_v5 = vpack.c.bf16 %v3567_v33, %v3566_v44  ;;  %v9325_v44 = vld [vmem:[#allocation79_spill] sm:$0xff] }
 0x1df   : > { %v3493_v7 = vpop.permute.xlu1 %3492  ;;  %v3488_v11 = vpop.permute.xlu0 %3487 }
 0x1e0   : > { %v3569_v59 = vmul.f32 %v3488_v11, %v9320_v17  ;;  %2301 = vperm.xlu1 %6568, %v5450_v6   ;;  %2296 = vperm.xlu0 %6567, %v5449_v27   ;;  %v3570_v30 = vmul.f32 %v3493_v7, %v9321_v22  ;;  %v9326_v6 = vld [vmem:[#allocation78_spill] sm:$0xff]  ;;  %v5650_v7 = vld [vmem:[%s8993_s6 + $0x880] sm:$0xff] }
 0x1e1   : > { %6206 = vmatprep.mubr.msk.bf16.mxu0 %vm1143_vm9, %v3590_v5  ;;  %v5651_v5 = vld [vmem:[%s8993_s6 + $0x888] sm:$0xff] }
 0x1e2   : > { %v3591_v16 = vpack.c.bf16 %v3569_v59, %v3568_v58 }
 0x1e3   : > { %v3503_v2 = vpop.permute.xlu1 %3502  ;;  %v3498_v26 = vpop.permute.xlu0 %3497 }
 0x1e4   : > { %v3571_v31 = vmul.f32 %v3498_v26, %v9322_v23  ;;  %4431 = vperm.xlu1 %6568, %v5647_v19   ;;  %4426 = vperm.xlu0 %6567, %v5646_v9   ;;  %v3572_v20 = vmul.f32 %v3503_v2, %v9323_v34  ;;  %v9327_v19 = vld [vmem:[#allocation19_spill] sm:$0xff]  ;;  %v5653_v26 = vld [vmem:[%s8993_s6 + $0x898] sm:$0xff] }
 0x1e5   : > { %6207 = vmatmul.mubr.msk.bf16.gmra.mrb[16].mxu0 %vm1143_vm9, %v3591_v16  ;;  %v9328_v16 = vld [vmem:[#allocation18_spill] sm:$0xff] }
 0x1e6   : > { %v3592_v45 = vpack.c.bf16 %v3571_v31, %v3570_v30  ;;  %v5652_v30 = vld [vmem:[%s8993_s6 + $0x890] sm:$0xff] }
 0x1e7   : > { %v3513_v47 = vpop.permute.xlu1 %3512  ;;  %v3508_v55 = vpop.permute.xlu0 %3507 }
 0x1e8   : > { %v3573_v35 = vmul.f32 %v3508_v55, %v9324_v42  ;;  %2311 = vperm.xlu1 %6568, %v5452_v28   ;;  %2306 = vperm.xlu0 %6567, %v5451_v8   ;;  %v3574_v33 = vmul.f32 %v3513_v47, %v9325_v44  ;;  %v9330_v55 = vld [vmem:[#allocation56_spill] sm:$0xff] }
 0x1e9   : > { %6210 = vmatprep.mubr.msk.bf16.mxu0 %vm1143_vm9, %v3592_v45  ;;  %v9329_v45 = vld [vmem:[#allocation57_spill] sm:$0xff] }
 0x1ea   : > { %v3593_v15 = vpack.c.bf16 %v3573_v35, %v3572_v20  ;;  %v5655_v35 = vld [vmem:[%s8993_s6 + $0x8a8] sm:$0xff] }
 0x1eb   : > { %v3523_v43 = vpop.permute.xlu1 %3522  ;;  %v3518_v4 = vpop.permute.xlu0 %3517 }
 0x1ec   : > { %v3575_v27 = vmul.f32 %v3518_v4, %v9326_v6  ;;  %4441 = vperm.xlu1 %6568, %v5649_v37   ;;  %4436 = vperm.xlu0 %6567, %v5648_v38   ;;  %v3576_v9 = vmul.f32 %v3523_v43, %v9327_v19  ;;  %v5654_v37 = vld [vmem:[%s8993_s6 + $0x8a0] sm:$0xff] }
 0x1ed   : > { %6211 = vmatmul.mubr.msk.bf16.gmra.mrb[20].mxu0 %vm1143_vm9, %v3593_v15 }
 0x1ee   : > { %v3594_v11 = vpack.c.bf16 %v3575_v27, %v3574_v33  ;;  %v5657_v27 = vld [vmem:[%s8993_s6 + $0x8b8] sm:$0xff] }
 0x1ef   : > { %v3533_v58 = vpop.permute.xlu1 %3532  ;;  %v3528_v59 = vpop.permute.xlu0 %3527 }
 0x1f0   : > { %v3577_v2 = vmul.f32 %v3528_v59, %v9328_v16  ;;  %4451 = vperm.xlu1 %6568, %v5651_v5   ;;  %4446 = vperm.xlu0 %6567, %v5650_v7   ;;  %v3578_v47 = vmul.f32 %v3533_v58, %v9329_v45  ;;  %v5656_v5 = vld [vmem:[%s8993_s6 + $0x8b0] sm:$0xff] }
 0x1f1   : > { %6214 = vmatprep.mubr.msk.bf16.mxu0 %vm1143_vm9, %v3594_v11  ;;  %v9331_v59 = vld [vmem:[#allocation29_spill] sm:$0xff] }
 0x1f2   : > { %v3595_v31 = vpack.c.bf16 %v3577_v2, %v3576_v9 }
 0x1f3   : > { %v3543_v28 = vpop.permute.xlu1 %3542  ;;  %v3538_v8 = vpop.permute.xlu0 %3537 }
 0x1f4   : > { %v3579_v20 = vmul.f32 %v3538_v8, %v9330_v55  ;;  %4461 = vperm.xlu1 %6568, %v5653_v26   ;;  %4456 = vperm.xlu0 %6567, %v5652_v30   ;;  %v3580_v4 = vmul.f32 %v3543_v28, %v9287_v39  ;;  %v9332_v39 = vld [vmem:[#allocation30_spill] sm:$0xff]  ;;  %v5658_v26 = vld [vmem:[%s8993_s6 + $0x8c0] sm:$0xff] }
 0x1f5   : > { %6215 = vmatmul.mubr.msk.bf16.gmra.mrb[24].mxu0 %vm1143_vm9, %v3595_v31  ;;  %v9333_v8 = vld [vmem:[#allocation31_spill] sm:$0xff] }
 0x1f6   : > { %v3596_v38 = vpack.c.bf16 %v3579_v20, %v3578_v47  ;;  %v9334_v20 = vld [vmem:[#allocation32_spill] sm:$0xff] }
 0x1f7   : > { %v3880_v15 = vpop.permute.xlu1 %3879  ;;  %v3548_v43 = vpop.permute.xlu0 %3547 }
 0x1f8   : > { %v3581_v33 = vmul.f32 %v3548_v43, %v9286_v56  ;;  %4471 = vperm.xlu1 %6568, %v5655_v35   ;;  %4466 = vperm.xlu0 %6567, %v5654_v37   ;;  %v4037_v9 = vmul.f32 %v3880_v15, %v9331_v59  ;;  %v5659_v56 = vld [vmem:[%s8993_s6 + $0x8c8] sm:$0xff]  ;;  %v5661_v37 = vld [vmem:[%s8993_s6 + $0x8d8] sm:$0xff]  ;;  %v5662_v59 = vld [vmem:[%s8993_s6 + $0x8e0] sm:$0xff] }
 0x1f9   : > { %6218 = vmatprep.mubr.msk.bf16.mxu0 %vm1143_vm9, %v3596_v38  ;;  %v5660_v38 = vld [vmem:[%s8993_s6 + $0x8d0] sm:$0xff] }
 0x1fa   : > { %v3597_v7 = vpack.c.bf16 %v3581_v33, %v3580_v4  ;;  %v4623_v33 = vsel %vm1192_vm0, %v8462_v40, 0  ;;  %vm4985_vm0 = vcmask 60416  }
 0x1fb   : > { %v3890_v11 = vpop.permute.xlu1 %3889  ;;  %v3885_v58 = vpop.permute.xlu0 %3884 }
 0x1fc   : > { %v4038_v2 = vmul.f32 %v3885_v58, %v9332_v39  ;;  %4481 = vperm.xlu1 %6568, %v5657_v27   ;;  %4476 = vperm.xlu0 %6567, %v5656_v5   ;;  %v4039_v47 = vmul.f32 %v3890_v11, %v9333_v8  ;;  %v9335_v27 = vld [vmem:[#allocation33_spill] sm:$0xff]  ;;  %v5663_v58 = vld [vmem:[%s8993_s6 + $0x8e8] sm:$0xff] }
 0x1fd   : > { %6219 = vmatmul.mubr.msk.bf16.gmra.mrb[28].mxu0 %vm1143_vm9, %v3597_v7  ;;  %v9336_v7 = vld [vmem:[#allocation34_spill] sm:$0xff] }
 0x1fe   : > { %v4069_v30 = vpack.c.bf16 %v4038_v2, %v4037_v9  ;;  %v9337_v2 = vld [vmem:[#allocation35_spill] sm:$0xff] }
 0x1ff   : > { %v3900_v31 = vpop.permute.xlu1 %3899  ;;  %v3895_v28 = vpop.permute.xlu0 %3894 }
 0x200   : > { %v4040_v35 = vmul.f32 %v3895_v28, %v9334_v20  ;;  %4491 = vperm.xlu1 %6568, %v5659_v56   ;;  %4486 = vperm.xlu0 %6567, %v5658_v26   ;;  %v4041_v5 = vmul.f32 %v3900_v31, %v9335_v27  ;;  %v9338_v26 = vld [vmem:[#allocation36_spill] sm:$0xff]  ;;  %v5665_v31 = vld [vmem:[%s8993_s6 + $0x8f8] sm:$0xff]  ;;  %v5664_v28 = vld [vmem:[%s8993_s6 + $0x8f0] sm:$0xff] }
 0x201   : > { %6224 = vmatprep.mubr.msk.bf16.mxu0 %vm1143_vm9, %v4069_v30  ;;  %v9341_v27 = vld [vmem:[#allocation40_spill] sm:$0xff] }
 0x202   : > { %v4070_v15 = vpack.c.bf16 %v4040_v35, %v4039_v47  ;;  %v9339_v35 = vld [vmem:[#allocation38_spill] sm:$0xff] }
 0x203   : > { %v3910_v43 = vpop.permute.xlu1 %3909  ;;  %v3905_v4 = vpop.permute.xlu0 %3904 }
 0x204   : > { %v4042_v11 = vmul.f32 %v3905_v4, %v9336_v7  ;;  %4501 = vperm.xlu1 %6568, %v5661_v37   ;;  %4496 = vperm.xlu0 %6567, %v5660_v38   ;;  %v4043_v56 = vmul.f32 %v3910_v43, %v9337_v2  ;;  %v9340_v38 = vld [vmem:[#allocation39_spill] sm:$0xff]  ;;  %v9342_v7 = vld [vmem:[#allocation41_spill] sm:$0xff] }
 0x205   : > { %6225 = vmatmul.mubr.msk.bf16.vlgmr.msra.gmra.mrb[0].mxu0 %vm1143_vm9, %v4070_v15  ;;  %v9344_v2 = vld [vmem:[#allocation43_spill] sm:$0xff] }
 0x206   : > { %v4071_v9 = vpack.c.bf16 %v4042_v11, %v4041_v5  ;;  %6257 = vmatpush3.bf16.msra.mxu0 %v4623_v33 }
 0x207   : > { %v3920_v39 = vpop.permute.xlu1 %3919  ;;  %v3915_v40 = vpop.permute.xlu0 %3914 }
 0x208   : > { %v4044_v30 = vmul.f32 %v3915_v40, %v9338_v26  ;;  %4511 = vperm.xlu1 %6568, %v5663_v58   ;;  %4506 = vperm.xlu0 %6567, %v5662_v59   ;;  %v4045_v37 = vmul.f32 %v3920_v39, %v9339_v35  ;;  %v9343_v40 = vld [vmem:[#allocation42_spill] sm:$0xff] }
 0x209   : > { %6228 = vmatprep.mubr.msk.bf16.mxu0 %vm1143_vm9, %v4071_v9 }
 0x20a   : > { %v4072_v8 = vpack.c.bf16 %v4044_v30, %v4043_v56 }
 0x20b   : > { %v3930_v47 = vpop.permute.xlu1 %3929  ;;  %v3925_v20 = vpop.permute.xlu0 %3924 }
 0x20c   : > { %v4046_v15 = vmul.f32 %v3925_v20, %v9340_v38  ;;  %4521 = vperm.xlu1 %6568, %v5665_v31   ;;  %4516 = vperm.xlu0 %6567, %v5664_v28   ;;  %v4047_v5 = vmul.f32 %v3930_v47, %v9341_v27  ;;  %v9345_v28 = vld [vmem:[#allocation44_spill] sm:$0xff]  ;;  %v9346_v20 = vld [vmem:[#allocation45_spill] sm:$0xff] }
 0x20d   : > { %6229 = vmatmul.mubr.msk.bf16.gmra.mrb[4].mxu0 %vm1143_vm9, %v4072_v8 }
 0x20e   : > { %v4073_v43 = vpack.c.bf16 %v4046_v15, %v4045_v37  ;;  %v9347_v15 = vld [vmem:[#allocation46_spill] sm:$0xff] }
 0x20f   : > { %v3940_v4 = vpop.permute.xlu1 %3939  ;;  %v3935_v33 = vpop.permute.xlu0 %3934 }
 0x210   : > { %v4048_v11 = vmul.f32 %v3935_v33, %v9342_v7  ;;  %6232 = vmatprep.mubr.msk.bf16.mxu0 %vm1143_vm9, %v4073_v43  ;;  %v4049_v39 = vmul.f32 %v3940_v4, %v9343_v40  ;;  %v9348_v33 = vld [vmem:[#allocation47_spill] sm:$0xff] }
 0x212   : > { %v4074_v58 = vpack.c.bf16 %v4048_v11, %v4047_v5  ;;  %v9349_v11 = vld [vmem:[#allocation48_spill] sm:$0xff] }
 0x213   : > { %v3950_v59 = vpop.permute.xlu1 %3949  ;;  %v3945_v9 = vpop.permute.xlu0 %3944 }
 0x214   : > { %v4050_v56 = vmul.f32 %v3945_v9, %v9344_v2  ;;  %v4051_v8 = vmul.f32 %v3950_v59, %v9345_v28  ;;  %v9350_v9 = vld [vmem:[#allocation49_spill] sm:$0xff] }
 0x215   : > { %6233 = vmatmul.mubr.msk.bf16.gmra.mrb[8].mxu0 %vm1143_vm9, %v4074_v58 }
 0x216   : > { %v4075_v26 = vpack.c.bf16 %v4050_v56, %v4049_v39  ;;  %v9351_v56 = vld [vmem:[#allocation50_spill] sm:$0xff] }
 0x217   : > { %v3960_v30 = vpop.permute.xlu1 %3959  ;;  %v3955_v31 = vpop.permute.xlu0 %3954 }
 0x218   : > { %v4052_v47 = vmul.f32 %v3955_v31, %v9346_v20  ;;  %6236 = vmatprep.mubr.msk.bf16.mxu0 %vm1143_vm9, %v4075_v26  ;;  %v4053_v43 = vmul.f32 %v3960_v30, %v9347_v15  ;;  %v9352_v31 = vld [vmem:[#allocation51_spill] sm:$0xff] }
 0x21a   : > { %v4076_v35 = vpack.c.bf16 %v4052_v47, %v4051_v8 }
 0x21b   : > { %v3970_v37 = vpop.permute.xlu1 %3969  ;;  %v3965_v38 = vpop.permute.xlu0 %3964 }
 0x21c   : > { %v4054_v4 = vmul.f32 %v3965_v38, %v9348_v33  ;;  %v4055_v58 = vmul.f32 %v3970_v37, %v9349_v11  ;;  %v9353_v38 = vld [vmem:[#allocation52_spill] sm:$0xff] }
 0x21d   : > { %6237 = vmatmul.mubr.msk.bf16.gmra.mrb[12].mxu0 %vm1143_vm9, %v4076_v35 }
 0x21e   : > { %v4077_v27 = vpack.c.bf16 %v4054_v4, %v4053_v43  ;;  %v9354_v4 = vld [vmem:[#allocation53_spill] sm:$0xff] }
 0x21f   : > { %v3980_v5 = vpop.permute.xlu1 %3979  ;;  %v3975_v7 = vpop.permute.xlu0 %3974 }
 0x220   : > { %v4056_v59 = vmul.f32 %v3975_v7, %v9350_v9  ;;  %6240 = vmatprep.mubr.msk.bf16.mxu0 %vm1143_vm9, %v4077_v27  ;;  %v4057_v26 = vmul.f32 %v3980_v5, %v9351_v56 }
 0x222   : > { %v4078_v40 = vpack.c.bf16 %v4056_v59, %v4055_v58  ;;  %v9355_v59 = vld [vmem:[#allocation54_spill] sm:$0xff] }
 0x223   : > { %v3990_v39 = vpop.permute.xlu1 %3989  ;;  %v3985_v2 = vpop.permute.xlu0 %3984 }
 0x224   : > { %v4058_v30 = vmul.f32 %v3985_v2, %v9352_v31  ;;  %v4059_v43 = vmul.f32 %v3990_v39, %v9353_v38 }
 0x225   : > { %6241 = vmatmul.mubr.msk.bf16.gmra.mrb[16].mxu0 %vm1143_vm9, %v4078_v40 }
 0x226   : > { %v4079_v8 = vpack.c.bf16 %v4058_v30, %v4057_v26  ;;  %v9357_v30 = vld [vmem:[#allocation58_spill] sm:$0xff] }
 0x227   : > { %v4000_v47 = vpop.permute.xlu1 %3999  ;;  %v3995_v35 = vpop.permute.xlu0 %3994 }
 0x228   : > { %v4060_v37 = vmul.f32 %v3995_v35, %v9354_v4  ;;  %6244 = vmatprep.mubr.msk.bf16.mxu0 %vm1143_vm9, %v4079_v8  ;;  %v4061_v46 = vmul.f32 %v4000_v47, %v9355_v59  ;;  %v9361_v59 = vld [vmem:[#allocation28_spill] sm:$0xff] }
 0x22a   : > { %v4080_v7 = vpack.c.bf16 %v4060_v37, %v4059_v43  ;;  %v9358_v37 = vld [vmem:[#allocation22_spill] sm:$0xff] }
 0x22b   : > { %v4010_v27 = vpop.permute.xlu1 %4009  ;;  %v4005_v58 = vpop.permute.xlu0 %4004 }
 0x22c   : > { %v4062_v5 = vmul.f32 %v4005_v58, %v9356_v24  ;;  %v4063_v61 = vmul.f32 %v4010_v27, %v9357_v30 }
 0x22d   : > { %6245 = vmatmul.mubr.msk.bf16.gmra.mrb[20].mxu0 %vm1143_vm9, %v4080_v7 }
 0x22e   : > { %v4081_v2 = vpack.c.bf16 %v4062_v5, %v4061_v46  ;;  %v9360_v5 = vld [vmem:[#allocation26_spill] sm:$0xff] }
 0x22f   : > { %v4020_v40 = vpop.permute.xlu1 %4019  ;;  %v4015_v26 = vpop.permute.xlu0 %4014 }
 0x230   : > { %v4064_v39 = vmul.f32 %v4015_v26, %v7044_v60  ;;  %6248 = vmatprep.mubr.msk.bf16.mxu0 %vm1143_vm9, %v4081_v2  ;;  %v4065_v3 = vmul.f32 %v4020_v40, %v9358_v37 }
 0x232   : > { %v4082_v35 = vpack.c.bf16 %v4064_v39, %v4063_v61 }
 0x233   : > { %v4030_v8 = vpop.permute.xlu1 %4029  ;;  %v4025_v43 = vpop.permute.xlu0 %4024 }
 0x234   : > { %v4066_v47 = vmul.f32 %v4025_v43, %v9359_v14  ;;  %v4067_v24 = vmul.f32 %v4030_v8, %v9360_v5 }
 0x235   : > { %6249 = vmatmul.mubr.msk.bf16.gmra.mrb[24].mxu0 %vm1143_vm9, %v4082_v35 }
 0x236   : > { %v4083_v58 = vpack.c.bf16 %v4066_v47, %v4065_v3  ;;  %v9362_v47 = vld [vmem:[#allocation10_spill] sm:$0xff] }
 0x237   : > { %v4367_v7 = vpop.permute.xlu1 %4366  ;;  %v4035_v46 = vpop.permute.xlu0 %4034  ;;  %v2334_v14 = vmul.f32 %v9362_v47, %v9319_v48 }
 0x238   : > { %v4068_v27 = vmul.f32 %v4035_v46, %v9361_v59  ;;  %6252 = vmatprep.mubr.msk.bf16.mxu0 %vm1143_vm9, %v4083_v58  ;;  %v4524_v39 = vmul.f32 %v4367_v7, %v7919_v32 }
 0x23a   : > { %v4084_v26 = vpack.c.bf16 %v4068_v27, %v4067_v24 }
 0x23b   : > { %v4377_v2 = vpop.permute.xlu1 %4376  ;;  %v4372_v61 = vpop.permute.xlu0 %4371 }
 0x23c   : > { %v4525_v40 = vmul.f32 %v4372_v61, %v7915_v54  ;;  %v4526_v8 = vmul.f32 %v4377_v2, %v7963_v13 }
 0x23d   : > { %6253 = vmatmul.mubr.msk.bf16.gmra.mrb[28].mxu0 %vm1143_vm9, %v4084_v26 }
 0x23e   : > { %v4556_v43 = vpack.c.bf16 %v4525_v40, %v4524_v39 }
 0x23f   : > { %v2262_v35 = vpop.permute.xlu1 %2261  ;;  %v4382_v3 = vpop.permute.xlu0 %4381 }
 0x240   : > { %v2335_v59 = vmul.f32 %v2262_v35, %v9320_v17  ;;  %v4527_v24 = vmul.f32 %v4382_v3, %v7959_v29  ;;  %6258 = vmatprep.mubr.msk.bf16.mxu0 %vm1143_vm9, %v4556_v43 }
 0x242   : > { %v2356_v58 = vpack.c.bf16 %v2335_v59, %v2334_v14  ;;  %v4557_v32 = vpack.c.bf16 %v4527_v24, %v4526_v8 }
 0x243   : > { %v4392_v7 = vpop.permute.xlu1 %4391  ;;  %v4387_v54 = vpop.permute.xlu0 %4386 }
 0x244   : > { %v4529_v46 = vmul.f32 %v4392_v7, %v7967_v21  ;;  %v4528_v5 = vmul.f32 %v4387_v54, %v7971_v1  ;;  %6108 = vmatprep.mubr.msk.bf16.mxu1 %vm1143_vm9, %v2356_v58 }
 0x245   : > { %6259 = vmatmul.mubr.msk.bf16.vlgmr.msra.gmra.mrb[0].mxu0 %vm1143_vm9, %v4557_v32 }
 0x246   : > { %v4558_v48 = vpack.c.bf16 %v4529_v46, %v4528_v5 }
 0x247   : > { %v2272_v13 = vpop.permute.xlu1 %2271  ;;  %v2267_v27 = vpop.permute.xlu0 %2266 }
 0x248   : > { %v2337_v17 = vmul.f32 %v2272_v13, %v9322_v23  ;;  %v2336_v29 = vmul.f32 %v2267_v27, %v9321_v22  ;;  %6262 = vmatprep.mubr.msk.bf16.mxu0 %vm1143_vm9, %v4558_v48 }
 0x24a   : > { %v2357_v14 = vpack.c.bf16 %v2337_v17, %v2336_v29 }
 0x24b   : > { %v4402_v26 = vpop.permute.xlu1 %4401  ;;  %v4397_v2 = vpop.permute.xlu0 %4396 }
 0x24c   : > { %v4531_v21 = vmul.f32 %v4402_v26, %v8013_v49  ;;  %v4530_v1 = vmul.f32 %v4397_v2, %v8017_v57  ;;  %6109 = vmatmul.mubr.msk.bf16.gmra.mrb[20].mxu1 %vm1143_vm9, %v2357_v14 }
 0x24e   : > { %v4559_v61 = vpack.c.bf16 %v4531_v21, %v4530_v1 }
 0x24f   : > { %v2282_v39 = vpop.permute.xlu1 %2281  ;;  %v2277_v40 = vpop.permute.xlu0 %2276 }
 0x250   : > { %v2339_v43 = vmul.f32 %v2282_v39, %v9324_v42  ;;  %v2338_v23 = vmul.f32 %v2277_v40, %v9323_v34  ;;  %6263 = vmatmul.mubr.msk.bf16.gmra.mrb[4].mxu0 %vm1143_vm9, %v4559_v61 }
 0x252   : > { %v2358_v22 = vpack.c.bf16 %v2339_v43, %v2338_v23  ;;  %v2618_v43 = vpack.c.bf16 %v9350_v9, %v9349_v11 }
 0x253   : > { %v4412_v35 = vpop.permute.xlu1 %4411  ;;  %v4407_v3 = vpop.permute.xlu0 %4406 }
 0x254   : > { %v4533_v47 = vmul.f32 %v4412_v35, %v8021_v62  ;;  %v4532_v49 = vmul.f32 %v4407_v3, %v8025_v52  ;;  %6112 = vmatprep.mubr.msk.bf16.mxu1 %vm1143_vm9, %v2358_v22 }
 0x256   : > { %v4560_v57 = vpack.c.bf16 %v4533_v47, %v4532_v49 }
 0x257   : > { %v2292_v8 = vpop.permute.xlu1 %2291  ;;  %v2287_v59 = vpop.permute.xlu0 %2286 }
 0x258   : > { %v2341_v24 = vmul.f32 %v2292_v8, %v9326_v6  ;;  %v2340_v42 = vmul.f32 %v2287_v59, %v9325_v44  ;;  %6266 = vmatprep.mubr.msk.bf16.mxu0 %vm1143_vm9, %v4560_v57  ;;  %v2619_v59 = vpack.c.bf16 %v9352_v31, %v9351_v56 }
 0x25a   : > { %v2359_v34 = vpack.c.bf16 %v2341_v24, %v2340_v42  ;;  %v9365_v24 = vld [vmem:[#allocation89_spill] sm:$0xff] }
 0x25b   : > { %v4422_v58 = vpop.permute.xlu1 %4421  ;;  %v4417_v32 = vpop.permute.xlu0 %4416 }
 0x25c   : > { %v4535_v7 = vmul.f32 %v4422_v58, %v8063_v0  ;;  %v4534_v62 = vmul.f32 %v4417_v32, %v8067_v53  ;;  %6113 = vmatmul.mubr.msk.bf16.gmra.mrb[24].mxu1 %vm1143_vm9, %v2359_v34  ;;  %v2620_v34 = vpack.c.bf16 %v9354_v4, %v9353_v38 }
 0x25e   : > { %v4561_v52 = vpack.c.bf16 %v4535_v7, %v4534_v62 }
 0x25f   : > { %v2302_v54 = vpop.permute.xlu1 %2301  ;;  %v2297_v46 = vpop.permute.xlu0 %2296 }
 0x260   : > { %v2343_v5 = vmul.f32 %v2302_v54, %v9328_v16  ;;  %v2342_v6 = vmul.f32 %v2297_v46, %v9327_v19  ;;  %6267 = vmatmul.mubr.msk.bf16.gmra.mrb[8].mxu0 %vm1143_vm9, %v4561_v52  ;;  %v2616_v19 = vpack.c.bf16 %v9346_v20, %v9345_v28 }
 0x262   : > { %v2360_v44 = vpack.c.bf16 %v2343_v5, %v2342_v6 }
 0x263   : > { %v4432_v48 = vpop.permute.xlu1 %4431  ;;  %v4427_v13 = vpop.permute.xlu0 %4426 }
 0x264   : > { %v4537_v27 = vmul.f32 %v4432_v48, %v8071_v25  ;;  %v4536_v0 = vmul.f32 %v4427_v13, %v8075_v50  ;;  %6116 = vmatprep.mubr.msk.bf16.mxu1 %vm1143_vm9, %v2360_v44  ;;  %v9367_v44 = vld [vmem:[#allocation54_spill] sm:$0xff]  ;;  %v9368_v48 = vld [vmem:[#allocation55_spill] sm:$0xff] }
 0x265   : > { %v2621_v13 = vpack.c.bf16 %v9368_v48, %v9367_v44 }
 0x266   : > { %v4562_v53 = vpack.c.bf16 %v4537_v27, %v4536_v0  ;;  %v9369_v27 = vld [vmem:[#allocation15_spill] sm:$0xff]  ;;  %v2622_v0 = vpack.c.bf16 %v7044_v60, %v9357_v30 }
 0x267   : > { %v2312_v17 = vpop.permute.xlu1 %2311  ;;  %v2307_v29 = vpop.permute.xlu0 %2306 }
 0x268   : > { %v2345_v14 = vmul.f32 %v2312_v17, %v9330_v55  ;;  %v2344_v16 = vmul.f32 %v2307_v29, %v9329_v45  ;;  %6270 = vmatprep.mubr.msk.bf16.mxu0 %vm1143_vm9, %v4562_v53  ;;  %v9370_v29 = vld [vmem:[#allocation25_spill] sm:$0xff] }
 0x26a   : > { %v2361_v26 = vpack.c.bf16 %v2345_v14, %v2344_v16 }
 0x26b   : > { %v4442_v2 = vpop.permute.xlu1 %4441  ;;  %v4437_v21 = vpop.permute.xlu0 %4436 }
 0x26c   : > { %v4539_v25 = vmul.f32 %v4442_v2, %v8113_v41  ;;  %v4538_v50 = vmul.f32 %v4437_v21, %v8117_v12  ;;  %v8708_v1 = vpop.f32.mrb[0].mxu1  ;;  %6117 = vmatmul.mubr.msk.bf16.gmra.mrb[28].mxu1 %vm1143_vm9, %v2361_v26  ;;  %v2617_v41 = vpack.c.bf16 %v9348_v33, %v9347_v15  ;;  %v9371_v26 = vld [vmem:[#allocation16_spill] sm:$0xff] }
 0x26d   : > { %v8711_v61 = vpop.f32.mrb[1].mxu1  ;;  %6138 = vmatprep.mubr.msk.bf16.mxu1 %vm1143_vm9, %v2616_v19 }
 0x26e   : > { %v4563_v45 = vpack.c.bf16 %v4539_v25, %v4538_v50  ;;  %v8714_v55 = vpop.f32.mrb[2].mxu1 }
 0x26f   : > { %v8716_v39 = vpop.f32.mrb[3].mxu1  ;;  %v4452_v28 = vpop.permute.xlu1 %4451 }
 0x270   : > { %v4541_v20 = vmul.f32 %v4452_v28, %v8121_v36  ;;  %v4447_v40 = vpop.permute.xlu0 %4446  ;;  %6271 = vmatmul.mubr.msk.bf16.gmra.mrb[12].mxu0 %vm1143_vm9, %v4563_v45  ;;  %v9363_v36 = vld [vmem:[#allocation11_spill] sm:$0xff]  ;;  %v9372_v45 = vld [vmem:[#allocation20_spill] sm:$0xff] }
 0x271   : > { %v4540_v12 = vmul.f32 %v4447_v40, %v8125_v63  ;;  %v9373_v40 = vld [vmem:[#allocation27_spill] sm:$0xff] }
 0x273   : > { %v4564_v23 = vpack.c.bf16 %v4541_v20, %v4540_v12  ;;  %v4462_v22 = vpop.permute.xlu1 %4461  ;;  %v9374_v12 = vld [vmem:[#allocation21_spill] sm:$0xff] }
 0x274   : > { %v4543_v35 = vmul.f32 %v4462_v22, %v8159_v10  ;;  %v4457_v3 = vpop.permute.xlu0 %4456  ;;  %v8726_v47 = vpop.f32.mrb[4].mxu1  ;;  %6139 = vmatmul.mubr.msk.bf16.vlgmr.msra.gmra.mrb[16].mxu1 %vm1143_vm9, %v2617_v41  ;;  %v9364_v10 = vld [vmem:[#allocation88_spill] sm:$0xff]  ;;  %v2623_v41 = vpack.c.bf16 %v9373_v40, %v9358_v37 }
 0x275   : > { %v4542_v49 = vmul.f32 %v4457_v3, %v9363_v36  ;;  %v8730_v57 = vpop.f32.mrb[5].mxu1  ;;  %6274 = vmatprep.mubr.msk.bf16.mxu0 %vm1143_vm9, %v4564_v23  ;;  %6142 = vmatprep.mubr.msk.bf16.mxu1 %vm1143_vm9, %v2618_v43 }
 0x276   : > { %v8734_v63 = vpop.f32.mrb[6].mxu1 }
 0x277   : > { %v4565_v15 = vpack.c.bf16 %v4543_v35, %v4542_v49  ;;  %v8736_v33 = vpop.f32.mrb[7].mxu1  ;;  %v4472_v11 = vpop.permute.xlu1 %4471  ;;  %v9375_v35 = vld [vmem:[#allocation23_spill] sm:$0xff]  ;;  %v9376_v49 = vld [vmem:[#allocation24_spill] sm:$0xff] }
 0x278   : > { %v4545_v9 = vmul.f32 %v4472_v11, %v9364_v10  ;;  %v4467_v8 = vpop.permute.xlu0 %4466  ;;  %v8791_v10 = vld [vmem:[%s8992_s5] ss:$0 sm:$0xff] }
 0x279   : > { %v4544_v42 = vmul.f32 %v4467_v8, %v9365_v24  ;;  %6275 = vmatmul.mubr.msk.bf16.gmra.mrb[16].mxu0 %vm1143_vm9, %v4565_v15 }
 0x27b   : > { %v4566_v58 = vpack.c.bf16 %v4545_v9, %v4544_v42  ;;  %v4482_v32 = vpop.permute.xlu1 %4481 }
 0x27c   : > { %v4547_v7 = vmul.f32 %v4482_v32, %v8205_v18  ;;  %v4477_v62 = vpop.permute.xlu0 %4476  ;;  %v8746_v52 = vpop.f32.mrb[8].mxu1  ;;  %6143 = vmatmul.mubr.msk.bf16.gmra.mrb[20].mxu1 %vm1143_vm9, %v2619_v59  ;;  %v9366_v18 = vld [vmem:[#allocation14_spill] sm:$0xff] }
 0x27d   : > { %v4546_v54 = vmul.f32 %v4477_v62, %v8209_v51  ;;  %v8750_v46 = vpop.f32.mrb[9].mxu1  ;;  %6278 = vmatprep.mubr.msk.bf16.mxu0 %vm1143_vm9, %v4566_v58  ;;  %6146 = vmatprep.mubr.msk.bf16.mxu1 %vm1143_vm9, %v2620_v34 }
 0x27e   : > { %v8754_v56 = vpop.f32.mrb[10].mxu1 }
 0x27f   : > { %v4567_v31 = vpack.c.bf16 %v4547_v7, %v4546_v54  ;;  %v8756_v38 = vpop.f32.mrb[11].mxu1  ;;  %v4492_v4 = vpop.permute.xlu1 %4491 }
 0x280   : > { %v4549_v5 = vmul.f32 %v4492_v4, %v9366_v18  ;;  %v4487_v6 = vpop.permute.xlu0 %4486 }
 0x281   : > { %v4548_v51 = vmul.f32 %v4487_v6, %v9369_v27  ;;  %6279 = vmatmul.mubr.msk.bf16.gmra.mrb[20].mxu0 %vm1143_vm9, %v4567_v31 }
 0x283   : > { %v4568_v53 = vpack.c.bf16 %v4549_v5, %v4548_v51  ;;  %v4502_v17 = vpop.permute.xlu1 %4501 }
 0x284   : > { %v4551_v14 = vmul.f32 %v4502_v17, %v9370_v29  ;;  %v4497_v16 = vpop.permute.xlu0 %4496  ;;  %v8766_v19 = vpop.f32.mrb[12].mxu1  ;;  %6147 = vmatmul.mubr.msk.bf16.gmra.mrb[24].mxu1 %vm1143_vm9, %v2621_v13 }
 0x285   : > { %v4550_v2 = vmul.f32 %v4497_v16, %v9371_v26  ;;  %v8770_v21 = vpop.f32.mrb[13].mxu1  ;;  %6282 = vmatprep.mubr.msk.bf16.mxu0 %vm1143_vm9, %v4568_v53  ;;  %6150 = vmatprep.mubr.msk.bf16.mxu1 %vm1143_vm9, %v2622_v0 }
 0x286   : > { %v8774_v25 = vpop.f32.mrb[14].mxu1 }
 0x287   : > { %v4569_v60 = vpack.c.bf16 %v4551_v14, %v4550_v2  ;;  %v8776_v30 = vpop.f32.mrb[15].mxu1  ;;  %v4512_v50 = vpop.permute.xlu1 %4511 }
 0x288   : > { %v4553_v28 = vmul.f32 %v4512_v50, %v9372_v45  ;;  %v4507_v20 = vpop.permute.xlu0 %4506 }
 0x289   : > { %v4552_v43 = vmul.f32 %v4507_v20, %v9374_v12  ;;  %6283 = vmatmul.mubr.msk.bf16.gmra.mrb[24].mxu0 %vm1143_vm9, %v4569_v60 }
 0x28b   : > { %v4570_v23 = vpack.c.bf16 %v4553_v28, %v4552_v43  ;;  %v4522_v22 = vpop.permute.xlu1 %4521 }
 0x28c   : > { %v4555_v3 = vmul.f32 %v4522_v22, %v9375_v35  ;;  %v4517_v36 = vpop.permute.xlu0 %4516  ;;  %6151 = vmatmul.mubr.msk.bf16.gmra.mrb[28].mxu1 %vm1143_vm9, %v2623_v41 }
 0x28d   : > { %v4554_v15 = vmul.f32 %v4517_v36, %v9376_v49  ;;  %6286 = vmatprep.mubr.msk.bf16.mxu0 %vm1143_vm9, %v4570_v23 }
 0x28f   : > { %v4571_v11 = vpack.c.bf16 %v4555_v3, %v4554_v15 }
 0x291   : > { %6287 = vmatmul.mubr.msk.bf16.gmra.mrb[28].mxu0 %vm1143_vm9, %v4571_v11 }
 0x318   : > { %v6260_v37 = vpop.f32.mrb[0].mxu0 }
 0x319   : > { %v6292_v9 = vadd.f32 %v6260_v37, %v8708_v1  ;;  %v4659_v8 = vpop.f32.mrb[1].mxu0 }
 0x31a   : > { %v6293_v59 = vadd.f32 %v4659_v8, %v8711_v61  ;;  %v6261_v24 = vpop.f32.mrb[2].mxu0 }
 0x31b   : > { %v4827_v42 = vadd.f32 %v6292_v9, %v8791_v10  ;;  %v6294_v34 = vadd.f32 %v6261_v24, %v8714_v55  ;;  %v4662_v58 = vpop.f32.mrb[3].mxu0 }
 0x31c   : > { %v4825_v1 = vadd.f32 %v6293_v59, %v8791_v10  ;;  %v6295_v61 = vadd.f32 %v4662_v58, %v8716_v39 }
 0x31d   : > { %v5722_v32 = vpack.c.bf16 %v4827_v42, %v4827_v42  ;;  %v4828_v7 = vadd.f32 %v6294_v34, %v8791_v10  ;;  %v5091_v31 = vmul.f32 %v4827_v42, %v4827_v42  ;;  %v5021_v48 = vsel %vm1143_vm9, %v4827_v42, 0.0 }
 0x31e   : > { %v5720_v62 = vpack.c.bf16 %v4825_v1, %v4825_v1  ;;  %v5089_v55 = vmul.f32 %v4825_v1, %v4825_v1  ;;  %v4826_v54 = vadd.f32 %v6295_v61, %v8791_v10  ;;  %v5018_v18 = vsel %vm1143_vm9, %v4825_v1, 0.0 }
 0x31f   : > { %4988 = vst.msk [vmem:[%s8802_s19 + $0x8] sm:$0xf] %vm4985_vm0, %v5722_v32  ;;  %v5723_v4 = vpack.c.bf16 %v4828_v7, %v4828_v7  ;;  %v5092_v27 = vmul.f32 %v4828_v7, %v4828_v7  ;;  %v5124_v29 = vsel %vm1143_vm9, %v5091_v31, 0.0  ;;  %v5023_v14 = vsel %vm1143_vm9, %v4828_v7, 0.0 }
 0x320   : > { %4986 = vst.msk [vmem:[%s8802_s19] sm:$0xf] %vm4985_vm0, %v5720_v62  ;;  %v5721_v5 = vpack.c.bf16 %v4826_v54, %v4826_v54  ;;  %v5019_v6 = vsel %vm1143_vm9, %v4826_v54, 0.0  ;;  %v5090_v39 = vmul.f32 %v4826_v54, %v4826_v54  ;;  %v5121_v13 = vsel %vm1143_vm9, %v5089_v55, 0.0 }
 0x321   : > { %4989 = vst.msk [vmem:[%s8802_s19 + $0xc] sm:$0xf] %vm4985_vm0, %v5723_v4  ;;  %v5020_v44 = vadd.f32 %v5019_v6, %v5018_v18  ;;  %v5126_v28 = vsel %vm1143_vm9, %v5092_v27, 0.0 }
 0x322   : > { %4987 = vst.msk [vmem:[%s8802_s19 + $0x4] sm:$0xf] %vm4985_vm0, %v5721_v5  ;;  %v5122_v51 = vsel %vm1143_vm9, %v5090_v39, 0.0 }
 0x323   : > { %v5022_v0 = vadd.f32 %v5021_v48, %v5020_v44  ;;  %v5123_v53 = vadd.f32 %v5122_v51, %v5121_v13  ;;  %v6264_v17 = vpop.f32.mrb[4].mxu0 }
 0x324   : > { %v6296_v16 = vadd.f32 %v6264_v17, %v8726_v47  ;;  %v4675_v26 = vpop.f32.mrb[5].mxu0 }
 0x325   : > { %v5125_v2 = vadd.f32 %v5124_v29, %v5123_v53  ;;  %v6297_v60 = vadd.f32 %v4675_v26, %v8730_v57  ;;  %v5024_v50 = vadd.f32 %v5023_v14, %v5022_v0  ;;  %v6265_v45 = vpop.f32.mrb[6].mxu0 }
 0x326   : > { %v4831_v20 = vadd.f32 %v6296_v16, %v8791_v10  ;;  %v6298_v40 = vadd.f32 %v6265_v45, %v8734_v63  ;;  %v4678_v41 = vpop.f32.mrb[7].mxu0 }
 0x327   : > { %v4829_v12 = vadd.f32 %v6297_v60, %v8791_v10  ;;  %v5127_v43 = vadd.f32 %v5126_v28, %v5125_v2  ;;  %v6299_v47 = vadd.f32 %v4678_v41, %v8736_v33 }
 0x328   : > { %v5726_v23 = vpack.c.bf16 %v4831_v20, %v4831_v20  ;;  %v4832_v57 = vadd.f32 %v6298_v40, %v8791_v10  ;;  %v5095_v37 = vmul.f32 %v4831_v20, %v4831_v20  ;;  %v5029_v24 = vsel %vm1143_vm9, %v4831_v20, 0.0 }
 0x329   : > { %v5724_v22 = vpack.c.bf16 %v4829_v12, %v4829_v12  ;;  %v5025_v35 = vsel %vm1143_vm9, %v4829_v12, 0.0  ;;  %v5093_v3 = vmul.f32 %v4829_v12, %v4829_v12  ;;  %v4830_v36 = vadd.f32 %v6299_v47, %v8791_v10 }
 0x32a   : > { %4992 = vst.msk [vmem:[%s8802_s19 + $0x18] sm:$0xf] %vm4985_vm0, %v5726_v23  ;;  %v5026_v63 = vadd.f32 %v5025_v35, %v5024_v50  ;;  %v5727_v49 = vpack.c.bf16 %v4832_v57, %v4832_v57  ;;  %v5096_v42 = vmul.f32 %v4832_v57, %v4832_v57  ;;  %v5031_v1 = vsel %vm1143_vm9, %v4832_v57, 0.0 }
 0x32b   : > { %4990 = vst.msk [vmem:[%s8802_s19 + $0x10] sm:$0xf] %vm4985_vm0, %v5724_v22  ;;  %v5128_v15 = vsel %vm1143_vm9, %v5093_v3, 0.0  ;;  %v5725_v33 = vpack.c.bf16 %v4830_v36, %v4830_v36  ;;  %v5027_v11 = vsel %vm1143_vm9, %v4830_v36, 0.0  ;;  %v5094_v59 = vmul.f32 %v4830_v36, %v4830_v36 }
 0x32c   : > { %v5129_v9 = vadd.f32 %v5128_v15, %v5127_v43  ;;  %4993 = vst.msk [vmem:[%s8802_s19 + $0x1c] sm:$0xf] %vm4985_vm0, %v5727_v49  ;;  %v5028_v8 = vadd.f32 %v5027_v11, %v5026_v63  ;;  %v5132_v32 = vsel %vm1143_vm9, %v5095_v37, 0.0  ;;  %v5134_v55 = vsel %vm1143_vm9, %v5096_v42, 0.0 }
 0x32d   : > { %4991 = vst.msk [vmem:[%s8802_s19 + $0x14] sm:$0xf] %vm4985_vm0, %v5725_v33  ;;  %v5130_v58 = vsel %vm1143_vm9, %v5094_v59, 0.0 }
 0x32e   : > { %v5030_v34 = vadd.f32 %v5029_v24, %v5028_v8  ;;  %v5131_v61 = vadd.f32 %v5130_v58, %v5129_v9 }
 0x330   : > { %v5032_v7 = vadd.f32 %v5031_v1, %v5030_v34  ;;  %v5133_v62 = vadd.f32 %v5132_v32, %v5131_v61 }
 0x332   : > { %v5135_v31 = vadd.f32 %v5134_v55, %v5133_v62 }
 0x333   : > { %v6268_v54 = vpop.f32.mrb[8].mxu0 }
 0x334   : > { %v6300_v4 = vadd.f32 %v6268_v54, %v8746_v52  ;;  %v4691_v18 = vpop.f32.mrb[9].mxu0 }
 0x335   : > { %v6301_v5 = vadd.f32 %v4691_v18, %v8750_v46  ;;  %v6269_v6 = vpop.f32.mrb[10].mxu0 }
 0x336   : > { %v4835_v39 = vadd.f32 %v6300_v4, %v8791_v10  ;;  %v6302_v44 = vadd.f32 %v6269_v6, %v8754_v56  ;;  %v4694_v48 = vpop.f32.mrb[11].mxu0 }
 0x337   : > { %v4833_v13 = vadd.f32 %v6301_v5, %v8791_v10  ;;  %v6303_v27 = vadd.f32 %v4694_v48, %v8756_v38 }
 0x338   : > { %v5730_v51 = vpack.c.bf16 %v4835_v39, %v4835_v39  ;;  %v4836_v0 = vadd.f32 %v6302_v44, %v8791_v10  ;;  %v5099_v26 = vmul.f32 %v4835_v39, %v4835_v39  ;;  %v5037_v45 = vsel %vm1143_vm9, %v4835_v39, 0.0 }
 0x339   : > { %v5728_v53 = vpack.c.bf16 %v4833_v13, %v4833_v13  ;;  %v5033_v52 = vsel %vm1143_vm9, %v4833_v13, 0.0  ;;  %v5097_v46 = vmul.f32 %v4833_v13, %v4833_v13  ;;  %v4834_v17 = vadd.f32 %v6303_v27, %v8791_v10 }
 0x33a   : > { %4996 = vst.msk [vmem:[%s8802_s19 + $0x28] sm:$0xf] %vm4985_vm0, %v5730_v51  ;;  %v5034_v29 = vadd.f32 %v5033_v52, %v5032_v7  ;;  %v5731_v56 = vpack.c.bf16 %v4836_v0, %v4836_v0  ;;  %v5100_v28 = vmul.f32 %v4836_v0, %v4836_v0  ;;  %v5039_v41 = vsel %vm1143_vm9, %v4836_v0, 0.0 }
 0x33b   : > { %4994 = vst.msk [vmem:[%s8802_s19 + $0x20] sm:$0xf] %vm4985_vm0, %v5728_v53  ;;  %v5136_v14 = vsel %vm1143_vm9, %v5097_v46, 0.0  ;;  %v5729_v38 = vpack.c.bf16 %v4834_v17, %v4834_v17  ;;  %v5035_v16 = vsel %vm1143_vm9, %v4834_v17, 0.0  ;;  %v5098_v50 = vmul.f32 %v4834_v17, %v4834_v17 }
 0x33c   : > { %v5137_v2 = vadd.f32 %v5136_v14, %v5135_v31  ;;  %4997 = vst.msk [vmem:[%s8802_s19 + $0x2c] sm:$0xf] %vm4985_vm0, %v5731_v56  ;;  %v5036_v60 = vadd.f32 %v5035_v16, %v5034_v29  ;;  %v5140_v43 = vsel %vm1143_vm9, %v5099_v26, 0.0  ;;  %v5142_v57 = vsel %vm1143_vm9, %v5100_v28, 0.0 }
 0x33d   : > { %4995 = vst.msk [vmem:[%s8802_s19 + $0x24] sm:$0xf] %vm4985_vm0, %v5729_v38  ;;  %v5138_v40 = vsel %vm1143_vm9, %v5098_v50, 0.0 }
 0x33e   : > { %v5038_v20 = vadd.f32 %v5037_v45, %v5036_v60  ;;  %v5139_v12 = vadd.f32 %v5138_v40, %v5137_v2 }
 0x340   : > { %v5040_v47 = vadd.f32 %v5039_v41, %v5038_v20  ;;  %v5141_v23 = vadd.f32 %v5140_v43, %v5139_v12 }
 0x342   : > { %v5143_v35 = vadd.f32 %v5142_v57, %v5141_v23 }
 0x343   : > { %v6272_v22 = vpop.f32.mrb[12].mxu0 }
 0x344   : > { %v6304_v3 = vadd.f32 %v6272_v22, %v8766_v19  ;;  %v4707_v36 = vpop.f32.mrb[13].mxu0 }
 0x345   : > { %v6305_v63 = vadd.f32 %v4707_v36, %v8770_v21  ;;  %v6273_v49 = vpop.f32.mrb[14].mxu0 }
 0x346   : > { %v4839_v15 = vadd.f32 %v6304_v3, %v8791_v10  ;;  %v6306_v33 = vadd.f32 %v6273_v49, %v8774_v25  ;;  %v4710_v11 = vpop.f32.mrb[15].mxu0 }
 0x347   : > { %v4837_v37 = vadd.f32 %v6305_v63, %v8791_v10  ;;  %v6307_v9 = vadd.f32 %v4710_v11, %v8776_v30  ;;  %v6140_v8 = vpop.f32.mrb[16].mxu1 }
 0x348   : > { %v5734_v59 = vpack.c.bf16 %v4839_v15, %v4839_v15  ;;  %v4840_v24 = vadd.f32 %v6306_v33, %v8791_v10  ;;  %v2775_v19 = vpop.f32.mrb[17].mxu1  ;;  %v5103_v55 = vmul.f32 %v4839_v15, %v4839_v15  ;;  %v5045_v5 = vsel %vm1143_vm9, %v4839_v15, 0.0 }
 0x349   : > { %v5732_v42 = vpack.c.bf16 %v4837_v37, %v4837_v37  ;;  %v5041_v21 = vsel %vm1143_vm9, %v4837_v37, 0.0  ;;  %v5101_v34 = vmul.f32 %v4837_v37, %v4837_v37  ;;  %v4838_v58 = vadd.f32 %v6307_v9, %v8791_v10  ;;  %v6141_v1 = vpop.f32.mrb[18].mxu1 }
 0x34a   : > { %5000 = vst.msk [vmem:[%s8802_s19 + $0x38] sm:$0xf] %vm4985_vm0, %v5734_v59  ;;  %v5042_v25 = vadd.f32 %v5041_v21, %v5040_v47  ;;  %v5735_v61 = vpack.c.bf16 %v4840_v24, %v4840_v24  ;;  %v2778_v32 = vpop.f32.mrb[19].mxu1  ;;  %v5104_v6 = vmul.f32 %v4840_v24, %v4840_v24  ;;  %v5047_v0 = vsel %vm1143_vm9, %v4840_v24, 0.0 }
 0x34b   : > { %4998 = vst.msk [vmem:[%s8802_s19 + $0x30] sm:$0xf] %vm4985_vm0, %v5732_v42  ;;  %v5144_v30 = vsel %vm1143_vm9, %v5101_v34, 0.0  ;;  %v5733_v7 = vpack.c.bf16 %v4838_v58, %v4838_v58  ;;  %v5043_v62 = vsel %vm1143_vm9, %v4838_v58, 0.0  ;;  %v5102_v4 = vmul.f32 %v4838_v58, %v4838_v58 }
 0x34c   : > { %v5145_v54 = vadd.f32 %v5144_v30, %v5143_v35  ;;  %5001 = vst.msk [vmem:[%s8802_s19 + $0x3c] sm:$0xf] %vm4985_vm0, %v5735_v61  ;;  %v5044_v31 = vadd.f32 %v5043_v62, %v5042_v25  ;;  %v6276_v18 = vpop.f32.mrb[16].mxu0  ;;  %v5148_v56 = vsel %vm1143_vm9, %v5103_v55, 0.0  ;;  %v5150_v2 = vsel %vm1143_vm9, %v5104_v6, 0.0 }
 0x34d   : > { %4999 = vst.msk [vmem:[%s8802_s19 + $0x34] sm:$0xf] %vm4985_vm0, %v5733_v7  ;;  %v6308_v39 = vadd.f32 %v6276_v18, %v6140_v8  ;;  %v4723_v44 = vpop.f32.mrb[17].mxu0  ;;  %v5146_v13 = vsel %vm1143_vm9, %v5102_v4, 0.0 }
 0x34e   : > { %v5046_v48 = vadd.f32 %v5045_v5, %v5044_v31  ;;  %v6309_v27 = vadd.f32 %v4723_v44, %v2775_v19  ;;  %v6277_v51 = vpop.f32.mrb[18].mxu0  ;;  %v5147_v53 = vadd.f32 %v5146_v13, %v5145_v54 }
 0x34f   : > { %v4843_v52 = vadd.f32 %v6308_v39, %v8791_v10  ;;  %v6310_v46 = vadd.f32 %v6277_v51, %v6141_v1  ;;  %v4726_v17 = vpop.f32.mrb[19].mxu0  ;;  %v6144_v29 = vpop.f32.mrb[20].mxu1 }
 0x350   : > { %v4841_v14 = vadd.f32 %v6309_v27, %v8791_v10  ;;  %v5048_v38 = vadd.f32 %v5047_v0, %v5046_v48  ;;  %v6311_v16 = vadd.f32 %v4726_v17, %v2778_v32  ;;  %v2791_v26 = vpop.f32.mrb[21].mxu1  ;;  %v5149_v60 = vadd.f32 %v5148_v56, %v5147_v53 }
 0x351   : > { %v5738_v50 = vpack.c.bf16 %v4843_v52, %v4843_v52  ;;  %v6145_v45 = vpop.f32.mrb[22].mxu1  ;;  %v4844_v41 = vadd.f32 %v6310_v46, %v8791_v10  ;;  %v5107_v57 = vmul.f32 %v4843_v52, %v4843_v52  ;;  %v5053_v24 = vsel %vm1143_vm9, %v4843_v52, 0.0 }
 0x352   : > { %v5736_v28 = vpack.c.bf16 %v4841_v14, %v4841_v14  ;;  %v5049_v20 = vsel %vm1143_vm9, %v4841_v14, 0.0  ;;  %v5105_v40 = vmul.f32 %v4841_v14, %v4841_v14  ;;  %v2794_v12 = vpop.f32.mrb[23].mxu1  ;;  %v5151_v47 = vadd.f32 %v5150_v2, %v5149_v60 }
 0x353   : > { %5004 = vst.msk [vmem:[%s8802_s19 + $0x48] sm:$0xf] %vm4985_vm0, %v5738_v50  ;;  %v5050_v43 = vadd.f32 %v5049_v20, %v5048_v38  ;;  %v4842_v23 = vadd.f32 %v6311_v16, %v8791_v10  ;;  %v5739_v35 = vpack.c.bf16 %v4844_v41, %v4844_v41  ;;  %v5108_v11 = vmul.f32 %v4844_v41, %v4844_v41 }
 0x354   : > { %5002 = vst.msk [vmem:[%s8802_s19 + $0x40] sm:$0xf] %vm4985_vm0, %v5736_v28  ;;  %v5152_v22 = vsel %vm1143_vm9, %v5105_v40, 0.0  ;;  %v6280_v3 = vpop.f32.mrb[20].mxu0  ;;  %v5156_v30 = vsel %vm1143_vm9, %v5107_v57, 0.0  ;;  %v5055_v54 = vsel %vm1143_vm9, %v4844_v41, 0.0 }
 0x355   : > { %v5153_v36 = vadd.f32 %v5152_v22, %v5151_v47  ;;  %v5737_v63 = vpack.c.bf16 %v4842_v23, %v4842_v23  ;;  %v5051_v49 = vsel %vm1143_vm9, %v4842_v23, 0.0  ;;  %v5106_v15 = vmul.f32 %v4842_v23, %v4842_v23  ;;  %v4739_v33 = vpop.f32.mrb[21].mxu0  ;;  %5005 = vst.msk [vmem:[%s8802_s19 + $0x4c] sm:$0xf] %vm4985_vm0, %v5739_v35 }
 0x356   : > { %v5052_v37 = vadd.f32 %v5051_v49, %v5050_v43  ;;  %v6312_v9 = vadd.f32 %v6280_v3, %v6144_v29  ;;  %v6313_v8 = vadd.f32 %v4739_v33, %v2791_v26  ;;  %v6281_v59 = vpop.f32.mrb[22].mxu0  ;;  %v5158_v31 = vsel %vm1143_vm9, %v5108_v11, 0.0 }
 0x357   : > { %5003 = vst.msk [vmem:[%s8802_s19 + $0x44] sm:$0xf] %vm4985_vm0, %v5737_v63  ;;  %v5154_v19 = vsel %vm1143_vm9, %v5106_v15, 0.0  ;;  %v6314_v42 = vadd.f32 %v6281_v59, %v6145_v45  ;;  %v4742_v21 = vpop.f32.mrb[23].mxu0  ;;  %v6148_v34 = vpop.f32.mrb[24].mxu1 }
 0x358   : > { %v5054_v58 = vadd.f32 %v5053_v24, %v5052_v37  ;;  %v5155_v1 = vadd.f32 %v5154_v19, %v5153_v36  ;;  %v4847_v25 = vadd.f32 %v6312_v9, %v8791_v10  ;;  %v4845_v61 = vadd.f32 %v6313_v8, %v8791_v10  ;;  %v2807_v32 = vpop.f32.mrb[25].mxu1 }
 0x359   : > { %v4848_v7 = vadd.f32 %v6314_v42, %v8791_v10  ;;  %v6315_v62 = vadd.f32 %v4742_v21, %v2794_v12  ;;  %v6149_v55 = vpop.f32.mrb[26].mxu1 }
 0x35a   : > { %v5157_v4 = vadd.f32 %v5156_v30, %v5155_v1  ;;  %v5742_v18 = vpack.c.bf16 %v4847_v25, %v4847_v25  ;;  %v2810_v5 = vpop.f32.mrb[27].mxu1  ;;  %v5740_v6 = vpack.c.bf16 %v4845_v61, %v4845_v61  ;;  %v5056_v39 = vadd.f32 %v5055_v54, %v5054_v58 }
 0x35b   : > { %v5057_v44 = vsel %vm1143_vm9, %v4845_v61, 0.0  ;;  %v5109_v48 = vmul.f32 %v4845_v61, %v4845_v61  ;;  %v5743_v27 = vpack.c.bf16 %v4848_v7, %v4848_v7  ;;  %v4846_v52 = vadd.f32 %v6315_v62, %v8791_v10 }
 0x35c   : > { %5008 = vst.msk [vmem:[%s8802_s19 + $0x58] sm:$0xf] %vm4985_vm0, %v5742_v18  ;;  %v5159_v13 = vadd.f32 %v5158_v31, %v5157_v4  ;;  %v6284_v51 = vpop.f32.mrb[24].mxu0  ;;  %5006 = vst.msk [vmem:[%s8802_s19 + $0x50] sm:$0xf] %vm4985_vm0, %v5740_v6  ;;  %v5058_v0 = vadd.f32 %v5057_v44, %v5056_v39  ;;  %v5111_v17 = vmul.f32 %v4847_v25, %v4847_v25  ;;  %v5061_v12 = vsel %vm1143_vm9, %v4847_v25, 0.0 }
 0x35d   : > { %v5160_v53 = vsel %vm1143_vm9, %v5109_v48, 0.0  ;;  %v4755_v46 = vpop.f32.mrb[25].mxu0  ;;  %5009 = vst.msk [vmem:[%s8802_s19 + $0x5c] sm:$0xf] %vm4985_vm0, %v5743_v27  ;;  %v6316_v56 = vadd.f32 %v6284_v51, %v6148_v34  ;;  %v5741_v16 = vpack.c.bf16 %v4846_v52, %v4846_v52  ;;  %v5059_v26 = vsel %vm1143_vm9, %v4846_v52, 0.0 }
 0x35e   : > { %v5161_v29 = vadd.f32 %v5160_v53, %v5159_v13  ;;  %v6317_v14 = vadd.f32 %v4755_v46, %v2807_v32  ;;  %v6285_v38 = vpop.f32.mrb[26].mxu0  ;;  %v5110_v2 = vmul.f32 %v4846_v52, %v4846_v52  ;;  %v5060_v45 = vadd.f32 %v5059_v26, %v5058_v0 }
 0x35f   : > { %v4758_v60 = vpop.f32.mrb[27].mxu0  ;;  %v6152_v50 = vpop.f32.mrb[28].mxu1  ;;  %v4851_v28 = vadd.f32 %v6316_v56, %v8791_v10  ;;  %v6318_v40 = vadd.f32 %v6285_v38, %v6149_v55  ;;  %v5112_v43 = vmul.f32 %v4848_v7, %v4848_v7  ;;  %5007 = vst.msk [vmem:[%s8802_s19 + $0x54] sm:$0xf] %vm4985_vm0, %v5741_v16  ;;  %v5164_v22 = vsel %vm1143_vm9, %v5111_v17, 0.0 }
 0x360   : > { %v4849_v20 = vadd.f32 %v6317_v14, %v8791_v10  ;;  %v2823_v41 = vpop.f32.mrb[29].mxu1  ;;  %v5162_v47 = vsel %vm1143_vm9, %v5110_v2, 0.0  ;;  %v6319_v23 = vadd.f32 %v4758_v60, %v2810_v5  ;;  %v5062_v35 = vadd.f32 %v5061_v12, %v5060_v45 }
 0x361   : > { %v6153_v57 = vpop.f32.mrb[30].mxu1  ;;  %v5163_v3 = vadd.f32 %v5162_v47, %v5161_v29  ;;  %v5746_v36 = vpack.c.bf16 %v4851_v28, %v4851_v28  ;;  %v5063_v49 = vsel %vm1143_vm9, %v4848_v7, 0.0  ;;  %v4852_v8 = vadd.f32 %v6318_v40, %v8791_v10 }
 0x362   : > { %v2826_v63 = vpop.f32.mrb[31].mxu1  ;;  %v5744_v15 = vpack.c.bf16 %v4849_v20, %v4849_v20  ;;  %v5065_v33 = vsel %vm1143_vm9, %v4849_v20, 0.0  ;;  %v5113_v11 = vmul.f32 %v4849_v20, %v4849_v20  ;;  %v5064_v9 = vadd.f32 %v5063_v49, %v5062_v35 }
 0x363   : > { %v5165_v37 = vadd.f32 %v5164_v22, %v5163_v3  ;;  %5012 = vst.msk [vmem:[%s8802_s19 + $0x68] sm:$0xf] %vm4985_vm0, %v5746_v36  ;;  %v4850_v59 = vadd.f32 %v6319_v23, %v8791_v10  ;;  %v5166_v19 = vsel %vm1143_vm9, %v5112_v43, 0.0  ;;  %v5115_v58 = vmul.f32 %v4851_v28, %v4851_v28 }
 0x364   : > { %v6288_v24 = vpop.f32.mrb[28].mxu0  ;;  %5010 = vst.msk [vmem:[%s8802_s19 + $0x60] sm:$0xf] %vm4985_vm0, %v5744_v15  ;;  %v5168_v42 = vsel %vm1143_vm9, %v5113_v11, 0.0  ;;  %v5066_v1 = vadd.f32 %v5065_v33, %v5064_v9  ;;  %v5747_v61 = vpack.c.bf16 %v4852_v8, %v4852_v8  ;;  %v5069_v30 = vsel %vm1143_vm9, %v4851_v28, 0.0 }
 0x365   : > { %v6320_v21 = vadd.f32 %v6288_v24, %v6152_v50  ;;  %v4771_v34 = vpop.f32.mrb[29].mxu0  ;;  %v5167_v25 = vadd.f32 %v5166_v19, %v5165_v37  ;;  %v5745_v7 = vpack.c.bf16 %v4850_v59, %v4850_v59  ;;  %v5067_v62 = vsel %vm1143_vm9, %v4850_v59, 0.0 }
 0x366   : > { %v6289_v32 = vpop.f32.mrb[30].mxu0  ;;  %v5114_v55 = vmul.f32 %v4850_v59, %v4850_v59  ;;  %5013 = vst.msk [vmem:[%s8802_s19 + $0x6c] sm:$0xf] %vm4985_vm0, %v5747_v61  ;;  %v5068_v4 = vadd.f32 %v5067_v62, %v5066_v1  ;;  %v6321_v5 = vadd.f32 %v4771_v34, %v2823_v41  ;;  %v5116_v6 = vmul.f32 %v4852_v8, %v4852_v8 }
 0x367   : > { %v4774_v54 = vpop.f32.mrb[31].mxu0  ;;  %v5169_v31 = vadd.f32 %v5168_v42, %v5167_v25  ;;  %v4855_v18 = vadd.f32 %v6320_v21, %v8791_v10  ;;  %5011 = vst.msk [vmem:[%s8802_s19 + $0x64] sm:$0xf] %vm4985_vm0, %v5745_v7  ;;  %v6322_v44 = vadd.f32 %v6289_v32, %v6153_v57  ;;  %v5172_v13 = vsel %vm1143_vm9, %v5115_v58, 0.0 }
 0x368   : > { %v5170_v39 = vsel %vm1143_vm9, %v5114_v55, 0.0  ;;  %v6323_v48 = vadd.f32 %v4774_v54, %v2826_v63  ;;  %v5070_v27 = vadd.f32 %v5069_v30, %v5068_v4  ;;  %v5071_v53 = vsel %vm1143_vm9, %v4852_v8, 0.0 }
 0x369   : > { %v5171_v51 = vadd.f32 %v5170_v39, %v5169_v31  ;;  %v5750_v0 = vpack.c.bf16 %v4855_v18, %v4855_v18  ;;  %v4853_v52 = vadd.f32 %v6321_v5, %v8791_v10  ;;  %v4856_v46 = vadd.f32 %v6322_v44, %v8791_v10 }
 0x36a   : > { %v4854_v17 = vadd.f32 %v6323_v48, %v8791_v10  ;;  %v5072_v56 = vadd.f32 %v5071_v53, %v5070_v27  ;;  %v5174_v14 = vsel %vm1143_vm9, %v5116_v6, 0.0  ;;  %v5119_v20 = vmul.f32 %v4855_v18, %v4855_v18 }
 0x36b   : > { %v5173_v29 = vadd.f32 %v5172_v13, %v5171_v51  ;;  %5016 = vst.msk [vmem:[%s8802_s19 + $0x78] sm:$0xf] %vm4985_vm0, %v5750_v0  ;;  %v5748_v38 = vpack.c.bf16 %v4853_v52, %v4853_v52  ;;  %v5073_v16 = vsel %vm1143_vm9, %v4853_v52, 0.0  ;;  %v5117_v26 = vmul.f32 %v4853_v52, %v4853_v52 }
 0x36c   : > { %v5074_v2 = vadd.f32 %v5073_v16, %v5072_v56  ;;  %v5751_v50 = vpack.c.bf16 %v4856_v46, %v4856_v46  ;;  %v5749_v10 = vpack.c.bf16 %v4854_v17, %v4854_v17  ;;  %v5075_v28 = vsel %vm1143_vm9, %v4854_v17, 0.0 }
 0x36d   : > { %v5175_v60 = vadd.f32 %v5174_v14, %v5173_v29  ;;  %5014 = vst.msk [vmem:[%s8802_s19 + $0x70] sm:$0xf] %vm4985_vm0, %v5748_v38  ;;  %v5176_v45 = vsel %vm1143_vm9, %v5117_v26, 0.0  ;;  %v5118_v12 = vmul.f32 %v4854_v17, %v4854_v17  ;;  %v5077_v43 = vsel %vm1143_vm9, %v4855_v18, 0.0 }
 0x36e   : > { %5017 = vst.msk [vmem:[%s8802_s19 + $0x7c] sm:$0xf] %vm4985_vm0, %v5751_v50  ;;  %v5076_v41 = vadd.f32 %v5075_v28, %v5074_v2  ;;  %5015 = vst.msk [vmem:[%s8802_s19 + $0x74] sm:$0xf] %vm4985_vm0, %v5749_v10  ;;  %v5120_v47 = vmul.f32 %v4856_v46, %v4856_v46  ;;  %v5079_v22 = vsel %vm1143_vm9, %v4856_v46, 0.0  ;;  %v5180_v3 = vsel %vm1143_vm9, %v5119_v20, 0.0 }
 0x36f   : > { %v5177_v40 = vadd.f32 %v5176_v45, %v5175_v60  ;;  %v5178_v57 = vsel %vm1143_vm9, %v5118_v12, 0.0 }
 0x370   : > { %v5078_v23 = vadd.f32 %v5077_v43, %v5076_v41  ;;  %v5182_v49 = vsel %vm1143_vm9, %v5120_v47, 0.0 }
 0x371   : > { %v5179_v35 = vadd.f32 %v5178_v57, %v5177_v40 }
 0x372   : > { %v5080_v36 = vadd.f32 %v5079_v22, %v5078_v23 }
 0x373   : > { %v5181_v63 = vadd.f32 %v5180_v3, %v5179_v35 }
 0x374   : > { %v5081_v15 = vrot.slane %v5080_v36, 4 }
 0x375   : > { %v5183_v33 = vadd.f32 %v5182_v49, %v5181_v63 }
 0x376   : > { %v5082_v11 = vadd.f32 %v5081_v15, %v5080_v36 }
 0x377   : > { %v5184_v37 = vrot.slane %v5183_v33, 4 }
 0x378   : > { %v5083_v9 = vrot.slane %v5082_v11, 2 }
 0x379   : > { %v5185_v8 = vadd.f32 %v5184_v37, %v5183_v33 }
 0x37a   : > { %v5084_v59 = vadd.f32 %v5083_v9, %v5082_v11 }
 0x37b   : > { %v5186_v24 = vrot.slane %v5185_v8, 2 }
 0x37c   : > { %v5085_v19 = vrot.slane %v5084_v59, 1 }
 0x37d   : > { %v5187_v42 = vadd.f32 %v5186_v24, %v5185_v8 }
 0x37e   : > { %v5086_v21 = vadd.f32 %v5085_v19, %v5084_v59 }
 0x37f   : > { %v5188_v34 = vrot.slane %v5187_v42, 1 }
 0x380   : > { %5088 = vst.msk [vmem:[%s347_s22] sm:$0x1] %vm5087_vm4, %v5086_v21 }
 0x381   : > { %v5189_v58 = vadd.f32 %v5188_v34, %v5187_v42 }
 0x383   : > { %5190 = vst.msk [vmem:[%s350_s25] sm:$0x1] %vm5087_vm4, %v5189_v58 }
 0x384 PF: > { %s21_s11 = sadd.s32 1, %s6576_s11  }
 0x385   : > { %p18_p4 = scmp.ge.s32.totalorder %s21_s11, 4  }
 0x387   :  { %20 = sbr.rel (!%p18_p4) target bundleno = 2 (0x2), region = 117 }

</bundles_post_ra>
